<compile_context>
chip_gen: v7x
topology: tpu7x:2x2x1
jax: 0.10.0
libtpu: 0.0.40
codegen_flags: <defaults>
</compile_context>

<pallas_src>
import math

import jax
import jax.numpy as jnp
from jax.experimental import pallas as pl
from jax.experimental.pallas import tpu as pltpu

# Layer sizes from the PyTorch module (DROP_NUM = 0).
IN_DIM = 26
DIMS = [IN_DIM, 128, 256, 512, 512, 512, 512, 1]
N_LAYERS = len(DIMS) - 1  # 7

PAD_IN = 128    # pad the 26-wide input to a full lane width (aligned loads)
PAD_OUT = 128   # pad the 1-wide output to a full lane width (lane-dense stores)
PADDED_DIMS = [PAD_IN] + DIMS[1:-1] + [PAD_OUT]

DEFAULT_BATCH_TILE = 1024   # sweep 512/1024/2048 for very large batches
MIN_SPLIT_BATCH = 256       # split into >=2 grid steps above this (v7x megacore)


def _round_up(x, m):
    return ((x + m - 1) // m) * m


def _choose_tile(batch, batch_tile):
    """Divisor-based tile: minimizes batch padding (<16 rows per grid step) and
    keeps the grid length >= 2 for large batches so v7x can shard both TCs."""
    num_tiles = max(1, -(-batch // batch_tile))
    if num_tiles == 1 and batch >= MIN_SPLIT_BATCH:
        num_tiles = 2
    # Multiple of 16 matches the bf16 LHS sublane packing.
    tile = _round_up(-(-batch // num_tiles), 16)
    return tile, num_tiles


def _mlp_kernel(x_ref, *refs):
    # refs = (w1, b1, w2, b2, ..., w7, b7, o_ref)
    o_ref = refs[-1]
    param_refs = refs[:-1]

    h = x_ref[...]  # bf16 activations, [tile, PAD_IN]
    for layer in range(N_LAYERS):
        w_ref = param_refs[2 * layer]      # bf16 [in, out]
        b_ref = param_refs[2 * layer + 1]  # f32  [1, out]
        # bf16 MXU inputs, f32 accumulation; bias add / ReLU stay in f32
        # (v5e has no bf16 VPU), then fused downcast so only the bf16 copy
        # of the activation stays live between layers.
        acc = jnp.dot(h, w_ref[...], preferred_element_type=jnp.float32) + b_ref[...]
        if layer != N_LAYERS - 1:
            h = jnp.maximum(acc, 0.0).astype(jnp.bfloat16)
        else:
            # Note: only lane 0 of the padded 128-wide output is real; a compact
            # XLU-packed [tile//128, 128] writeback would further cut HBM bytes
            # but is skipped here (reshape lowering risk).
            o_ref[...] = acc.astype(o_ref.dtype)


def prepare_params(params):
    """Zero-pad first-layer K (26->128) and last-layer N (1->128); cast W to bf16.
    Call ONCE and reuse across forward calls (hoisted out of the hot path)."""
    prepped = []
    for layer, (w, b) in enumerate(params):
        if layer == 0:
            w = jnp.pad(w, ((0, PAD_IN - w.shape[0]), (0, 0)))
        if layer == N_LAYERS - 1:
            w = jnp.pad(w, ((0, 0), (0, PAD_OUT - w.shape[1])))
            b = jnp.pad(b, ((0, 0), (0, PAD_OUT - b.shape[1])))
        prepped.append((w.astype(jnp.bfloat16), b.astype(jnp.float32)))
    return prepped


def linnet_forward(x, prepped_params, *, batch_tile=DEFAULT_BATCH_TILE):
    """x: [B, 26] float; prepped_params: output of prepare_params()."""
    B = x.shape[0]
    tile, num_tiles = _choose_tile(B, batch_tile)
    Bp = tile * num_tiles

    # bf16 streaming input (halves input HBM/DMA bytes; matmul consumes bf16).
    x_pad = jnp.pad(x.astype(jnp.bfloat16), ((0, Bp - B), (0, PAD_IN - IN_DIM)))

    in_specs = [pl.BlockSpec((tile, PAD_IN), lambda i: (i, 0))]
    flat_params = []
    for (w, b) in prepped_params:
        # Constant index_map -> the block is fetched once and stays in VMEM.
        in_specs.append(pl.BlockSpec(w.shape, lambda i: (0, 0)))
        in_specs.append(pl.BlockSpec(b.shape, lambda i: (0, 0)))
        flat_params.extend([w, b])

    out_spec = pl.BlockSpec((tile, PAD_OUT), lambda i: (i, 0))

    flops = 2 * Bp * sum(PADDED_DIMS[l] * PADDED_DIMS[l + 1] for l in range(N_LAYERS))
    bytes_accessed = int(
        x_pad.size * 2
        + sum(w.size * 2 + b.size * 4 for (w, b) in prepped_params)
        + Bp * PAD_OUT * 4
    )

    out = pl.pallas_call(
        _mlp_kernel,
        out_shape=jax.ShapeDtypeStruct((Bp, PAD_OUT), jnp.float32),
        grid_spec=pltpu.PrefetchScalarGridSpec(
            num_scalar_prefetch=0,
            grid=(num_tiles,),
            in_specs=in_specs,
            out_specs=out_spec,
        ),
        compiler_params=pltpu.CompilerParams(
            dimension_semantics=("parallel",),
            vmem_limit_bytes=48 * 1024 * 1024,
        ),
        cost_estimate=pl.CostEstimate(
            flops=flops, transcendentals=0, bytes_accessed=bytes_accessed
        ),
    )(x_pad, *flat_params)

    # Drop batch padding and the zero-padded output lanes.
    return out[:B, :1]


def init_params(key):
    """Deterministic init matching PyTorch nn.Linear default:
    U(-1/sqrt(fan_in), +1/sqrt(fan_in)) for both weight and bias."""
    params = []
    for layer in range(N_LAYERS):
        fan_in, fan_out = DIMS[layer], DIMS[layer + 1]
        key, kw, kb = jax.random.split(key, 3)
        bound = 1.0 / math.sqrt(fan_in)
        w = jax.random.uniform(
            kw, (fan_in, fan_out), dtype=jnp.float32, minval=-bound, maxval=bound
        )
        b = jax.random.uniform(
            kb, (1, fan_out), dtype=jnp.float32, minval=-bound, maxval=bound
        )
        params.append((w, b))
    return params


def reference_forward(x, params):
    """Pure-JAX reference with the same numerics as the kernel
    (bf16 matmul inputs and carried activations, f32 accumulation/bias/ReLU)."""
    h = x.astype(jnp.bfloat16)
    for layer, (w, b) in enumerate(params):
        acc = jnp.dot(h, w.astype(jnp.bfloat16),
                      preferred_element_type=jnp.float32) + b
        if layer != N_LAYERS - 1:
            h = jnp.maximum(acc, 0.0).astype(jnp.bfloat16)
        else:
            h = acc
    return h


if __name__ == "__main__":
    key = jax.random.PRNGKey(0)
    key, kx = jax.random.split(key)

    batch = 512  # splits into a 2-step grid (2 tiles of 256) -> exercises megacore path
    x = jax.random.normal(kx, (batch, IN_DIM), dtype=jnp.float32)
    params = init_params(key)
    prepped = prepare_params(params)  # hoisted: prepare once, reuse every forward

    out = linnet_forward(x, prepped)
    out = jax.block_until_ready(out)

    ref = reference_forward(x, params)
    assert out.shape == (batch, 1)
    assert jnp.allclose(out, ref, atol=1e-2, rtol=1e-2), "mismatch vs JAX reference"

    print("KERNEL_OK")
</pallas_src>

<mosaic_0001>
module attributes {stable_mosaic.version = 11 : i64} {
  func.func @_mlp_kernel(%arg0: i32, %arg1: memref<256x128xbf16, #tpu.memory_space<vmem>>, %arg2: memref<128x128xbf16, #tpu.memory_space<vmem>>, %arg3: memref<1x128xf32, #tpu.memory_space<vmem>>, %arg4: memref<128x256xbf16, #tpu.memory_space<vmem>>, %arg5: memref<1x256xf32, #tpu.memory_space<vmem>>, %arg6: memref<256x512xbf16, #tpu.memory_space<vmem>>, %arg7: memref<1x512xf32, #tpu.memory_space<vmem>>, %arg8: memref<512x512xbf16, #tpu.memory_space<vmem>>, %arg9: memref<1x512xf32, #tpu.memory_space<vmem>>, %arg10: memref<512x512xbf16, #tpu.memory_space<vmem>>, %arg11: memref<1x512xf32, #tpu.memory_space<vmem>>, %arg12: memref<512x512xbf16, #tpu.memory_space<vmem>>, %arg13: memref<1x512xf32, #tpu.memory_space<vmem>>, %arg14: memref<512x128xbf16, #tpu.memory_space<vmem>>, %arg15: memref<1x128xf32, #tpu.memory_space<vmem>>, %arg16: memref<256x128xf32, #tpu.memory_space<vmem>>) attributes {dimension_semantics = [#tpu.dimension_semantics<parallel>], iteration_bounds = array<i64: 2>, scalar_prefetch = 0 : i64, scratch_operands = 0 : i64, tpu.core_type = #tpu.core_type<tc>, window_params = [{transform_indices = @transform_0, window_bounds = array<i64: 256, 128>}, {pipeline_mode = #tpu.pipeline_mode<synchronous>, transform_indices = @transform_1, window_bounds = array<i64: 128, 128>}, {pipeline_mode = #tpu.pipeline_mode<synchronous>, transform_indices = @transform_2, window_bounds = array<i64: 1, 128>}, {pipeline_mode = #tpu.pipeline_mode<synchronous>, transform_indices = @transform_3, window_bounds = array<i64: 128, 256>}, {pipeline_mode = #tpu.pipeline_mode<synchronous>, transform_indices = @transform_4, window_bounds = array<i64: 1, 256>}, {pipeline_mode = #tpu.pipeline_mode<synchronous>, transform_indices = @transform_5, window_bounds = array<i64: 256, 512>}, {pipeline_mode = #tpu.pipeline_mode<synchronous>, transform_indices = @transform_6, window_bounds = array<i64: 1, 512>}, {pipeline_mode = #tpu.pipeline_mode<synchronous>, transform_indices = @transform_7, window_bounds = array<i64: 512, 512>}, {pipeline_mode = #tpu.pipeline_mode<synchronous>, transform_indices = @transform_8, window_bounds = array<i64: 1, 512>}, {pipeline_mode = #tpu.pipeline_mode<synchronous>, transform_indices = @transform_9, window_bounds = array<i64: 512, 512>}, {pipeline_mode = #tpu.pipeline_mode<synchronous>, transform_indices = @transform_10, window_bounds = array<i64: 1, 512>}, {pipeline_mode = #tpu.pipeline_mode<synchronous>, transform_indices = @transform_11, window_bounds = array<i64: 512, 512>}, {pipeline_mode = #tpu.pipeline_mode<synchronous>, transform_indices = @transform_12, window_bounds = array<i64: 1, 512>}, {pipeline_mode = #tpu.pipeline_mode<synchronous>, transform_indices = @transform_13, window_bounds = array<i64: 512, 128>}, {pipeline_mode = #tpu.pipeline_mode<synchronous>, transform_indices = @transform_14, window_bounds = array<i64: 1, 128>}, {transform_indices = @transform_15, window_bounds = array<i64: 256, 128>}]} {
    %c0 = arith.constant 0 : index
    %c0_0 = arith.constant 0 : index
    %0 = vector.load %arg1[%c0, %c0_0] : memref<256x128xbf16, #tpu.memory_space<vmem>>, vector<256x128xbf16>
    %c0_1 = arith.constant 0 : index
    %c0_2 = arith.constant 0 : index
    %1 = vector.load %arg2[%c0_1, %c0_2] : memref<128x128xbf16, #tpu.memory_space<vmem>>, vector<128x128xbf16>
    %cst = arith.constant dense<0.000000e+00> : vector<256x128xf32>
    %2 = tpu.matmul %0, %1, %cst {dimension_numbers = #tpu.dot_dimension_numbers<[1], [0], [0], [1], [0, 0, 1, 1], [], []>} : vector<256x128xbf16>, vector<128x128xbf16>, vector<256x128xf32> -> vector<256x128xf32>
    %c0_3 = arith.constant 0 : index
    %c0_4 = arith.constant 0 : index
    %3 = vector.load %arg3[%c0_3, %c0_4] : memref<1x128xf32, #tpu.memory_space<vmem>>, vector<1x128xf32>
    %4 = vector.broadcast %3 : vector<1x128xf32> to vector<256x128xf32>
    %5 = arith.addf %2, %4 : vector<256x128xf32>
    %cst_5 = arith.constant 0.000000e+00 : f32
    %6 = vector.broadcast %cst_5 : f32 to vector<256x128xf32>
    %7 = arith.maximumf %5, %6 : vector<256x128xf32>
    %8 = arith.truncf %7 : vector<256x128xf32> to vector<256x128xbf16>
    %c0_6 = arith.constant 0 : index
    %c0_7 = arith.constant 0 : index
    %9 = vector.load %arg4[%c0_6, %c0_7] : memref<128x256xbf16, #tpu.memory_space<vmem>>, vector<128x256xbf16>
    %cst_8 = arith.constant dense<0.000000e+00> : vector<256x256xf32>
    %10 = tpu.matmul %8, %9, %cst_8 {dimension_numbers = #tpu.dot_dimension_numbers<[1], [0], [0], [1], [0, 0, 1, 1], [], []>} : vector<256x128xbf16>, vector<128x256xbf16>, vector<256x256xf32> -> vector<256x256xf32>
    %c0_9 = arith.constant 0 : index
    %c0_10 = arith.constant 0 : index
    %11 = vector.load %arg5[%c0_9, %c0_10] : memref<1x256xf32, #tpu.memory_space<vmem>>, vector<1x256xf32>
    %12 = vector.broadcast %11 : vector<1x256xf32> to vector<256x256xf32>
    %13 = arith.addf %10, %12 : vector<256x256xf32>
    %cst_11 = arith.constant 0.000000e+00 : f32
    %14 = vector.broadcast %cst_11 : f32 to vector<256x256xf32>
    %15 = arith.maximumf %13, %14 : vector<256x256xf32>
    %16 = arith.truncf %15 : vector<256x256xf32> to vector<256x256xbf16>
    %c0_12 = arith.constant 0 : index
    %c0_13 = arith.constant 0 : index
    %17 = vector.load %arg6[%c0_12, %c0_13] : memref<256x512xbf16, #tpu.memory_space<vmem>>, vector<256x512xbf16>
    %cst_14 = arith.constant dense<0.000000e+00> : vector<256x512xf32>
    %18 = tpu.matmul %16, %17, %cst_14 {dimension_numbers = #tpu.dot_dimension_numbers<[1], [0], [0], [1], [0, 0, 1, 1], [], []>} : vector<256x256xbf16>, vector<256x512xbf16>, vector<256x512xf32> -> vector<256x512xf32>
    %c0_15 = arith.constant 0 : index
    %c0_16 = arith.constant 0 : index
    %19 = vector.load %arg7[%c0_15, %c0_16] : memref<1x512xf32, #tpu.memory_space<vmem>>, vector<1x512xf32>
    %20 = vector.broadcast %19 : vector<1x512xf32> to vector<256x512xf32>
    %21 = arith.addf %18, %20 : vector<256x512xf32>
    %cst_17 = arith.constant 0.000000e+00 : f32
    %22 = vector.broadcast %cst_17 : f32 to vector<256x512xf32>
    %23 = arith.maximumf %21, %22 : vector<256x512xf32>
    %24 = arith.truncf %23 : vector<256x512xf32> to vector<256x512xbf16>
    %c0_18 = arith.constant 0 : index
    %c0_19 = arith.constant 0 : index
    %25 = vector.load %arg8[%c0_18, %c0_19] : memref<512x512xbf16, #tpu.memory_space<vmem>>, vector<512x512xbf16>
    %cst_20 = arith.constant dense<0.000000e+00> : vector<256x512xf32>
    %26 = tpu.matmul %24, %25, %cst_20 {dimension_numbers = #tpu.dot_dimension_numbers<[1], [0], [0], [1], [0, 0, 1, 1], [], []>} : vector<256x512xbf16>, vector<512x512xbf16>, vector<256x512xf32> -> vector<256x512xf32>
    %c0_21 = arith.constant 0 : index
    %c0_22 = arith.constant 0 : index
    %27 = vector.load %arg9[%c0_21, %c0_22] : memref<1x512xf32, #tpu.memory_space<vmem>>, vector<1x512xf32>
    %28 = vector.broadcast %27 : vector<1x512xf32> to vector<256x512xf32>
    %29 = arith.addf %26, %28 : vector<256x512xf32>
    %cst_23 = arith.constant 0.000000e+00 : f32
    %30 = vector.broadcast %cst_23 : f32 to vector<256x512xf32>
    %31 = arith.maximumf %29, %30 : vector<256x512xf32>
    %32 = arith.truncf %31 : vector<256x512xf32> to vector<256x512xbf16>
    %c0_24 = arith.constant 0 : index
    %c0_25 = arith.constant 0 : index
    %33 = vector.load %arg10[%c0_24, %c0_25] : memref<512x512xbf16, #tpu.memory_space<vmem>>, vector<512x512xbf16>
    %cst_26 = arith.constant dense<0.000000e+00> : vector<256x512xf32>
    %34 = tpu.matmul %32, %33, %cst_26 {dimension_numbers = #tpu.dot_dimension_numbers<[1], [0], [0], [1], [0, 0, 1, 1], [], []>} : vector<256x512xbf16>, vector<512x512xbf16>, vector<256x512xf32> -> vector<256x512xf32>
    %c0_27 = arith.constant 0 : index
    %c0_28 = arith.constant 0 : index
    %35 = vector.load %arg11[%c0_27, %c0_28] : memref<1x512xf32, #tpu.memory_space<vmem>>, vector<1x512xf32>
    %36 = vector.broadcast %35 : vector<1x512xf32> to vector<256x512xf32>
    %37 = arith.addf %34, %36 : vector<256x512xf32>
    %cst_29 = arith.constant 0.000000e+00 : f32
    %38 = vector.broadcast %cst_29 : f32 to vector<256x512xf32>
    %39 = arith.maximumf %37, %38 : vector<256x512xf32>
    %40 = arith.truncf %39 : vector<256x512xf32> to vector<256x512xbf16>
    %c0_30 = arith.constant 0 : index
    %c0_31 = arith.constant 0 : index
    %41 = vector.load %arg12[%c0_30, %c0_31] : memref<512x512xbf16, #tpu.memory_space<vmem>>, vector<512x512xbf16>
    %cst_32 = arith.constant dense<0.000000e+00> : vector<256x512xf32>
    %42 = tpu.matmul %40, %41, %cst_32 {dimension_numbers = #tpu.dot_dimension_numbers<[1], [0], [0], [1], [0, 0, 1, 1], [], []>} : vector<256x512xbf16>, vector<512x512xbf16>, vector<256x512xf32> -> vector<256x512xf32>
    %c0_33 = arith.constant 0 : index
    %c0_34 = arith.constant 0 : index
    %43 = vector.load %arg13[%c0_33, %c0_34] : memref<1x512xf32, #tpu.memory_space<vmem>>, vector<1x512xf32>
    %44 = vector.broadcast %43 : vector<1x512xf32> to vector<256x512xf32>
    %45 = arith.addf %42, %44 : vector<256x512xf32>
    %cst_35 = arith.constant 0.000000e+00 : f32
    %46 = vector.broadcast %cst_35 : f32 to vector<256x512xf32>
    %47 = arith.maximumf %45, %46 : vector<256x512xf32>
    %48 = arith.truncf %47 : vector<256x512xf32> to vector<256x512xbf16>
    %c0_36 = arith.constant 0 : index
    %c0_37 = arith.constant 0 : index
    %49 = vector.load %arg14[%c0_36, %c0_37] : memref<512x128xbf16, #tpu.memory_space<vmem>>, vector<512x128xbf16>
    %cst_38 = arith.constant dense<0.000000e+00> : vector<256x128xf32>
    %50 = tpu.matmul %48, %49, %cst_38 {dimension_numbers = #tpu.dot_dimension_numbers<[1], [0], [0], [1], [0, 0, 1, 1], [], []>} : vector<256x512xbf16>, vector<512x128xbf16>, vector<256x128xf32> -> vector<256x128xf32>
    %c0_39 = arith.constant 0 : index
    %c0_40 = arith.constant 0 : index
    %51 = vector.load %arg15[%c0_39, %c0_40] : memref<1x128xf32, #tpu.memory_space<vmem>>, vector<1x128xf32>
    %52 = vector.broadcast %51 : vector<1x128xf32> to vector<256x128xf32>
    %53 = arith.addf %50, %52 : vector<256x128xf32>
    %c0_41 = arith.constant 0 : index
    %c0_42 = arith.constant 0 : index
    %54 = vector.load %arg16[%c0_41, %c0_42] : memref<256x128xf32, #tpu.memory_space<vmem>>, vector<256x128xf32>
    tpu.vector_store %arg16[%c0_41, %c0_42], %53 {strides = array<i32>} : memref<256x128xf32, #tpu.memory_space<vmem>>, vector<256x128xf32>,
    return
  }
  func.func @transform_0(%arg0: i32) -> (i32, i32) {
    %c0_i32 = arith.constant 0 : i32
    %c0_i32_0 = arith.constant 0 : i32
    return %arg0, %c0_i32 : i32, i32
  }
  func.func @transform_1(%arg0: i32) -> (i32, i32) {
    %c0_i32 = arith.constant 0 : i32
    %c0_i32_0 = arith.constant 0 : i32
    %c0_i32_1 = arith.constant 0 : i32
    return %c0_i32, %c0_i32_0 : i32, i32
  }
  func.func @transform_2(%arg0: i32) -> (i32, i32) {
    %c0_i32 = arith.constant 0 : i32
    %c0_i32_0 = arith.constant 0 : i32
    %c0_i32_1 = arith.constant 0 : i32
    return %c0_i32, %c0_i32_0 : i32, i32
  }
  func.func @transform_3(%arg0: i32) -> (i32, i32) {
    %c0_i32 = arith.constant 0 : i32
    %c0_i32_0 = arith.constant 0 : i32
    %c0_i32_1 = arith.constant 0 : i32
    return %c0_i32, %c0_i32_0 : i32, i32
  }
  func.func @transform_4(%arg0: i32) -> (i32, i32) {
    %c0_i32 = arith.constant 0 : i32
    %c0_i32_0 = arith.constant 0 : i32
    %c0_i32_1 = arith.constant 0 : i32
    return %c0_i32, %c0_i32_0 : i32, i32
  }
  func.func @transform_5(%arg0: i32) -> (i32, i32) {
    %c0_i32 = arith.constant 0 : i32
    %c0_i32_0 = arith.constant 0 : i32
    %c0_i32_1 = arith.constant 0 : i32
    return %c0_i32, %c0_i32_0 : i32, i32
  }
  func.func @transform_6(%arg0: i32) -> (i32, i32) {
    %c0_i32 = arith.constant 0 : i32
    %c0_i32_0 = arith.constant 0 : i32
    %c0_i32_1 = arith.constant 0 : i32
    return %c0_i32, %c0_i32_0 : i32, i32
  }
  func.func @transform_7(%arg0: i32) -> (i32, i32) {
    %c0_i32 = arith.constant 0 : i32
    %c0_i32_0 = arith.constant 0 : i32
    %c0_i32_1 = arith.constant 0 : i32
    return %c0_i32, %c0_i32_0 : i32, i32
  }
  func.func @transform_8(%arg0: i32) -> (i32, i32) {
    %c0_i32 = arith.constant 0 : i32
    %c0_i32_0 = arith.constant 0 : i32
    %c0_i32_1 = arith.constant 0 : i32
    return %c0_i32, %c0_i32_0 : i32, i32
  }
  func.func @transform_9(%arg0: i32) -> (i32, i32) {
    %c0_i32 = arith.constant 0 : i32
    %c0_i32_0 = arith.constant 0 : i32
    %c0_i32_1 = arith.constant 0 : i32
    return %c0_i32, %c0_i32_0 : i32, i32
  }
  func.func @transform_10(%arg0: i32) -> (i32, i32) {
    %c0_i32 = arith.constant 0 : i32
    %c0_i32_0 = arith.constant 0 : i32
    %c0_i32_1 = arith.constant 0 : i32
    return %c0_i32, %c0_i32_0 : i32, i32
  }
  func.func @transform_11(%arg0: i32) -> (i32, i32) {
    %c0_i32 = arith.constant 0 : i32
    %c0_i32_0 = arith.constant 0 : i32
    %c0_i32_1 = arith.constant 0 : i32
    return %c0_i32, %c0_i32_0 : i32, i32
  }
  func.func @transform_12(%arg0: i32) -> (i32, i32) {
    %c0_i32 = arith.constant 0 : i32
    %c0_i32_0 = arith.constant 0 : i32
    %c0_i32_1 = arith.constant 0 : i32
    return %c0_i32, %c0_i32_0 : i32, i32
  }
  func.func @transform_13(%arg0: i32) -> (i32, i32) {
    %c0_i32 = arith.constant 0 : i32
    %c0_i32_0 = arith.constant 0 : i32
    %c0_i32_1 = arith.constant 0 : i32
    return %c0_i32, %c0_i32_0 : i32, i32
  }
  func.func @transform_14(%arg0: i32) -> (i32, i32) {
    %c0_i32 = arith.constant 0 : i32
    %c0_i32_0 = arith.constant 0 : i32
    %c0_i32_1 = arith.constant 0 : i32
    return %c0_i32, %c0_i32_0 : i32, i32
  }
  func.func @transform_15(%arg0: i32) -> (i32, i32) {
    %c0_i32 = arith.constant 0 : i32
    %c0_i32_0 = arith.constant 0 : i32
    return %arg0, %c0_i32 : i32, i32
  }
}

</mosaic_0001>

<bundles_post_ra>
// kernel: tpu_custom_call.1
= control target key start
LH: loop header
LB: loop body
LE: loop exit
PB: predicated region body
PF: predicated region fallthrough
CT: control target
= control target key end

     0   :  { %s13330_s0 = inlined_call_operand.hbm [shape: bf16[512,128], index: 0, kind: input, shape index: {}]   ;;  %s13331_s1 = inlined_call_operand.hbm [shape: bf16[128,128], index: 1, kind: input, shape index: {}]   ;;  %s13332_s2 = inlined_call_operand.hbm [shape: f32[1,128], index: 2, kind: input, shape index: {}]   ;;  %s13333_s3 = inlined_call_operand.hbm [shape: bf16[128,256], index: 3, kind: input, shape index: {}]   ;;  %s13334_s4 = inlined_call_operand.vmem [shape: f32[1,256], index: 4, kind: input, shape index: {}]   ;;  %s13335_s5 = inlined_call_operand.hbm [shape: bf16[256,512], index: 5, kind: input, shape index: {}]   ;;  %s13336_s6 = inlined_call_operand.vmem [shape: f32[1,512], index: 6, kind: input, shape index: {}]   ;;  %s13337_s7 = inlined_call_operand.hbm [shape: bf16[512,512], index: 7, kind: input, shape index: {}]   ;;  %s13338_s8 = inlined_call_operand.vmem [shape: f32[1,512], index: 8, kind: input, shape index: {}]   ;;  %s13339_s9 = inlined_call_operand.hbm [shape: bf16[512,512], index: 9, kind: input, shape index: {}]   ;;  %s13340_s10 = inlined_call_operand.vmem [shape: f32[1,512], index: 10, kind: input, shape index: {}]   ;;  %s13341_s11 = inlined_call_operand.hbm [shape: bf16[512,512], index: 11, kind: input, shape index: {}]   ;;  %s13342_s12 = inlined_call_operand.vmem [shape: f32[1,512], index: 12, kind: input, shape index: {}]   ;;  %s13343_s13 = inlined_call_operand.hbm [shape: bf16[512,128], index: 13, kind: input, shape index: {}]   ;;  %s13344_s14 = inlined_call_operand.vmem [shape: f32[1,128], index: 14, kind: input, shape index: {}]   ;;  %s13345_s15 = inlined_call_operand.hbm [shape: f32[512,128], index: 15, kind: output, shape index: {}]  }
   0x1   :  { %13358 = sst [smem:[#allocation28_spill]] %s13331_s1 }
   0x2   :  { %13359 = sst [smem:[#allocation29_spill]] %s13332_s2 }
   0x3   :  { %13360 = sst [smem:[#allocation30_spill]] %s13333_s3 }
   0x4   :  { %13361 = sst [smem:[#allocation31_spill]] %s13336_s6 }
   0x5   :  { %13362 = sst [smem:[#allocation32_spill]] %s13338_s8 }
   0x6   :  { %13363 = sst [smem:[#allocation33_spill]] %s13340_s10 }
   0x7   :  { %13364 = sst [smem:[#allocation34_spill]] %s13342_s12 }
   0x8   :  { %13365 = sst [smem:[#allocation35_spill]] %s13344_s14 }
   0x9   :  { %13366 = sst [smem:[#allocation36_spill]] %s13345_s15 }
   0xa   :  { %20 = vsyncpa [#allocation3], 0 }
   0xb   :  { %22 = vsyncpa [#allocation3 + $0x1], 0 }
   0xc   :  { %23 = vsyncpa [#allocation6], 0 }
   0xd   :  { %24 = vsyncpa [#allocation9], 0 }
   0xe   :  { %25 = vsyncpa [#allocation12], 0 }
   0xf   :  { %26 = vsyncpa [#allocation15], 0 }
  0x10   :  { %27 = vsyncpa [#allocation4], 0 }
  0x11   :  { %29 = vsyncpa [#allocation4 + $0x1], 0  ;;  %s11468_s18 = smov 0   ;;  %s11470_s19 = smov 0  }
  0x12   :  { %s11472_s20 = smov 0   ;;  %s11474_s21 = smov 0  }
  0x13 LB: > { %s11369_s22 = smov [#allocation5]   ;;  %s11489_s24 = sadd.s32 4294967295, %s11367_s21   ;;  %s11367_s21 = sphi %s11474_s21, %s13412_s21   ;;  %s11363_s20 = sphi %s11472_s20, %s13411_s20   ;;  %s11359_s19 = sphi %s11470_s19, %s13410_s19   ;;  %s11355_s18 = sphi %s11468_s18, %s13409_s18  }
  0x14   : > { %s398_s23 = sshll.u32 %s11369_s22, 4  ;;  %p8462_p0 = scmp.ge.s32.totalorder %s11367_s21, 1  ;;  %s11494_s23 = int_to_ptr.vmem [resolvable:$true] %s398_s23 }
  0x15   : > { %p13351_p1 = scmp.eq.s32.totalorder %s11489_s24, 0  ;;  %p386_p2 = scmp.lt.s32.totalorder %s11367_s21, 3 }
  0x16   : > { %s11370_s26 = smov [#allocation8]   ;;  %s13369_s1 = sld [smem:[#allocation28_spill]] }
  0x17   : > { %p11496_p3 = pnand %p8462_p0, %p386_p2  ;;  %s422_s27 = sshll.u32 %s11370_s26, 4  ;;  %s11509_s27 = int_to_ptr.vmem [resolvable:$true] %s422_s27 }
  0x19   : > { %s13367_s25 = scalar_select %p11496_p3, 1, 0 }
  0x1a   : > { %p10147_p5 = pneg %p11496_p3 }
  0x1c   : > { %p11505_p6 = pnand %p10147_p5, %p13351_p1  ;;  %s11031_s16 = scalar_lea.hbm %s13369_s1, 1024 }
  0x1d   : > { %p11032_p7 = scmp.ne.s32.totalorder %s13369_s1, %s11031_s16  ;;  %p11038_p11 = scmp.lt.u32.totalorder %s11031_s16, %s13369_s1 }
  0x1e   : > { %p11519_p8 = pneg %p11505_p6 }
  0x20   : > { %p11034_p9 = pnand %p11519_p8, %p11032_p7 }
  0x22   : > { %p11035_p10 = pneg %p11034_p9 }
  0x24   : > { %p11040_p12 = pnand %p11038_p11, %p11035_p10 }
  0x26   : > { %11043 = shalt.err (!%p11040_p12)
}
  0x27   : > { %s11044_s29 = scalar_lea.vmem %s11494_s23, 1024  ;;  %p11052_p5 = scmp.lt.s32.totalorder %s11494_s23, %s11494_s23 }
  0x28   : > { %p11045_p13 = scmp.ne.s32.totalorder %s11494_s23, %s11044_s29  ;;  %p11053_p4 = scmp.lt.s32.totalorder %s11044_s29, %s11044_s29 }
  0x2a   : > { %p11047_p0 = pnand %p11045_p13, %p11519_p8  ;;  %p11054_p7 = por %p11053_p4, %p11052_p5 }
  0x2c   : > { %p11048_p2 = pneg %p11047_p0 }
  0x2e   : > { %p11055_p9 = pnand %p11054_p7, %p11048_p2 }
  0x30   : > { %11058 = shalt.err (!%p11055_p9)
}
  0x31   : > { %s13347_s30 = smov 64   ;;  %s13349_s14 = smov 4  }
  0x32   : > { %10150 = dma.hbm_to_vmem [thread:$0]  (!%p11505_p6), %s13369_s1, 1024, %s11494_s23, [#allocation6], %s13347_s30, %s13347_s30, %s13349_s14  }
  0x33   : > { %s13371_s3 = sld [smem:[#allocation30_spill]] }
  0x39   : > { %s11059_s29 = scalar_lea.hbm %s13371_s3, 2048 }
  0x3a   : > { %p11060_p4 = scmp.ne.s32.totalorder %s13371_s3, %s11059_s29  ;;  %p11066_p12 = scmp.lt.u32.totalorder %s11059_s29, %s13371_s3 }
  0x3c   : > { %p11062_p10 = pnand %p11060_p4, %p11519_p8 }
  0x3e   : > { %p11063_p11 = pneg %p11062_p10 }
  0x40   : > { %p11068_p13 = pnand %p11066_p12, %p11063_p11 }
  0x42   : > { %11071 = shalt.err (!%p11068_p13)
}
  0x43   : > { %s11072_s23 = scalar_lea.vmem %s11509_s27, 2048  ;;  %p11080_p7 = scmp.lt.s32.totalorder %s11509_s27, %s11509_s27 }
  0x44   : > { %p11073_p0 = scmp.ne.s32.totalorder %s11509_s27, %s11072_s23  ;;  %p11081_p9 = scmp.lt.s32.totalorder %s11072_s23, %s11072_s23 }
  0x46   : > { %p11075_p2 = pnand %p11073_p0, %p11519_p8  ;;  %p11082_p4 = por %p11081_p9, %p11080_p7 }
  0x48   : > { %p11076_p5 = pneg %p11075_p2 }
  0x4a   : > { %p11083_p10 = pnand %p11082_p4, %p11076_p5 }
  0x4c   : > { %11086 = shalt.err (!%p11083_p10)
}
  0x4d   : > { %s11373_s10 = smov 128   ;;  %s11374_s6 = smov 8  }
  0x4e   : > { %10156 = dma.hbm_to_vmem [thread:$0]  (!%p11505_p6), %s13371_s3, 2048, %s11509_s27, [#allocation9], %s11373_s10, %s11373_s10, %s11374_s6  }
  0x4f   : > { %s11375_s16 = smov [#allocation11]   ;;  %s11376_s22 = smov [#allocation14]  }
  0x50   : > { %s454_s17 = sshll.u32 %s11375_s16, 4  ;;  %s486_s26 = sshll.u32 %s11376_s22, 4  ;;  %s455_s17 = int_to_ptr.vmem [resolvable:$true] %s454_s17  ;;  %s11566_s26 = int_to_ptr.vmem [resolvable:$true] %s486_s26 }
  0x51   : > { %s11087_s30 = scalar_lea.hbm %s13337_s7, 16384 }
  0x52   : > { %p11088_p11 = scmp.ne.s32.totalorder %s13337_s7, %s11087_s30  ;;  %p11094_p0 = scmp.lt.u32.totalorder %s11087_s30, %s13337_s7 }
  0x54   : > { %p11090_p12 = pnand %p11088_p11, %p11519_p8 }
  0x56   : > { %p11091_p13 = pneg %p11090_p12 }
  0x58   : > { %p11096_p2 = pnand %p11094_p0, %p11091_p13 }
  0x5a   : > { %11099 = shalt.err (!%p11096_p2)
}
  0x5b   : > { %s11100_s10 = scalar_lea.vmem %s455_s17, 16384  ;;  %p11108_p4 = scmp.lt.s32.totalorder %s455_s17, %s455_s17 }
  0x5c   : > { %p11101_p5 = scmp.ne.s32.totalorder %s455_s17, %s11100_s10  ;;  %p11109_p10 = scmp.lt.s32.totalorder %s11100_s10, %s11100_s10 }
  0x5e   : > { %p11103_p7 = pnand %p11101_p5, %p11519_p8  ;;  %p11110_p1 = por %p11109_p10, %p11108_p4 }
  0x60   : > { %p11104_p9 = pneg %p11103_p7 }
  0x62   : > { %p11111_p3 = pnand %p11110_p1, %p11104_p9 }
  0x64   : > { %11114 = shalt.err (!%p11111_p3)
}
  0x65   : > { %s11377_s1 = smov 256   ;;  %s11378_s14 = smov 16  }
  0x66   : > { %10162 = dma.hbm_to_vmem [thread:$0]  (!%p11505_p6), %s13337_s7, 16384, %s455_s17, [#allocation12], %s11377_s1, %s11377_s1, %s11378_s14  }
  0x67   : > { %s11115_s22 = scalar_lea.hbm %s13341_s11, 16384 }
  0x68   : > { %p11116_p1 = scmp.ne.s32.totalorder %s13341_s11, %s11115_s22  ;;  %p11122_p12 = scmp.lt.u32.totalorder %s11115_s22, %s13341_s11 }
  0x6a   : > { %p11118_p3 = pnand %p11116_p1, %p11519_p8 }
  0x6c   : > { %p11119_p11 = pneg %p11118_p3 }
  0x6e   : > { %p11124_p13 = pnand %p11122_p12, %p11119_p11 }
  0x70   : > { %11127 = shalt.err (!%p11124_p13)
}
  0x71   : > { %s11128_s17 = scalar_lea.vmem %s11566_s26, 16384  ;;  %p11136_p7 = scmp.lt.s32.totalorder %s11566_s26, %s11566_s26 }
  0x72   : > { %p11129_p0 = scmp.ne.s32.totalorder %s11566_s26, %s11128_s17  ;;  %p11137_p9 = scmp.lt.s32.totalorder %s11128_s17, %s11128_s17 }
  0x74   : > { %p11131_p2 = pnand %p11129_p0, %p11519_p8  ;;  %p11138_p4 = por %p11137_p9, %p11136_p7 }
  0x76   : > { %p11132_p5 = pneg %p11131_p2 }
  0x78   : > { %p11139_p10 = pnand %p11138_p4, %p11132_p5 }
  0x7a   : > { %11142 = shalt.err (!%p11139_p10)
}
  0x7b   : > { %10168 = dma.hbm_to_vmem [thread:$0]  (!%p11505_p6), %s13341_s11, 16384, %s11566_s26, [#allocation15], %s11377_s1, %s11377_s1, %s11378_s14  }
  0x7c   : > { %s11379_s6 = smov [#allocation7]   ;;  %s11380_s16 = smov [#allocation10]  }
  0x7d   : > { %s412_s12 = sshll.u32 %s11379_s6, 4  ;;  %s438_s22 = sshll.u32 %s11380_s16, 4  ;;  %s413_s12 = int_to_ptr.vmem [resolvable:$true] %s412_s12  ;;  %s11615_s22 = int_to_ptr.vmem [resolvable:$true] %s438_s22 }
  0x7e   : > { %s13372_s2 = sld [smem:[#allocation29_spill]] }
  0x84   : > { %s11143_s8 = scalar_lea.hbm %s13372_s2, 16 }
  0x85   : > { %p11144_p1 = scmp.ne.s32.totalorder %s13372_s2, %s11143_s8  ;;  %p11150_p12 = scmp.lt.u32.totalorder %s11143_s8, %s13372_s2 }
  0x87   : > { %p11146_p3 = pnand %p11144_p1, %p11519_p8 }
  0x89   : > { %p11147_p11 = pneg %p11146_p3 }
  0x8b   : > { %p11152_p13 = pnand %p11150_p12, %p11147_p11 }
  0x8d   : > { %11155 = shalt.err (!%p11152_p13)
}
  0x8e   : > { %s11156_s30 = scalar_lea.vmem %s413_s12, 16  ;;  %s11163_s6 = scalar_lea.vmem %s413_s12, 32 }
  0x8f   : > { %p11157_p0 = scmp.ne.s32.totalorder %s413_s12, %s11156_s30  ;;  %p11164_p7 = scmp.lt.s32.totalorder %s413_s12, %s413_s12 }
  0x90   : > { %p11165_p9 = scmp.lt.s32.totalorder %s11163_s6, %s11156_s30 }
  0x91   : > { %p11159_p2 = pnand %p11157_p0, %p11519_p8 }
  0x92   : > { %p11166_p4 = por %p11165_p9, %p11164_p7 }
  0x93   : > { %p11160_p5 = pneg %p11159_p2 }
  0x95   : > { %p11167_p10 = pnand %p11166_p4, %p11160_p5 }
  0x97   : > { %11170 = shalt.err (!%p11167_p10)
}
  0x98   : > { %10153 = dma.hbm_to_vmem [thread:$0]  (!%p11505_p6), %s13372_s2, 16, %s413_s12, [#allocation6]  }
  0x99   : > { %s11171_s27 = scalar_lea.hbm %s13335_s5, 8192 }
  0x9a   : > { %p11172_p1 = scmp.ne.s32.totalorder %s13335_s5, %s11171_s27  ;;  %p11178_p12 = scmp.lt.u32.totalorder %s11171_s27, %s13335_s5 }
  0x9c   : > { %p11174_p3 = pnand %p11172_p1, %p11519_p8 }
  0x9e   : > { %p11175_p11 = pneg %p11174_p3 }
  0xa0   : > { %p11180_p13 = pnand %p11178_p12, %p11175_p11 }
  0xa2   : > { %11183 = shalt.err (!%p11180_p13)
}
  0xa3   : > { %s11184_s12 = scalar_lea.vmem %s11615_s22, 8192  ;;  %p11192_p7 = scmp.lt.s32.totalorder %s11615_s22, %s11615_s22 }
  0xa4   : > { %p11185_p0 = scmp.ne.s32.totalorder %s11615_s22, %s11184_s12  ;;  %p11193_p9 = scmp.lt.s32.totalorder %s11184_s12, %s11184_s12 }
  0xa6   : > { %p11187_p2 = pnand %p11185_p0, %p11519_p8  ;;  %p11194_p4 = por %p11193_p9, %p11192_p7 }
  0xa8   : > { %p11188_p5 = pneg %p11187_p2 }
  0xaa   : > { %p11195_p10 = pnand %p11194_p4, %p11188_p5 }
  0xac   : > { %11198 = shalt.err (!%p11195_p10)
}
  0xad   : > { %10159 = dma.hbm_to_vmem [thread:$0]  (!%p11505_p6), %s13335_s5, 8192, %s11615_s22, [#allocation9], %s11377_s1, %s11377_s1, %s11378_s14  }
  0xae   : > { %s11381_s29 = smov [#allocation13]   ;;  %s11382_s8 = smov [#allocation16]  }
  0xaf   : > { %s470_s23 = sshll.u32 %s11381_s29, 4  ;;  %s502_s27 = sshll.u32 %s11382_s8, 4  ;;  %s471_s23 = int_to_ptr.vmem [resolvable:$true] %s470_s23  ;;  %s11661_s27 = int_to_ptr.vmem [resolvable:$true] %s502_s27 }
  0xb0   : > { %s11199_s26 = scalar_lea.hbm %s13339_s9, 16384 }
  0xb1   : > { %p11200_p1 = scmp.ne.s32.totalorder %s13339_s9, %s11199_s26  ;;  %p11206_p12 = scmp.lt.u32.totalorder %s11199_s26, %s13339_s9 }
  0xb3   : > { %p11202_p3 = pnand %p11200_p1, %p11519_p8 }
  0xb5   : > { %p11203_p11 = pneg %p11202_p3 }
  0xb7   : > { %p11208_p13 = pnand %p11206_p12, %p11203_p11 }
  0xb9   : > { %11211 = shalt.err (!%p11208_p13)
}
  0xba   : > { %s11212_s16 = scalar_lea.vmem %s471_s23, 16384  ;;  %p11220_p7 = scmp.lt.s32.totalorder %s471_s23, %s471_s23 }
  0xbb   : > { %p11213_p0 = scmp.ne.s32.totalorder %s471_s23, %s11212_s16  ;;  %p11221_p9 = scmp.lt.s32.totalorder %s11212_s16, %s11212_s16 }
  0xbd   : > { %p11215_p2 = pnand %p11213_p0, %p11519_p8  ;;  %p11222_p4 = por %p11221_p9, %p11220_p7 }
  0xbf   : > { %p11216_p5 = pneg %p11215_p2 }
  0xc1   : > { %p11223_p10 = pnand %p11222_p4, %p11216_p5 }
  0xc3   : > { %11226 = shalt.err (!%p11223_p10)
}
  0xc4   : > { %10165 = dma.hbm_to_vmem [thread:$0]  (!%p11505_p6), %s13339_s9, 16384, %s471_s23, [#allocation12], %s11377_s1, %s11377_s1, %s11378_s14  }
  0xc5   : > { %s11227_s26 = scalar_lea.hbm %s13343_s13, 4096 }
  0xc6   : > { %p11228_p1 = scmp.ne.s32.totalorder %s13343_s13, %s11227_s26  ;;  %p11234_p12 = scmp.lt.u32.totalorder %s11227_s26, %s13343_s13 }
  0xc8   : > { %p11230_p3 = pnand %p11228_p1, %p11519_p8 }
  0xca   : > { %p11231_p11 = pneg %p11230_p3 }
  0xcc   : > { %p11236_p13 = pnand %p11234_p12, %p11231_p11 }
  0xce   : > { %11239 = shalt.err (!%p11236_p13)
}
  0xcf   : > { %s11240_s1 = scalar_lea.vmem %s11661_s27, 4096  ;;  %p11248_p7 = scmp.lt.s32.totalorder %s11661_s27, %s11661_s27 }
  0xd0   : > { %p11241_p0 = scmp.ne.s32.totalorder %s11661_s27, %s11240_s1  ;;  %p11249_p9 = scmp.lt.s32.totalorder %s11240_s1, %s11240_s1 }
  0xd2   : > { %p11243_p2 = pnand %p11241_p0, %p11519_p8  ;;  %p11250_p4 = por %p11249_p9, %p11248_p7 }
  0xd4   : > { %p11244_p5 = pneg %p11243_p2 }
  0xd6   : > { %p11251_p10 = pnand %p11250_p4, %p11244_p5 }
  0xd8   : > { %11254 = shalt.err (!%p11251_p10)
}
  0xd9   : > { %s13373_s14 = smov 4   ;;  %s13374_s23 = smov 64  }
  0xda   : > { %10171 = dma.hbm_to_vmem [thread:$0]  (!%p11505_p6), %s13343_s13, 4096, %s11661_s27, [#allocation15], %s13374_s23, %s13374_s23, %s13373_s14  }
  0xdb   : > { %s8461_s15 = sadd.s32 4294967294, %s11367_s21   ;;  %s11712_s28 = sadd.s32 1, %s11367_s21  }
  0xdc   : > { %s39_s8 = ssub.s32 %s11367_s21, %s11712_s28  ;;  %s42_s17 = sadd.s32 1, %s11363_s20 }
  0xdd   : > { %p40_p8 = scmp.eq.s32.totalorder %s39_s8, 0  ;;  %p49_p1 = scmp.ne.s32.totalorder %s11363_s20, %s11359_s19 }
  0xde   : > { %p50_p3 = scmp.eq.s32.totalorder %s11367_s21, 0  ;;  %p55_p11 = scmp.ne.s32.totalorder %s11359_s19, %s11355_s18 }
  0xdf   : > { %s11723_s10 = scalar_select %p40_p8, %s11363_s20, %s42_s17  }
  0xe0   : > { %p11725_p12 = por %p50_p3, %p49_p1  ;;  %p13376_p13 = scmp.eq.s32.totalorder %s11489_s24, 0 }
  0xe1   : > { %p373_p0 = scmp.eq.s32.totalorder %s11489_s24, 1  ;;  %p379_p2 = scmp.eq.s32.totalorder %s8461_s15, 1 }
  0xe2   : > { %p11731_p6 = por %p13376_p13, %p55_p11  ;;  %p10188_p5 = scmp.lt.s32.totalorder %s11367_s21, 2 }
  0xe3   : > { %s519_s30 = sand.u32 1, %s11363_s20   ;;  %p11738_p7 = por %p373_p0, %p49_p1 }
  0xe4   : > { %p11742_p9 = por %p379_p2, %p55_p11  ;;  %s8472_s22 = sshll.u32 %s519_s30, 7 }
  0xe5   : > { %s13378_s12 = scalar_select %p11738_p7, 1, 0 }
  0xe6   : > { %s13379_s6 = scalar_select %p11742_p9, 1, 0 }
  0xe7   : > { %s9013_s1 = sshll.u32 %s11367_s21, 11  ;;  %s523_s15 = scalar_lea.vmem [#allocation2], %s8472_s22 }
  0xe8   : > { %s11750_s8 = scalar_lea.hbm %s13330_s0, %s9013_s1  ;;  %s530_s17 = sshll.u32 %s523_s15, 4  ;;  %s11752_s17 = int_to_ptr.vmem [resolvable:$true] %s530_s17 }
  0xe9   : > { %p11756_p4 = pnand %p10188_p5, %p11725_p12  ;;  %s11760_s3 = scalar_lea.sflag [#allocation3], %s519_s30 }
  0xea   : > { %s11255_s16 = scalar_lea.hbm %s11750_s8, 2048  ;;  %s11260_s26 = scalar_lea.hbm %s13330_s0, 4096 }
  0xeb   : > { %p11256_p10 = scmp.ne.s32.totalorder %s11750_s8, %s11255_s16  ;;  %p11257_p8 = pneg %p11756_p4 }
  0xec   : > { %p11261_p11 = scmp.lt.u32.totalorder %s11750_s8, %s13330_s0  ;;  %p11262_p12 = scmp.lt.u32.totalorder %s11260_s26, %s11255_s16 }
  0xed   : > { %p11258_p1 = pnand %p11257_p8, %p11256_p10  ;;  %p11264_p0 = scmp.lt.u32.totalorder %s11255_s16, %s11750_s8 }
  0xee   : > { %p11263_p13 = por %p11262_p12, %p11261_p11 }
  0xef   : > { %p11259_p3 = pneg %p11258_p1 }
  0xf0   : > { %p11265_p2 = por %p11264_p0, %p11263_p13 }
  0xf2   : > { %p11266_p5 = pnand %p11265_p2, %p11259_p3 }
  0xf4   : > { %11269 = shalt.err (!%p11266_p5)
}
  0xf5   : > { %s11270_s30 = scalar_lea.vmem %s11752_s17, 2048  ;;  %s11383_s22 = smov [#allocation2]  }
  0xf6   : > { %p11271_p10 = scmp.ne.s32.totalorder %s11752_s17, %s11270_s30  ;;  %s11275_s1 = sshll.u32 %s11383_s22, 4  ;;  %s11276_s1 = int_to_ptr.vmem [resolvable:$false] %s11275_s1 }
  0xf7   : > { %s11277_s29 = scalar_lea.vmem %s11276_s1, 4096  ;;  %p11278_p7 = scmp.lt.s32.totalorder %s11752_s17, %s11276_s1 }
  0xf8   : > { %p11273_p1 = pnand %p11271_p10, %p11257_p8  ;;  %p11279_p11 = scmp.lt.s32.totalorder %s11277_s29, %s11270_s30 }
  0xfa   : > { %p11274_p9 = pneg %p11273_p1  ;;  %p11280_p12 = por %p11279_p11, %p11278_p7 }
  0xfc   : > { %p11281_p13 = pnand %p11280_p12, %p11274_p9 }
  0xfe   : > { %11284 = shalt.err (!%p11281_p13)
}
  0xff   : > { %10175 = dma.hbm_to_vmem [thread:$0]  (!%p11756_p4), %s11750_s8, 2048, %s11752_s17, %s11760_s3, %s13374_s23, %s13374_s23, %s13373_s14  }
 0x100   : > { %p13381_p8 = scmp.ne.s32.totalorder %s13367_s25, 0 }
 0x102   : > { %542 = sbr.rel (%p13381_p8) target bundleno = 2514 (0x9d2), region = 80 }
 0x109   : > { %s11794_s16 = sand.u32 1, %s11359_s19  }
 0x10a   : > { %s8476_s26 = sshll.u32 %s11794_s16, 7  ;;  %s545_s15 = scalar_lea.sflag [#allocation3], %s11794_s16 }
 0x10b   : > { %s11798_s30 = scalar_lea.vmem [#allocation2], %s8476_s26 }
 0x10c   : > { %11330 = dma.done.wait (%p11731_p6), %s545_s15, 2048  }
 0x10d   : > { %11332 = vsyncadd (%p11731_p6), %s545_s15, 4294965248  ;;  %p13382_p7 = scmp.eq.s32.totalorder %s11489_s24, 0 }
 0x10f   : > { %11334 = dma.done.wait (%p13382_p7), [#allocation6], 1040   ;;  %p13383_p9 = pmov %p13382_p7 }
 0x110   : > { %p13384_p4 = pmov %p13382_p7 }
 0x111   : > { %11336 = vsyncadd (%p13383_p9), [#allocation6], 4294966256 }
 0x112   : > { %11338 = dma.done.wait (%p13384_p4), [#allocation9], 10240   ;;  %p13385_p3 = pmov %p13384_p4 }
 0x114   : > { %11340 = vsyncadd (%p13385_p3), [#allocation9], 4294957056  ;;  %p13386_p0 = pmov %p13385_p3 }
 0x116   : > { %11342 = dma.done.wait (%p13386_p0), [#allocation12], 32768   ;;  %p13387_p2 = pmov %p13386_p0 }
 0x117   : > { %p13388_p6 = pmov %p13386_p0 }
 0x118   : > { %11344 = vsyncadd (%p13387_p2), [#allocation12], 4294934528 }
 0x119   : > { %11346 = dma.done.wait (%p13388_p6), [#allocation15], 20480   ;;  %p13389_p5 = pmov %p13386_p0 }
 0x11a   : > { %v10247_v0 = vld [vmem:[#allocation5] sm:$0xff]   ;;  %v10248_v1 = vld [vmem:[#allocation5 + $0x8] sm:$0xff]   ;;  %v10249_v2 = vld [vmem:[#allocation5 + $0x10] sm:$0xff]   ;;  %v11384_v40 = vmov 0   ;;  %s13393_s23 = sld [smem:[#allocation31_spill]]  ;;  %s13395_s17 = sld [smem:[#allocation32_spill]] }
 0x11b   : > { %11348 = vsyncadd (%p13389_p5), [#allocation15], 4294946816  ;;  %9263 = vmatprep.subr.bf16.mxu0 %v10247_v0  ;;  %v10250_v3 = vld [vmem:[#allocation5 + $0x18] sm:$0xff]   ;;  %v10255_v4 = vld [vmem:[%s11798_s30] sm:$0xff]   ;;  %1178 = vmatprep.mubr.bf16.mxu1 %v11384_v40  ;;  %s13396_s29 = sld [smem:[#allocation33_spill]]  ;;  %s13404_s25 = sld [smem:[#allocation35_spill]] }
 0x11c   : > { %9264 = vmatpush3.bf16.msra.mxu0 %v10247_v0  ;;  %9279 = vmatprep.mubr.bf16.mxu0 %v10255_v4  ;;  %v10251_v5 = vld [vmem:[#allocation5 + $0x20] sm:$0xff]   ;;  %v10252_v6 = vld [vmem:[#allocation5 + $0x28] sm:$0xff]   ;;  %v10253_v7 = vld [vmem:[#allocation5 + $0x30] sm:$0xff]   ;;  %s8485_s14 = sshll.u32 %s11794_s16, 8  ;;  %s9014_s27 = sshll.u32 %s11489_s24, 12 }
 0x11d   : > { %9265 = vmatprep.subr.bf16.mxu0 %v10248_v1  ;;  %v10254_v8 = vld [vmem:[#allocation5 + $0x38] sm:$0xff]   ;;  %v10271_v9 = vld [vmem:[#allocation8 + $0x4] ss:$8 sps:$4 sm:$0xff]   ;;  %v10273_v10 = vld [vmem:[#allocation8] ss:$8 sps:$4 sm:$0xff]   ;;  %s13405_s1 = sld [smem:[#allocation36_spill]] }
 0x11e   : > { %1146 = vmatprep.subr.bf16.mxu1 %v10271_v9  ;;  %v10274_v11 = vld [vmem:[#allocation8 + $0x14] ss:$8 sps:$4 sm:$0xff]   ;;  %v10276_v12 = vld [vmem:[#allocation8 + $0x10] ss:$8 sps:$4 sm:$0xff]   ;;  %v10277_v13 = vld [vmem:[#allocation8 + $0x24] ss:$8 sps:$4 sm:$0xff]  }
 0x11f   : > { %1147 = vmatpush1.bf16.msra.mxu1 %v10273_v10  ;;  %v10256_v14 = vld [vmem:[%s11798_s30 + $0x8] sm:$0xff]   ;;  %v10257_v15 = vld [vmem:[%s11798_s30 + $0x10] sm:$0xff]   ;;  %v10258_v20 = vld [vmem:[%s11798_s30 + $0x18] sm:$0xff]   ;;  %s8299_s24 = scalar_lea.sflag [#allocation4], %s11794_s16  ;;  %p13406_p1 = scmp.ne.s32.totalorder %s13378_s12, 0 }
 0x120   : > { %9266 = vmatpush3.bf16.msra.mxu0 %v10248_v1  ;;  %1148 = vmatprep.subr.bf16.mxu1 %v10274_v11  ;;  %v10279_v16 = vld [vmem:[#allocation8 + $0x20] ss:$8 sps:$4 sm:$0xff]   ;;  %v10280_v17 = vld [vmem:[#allocation8 + $0x34] ss:$8 sps:$4 sm:$0xff]   ;;  %v10282_v18 = vld [vmem:[#allocation8 + $0x30] ss:$8 sps:$4 sm:$0xff]  }
 0x121   : > { %9267 = vmatprep.subr.bf16.mxu0 %v10249_v2  ;;  %v10283_v19 = vld [vmem:[#allocation8 + $0x44] ss:$8 sps:$4 sm:$0xff]   ;;  %v10285_v22 = vld [vmem:[#allocation8 + $0x40] ss:$8 sps:$4 sm:$0xff]   ;;  %v10286_v23 = vld [vmem:[#allocation8 + $0x54] ss:$8 sps:$4 sm:$0xff]  }
 0x122   : > { %v10259_v21 = vld [vmem:[%s11798_s30 + $0x20] sm:$0xff]   ;;  %v10288_v24 = vld [vmem:[#allocation8 + $0x50] ss:$8 sps:$4 sm:$0xff]   ;;  %v10260_v25 = vld [vmem:[%s11798_s30 + $0x28] sm:$0xff]   ;;  %s11385_s15 = smov [#allocation17]  }
 0x123   : > { %1149 = vmatpush1.bf16.msra.mxu1 %v10276_v12  ;;  %v10261_v26 = vld [vmem:[%s11798_s30 + $0x30] sm:$0xff]   ;;  %v10262_v27 = vld [vmem:[%s11798_s30 + $0x38] sm:$0xff]   ;;  %v10263_v28 = vld [vmem:[%s11798_s30 + $0x40] sm:$0xff]  }
 0x124   : > { %9268 = vmatpush3.bf16.msra.mxu0 %v10249_v2  ;;  %1150 = vmatprep.subr.bf16.mxu1 %v10277_v13  ;;  %v10264_v29 = vld [vmem:[%s11798_s30 + $0x48] sm:$0xff]   ;;  %v10265_v30 = vld [vmem:[%s11798_s30 + $0x50] sm:$0xff]   ;;  %v10266_v31 = vld [vmem:[%s11798_s30 + $0x58] sm:$0xff]  }
 0x125   : > { %9269 = vmatprep.subr.bf16.mxu0 %v10250_v3  ;;  %v10267_v32 = vld [vmem:[%s11798_s30 + $0x60] sm:$0xff]   ;;  %v10268_v33 = vld [vmem:[%s11798_s30 + $0x68] sm:$0xff]   ;;  %v10269_v34 = vld [vmem:[%s11798_s30 + $0x70] sm:$0xff]  }
 0x126   : > { %v10270_v35 = vld [vmem:[%s11798_s30 + $0x78] sm:$0xff]   ;;  %v10289_v36 = vld [vmem:[#allocation8 + $0x64] ss:$8 sps:$4 sm:$0xff]   ;;  %v10291_v37 = vld [vmem:[#allocation8 + $0x60] ss:$8 sps:$4 sm:$0xff]   ;;  %s13397_s30 = sld [smem:[#allocation34_spill]] }
 0x127   : > { %1151 = vmatpush1.bf16.msra.mxu1 %v10279_v16  ;;  %v10292_v38 = vld [vmem:[#allocation8 + $0x74] ss:$8 sps:$4 sm:$0xff]   ;;  %v10294_v39 = vld [vmem:[#allocation8 + $0x70] ss:$8 sps:$4 sm:$0xff]  }
 0x128   : > { %9270 = vmatpush3.bf16.msra.mxu0 %v10250_v3  ;;  %1152 = vmatprep.subr.bf16.mxu1 %v10280_v17  ;;  %v11837_v41 = vld [vmem:[#allocation7] ss:$0 sm:$0xff]  ;;  %v10295_v47 = vld [vmem:[#allocation10] ss:$16 sps:$4 sm:$0xff]   ;;  %v10297_v48 = vld [vmem:[#allocation10 + $0x4] ss:$16 sps:$4 sm:$0xff]  }
 0x129   : > { %9271 = vmatprep.subr.bf16.mxu0 %v10251_v5  ;;  %v10300_v51 = vld [vmem:[#allocation10 + $0xc] ss:$16 sps:$4 sm:$0xff]   ;;  %v10303_v53 = vld [vmem:[#allocation10 + $0x24] ss:$16 sps:$4 sm:$0xff]   ;;  %v10301_v56 = vld [vmem:[#allocation10 + $0x20] ss:$16 sps:$4 sm:$0xff]  }
 0x12a   : > { %v10309_v59 = vld [vmem:[#allocation10 + $0x44] ss:$16 sps:$4 sm:$0xff]   ;;  %v10298_v61 = vld [vmem:[#allocation10 + $0x8] ss:$16 sps:$4 sm:$0xff]   ;;  %v10306_v0 = vld [vmem:[#allocation10 + $0x2c] ss:$16 sps:$4 sm:$0xff]  }
 0x12b   : > { %1153 = vmatpush1.bf16.msra.mxu1 %v10282_v18  ;;  %v10307_v3 = vld [vmem:[#allocation10 + $0x40] ss:$16 sps:$4 sm:$0xff]   ;;  %v10304_v10 = vld [vmem:[#allocation10 + $0x28] ss:$16 sps:$4 sm:$0xff]   ;;  %v10312_v13 = vld [vmem:[#allocation10 + $0x4c] ss:$16 sps:$4 sm:$0xff]  }
 0x12c   : > { %9272 = vmatpush3.bf16.msra.mxu0 %v10251_v5  ;;  %1154 = vmatprep.subr.bf16.mxu1 %v10283_v19  ;;  %v10321_v17 = vld [vmem:[#allocation10 + $0x84] ss:$16 sps:$4 sm:$0xff]   ;;  %v10310_v19 = vld [vmem:[#allocation10 + $0x48] ss:$16 sps:$4 sm:$0xff]  }
 0x12d   : > { %9273 = vmatprep.subr.bf16.mxu0 %v10252_v6 }
 0x12f   : > { %1155 = vmatpush1.bf16.msra.mxu1 %v10285_v22  ;;  %v10318_v22 = vld [vmem:[#allocation10 + $0x6c] ss:$16 sps:$4 sm:$0xff]  }
 0x130   : > { %9274 = vmatpush3.bf16.msra.mxu0 %v10252_v6  ;;  %1156 = vmatprep.subr.bf16.mxu1 %v10286_v23  ;;  %v10315_v6 = vld [vmem:[#allocation10 + $0x64] ss:$16 sps:$4 sm:$0xff]  }
 0x131   : > { %9275 = vmatprep.subr.bf16.mxu0 %v10253_v7 }
 0x133   : > { %1157 = vmatpush1.bf16.msra.mxu1 %v10288_v24 }
 0x134   : > { %9276 = vmatpush3.bf16.msra.mxu0 %v10253_v7  ;;  %1158 = vmatprep.subr.bf16.mxu1 %v10289_v36 }
 0x135   : > { %9277 = vmatprep.subr.bf16.mxu0 %v10254_v8 }
 0x137   : > { %1159 = vmatpush1.bf16.msra.mxu1 %v10291_v37  ;;  %v10325_v37 = vld [vmem:[#allocation10 + $0xa0] ss:$16 sps:$4 sm:$0xff]  }
 0x138   : > { %9278 = vmatpush3.bf16.msra.mxu0 %v10254_v8  ;;  %1160 = vmatprep.subr.bf16.mxu1 %v10292_v38 }
 0x139   : > { %1841 = vmatprep.subr.bf16.mxu0 %v10297_v48 }
 0x13b   : > { %9280 = vmatmul.mubr.bf16.vlgmr.msra.gmra.mrb[0].mxu0 %v10256_v14  ;;  %1161 = vmatpush1.bf16.msra.mxu1 %v10294_v39  ;;  %v10333_v39 = vld [vmem:[#allocation10 + $0xc4] ss:$16 sps:$4 sm:$0xff]  }
 0x13c   : > { %9283 = vmatprep.mubr.bf16.mxu0 %v10257_v15  ;;  %1842 = vmatpush1.bf16.msra.mxu0 %v10295_v47  ;;  %v10313_v15 = vld [vmem:[#allocation10 + $0x60] ss:$16 sps:$4 sm:$0xff]  }
 0x13d   : > { %2034 = vmatprep.subr.bf16.mxu1 %v10300_v51  ;;  %1843 = vmatprep.subr.bf16.mxu0 %v10303_v53 }
 0x140   : > { %1844 = vmatpush1.bf16.msra.mxu0 %v10301_v56  ;;  %v10328_v56 = vld [vmem:[#allocation10 + $0xa8] ss:$16 sps:$4 sm:$0xff]  }
 0x141   : > { %1845 = vmatprep.subr.bf16.mxu0 %v10309_v59  ;;  %v10336_v59 = vld [vmem:[#allocation10 + $0xcc] ss:$16 sps:$4 sm:$0xff]  }
 0x143   : > { %9284 = vmatmul.mubr.bf16.gmra.mrb[4].mxu0 %v10258_v20 }
 0x144   : > { %9287 = vmatprep.mubr.bf16.mxu0 %v10259_v21  ;;  %1846 = vmatpush1.bf16.msra.mxu0 %v10307_v3 }
 0x145   : > { %1847 = vmatprep.subr.bf16.mxu0 %v10315_v6 }
 0x148   : > { %1848 = vmatpush1.bf16.msra.mxu0 %v10313_v15 }
 0x149   : > { %1849 = vmatprep.subr.bf16.mxu0 %v10321_v17  ;;  %v10348_v17 = vld [vmem:[#allocation10 + $0x10c] ss:$16 sps:$4 sm:$0xff]  }
 0x14b   : > { %9288 = vmatmul.mubr.bf16.gmra.mrb[8].mxu0 %v10260_v25  ;;  %v10319_v25 = vld [vmem:[#allocation10 + $0x80] ss:$16 sps:$4 sm:$0xff]  }
 0x14c   : > { %9291 = vmatprep.mubr.bf16.mxu0 %v10261_v26  ;;  %1850 = vmatpush1.bf16.msra.mxu0 %v10319_v25 }
 0x153   : > { %9292 = vmatmul.mubr.bf16.gmra.mrb[12].mxu0 %v10262_v27 }
 0x154   : > { %9295 = vmatprep.mubr.bf16.mxu0 %v10263_v28  ;;  %v10327_v28 = vld [vmem:[#allocation10 + $0xa4] ss:$16 sps:$4 sm:$0xff]  }
 0x155   : > { %1851 = vmatprep.subr.bf16.mxu0 %v10327_v28 }
 0x156   : > { %1852 = vmatpush1.bf16.msra.mxu0 %v10325_v37 }
 0x157   : > { %1853 = vmatprep.subr.bf16.mxu0 %v10333_v39  ;;  %v10360_v39 = vld [vmem:[#allocation10 + $0x14c] ss:$16 sps:$4 sm:$0xff]  }
 0x15b   : > { %9296 = vmatmul.mubr.bf16.gmra.mrb[16].mxu0 %v10264_v29 }
 0x15c   : > { %9299 = vmatprep.mubr.bf16.mxu0 %v10265_v30 }
 0x163   : > { %9300 = vmatmul.mubr.bf16.gmra.mrb[20].mxu0 %v10266_v31 }
 0x164   : > { %9303 = vmatprep.mubr.bf16.mxu0 %v10267_v32  ;;  %v10316_v32 = vld [vmem:[#allocation10 + $0x68] ss:$16 sps:$4 sm:$0xff]  }
 0x16b   : > { %9304 = vmatmul.mubr.bf16.gmra.mrb[24].mxu0 %v10268_v33 }
 0x16c   : > { %9307 = vmatprep.mubr.bf16.mxu0 %v10269_v34 }
 0x173   : > { %9308 = vmatmul.mubr.bf16.gmra.mrb[28].mxu0 %v10270_v35  ;;  %v10324_v35 = vld [vmem:[#allocation10 + $0x8c] ss:$16 sps:$4 sm:$0xff]  }
 0x20e   : > { %v9281_v42 = vpop.f32.mrb[0].mxu0 }
 0x20f   : > { %v872_v43 = vadd.f32 %v9281_v42, %v11837_v41  ;;  %v863_v44 = vpop.f32.mrb[1].mxu0 }
 0x210   : > { %v864_v45 = vadd.f32 %v11837_v41, %v863_v44  ;;  %v9282_v46 = vpop.f32.mrb[2].mxu0 }
 0x211   : > { %v875_v49 = vadd.f32 %v9282_v46, %v11837_v41  ;;  %v866_v50 = vpop.f32.mrb[3].mxu0  ;;  %v992_v54 = vmax.f32 %v872_v43, 0.0  ;;  %v10322_v43 = vld [vmem:[#allocation10 + $0x88] ss:$16 sps:$4 sm:$0xff]   ;;  %v10330_v46 = vld [vmem:[#allocation10 + $0xac] ss:$16 sps:$4 sm:$0xff]  }
 0x212   : > { %v867_v52 = vadd.f32 %v11837_v41, %v866_v50  ;;  %v990_v57 = vmax.f32 %v864_v45, 0.0 }
 0x213   : > { %v993_v55 = vmax.f32 %v875_v49, 0.0  ;;  %v10331_v49 = vld [vmem:[#allocation10 + $0xc0] ss:$16 sps:$4 sm:$0xff]  }
 0x214   : > { %v991_v58 = vmax.f32 %v867_v52, 0.0  ;;  %v10339_v52 = vld [vmem:[#allocation10 + $0xe4] ss:$16 sps:$4 sm:$0xff]   ;;  %1854 = vmatpush1.bf16.msra.mxu0 %v10331_v49 }
 0x215   : > { %v1023_v60 = vpack.c.bf16 %v993_v55, %v992_v54  ;;  %1855 = vmatprep.subr.bf16.mxu0 %v10339_v52 }
 0x216   : > { %v1022_v62 = vpack.c.bf16 %v991_v58, %v990_v57  ;;  %v9285_v63 = vpop.f32.mrb[4].mxu0 }
 0x217   : > { %v888_v1 = vadd.f32 %v9285_v63, %v11837_v41  ;;  %v879_v2 = vpop.f32.mrb[5].mxu0  ;;  %v10345_v63 = vld [vmem:[#allocation10 + $0x104] ss:$16 sps:$4 sm:$0xff]  }
 0x218   : > { %1179 = vmatmul.mubr.bf16.vlgmr.msra.gmra.mrb[0].mxu1 %v1022_v62  ;;  %v880_v4 = vadd.f32 %v11837_v41, %v879_v2  ;;  %v9286_v5 = vpop.f32.mrb[6].mxu0 }
 0x219   : > { %v891_v7 = vadd.f32 %v9286_v5, %v11837_v41  ;;  %v882_v8 = vpop.f32.mrb[7].mxu0  ;;  %1188 = vmatprep.mubr.bf16.mxu1 %v11384_v40  ;;  %v996_v9 = vmax.f32 %v888_v1, 0.0  ;;  %2035 = vmatpush1.bf16.msra.mxu1 %v10298_v61  ;;  %v10337_v61 = vld [vmem:[#allocation10 + $0xe0] ss:$16 sps:$4 sm:$0xff]   ;;  %v10334_v1 = vld [vmem:[#allocation10 + $0xc8] ss:$16 sps:$4 sm:$0xff]  }
 0x21a   : > { %v883_v11 = vadd.f32 %v11837_v41, %v882_v8  ;;  %v994_v12 = vmax.f32 %v880_v4, 0.0  ;;  %2036 = vmatprep.subr.bf16.mxu1 %v10306_v0  ;;  %v10342_v4 = vld [vmem:[#allocation10 + $0xec] ss:$16 sps:$4 sm:$0xff]   ;;  %1856 = vmatpush1.bf16.msra.mxu0 %v10337_v61  ;;  %v10364_v61 = vld [vmem:[#allocation10 + $0x168] ss:$16 sps:$4 sm:$0xff]  }
 0x21b   : > { %v997_v14 = vmax.f32 %v891_v7, 0.0  ;;  %v10343_v7 = vld [vmem:[#allocation10 + $0x100] ss:$16 sps:$4 sm:$0xff]   ;;  %1857 = vmatprep.subr.bf16.mxu0 %v10345_v63 }
 0x21c   : > { %v995_v16 = vmax.f32 %v883_v11, 0.0 }
 0x21d   : > { %v11848_v18 = vpack.c.bf16 %v997_v14, %v996_v9  ;;  %2037 = vmatpush1.bf16.msra.mxu1 %v10304_v10  ;;  %v10351_v10 = vld [vmem:[#allocation10 + $0x124] ss:$16 sps:$4 sm:$0xff]   ;;  %v10340_v14 = vld [vmem:[#allocation10 + $0xe8] ss:$16 sps:$4 sm:$0xff]  }
 0x21e   : > { %v1024_v20 = vpack.c.bf16 %v995_v16, %v994_v12  ;;  %v9289_v21 = vpop.f32.mrb[8].mxu0  ;;  %2038 = vmatprep.subr.bf16.mxu1 %v10312_v13  ;;  %1858 = vmatpush1.bf16.msra.mxu0 %v10343_v7 }
 0x21f   : > { %v904_v23 = vadd.f32 %v9289_v21, %v11837_v41  ;;  %v895_v24 = vpop.f32.mrb[9].mxu0  ;;  %1859 = vmatprep.subr.bf16.mxu0 %v10351_v10  ;;  %v10357_v21 = vld [vmem:[#allocation10 + $0x144] ss:$16 sps:$4 sm:$0xff]  }
 0x220   : > { %1189 = vmatmul.mubr.bf16.gmra.mrb[4].mxu1 %v1023_v60  ;;  %v896_v26 = vadd.f32 %v11837_v41, %v895_v24  ;;  %v9290_v27 = vpop.f32.mrb[10].mxu0 }
 0x221   : > { %1198 = vmatprep.mubr.bf16.mxu1 %v11384_v40  ;;  %v907_v29 = vadd.f32 %v9290_v27, %v11837_v41  ;;  %v898_v30 = vpop.f32.mrb[11].mxu0  ;;  %v1000_v31 = vmax.f32 %v904_v23, 0.0  ;;  %2039 = vmatpush1.bf16.msra.mxu1 %v10310_v19  ;;  %v10346_v23 = vld [vmem:[#allocation10 + $0x108] ss:$16 sps:$4 sm:$0xff]  }
 0x222   : > { %v899_v33 = vadd.f32 %v11837_v41, %v898_v30  ;;  %v998_v34 = vmax.f32 %v896_v26, 0.0  ;;  %2040 = vmatprep.subr.bf16.mxu1 %v10318_v22  ;;  %v10354_v26 = vld [vmem:[#allocation10 + $0x12c] ss:$16 sps:$4 sm:$0xff]  }
 0x223   : > { %v1001_v36 = vmax.f32 %v907_v29, 0.0  ;;  %v10355_v29 = vld [vmem:[#allocation10 + $0x140] ss:$16 sps:$4 sm:$0xff]  }
 0x224   : > { %v999_v38 = vmax.f32 %v899_v33, 0.0 }
 0x225   : > { %v11855_v42 = vpack.c.bf16 %v1001_v36, %v1000_v31  ;;  %2041 = vmatpush1.bf16.msra.mxu1 %v10316_v32  ;;  %v10363_v32 = vld [vmem:[#allocation10 + $0x164] ss:$16 sps:$4 sm:$0xff]   ;;  %v10352_v36 = vld [vmem:[#allocation10 + $0x128] ss:$16 sps:$4 sm:$0xff]  }
 0x226   : > { %v11857_v44 = vpack.c.bf16 %v999_v38, %v998_v34  ;;  %v9293_v45 = vpop.f32.mrb[12].mxu0  ;;  %2042 = vmatprep.subr.bf16.mxu1 %v10324_v35 }
 0x227   : > { %v920_v47 = vadd.f32 %v9293_v45, %v11837_v41  ;;  %v911_v48 = vpop.f32.mrb[13].mxu0 }
 0x228   : > { %1199 = vmatmul.mubr.bf16.gmra.mrb[8].mxu1 %v1024_v20  ;;  %v912_v50 = vadd.f32 %v11837_v41, %v911_v48  ;;  %v9294_v51 = vpop.f32.mrb[14].mxu0  ;;  %v10358_v48 = vld [vmem:[#allocation10 + $0x148] ss:$16 sps:$4 sm:$0xff]  }
 0x229   : > { %1208 = vmatprep.mubr.bf16.mxu1 %v11384_v40  ;;  %v923_v53 = vadd.f32 %v9294_v51, %v11837_v41  ;;  %v914_v54 = vpop.f32.mrb[15].mxu0  ;;  %v1004_v55 = vmax.f32 %v920_v47, 0.0  ;;  %2043 = vmatpush1.bf16.msra.mxu1 %v10322_v43  ;;  %v10366_v51 = vld [vmem:[#allocation10 + $0x16c] ss:$16 sps:$4 sm:$0xff]  }
 0x22a   : > { %v915_v57 = vadd.f32 %v11837_v41, %v914_v54  ;;  %v1002_v58 = vmax.f32 %v912_v50, 0.0  ;;  %2044 = vmatprep.subr.bf16.mxu1 %v10330_v46  ;;  %v10369_v46 = vld [vmem:[#allocation10 + $0x184] ss:$16 sps:$4 sm:$0xff]   ;;  %v10367_v54 = vld [vmem:[#allocation10 + $0x180] ss:$16 sps:$4 sm:$0xff]  }
 0x22b   : > { %v1005_v60 = vmax.f32 %v923_v53, 0.0 }
 0x22c   : > { %v1003_v62 = vmax.f32 %v915_v57, 0.0  ;;  %v10375_v57 = vld [vmem:[#allocation10 + $0x1a4] ss:$16 sps:$4 sm:$0xff]  }
 0x22d   : > { %v11864_v0 = vpack.c.bf16 %v1005_v60, %v1004_v55  ;;  %2045 = vmatpush1.bf16.msra.mxu1 %v10328_v56 }
 0x22e   : > { %v11866_v2 = vpack.c.bf16 %v1003_v62, %v1002_v58  ;;  %v9297_v3 = vpop.f32.mrb[16].mxu0  ;;  %2046 = vmatprep.subr.bf16.mxu1 %v10336_v59 }
 0x22f   : > { %v936_v5 = vadd.f32 %v9297_v3, %v11837_v41  ;;  %v927_v6 = vpop.f32.mrb[17].mxu0 }
 0x230   : > { %1209 = vmatmul.mubr.bf16.gmra.mrb[12].mxu1 %v11848_v18  ;;  %v928_v8 = vadd.f32 %v11837_v41, %v927_v6  ;;  %v9298_v9 = vpop.f32.mrb[18].mxu0  ;;  %v10349_v18 = vld [vmem:[#allocation10 + $0x120] ss:$16 sps:$4 sm:$0xff]   ;;  %v10370_v6 = vld [vmem:[#allocation10 + $0x188] ss:$16 sps:$4 sm:$0xff]  }
 0x231   : > { %1218 = vmatprep.mubr.bf16.mxu1 %v11384_v40  ;;  %v939_v11 = vadd.f32 %v9298_v9, %v11837_v41  ;;  %v930_v12 = vpop.f32.mrb[19].mxu0  ;;  %v1008_v13 = vmax.f32 %v936_v5, 0.0  ;;  %2047 = vmatpush1.bf16.msra.mxu1 %v10334_v1  ;;  %v10372_v1 = vld [vmem:[#allocation10 + $0x18c] ss:$16 sps:$4 sm:$0xff]  }
 0x232   : > { %v931_v15 = vadd.f32 %v11837_v41, %v930_v12  ;;  %v1006_v16 = vmax.f32 %v928_v8, 0.0  ;;  %2048 = vmatprep.subr.bf16.mxu1 %v10342_v4  ;;  %1860 = vmatpush1.bf16.msra.mxu0 %v10349_v18  ;;  %v10378_v9 = vld [vmem:[#allocation10 + $0x1ac] ss:$16 sps:$4 sm:$0xff]  }
 0x233   : > { %v1009_v19 = vmax.f32 %v939_v11, 0.0  ;;  %1861 = vmatprep.subr.bf16.mxu0 %v10357_v21 }
 0x234   : > { %v1007_v20 = vmax.f32 %v931_v15, 0.0 }
 0x235   : > { %v11874_v22 = vpack.c.bf16 %v1009_v19, %v1008_v13  ;;  %2049 = vmatpush1.bf16.msra.mxu1 %v10340_v14 }
 0x236   : > { %v11876_v24 = vpack.c.bf16 %v1007_v20, %v1006_v16  ;;  %v9301_v25 = vpop.f32.mrb[20].mxu0  ;;  %2050 = vmatprep.subr.bf16.mxu1 %v10348_v17  ;;  %1862 = vmatpush1.bf16.msra.mxu0 %v10355_v29  ;;  %v10376_v17 = vld [vmem:[#allocation10 + $0x1a8] ss:$16 sps:$4 sm:$0xff]   ;;  %v10393_v29 = vld [vmem:[#allocation11 + $0x4] ss:$16 sps:$4 sm:$0xff]  }
 0x237   : > { %v952_v27 = vadd.f32 %v9301_v25, %v11837_v41  ;;  %v943_v28 = vpop.f32.mrb[21].mxu0  ;;  %1863 = vmatprep.subr.bf16.mxu0 %v10363_v32  ;;  %v10384_v25 = vld [vmem:[#allocation10 + $0x1cc] ss:$16 sps:$4 sm:$0xff]  }
 0x238   : > { %1219 = vmatmul.mubr.bf16.gmra.mrb[16].mxu1 %v11857_v44  ;;  %v944_v30 = vadd.f32 %v11837_v41, %v943_v28  ;;  %v9302_v31 = vpop.f32.mrb[22].mxu0  ;;  %v10361_v44 = vld [vmem:[#allocation10 + $0x160] ss:$16 sps:$4 sm:$0xff]   ;;  %v10388_v28 = vld [vmem:[#allocation10 + $0x1e8] ss:$16 sps:$4 sm:$0xff]  }
 0x239   : > { %1228 = vmatprep.mubr.bf16.mxu1 %v11384_v40  ;;  %v955_v33 = vadd.f32 %v9302_v31, %v11837_v41  ;;  %v946_v34 = vpop.f32.mrb[23].mxu0  ;;  %v1012_v35 = vmax.f32 %v952_v27, 0.0  ;;  %2051 = vmatpush1.bf16.msra.mxu1 %v10346_v23  ;;  %v10382_v27 = vld [vmem:[#allocation10 + $0x1c8] ss:$16 sps:$4 sm:$0xff]  }
 0x23a   : > { %v947_v37 = vadd.f32 %v11837_v41, %v946_v34  ;;  %v1010_v38 = vmax.f32 %v944_v30, 0.0  ;;  %2052 = vmatprep.subr.bf16.mxu1 %v10354_v26  ;;  %1864 = vmatpush1.bf16.msra.mxu0 %v10361_v44  ;;  %v10379_v26 = vld [vmem:[#allocation10 + $0x1c0] ss:$16 sps:$4 sm:$0xff]   ;;  %v1056_v30 = vlaneseq }
 0x23b   : > { %v1013_v43 = vmax.f32 %v955_v33, 0.0  ;;  %1865 = vmatprep.subr.bf16.mxu0 %v10369_v46  ;;  %v1054_v33 = vld [vmem:[%s13334_s4] sm:$0x3] }
 0x23c   : > { %v1011_v45 = vmax.f32 %v947_v37, 0.0  ;;  %v11910_v31 = vshrl.u32 %v1056_v30, 7 }
 0x23d   : > { %v11884_v47 = vpack.c.bf16 %v1013_v43, %v1012_v35  ;;  %2053 = vmatpush1.bf16.msra.mxu1 %v10352_v36 }
 0x23e   : > { %v1032_v49 = vpack.c.bf16 %v1011_v45, %v1010_v38  ;;  %v9305_v50 = vpop.f32.mrb[24].mxu0  ;;  %2054 = vmatprep.subr.bf16.mxu1 %v10360_v39  ;;  %1866 = vmatpush1.bf16.msra.mxu0 %v10367_v54  ;;  %v11913_v32 = vsub.s32 0, %v11910_v31  ;;  %v11919_v34 = vsub.s32 1, %v11910_v31  ;;  %v10391_v54 = vld [vmem:[#allocation11] ss:$16 sps:$4 sm:$0xff]  }
 0x23f   : > { %v968_v52 = vadd.f32 %v9305_v50, %v11837_v41  ;;  %v959_v53 = vpop.f32.mrb[25].mxu0  ;;  %1867 = vmatprep.subr.bf16.mxu0 %v10375_v57 }
 0x240   : > { %1229 = vmatmul.mubr.bf16.gmra.mrb[20].mxu1 %v11855_v42  ;;  %v960_v55 = vadd.f32 %v11837_v41, %v959_v53  ;;  %v9306_v56 = vpop.f32.mrb[26].mxu0  ;;  %v10373_v42 = vld [vmem:[#allocation10 + $0x1a0] ss:$16 sps:$4 sm:$0xff]   ;;  %13390 = vst [vmem:[#allocation24_spill] sm:$0xff] %v11913_v32  ;;  %13391 = vst [vmem:[#allocation25_spill] sm:$0xff] %v11919_v34  ;;  %v11922_v35 = vrot.slane %v1054_v33, %v11913_v32 }
 0x241   : > { %1238 = vmatprep.mubr.bf16.mxu1 %v11384_v40  ;;  %v971_v58 = vadd.f32 %v9306_v56, %v11837_v41  ;;  %v962_v59 = vpop.f32.mrb[27].mxu0  ;;  %v1016_v60 = vmax.f32 %v968_v52, 0.0  ;;  %2055 = vmatpush1.bf16.msra.mxu1 %v10358_v48 }
 0x242   : > { %v963_v62 = vadd.f32 %v11837_v41, %v962_v59  ;;  %v1014_v63 = vmax.f32 %v960_v55, 0.0  ;;  %2056 = vmatprep.subr.bf16.mxu1 %v10366_v51  ;;  %1868 = vmatpush1.bf16.msra.mxu0 %v10373_v42  ;;  %v10420_v55 = vld [vmem:[#allocation11 + $0xc] ss:$16 sps:$4 sm:$0xff]   ;;  %v10418_v59 = vld [vmem:[#allocation11 + $0x8] ss:$16 sps:$4 sm:$0xff]  }
 0x243   : > { %v1017_v3 = vmax.f32 %v971_v58, 0.0  ;;  %v10396_v58 = vld [vmem:[#allocation11 + $0x24] ss:$16 sps:$4 sm:$0xff]   ;;  %v10394_v42 = vld [vmem:[#allocation11 + $0x20] ss:$16 sps:$4 sm:$0xff]  }
 0x244   : > { %v1015_v4 = vmax.f32 %v963_v62, 0.0  ;;  %v10423_v62 = vld [vmem:[#allocation11 + $0x2c] ss:$16 sps:$4 sm:$0xff]  }
 0x245   : > { %v1035_v5 = vpack.c.bf16 %v1017_v3, %v1016_v60  ;;  %2057 = vmatpush1.bf16.msra.mxu1 %v10364_v61 }
 0x246   : > { %v1034_v7 = vpack.c.bf16 %v1015_v4, %v1014_v63  ;;  %v9309_v8 = vpop.f32.mrb[28].mxu0  ;;  %2058 = vmatprep.subr.bf16.mxu1 %v10372_v1 }
 0x247   : > { %v984_v10 = vadd.f32 %v9309_v8, %v11837_v41  ;;  %v975_v11 = vpop.f32.mrb[29].mxu0 }
 0x248   : > { %1239 = vmatmul.mubr.bf16.gmra.mrb[24].mxu1 %v11866_v2  ;;  %v976_v12 = vadd.f32 %v11837_v41, %v975_v11  ;;  %v9310_v13 = vpop.f32.mrb[30].mxu0 }
 0x249   : > { %1248 = vmatprep.mubr.bf16.mxu1 %v11384_v40  ;;  %v987_v14 = vadd.f32 %v9310_v13, %v11837_v41  ;;  %v978_v15 = vpop.f32.mrb[31].mxu0  ;;  %v1020_v16 = vmax.f32 %v984_v10, 0.0  ;;  %2059 = vmatpush1.bf16.msra.mxu1 %v10370_v6  ;;  %v10399_v6 = vld [vmem:[#allocation11 + $0x44] ss:$16 sps:$4 sm:$0xff]   ;;  %v10397_v13 = vld [vmem:[#allocation11 + $0x40] ss:$16 sps:$4 sm:$0xff]  }
 0x24a   : > { %v979_v19 = vadd.f32 %v11837_v41, %v978_v15  ;;  %v1018_v18 = vmax.f32 %v976_v12, 0.0  ;;  %2060 = vmatprep.subr.bf16.mxu1 %v10378_v9  ;;  %v10381_v41 = vld [vmem:[#allocation10 + $0x1c4] ss:$16 sps:$4 sm:$0xff]  }
 0x24b   : > { %v1021_v20 = vmax.f32 %v987_v14, 0.0  ;;  %1869 = vmatprep.subr.bf16.mxu0 %v10381_v41  ;;  %v10429_v14 = vld [vmem:[#allocation11 + $0x4c] ss:$16 sps:$4 sm:$0xff]  }
 0x24c   : > { %v1019_v21 = vmax.f32 %v979_v19, 0.0  ;;  %1870 = vmatpush1.bf16.msra.mxu0 %v10379_v26  ;;  %v10427_v19 = vld [vmem:[#allocation11 + $0x48] ss:$16 sps:$4 sm:$0xff]  }
 0x24d   : > { %v1037_v23 = vpack.c.bf16 %v1021_v20, %v1020_v16  ;;  %2061 = vmatpush1.bf16.msra.mxu1 %v10376_v17  ;;  %v10402_v17 = vld [vmem:[#allocation11 + $0x64] ss:$16 sps:$4 sm:$0xff]  }
 0x24e   : > { %v1036_v2 = vpack.c.bf16 %v1019_v21, %v1018_v18  ;;  %2062 = vmatprep.subr.bf16.mxu1 %v10384_v25  ;;  %v10432_v21 = vld [vmem:[#allocation11 + $0x6c] ss:$16 sps:$4 sm:$0xff]   ;;  %v10400_v25 = vld [vmem:[#allocation11 + $0x60] ss:$16 sps:$4 sm:$0xff]  }
 0x250   : > { %1249 = vmatmul.mubr.bf16.gmra.mrb[28].mxu1 %v11864_v0  ;;  %v10387_v0 = vld [vmem:[#allocation10 + $0x1e4] ss:$16 sps:$4 sm:$0xff]  }
 0x251   : > { %1258 = vmatprep.mubr.bf16.mxu1 %v11384_v40  ;;  %2063 = vmatpush1.bf16.msra.mxu1 %v10382_v27 }
 0x252   : > { %1871 = vmatprep.subr.bf16.mxu0 %v10387_v0  ;;  %v10405_v0 = vld [vmem:[#allocation11 + $0x84] ss:$16 sps:$4 sm:$0xff]  }
 0x258   : > { %1259 = vmatmul.mubr.bf16.gmra.mrb[32].mxu1 %v11876_v24  ;;  %v10390_v24 = vld [vmem:[#allocation10 + $0x1ec] ss:$16 sps:$4 sm:$0xff]  }
 0x259   : > { %1268 = vmatprep.mubr.bf16.mxu1 %v11384_v40  ;;  %2064 = vmatprep.subr.bf16.mxu1 %v10390_v24  ;;  %v10430_v24 = vld [vmem:[#allocation11 + $0x68] ss:$16 sps:$4 sm:$0xff]  }
 0x25a   : > { %2065 = vmatpush1.bf16.msra.mxu1 %v10388_v28 }
 0x25b   : > { %3595 = vmatprep.subr.bf16.mxu1 %v10420_v55  ;;  %v10439_v55 = vld [vmem:[#allocation11 + $0xa8] ss:$16 sps:$4 sm:$0xff]  }
 0x260   : > { %1269 = vmatmul.mubr.bf16.gmra.mrb[36].mxu1 %v11874_v22  ;;  %v10385_v22 = vld [vmem:[#allocation10 + $0x1e0] ss:$16 sps:$4 sm:$0xff]  }
 0x261   : > { %1278 = vmatprep.mubr.bf16.mxu1 %v11384_v40  ;;  %1872 = vmatpush1.bf16.msra.mxu0 %v10385_v22 }
 0x262   : > { %3209 = vmatprep.subr.bf16.mxu0 %v10393_v29 }
 0x268   : > { %1279 = vmatmul.mubr.bf16.gmra.mrb[40].mxu1 %v1032_v49 }
 0x269   : > { %1288 = vmatprep.mubr.bf16.mxu1 %v11384_v40 }
 0x270   : > { %1289 = vmatmul.mubr.bf16.gmra.mrb[44].mxu1 %v11884_v47 }
 0x271   : > { %1298 = vmatprep.mubr.bf16.mxu1 %v11384_v40 }
 0x278   : > { %1299 = vmatmul.mubr.bf16.gmra.mrb[48].mxu1 %v1034_v7  ;;  %v10421_v7 = vld [vmem:[#allocation11 + $0x28] ss:$16 sps:$4 sm:$0xff]  }
 0x279   : > { %1308 = vmatprep.mubr.bf16.mxu1 %v11384_v40 }
 0x280   : > { %1309 = vmatmul.mubr.bf16.gmra.mrb[52].mxu1 %v1035_v5 }
 0x281   : > { %1318 = vmatprep.mubr.bf16.mxu1 %v11384_v40 }
 0x288   : > { %1319 = vmatmul.mubr.bf16.gmra.mrb[56].mxu1 %v1036_v2 }
 0x289   : > { %1328 = vmatprep.mubr.bf16.mxu1 %v11384_v40  ;;  %v11925_v40 = vrot.slane %v1054_v33, %v11919_v34 }
 0x290   : > { %1329 = vmatmul.mubr.bf16.gmra.mrb[60].mxu1 %v1037_v23 }
 0x2eb   : > { %v1180_v36 = vpop.f32.mrb[0].mxu1 }
 0x2ec   : > { %v1181_v37 = vadd.f32 %v1180_v36, %v11922_v35  ;;  %v1182_v38 = vpop.f32.mrb[1].mxu1  ;;  %v10403_v36 = vld [vmem:[#allocation11 + $0x80] ss:$16 sps:$4 sm:$0xff]  }
 0x2ed   : > { %v1183_v39 = vadd.f32 %v1182_v38, %v11925_v40  ;;  %v1184_v43 = vpop.f32.mrb[2].mxu1 }
 0x2ee   : > { %v1185_v44 = vadd.f32 %v1184_v43, %v11922_v35  ;;  %v1186_v45 = vpop.f32.mrb[3].mxu1  ;;  %v1339_v47 = vmax.f32 %v1181_v37, 0.0  ;;  %v10438_v37 = vld [vmem:[#allocation11 + $0x8c] ss:$16 sps:$4 sm:$0xff]   ;;  %v10408_v43 = vld [vmem:[#allocation11 + $0xa4] ss:$16 sps:$4 sm:$0xff]  }
 0x2ef   : > { %v1187_v46 = vadd.f32 %v1186_v45, %v11925_v40  ;;  %v1340_v49 = vmax.f32 %v1183_v39, 0.0 }
 0x2f0   : > { %v1341_v48 = vmax.f32 %v1185_v44, 0.0  ;;  %v10436_v44 = vld [vmem:[#allocation11 + $0x88] ss:$16 sps:$4 sm:$0xff]  }
 0x2f1   : > { %v1342_v50 = vmax.f32 %v1187_v46, 0.0 }
 0x2f2   : > { %v1403_v51 = vpack.c.bf16 %v1341_v48, %v1339_v47  ;;  %v10441_v47 = vld [vmem:[#allocation11 + $0xac] ss:$16 sps:$4 sm:$0xff]  }
 0x2f3   : > { %v1190_v52 = vpop.f32.mrb[4].mxu1  ;;  %v1404_v53 = vpack.c.bf16 %v1342_v50, %v1340_v49 }
 0x2f4   : > { %v1191_v56 = vadd.f32 %v1190_v52, %v11922_v35  ;;  %v1192_v57 = vpop.f32.mrb[5].mxu1 }
 0x2f5   : > { %v1193_v60 = vadd.f32 %v1192_v57, %v11925_v40  ;;  %v1194_v61 = vpop.f32.mrb[6].mxu1  ;;  %1873 = vmatprep.mubr.bf16.mxu0 %v1404_v53  ;;  %2066 = vmatprep.mubr.bf16.mxu1 %v1404_v53 }
 0x2f6   : > { %v1195_v63 = vadd.f32 %v1194_v61, %v11922_v35  ;;  %v1196_v1 = vpop.f32.mrb[7].mxu1  ;;  %1874 = vmatmul.mubr.bf16.vlgmr.msra.gmra.mrb[32].mxu0 %v1403_v51  ;;  %2067 = vmatmul.mubr.bf16.vlgmr.msra.gmra.mrb[64].mxu1 %v1403_v51  ;;  %v1343_v4 = vmax.f32 %v1191_v56, 0.0  ;;  %v10406_v51 = vld [vmem:[#allocation11 + $0xa0] ss:$16 sps:$4 sm:$0xff]  }
 0x2f7   : > { %v1197_v3 = vadd.f32 %v1196_v1, %v11925_v40  ;;  %3210 = vmatpush1.bf16.msra.mxu0 %v10391_v54  ;;  %3596 = vmatpush1.bf16.msra.mxu1 %v10418_v59  ;;  %v1344_v8 = vmax.f32 %v1193_v60, 0.0  ;;  %v10411_v54 = vld [vmem:[#allocation11 + $0xc4] ss:$16 sps:$4 sm:$0xff]   ;;  %v10409_v61 = vld [vmem:[#allocation11 + $0xc0] ss:$16 sps:$4 sm:$0xff]  }
 0x2f8   : > { %v1345_v5 = vmax.f32 %v1195_v63, 0.0  ;;  %3211 = vmatprep.subr.bf16.mxu0 %v10396_v58  ;;  %3597 = vmatprep.subr.bf16.mxu1 %v10423_v62  ;;  %v10447_v62 = vld [vmem:[#allocation11 + $0xcc] ss:$16 sps:$4 sm:$0xff]  }
 0x2f9   : > { %v1346_v9 = vmax.f32 %v1197_v3, 0.0  ;;  %v10414_v3 = vld [vmem:[#allocation11 + $0xe4] ss:$16 sps:$4 sm:$0xff]  }
 0x2fa   : > { %v1405_v10 = vpack.c.bf16 %v1345_v5, %v1343_v4 }
 0x2fb   : > { %v1200_v11 = vpop.f32.mrb[8].mxu1  ;;  %v1406_v12 = vpack.c.bf16 %v1346_v9, %v1344_v8  ;;  %3212 = vmatpush1.bf16.msra.mxu0 %v10394_v42  ;;  %3598 = vmatpush1.bf16.msra.mxu1 %v10421_v7  ;;  %v10445_v42 = vld [vmem:[#allocation11 + $0xc8] ss:$16 sps:$4 sm:$0xff]  }
 0x2fc   : > { %v1201_v15 = vadd.f32 %v1200_v11, %v11922_v35  ;;  %v1202_v16 = vpop.f32.mrb[9].mxu1  ;;  %3213 = vmatprep.subr.bf16.mxu0 %v10399_v6  ;;  %3599 = vmatprep.subr.bf16.mxu1 %v10429_v14  ;;  %v10450_v6 = vld [vmem:[#allocation11 + $0xec] ss:$16 sps:$4 sm:$0xff]   ;;  %v10448_v14 = vld [vmem:[#allocation11 + $0xe8] ss:$16 sps:$4 sm:$0xff]  }
 0x2fd   : > { %v1203_v18 = vadd.f32 %v1202_v16, %v11925_v40  ;;  %v1204_v20 = vpop.f32.mrb[10].mxu1  ;;  %1883 = vmatprep.mubr.bf16.mxu0 %v1406_v12  ;;  %2076 = vmatprep.mubr.bf16.mxu1 %v1406_v12 }
 0x2fe   : > { %v1205_v23 = vadd.f32 %v1204_v20, %v11922_v35  ;;  %v1206_v2 = vpop.f32.mrb[11].mxu1  ;;  %1884 = vmatmul.mubr.bf16.gmra.mrb[36].mxu0 %v1405_v10  ;;  %2077 = vmatmul.mubr.bf16.gmra.mrb[68].mxu1 %v1405_v10  ;;  %v1347_v26 = vmax.f32 %v1201_v15, 0.0  ;;  %v10412_v10 = vld [vmem:[#allocation11 + $0xe0] ss:$16 sps:$4 sm:$0xff]  }
 0x2ff   : > { %v1207_v41 = vadd.f32 %v1206_v2, %v11925_v40  ;;  %3214 = vmatpush1.bf16.msra.mxu0 %v10397_v13  ;;  %3600 = vmatpush1.bf16.msra.mxu1 %v10427_v19  ;;  %v1348_v22 = vmax.f32 %v1203_v18, 0.0  ;;  %v10417_v13 = vld [vmem:[#allocation11 + $0x104] ss:$16 sps:$4 sm:$0xff]   ;;  %v10415_v20 = vld [vmem:[#allocation11 + $0x100] ss:$16 sps:$4 sm:$0xff]  }
 0x300   : > { %v1349_v27 = vmax.f32 %v1205_v23, 0.0  ;;  %3215 = vmatprep.subr.bf16.mxu0 %v10402_v17  ;;  %3601 = vmatprep.subr.bf16.mxu1 %v10432_v21  ;;  %v10456_v21 = vld [vmem:[#allocation11 + $0x10c] ss:$16 sps:$4 sm:$0xff]  }
 0x301   : > { %v1350_v28 = vmax.f32 %v1207_v41, 0.0  ;;  %v10426_v41 = vld [vmem:[#allocation11 + $0x124] ss:$16 sps:$4 sm:$0xff]  }
 0x302   : > { %v1407_v29 = vpack.c.bf16 %v1349_v27, %v1347_v26 }
 0x303   : > { %v1210_v30 = vpop.f32.mrb[12].mxu1  ;;  %v1408_v33 = vpack.c.bf16 %v1350_v28, %v1348_v22  ;;  %3216 = vmatpush1.bf16.msra.mxu0 %v10400_v25  ;;  %3602 = vmatpush1.bf16.msra.mxu1 %v10430_v24  ;;  %v10454_v25 = vld [vmem:[#allocation11 + $0x108] ss:$16 sps:$4 sm:$0xff]  }
 0x304   : > { %v1211_v38 = vadd.f32 %v1210_v30, %v11922_v35  ;;  %v1212_v39 = vpop.f32.mrb[13].mxu1  ;;  %3217 = vmatprep.subr.bf16.mxu0 %v10405_v0  ;;  %3603 = vmatprep.subr.bf16.mxu1 %v10438_v37  ;;  %v10459_v0 = vld [vmem:[#allocation11 + $0x12c] ss:$16 sps:$4 sm:$0xff]   ;;  %v10457_v37 = vld [vmem:[#allocation11 + $0x128] ss:$16 sps:$4 sm:$0xff]  }
 0x305   : > { %v1213_v45 = vadd.f32 %v1212_v39, %v11925_v40  ;;  %v1214_v46 = vpop.f32.mrb[14].mxu1  ;;  %1893 = vmatprep.mubr.bf16.mxu0 %v1408_v33  ;;  %2086 = vmatprep.mubr.bf16.mxu1 %v1408_v33 }
 0x306   : > { %v1215_v48 = vadd.f32 %v1214_v46, %v11922_v35  ;;  %v1216_v49 = vpop.f32.mrb[15].mxu1  ;;  %1894 = vmatmul.mubr.bf16.gmra.mrb[40].mxu0 %v1407_v29  ;;  %2087 = vmatmul.mubr.bf16.gmra.mrb[72].mxu1 %v1407_v29  ;;  %v1351_v52 = vmax.f32 %v1211_v38, 0.0  ;;  %v10424_v29 = vld [vmem:[#allocation11 + $0x120] ss:$16 sps:$4 sm:$0xff]  }
 0x307   : > { %v1217_v50 = vadd.f32 %v1216_v49, %v11925_v40  ;;  %3218 = vmatpush1.bf16.msra.mxu0 %v10403_v36  ;;  %3604 = vmatpush1.bf16.msra.mxu1 %v10436_v44  ;;  %v1352_v56 = vmax.f32 %v1213_v45, 0.0  ;;  %v10435_v36 = vld [vmem:[#allocation11 + $0x144] ss:$16 sps:$4 sm:$0xff]   ;;  %v10433_v46 = vld [vmem:[#allocation11 + $0x140] ss:$16 sps:$4 sm:$0xff]  }
 0x308   : > { %v1353_v53 = vmax.f32 %v1215_v48, 0.0  ;;  %3219 = vmatprep.subr.bf16.mxu0 %v10408_v43  ;;  %3605 = vmatprep.subr.bf16.mxu1 %v10441_v47  ;;  %v10465_v47 = vld [vmem:[#allocation11 + $0x14c] ss:$16 sps:$4 sm:$0xff]  }
 0x309   : > { %v1354_v57 = vmax.f32 %v1217_v50, 0.0  ;;  %v10444_v50 = vld [vmem:[#allocation11 + $0x164] ss:$16 sps:$4 sm:$0xff]  }
 0x30a   : > { %v1409_v58 = vpack.c.bf16 %v1353_v53, %v1351_v52 }
 0x30b   : > { %v1220_v59 = vpop.f32.mrb[16].mxu1  ;;  %v1410_v60 = vpack.c.bf16 %v1354_v57, %v1352_v56  ;;  %3220 = vmatpush1.bf16.msra.mxu0 %v10406_v51  ;;  %3606 = vmatpush1.bf16.msra.mxu1 %v10439_v55  ;;  %v10463_v51 = vld [vmem:[#allocation11 + $0x148] ss:$16 sps:$4 sm:$0xff]  }
 0x30c   : > { %v1221_v63 = vadd.f32 %v1220_v59, %v11922_v35  ;;  %v1222_v1 = vpop.f32.mrb[17].mxu1  ;;  %3221 = vmatprep.subr.bf16.mxu0 %v10411_v54  ;;  %3607 = vmatprep.subr.bf16.mxu1 %v10447_v62  ;;  %v10468_v54 = vld [vmem:[#allocation11 + $0x16c] ss:$16 sps:$4 sm:$0xff]   ;;  %v10466_v62 = vld [vmem:[#allocation11 + $0x168] ss:$16 sps:$4 sm:$0xff]  }
 0x30d   : > { %v1223_v4 = vadd.f32 %v1222_v1, %v11925_v40  ;;  %v1224_v5 = vpop.f32.mrb[18].mxu1  ;;  %1903 = vmatprep.mubr.bf16.mxu0 %v1410_v60  ;;  %2096 = vmatprep.mubr.bf16.mxu1 %v1410_v60 }
 0x30e   : > { %v1225_v7 = vadd.f32 %v1224_v5, %v11922_v35  ;;  %v1226_v8 = vpop.f32.mrb[19].mxu1  ;;  %1904 = vmatmul.mubr.bf16.gmra.mrb[44].mxu0 %v1409_v58  ;;  %2097 = vmatmul.mubr.bf16.gmra.mrb[76].mxu1 %v1409_v58  ;;  %v1355_v11 = vmax.f32 %v1221_v63, 0.0  ;;  %v10442_v58 = vld [vmem:[#allocation11 + $0x160] ss:$16 sps:$4 sm:$0xff]  }
 0x30f   : > { %v1227_v9 = vadd.f32 %v1226_v8, %v11925_v40  ;;  %3222 = vmatpush1.bf16.msra.mxu0 %v10409_v61  ;;  %3608 = vmatpush1.bf16.msra.mxu1 %v10445_v42  ;;  %v1356_v15 = vmax.f32 %v1223_v4, 0.0  ;;  %v10453_v61 = vld [vmem:[#allocation11 + $0x184] ss:$16 sps:$4 sm:$0xff]   ;;  %v10451_v5 = vld [vmem:[#allocation11 + $0x180] ss:$16 sps:$4 sm:$0xff]  }
 0x310   : > { %v1357_v12 = vmax.f32 %v1225_v7, 0.0  ;;  %3223 = vmatprep.subr.bf16.mxu0 %v10414_v3  ;;  %3609 = vmatprep.subr.bf16.mxu1 %v10450_v6  ;;  %v10474_v6 = vld [vmem:[#allocation11 + $0x18c] ss:$16 sps:$4 sm:$0xff]  }
 0x311   : > { %v1358_v16 = vmax.f32 %v1227_v9, 0.0  ;;  %v10462_v9 = vld [vmem:[#allocation11 + $0x1a4] ss:$16 sps:$4 sm:$0xff]  }
 0x312   : > { %v1411_v17 = vpack.c.bf16 %v1357_v12, %v1355_v11 }
 0x313   : > { %v1230_v19 = vpop.f32.mrb[20].mxu1  ;;  %v1412_v18 = vpack.c.bf16 %v1358_v16, %v1356_v15  ;;  %3224 = vmatpush1.bf16.msra.mxu0 %v10412_v10  ;;  %3610 = vmatpush1.bf16.msra.mxu1 %v10448_v14  ;;  %v10472_v10 = vld [vmem:[#allocation11 + $0x188] ss:$16 sps:$4 sm:$0xff]  }
 0x314   : > { %v1231_v23 = vadd.f32 %v1230_v19, %v11922_v35  ;;  %v1232_v2 = vpop.f32.mrb[21].mxu1  ;;  %3225 = vmatprep.subr.bf16.mxu0 %v10417_v13  ;;  %3611 = vmatprep.subr.bf16.mxu1 %v10456_v21  ;;  %v10477_v13 = vld [vmem:[#allocation11 + $0x1ac] ss:$16 sps:$4 sm:$0xff]   ;;  %v10475_v21 = vld [vmem:[#allocation11 + $0x1a8] ss:$16 sps:$4 sm:$0xff]  }
 0x315   : > { %v1233_v26 = vadd.f32 %v1232_v2, %v11925_v40  ;;  %v1234_v27 = vpop.f32.mrb[22].mxu1  ;;  %1913 = vmatprep.mubr.bf16.mxu0 %v1412_v18  ;;  %2106 = vmatprep.mubr.bf16.mxu1 %v1412_v18 }
 0x316   : > { %v1235_v24 = vadd.f32 %v1234_v27, %v11922_v35  ;;  %v1236_v22 = vpop.f32.mrb[23].mxu1  ;;  %1914 = vmatmul.mubr.bf16.gmra.mrb[48].mxu0 %v1411_v17  ;;  %2107 = vmatmul.mubr.bf16.gmra.mrb[80].mxu1 %v1411_v17  ;;  %v1359_v30 = vmax.f32 %v1231_v23, 0.0  ;;  %v10460_v17 = vld [vmem:[#allocation11 + $0x1a0] ss:$16 sps:$4 sm:$0xff]  }
 0x317   : > { %v1237_v28 = vadd.f32 %v1236_v22, %v11925_v40  ;;  %3226 = vmatpush1.bf16.msra.mxu0 %v10415_v20  ;;  %3612 = vmatpush1.bf16.msra.mxu1 %v10454_v25  ;;  %v1360_v38 = vmax.f32 %v1233_v26, 0.0  ;;  %v10471_v20 = vld [vmem:[#allocation11 + $0x1c4] ss:$16 sps:$4 sm:$0xff]   ;;  %v10469_v27 = vld [vmem:[#allocation11 + $0x1c0] ss:$16 sps:$4 sm:$0xff]  }
 0x318   : > { %v1361_v33 = vmax.f32 %v1235_v24, 0.0  ;;  %3227 = vmatprep.subr.bf16.mxu0 %v10426_v41  ;;  %3613 = vmatprep.subr.bf16.mxu1 %v10459_v0 }
 0x319   : > { %v1362_v39 = vmax.f32 %v1237_v28, 0.0 }
 0x31a   : > { %v1413_v43 = vpack.c.bf16 %v1361_v33, %v1359_v30 }
 0x31b   : > { %v1240_v44 = vpop.f32.mrb[24].mxu1  ;;  %v1414_v45 = vpack.c.bf16 %v1362_v39, %v1360_v38  ;;  %3228 = vmatpush1.bf16.msra.mxu0 %v10424_v29  ;;  %3614 = vmatpush1.bf16.msra.mxu1 %v10457_v37 }
 0x31c   : > { %v1241_v48 = vadd.f32 %v1240_v44, %v11922_v35  ;;  %v1242_v49 = vpop.f32.mrb[25].mxu1  ;;  %3229 = vmatprep.subr.bf16.mxu0 %v10435_v36  ;;  %3615 = vmatprep.subr.bf16.mxu1 %v10465_v47 }
 0x31d   : > { %v1243_v52 = vadd.f32 %v1242_v49, %v11925_v40  ;;  %v1244_v53 = vpop.f32.mrb[26].mxu1  ;;  %1923 = vmatprep.mubr.bf16.mxu0 %v1414_v45  ;;  %2116 = vmatprep.mubr.bf16.mxu1 %v1414_v45 }
 0x31e   : > { %v1245_v55 = vadd.f32 %v1244_v53, %v11922_v35  ;;  %v1246_v56 = vpop.f32.mrb[27].mxu1  ;;  %1924 = vmatmul.mubr.bf16.gmra.mrb[52].mxu0 %v1413_v43  ;;  %2117 = vmatmul.mubr.bf16.gmra.mrb[84].mxu1 %v1413_v43  ;;  %v1363_v59 = vmax.f32 %v1241_v48, 0.0 }
 0x31f   : > { %v1247_v57 = vadd.f32 %v1246_v56, %v11925_v40  ;;  %3230 = vmatpush1.bf16.msra.mxu0 %v10433_v46  ;;  %3616 = vmatpush1.bf16.msra.mxu1 %v10463_v51  ;;  %v1364_v63 = vmax.f32 %v1243_v52, 0.0 }
 0x320   : > { %v1365_v60 = vmax.f32 %v1245_v55, 0.0  ;;  %3231 = vmatprep.subr.bf16.mxu0 %v10444_v50  ;;  %3617 = vmatprep.subr.bf16.mxu1 %v10468_v54 }
 0x321   : > { %v1366_v1 = vmax.f32 %v1247_v57, 0.0 }
 0x322   : > { %v1415_v3 = vpack.c.bf16 %v1365_v60, %v1363_v59 }
 0x323   : > { %v1250_v42 = vpop.f32.mrb[28].mxu1  ;;  %v1416_v4 = vpack.c.bf16 %v1366_v1, %v1364_v63  ;;  %3232 = vmatpush1.bf16.msra.mxu0 %v10442_v58  ;;  %3618 = vmatpush1.bf16.msra.mxu1 %v10466_v62 }
 0x324   : > { %v1251_v7 = vadd.f32 %v1250_v42, %v11922_v35  ;;  %v1252_v8 = vpop.f32.mrb[29].mxu1  ;;  %3233 = vmatprep.subr.bf16.mxu0 %v10453_v61  ;;  %3619 = vmatprep.subr.bf16.mxu1 %v10474_v6 }
 0x325   : > { %v1253_v11 = vadd.f32 %v1252_v8, %v11925_v40  ;;  %v1254_v12 = vpop.f32.mrb[30].mxu1  ;;  %1933 = vmatprep.mubr.bf16.mxu0 %v1416_v4  ;;  %2126 = vmatprep.mubr.bf16.mxu1 %v1416_v4 }
 0x326   : > { %v1255_v14 = vadd.f32 %v1254_v12, %v11922_v35  ;;  %v1256_v15 = vpop.f32.mrb[31].mxu1  ;;  %1934 = vmatmul.mubr.bf16.gmra.mrb[56].mxu0 %v1415_v3  ;;  %2127 = vmatmul.mubr.bf16.gmra.mrb[88].mxu1 %v1415_v3  ;;  %v1367_v19 = vmax.f32 %v1251_v7, 0.0 }
 0x327   : > { %v1257_v16 = vadd.f32 %v1256_v15, %v11925_v40  ;;  %3234 = vmatpush1.bf16.msra.mxu0 %v10451_v5  ;;  %3620 = vmatpush1.bf16.msra.mxu1 %v10472_v10  ;;  %v1368_v23 = vmax.f32 %v1253_v11, 0.0 }
 0x328   : > { %v1369_v18 = vmax.f32 %v1255_v14, 0.0  ;;  %3235 = vmatprep.subr.bf16.mxu0 %v10462_v9  ;;  %3621 = vmatprep.subr.bf16.mxu1 %v10477_v13 }
 0x329   : > { %v1370_v2 = vmax.f32 %v1257_v16, 0.0 }
 0x32a   : > { %v1417_v41 = vpack.c.bf16 %v1369_v18, %v1367_v19 }
 0x32b   : > { %v1260_v25 = vpop.f32.mrb[32].mxu1  ;;  %v1418_v26 = vpack.c.bf16 %v1370_v2, %v1368_v23  ;;  %3236 = vmatpush1.bf16.msra.mxu0 %v10460_v17  ;;  %3622 = vmatpush1.bf16.msra.mxu1 %v10475_v21  ;;  %v10483_v2 = vld [vmem:[#allocation11 + $0x1cc] ss:$16 sps:$4 sm:$0xff]  }
 0x32c   : > { %v1261_v0 = vadd.f32 %v1260_v25, %v11922_v35  ;;  %v1262_v24 = vpop.f32.mrb[33].mxu1  ;;  %3237 = vmatprep.subr.bf16.mxu0 %v10471_v20  ;;  %3623 = vmatprep.subr.bf16.mxu1 %v10483_v2 }
 0x32d   : > { %v1263_v22 = vadd.f32 %v1262_v24, %v11925_v40  ;;  %v1264_v28 = vpop.f32.mrb[34].mxu1  ;;  %1943 = vmatprep.mubr.bf16.mxu0 %v1418_v26  ;;  %2136 = vmatprep.mubr.bf16.mxu1 %v1418_v26  ;;  %v10481_v26 = vld [vmem:[#allocation11 + $0x1c8] ss:$16 sps:$4 sm:$0xff]  }
 0x32e   : > { %v1265_v29 = vadd.f32 %v1264_v28, %v11922_v35  ;;  %v1266_v30 = vpop.f32.mrb[35].mxu1  ;;  %1944 = vmatmul.mubr.bf16.gmra.mrb[60].mxu0 %v1417_v41  ;;  %2137 = vmatmul.mubr.bf16.gmra.mrb[92].mxu1 %v1417_v41  ;;  %v1371_v36 = vmax.f32 %v1261_v0, 0.0 }
 0x32f   : > { %v1267_v33 = vadd.f32 %v1266_v30, %v11925_v40  ;;  %3238 = vmatpush1.bf16.msra.mxu0 %v10469_v27  ;;  %v1372_v38 = vmax.f32 %v1263_v22, 0.0  ;;  %v10480_v30 = vld [vmem:[#allocation11 + $0x1e4] ss:$16 sps:$4 sm:$0xff]   ;;  %3624 = vmatpush1.bf16.msra.mxu1 %v10481_v26 }
 0x330   : > { %v1373_v37 = vmax.f32 %v1265_v29, 0.0  ;;  %3239 = vmatprep.subr.bf16.mxu0 %v10480_v30 }
 0x331   : > { %v1374_v39 = vmax.f32 %v1267_v33, 0.0  ;;  %v10486_v33 = vld [vmem:[#allocation11 + $0x1ec] ss:$16 sps:$4 sm:$0xff]  }
 0x332   : > { %v1419_v43 = vpack.c.bf16 %v1373_v37, %v1371_v36  ;;  %v10478_v37 = vld [vmem:[#allocation11 + $0x1e0] ss:$16 sps:$4 sm:$0xff]   ;;  %3625 = vmatprep.subr.bf16.mxu1 %v10486_v33 }
 0x333   : > { %v1270_v44 = vpop.f32.mrb[36].mxu1  ;;  %v1420_v45 = vpack.c.bf16 %v1374_v39, %v1372_v38  ;;  %v10484_v38 = vld [vmem:[#allocation11 + $0x1e8] ss:$16 sps:$4 sm:$0xff]   ;;  %3240 = vmatpush1.bf16.msra.mxu0 %v10478_v37 }
 0x334   : > { %v1271_v46 = vadd.f32 %v1270_v44, %v11922_v35  ;;  %v1272_v47 = vpop.f32.mrb[37].mxu1  ;;  %3626 = vmatpush1.bf16.msra.mxu1 %v10484_v38 }
 0x335   : > { %v1273_v48 = vadd.f32 %v1272_v47, %v11925_v40  ;;  %v1274_v49 = vpop.f32.mrb[38].mxu1  ;;  %1953 = vmatprep.mubr.bf16.mxu0 %v1420_v45  ;;  %2146 = vmatprep.mubr.bf16.mxu1 %v1420_v45 }
 0x336   : > { %v1275_v50 = vadd.f32 %v1274_v49, %v11922_v35  ;;  %v1276_v51 = vpop.f32.mrb[39].mxu1  ;;  %1954 = vmatmul.mubr.bf16.gmra.mrb[64].mxu0 %v1419_v43  ;;  %2147 = vmatmul.mubr.bf16.gmra.mrb[96].mxu1 %v1419_v43  ;;  %v1375_v53 = vmax.f32 %v1271_v46, 0.0 }
 0x337   : > { %v1277_v52 = vadd.f32 %v1276_v51, %v11925_v40  ;;  %v1376_v55 = vmax.f32 %v1273_v48, 0.0 }
 0x338   : > { %v1377_v54 = vmax.f32 %v1275_v50, 0.0 }
 0x339   : > { %v1378_v56 = vmax.f32 %v1277_v52, 0.0 }
 0x33a   : > { %v1421_v57 = vpack.c.bf16 %v1377_v54, %v1375_v53 }
 0x33b   : > { %v1280_v58 = vpop.f32.mrb[40].mxu1  ;;  %v1422_v59 = vpack.c.bf16 %v1378_v56, %v1376_v55  ;;  %v10489_v55 = vld [vmem:[#allocation11 + $0x204] ss:$16 sps:$4 sm:$0xff]  }
 0x33c   : > { %v1281_v60 = vadd.f32 %v1280_v58, %v11922_v35  ;;  %v1282_v61 = vpop.f32.mrb[41].mxu1  ;;  %3402 = vmatprep.subr.bf16.mxu0 %v10489_v55 }
 0x33d   : > { %v1283_v62 = vadd.f32 %v1282_v61, %v11925_v40  ;;  %v1284_v63 = vpop.f32.mrb[42].mxu1  ;;  %1963 = vmatprep.mubr.bf16.mxu0 %v1422_v59  ;;  %2156 = vmatprep.mubr.bf16.mxu1 %v1422_v59 }
 0x33e   : > { %v1285_v1 = vadd.f32 %v1284_v63, %v11922_v35  ;;  %v1286_v3 = vpop.f32.mrb[43].mxu1  ;;  %1964 = vmatmul.mubr.bf16.gmra.mrb[68].mxu0 %v1421_v57  ;;  %2157 = vmatmul.mubr.bf16.gmra.mrb[100].mxu1 %v1421_v57  ;;  %v1379_v4 = vmax.f32 %v1281_v60, 0.0 }
 0x33f   : > { %v1287_v42 = vadd.f32 %v1286_v3, %v11925_v40  ;;  %v1380_v6 = vmax.f32 %v1283_v62, 0.0 }
 0x340   : > { %v1381_v5 = vmax.f32 %v1285_v1, 0.0 }
 0x341   : > { %v1382_v7 = vmax.f32 %v1287_v42, 0.0 }
 0x342   : > { %v1423_v8 = vpack.c.bf16 %v1381_v5, %v1379_v4 }
 0x343   : > { %v1290_v9 = vpop.f32.mrb[44].mxu1  ;;  %v1424_v10 = vpack.c.bf16 %v1382_v7, %v1380_v6 }
 0x344   : > { %v1291_v11 = vadd.f32 %v1290_v9, %v11922_v35  ;;  %v1292_v12 = vpop.f32.mrb[45].mxu1 }
 0x345   : > { %v1293_v13 = vadd.f32 %v1292_v12, %v11925_v40  ;;  %v1294_v14 = vpop.f32.mrb[46].mxu1  ;;  %1973 = vmatprep.mubr.bf16.mxu0 %v1424_v10  ;;  %2166 = vmatprep.mubr.bf16.mxu1 %v1424_v10 }
 0x346   : > { %v1295_v15 = vadd.f32 %v1294_v14, %v11922_v35  ;;  %v1296_v16 = vpop.f32.mrb[47].mxu1  ;;  %1974 = vmatmul.mubr.bf16.gmra.mrb[72].mxu0 %v1423_v8  ;;  %2167 = vmatmul.mubr.bf16.gmra.mrb[104].mxu1 %v1423_v8  ;;  %v1383_v19 = vmax.f32 %v1291_v11, 0.0 }
 0x347   : > { %v1297_v17 = vadd.f32 %v1296_v16, %v11925_v40  ;;  %v1384_v20 = vmax.f32 %v1293_v13, 0.0 }
 0x348   : > { %v1385_v18 = vmax.f32 %v1295_v15, 0.0 }
 0x349   : > { %v1386_v21 = vmax.f32 %v1297_v17, 0.0 }
 0x34a   : > { %v1425_v23 = vpack.c.bf16 %v1385_v18, %v1383_v19 }
 0x34b   : > { %v1300_v41 = vpop.f32.mrb[48].mxu1  ;;  %v1426_v25 = vpack.c.bf16 %v1386_v21, %v1384_v20 }
 0x34c   : > { %v1301_v27 = vadd.f32 %v1300_v41, %v11922_v35  ;;  %v1302_v0 = vpop.f32.mrb[49].mxu1 }
 0x34d   : > { %v1303_v24 = vadd.f32 %v1302_v0, %v11925_v40  ;;  %v1304_v22 = vpop.f32.mrb[50].mxu1  ;;  %1983 = vmatprep.mubr.bf16.mxu0 %v1426_v25  ;;  %2176 = vmatprep.mubr.bf16.mxu1 %v1426_v25  ;;  %v10516_v0 = vld [vmem:[#allocation11 + $0x20c] ss:$16 sps:$4 sm:$0xff]  }
 0x34e   : > { %v1305_v28 = vadd.f32 %v1304_v22, %v11922_v35  ;;  %v1306_v29 = vpop.f32.mrb[51].mxu1  ;;  %1984 = vmatmul.mubr.bf16.gmra.mrb[76].mxu0 %v1425_v23  ;;  %2177 = vmatmul.mubr.bf16.gmra.mrb[108].mxu1 %v1425_v23  ;;  %v1387_v39 = vmax.f32 %v1301_v27, 0.0 }
 0x34f   : > { %v1307_v36 = vadd.f32 %v1306_v29, %v11925_v40  ;;  %v1388_v44 = vmax.f32 %v1303_v24, 0.0  ;;  %3788 = vmatprep.subr.bf16.mxu1 %v10516_v0  ;;  %v11992_v24 = vsub.s32 2, %v11910_v31 }
 0x350   : > { %v1389_v43 = vmax.f32 %v1305_v28, 0.0 }
 0x351   : > { %v1390_v45 = vmax.f32 %v1307_v36, 0.0  ;;  %13392 = vst [vmem:[#allocation26_spill] sm:$0xff] %v11992_v24 }
 0x352   : > { %v1427_v46 = vpack.c.bf16 %v1389_v43, %v1387_v39 }
 0x353   : > { %v1310_v47 = vpop.f32.mrb[52].mxu1  ;;  %v1428_v48 = vpack.c.bf16 %v1390_v45, %v1388_v44 }
 0x354   : > { %v1311_v49 = vadd.f32 %v1310_v47, %v11922_v35  ;;  %v1312_v50 = vpop.f32.mrb[53].mxu1 }
 0x355   : > { %v1313_v51 = vadd.f32 %v1312_v50, %v11925_v40  ;;  %v1314_v52 = vpop.f32.mrb[54].mxu1  ;;  %1993 = vmatprep.mubr.bf16.mxu0 %v1428_v48  ;;  %2186 = vmatprep.mubr.bf16.mxu1 %v1428_v48 }
 0x356   : > { %v1315_v53 = vadd.f32 %v1314_v52, %v11922_v35  ;;  %v1316_v54 = vpop.f32.mrb[55].mxu1  ;;  %1994 = vmatmul.mubr.bf16.gmra.mrb[80].mxu0 %v1427_v46  ;;  %2187 = vmatmul.mubr.bf16.gmra.mrb[112].mxu1 %v1427_v46  ;;  %v1391_v57 = vmax.f32 %v1311_v49, 0.0 }
 0x357   : > { %v1317_v56 = vadd.f32 %v1316_v54, %v11925_v40  ;;  %v1392_v59 = vmax.f32 %v1313_v51, 0.0 }
 0x358   : > { %v1393_v58 = vmax.f32 %v1315_v53, 0.0 }
 0x359   : > { %v1394_v60 = vmax.f32 %v1317_v56, 0.0 }
 0x35a   : > { %v1429_v61 = vpack.c.bf16 %v1393_v58, %v1391_v57 }
 0x35b   : > { %v1320_v62 = vpop.f32.mrb[56].mxu1  ;;  %v1430_v63 = vpack.c.bf16 %v1394_v60, %v1392_v59 }
 0x35c   : > { %v1321_v1 = vadd.f32 %v1320_v62, %v11922_v35  ;;  %v1322_v3 = vpop.f32.mrb[57].mxu1 }
 0x35d   : > { %v1323_v42 = vadd.f32 %v1322_v3, %v11925_v40  ;;  %v1324_v4 = vpop.f32.mrb[58].mxu1  ;;  %2003 = vmatprep.mubr.bf16.mxu0 %v1430_v63  ;;  %2196 = vmatprep.mubr.bf16.mxu1 %v1430_v63 }
 0x35e   : > { %v1325_v5 = vadd.f32 %v1324_v4, %v11922_v35  ;;  %v1326_v6 = vpop.f32.mrb[59].mxu1  ;;  %2004 = vmatmul.mubr.bf16.gmra.mrb[84].mxu0 %v1429_v61  ;;  %2197 = vmatmul.mubr.bf16.gmra.mrb[116].mxu1 %v1429_v61  ;;  %v1395_v8 = vmax.f32 %v1321_v1, 0.0  ;;  %v10514_v4 = vld [vmem:[#allocation11 + $0x208] ss:$16 sps:$4 sm:$0xff]  }
 0x35f   : > { %v1327_v7 = vadd.f32 %v1326_v6, %v11925_v40  ;;  %v1396_v10 = vmax.f32 %v1323_v42, 0.0  ;;  %v10487_v42 = vld [vmem:[#allocation11 + $0x200] ss:$16 sps:$4 sm:$0xff]  }
 0x360   : > { %v1397_v9 = vmax.f32 %v1325_v5, 0.0 }
 0x361   : > { %v1398_v11 = vmax.f32 %v1327_v7, 0.0 }
 0x362   : > { %v1431_v12 = vpack.c.bf16 %v1397_v9, %v1395_v8 }
 0x363   : > { %v1330_v13 = vpop.f32.mrb[60].mxu1  ;;  %v1432_v14 = vpack.c.bf16 %v1398_v11, %v1396_v10  ;;  %v10492_v10 = vld [vmem:[#allocation11 + $0x224] ss:$16 sps:$4 sm:$0xff]   ;;  %v10519_v11 = vld [vmem:[#allocation11 + $0x22c] ss:$16 sps:$4 sm:$0xff]  }
 0x364   : > { %v1331_v15 = vadd.f32 %v1330_v13, %v11922_v35  ;;  %v1332_v16 = vpop.f32.mrb[61].mxu1 }
 0x365   : > { %v1333_v17 = vadd.f32 %v1332_v16, %v11925_v40  ;;  %v1334_v19 = vpop.f32.mrb[62].mxu1  ;;  %2013 = vmatprep.mubr.bf16.mxu0 %v1432_v14  ;;  %2206 = vmatprep.mubr.bf16.mxu1 %v1432_v14 }
 0x366   : > { %v1335_v18 = vadd.f32 %v1334_v19, %v11922_v35  ;;  %v1336_v20 = vpop.f32.mrb[63].mxu1  ;;  %2014 = vmatmul.mubr.bf16.gmra.mrb[88].mxu0 %v1431_v12  ;;  %2207 = vmatmul.mubr.bf16.gmra.mrb[120].mxu1 %v1431_v12  ;;  %v1399_v23 = vmax.f32 %v1331_v15, 0.0  ;;  %v1499_v35 = vld [vmem:[%s13393_s23] sm:$0xf]  ;;  %s13185_s23 = scalar_lea.vmem [#allocation17], %s8485_s14 }
 0x367   : > { %v1337_v21 = vadd.f32 %v1336_v20, %v11925_v40  ;;  %v1400_v41 = vmax.f32 %v1333_v17, 0.0  ;;  %v11998_v40 = vsub.s32 3, %v11910_v31  ;;  %v12001_v22 = vrot.slane %v1499_v35, %v11913_v32  ;;  %s8312_s8 = sshll.u32 %s13185_s23, 4  ;;  %s13284_s8 = int_to_ptr.vmem [resolvable:$true] %s8312_s8 }
 0x368   : > { %v1401_v2 = vmax.f32 %v1335_v18, 0.0  ;;  %v12004_v28 = vrot.slane %v1499_v35, %v11992_v24  ;;  %v12007_v29 = vrot.slane %v1499_v35, %v11919_v34  ;;  %s11285_s26 = scalar_lea.vmem %s13284_s8, 4096 }
 0x369   : > { %v1402_v25 = vmax.f32 %v1337_v21, 0.0  ;;  %13394 = vst [vmem:[#allocation27_spill] sm:$0xff] %v11998_v40  ;;  %v12010_v30 = vrot.slane %v1499_v35, %v11998_v40  ;;  %v10525_v35 = vld [vmem:[#allocation11 + $0x24c] ss:$16 sps:$4 sm:$0xff]   ;;  %p11286_p10 = scmp.ne.s32.totalorder %s13284_s8, %s11285_s26 }
 0x36a   : > { %v1433_v26 = vpack.c.bf16 %v1401_v2, %v1399_v23  ;;  %v10490_v23 = vld [vmem:[#allocation11 + $0x220] ss:$16 sps:$4 sm:$0xff]   ;;  %v10495_v2 = vld [vmem:[#allocation11 + $0x244] ss:$16 sps:$4 sm:$0xff]  }
 0x36b   : > { %v1434_v27 = vpack.c.bf16 %v1402_v25, %v1400_v41  ;;  %v10517_v41 = vld [vmem:[#allocation11 + $0x228] ss:$16 sps:$4 sm:$0xff]   ;;  %p11287_p11 = pnand %p11286_p10, %p13406_p1 }
 0x36d   : > { %2023 = vmatprep.mubr.bf16.mxu0 %v1434_v27  ;;  %2216 = vmatprep.mubr.bf16.mxu1 %v1434_v27  ;;  %p11288_p12 = pneg %p11287_p11 }
 0x36e   : > { %2024 = vmatmul.mubr.bf16.gmra.mrb[92].mxu0 %v1433_v26  ;;  %2217 = vmatmul.mubr.bf16.gmra.mrb[124].mxu1 %v1433_v26 }
 0x3c9   : > { %v1875_v33 = vpop.f32.mrb[32].mxu0  ;;  %v2068_v36 = vpop.f32.mrb[64].mxu1 }
 0x3ca   : > { %v1876_v37 = vadd.f32 %v1875_v33, %v12001_v22  ;;  %v2069_v38 = vadd.f32 %v2068_v36, %v12004_v28  ;;  %v1877_v31 = vpop.f32.mrb[33].mxu0  ;;  %v2070_v39 = vpop.f32.mrb[65].mxu1 }
 0x3cb   : > { %v1878_v43 = vadd.f32 %v1877_v31, %v12007_v29  ;;  %v2071_v44 = vadd.f32 %v2070_v39, %v12010_v30  ;;  %v1879_v45 = vpop.f32.mrb[34].mxu0  ;;  %v2072_v46 = vpop.f32.mrb[66].mxu1 }
 0x3cc   : > { %v1880_v47 = vadd.f32 %v1879_v45, %v12001_v22  ;;  %v2073_v48 = vadd.f32 %v2072_v46, %v12004_v28  ;;  %v1881_v49 = vpop.f32.mrb[35].mxu0  ;;  %v2074_v50 = vpop.f32.mrb[67].mxu1  ;;  %v2227_v53 = vmax.f32 %v1876_v37, 0.0  ;;  %v2229_v54 = vmax.f32 %v2069_v38, 0.0  ;;  %v10493_v46 = vld [vmem:[#allocation11 + $0x240] ss:$16 sps:$4 sm:$0xff]  }
 0x3cd   : > { %v1882_v51 = vadd.f32 %v1881_v49, %v12007_v29  ;;  %v2075_v52 = vadd.f32 %v2074_v50, %v12010_v30  ;;  %v2228_v57 = vmax.f32 %v1878_v43, 0.0  ;;  %v2230_v58 = vmax.f32 %v2071_v44, 0.0 }
 0x3ce   : > { %v2231_v55 = vmax.f32 %v1880_v47, 0.0  ;;  %v2233_v56 = vmax.f32 %v2073_v48, 0.0  ;;  %v10523_v47 = vld [vmem:[#allocation11 + $0x248] ss:$16 sps:$4 sm:$0xff]  }
 0x3cf   : > { %v2232_v59 = vmax.f32 %v1882_v51, 0.0  ;;  %v2234_v60 = vmax.f32 %v2075_v52, 0.0 }
 0x3d0   : > { %v2355_v61 = vpack.c.bf16 %v2231_v55, %v2227_v53  ;;  %v12020_v62 = vpack.c.bf16 %v2233_v56, %v2229_v54  ;;  %v10498_v53 = vld [vmem:[#allocation11 + $0x264] ss:$16 sps:$4 sm:$0xff]   ;;  %v10528_v54 = vld [vmem:[#allocation11 + $0x26c] ss:$16 sps:$4 sm:$0xff]  }
 0x3d1   : > { %v1885_v63 = vpop.f32.mrb[36].mxu0  ;;  %v2078_v1 = vpop.f32.mrb[68].mxu1  ;;  %v2356_v3 = vpack.c.bf16 %v2232_v59, %v2228_v57  ;;  %v12022_v5 = vpack.c.bf16 %v2234_v60, %v2230_v58 }
 0x3d2   : > { %v1886_v6 = vadd.f32 %v1885_v63, %v12001_v22  ;;  %v2079_v7 = vadd.f32 %v2078_v1, %v12004_v28  ;;  %v1887_v8 = vpop.f32.mrb[37].mxu0  ;;  %v2080_v9 = vpop.f32.mrb[69].mxu1 }
 0x3d3   : > { %v1888_v12 = vadd.f32 %v1887_v8, %v12007_v29  ;;  %v2081_v13 = vadd.f32 %v2080_v9, %v12010_v30  ;;  %v1889_v14 = vpop.f32.mrb[38].mxu0  ;;  %v2082_v15 = vpop.f32.mrb[70].mxu1  ;;  %3241 = vmatprep.mubr.bf16.mxu0 %v2356_v3  ;;  %3627 = vmatprep.mubr.bf16.mxu1 %v2356_v3 }
 0x3d4   : > { %v1890_v16 = vadd.f32 %v1889_v14, %v12001_v22  ;;  %v2083_v17 = vadd.f32 %v2082_v15, %v12004_v28  ;;  %v1891_v19 = vpop.f32.mrb[39].mxu0  ;;  %v2084_v18 = vpop.f32.mrb[71].mxu1  ;;  %3242 = vmatmul.mubr.bf16.vlgmr.msra.gmra.mrb[96].mxu0 %v2355_v61  ;;  %3628 = vmatmul.mubr.bf16.vlgmr.msra.gmra.mrb[128].mxu1 %v2355_v61  ;;  %v2235_v25 = vmax.f32 %v1886_v6, 0.0  ;;  %v2237_v26 = vmax.f32 %v2079_v7, 0.0  ;;  %v10526_v6 = vld [vmem:[#allocation11 + $0x268] ss:$16 sps:$4 sm:$0xff]  }
 0x3d5   : > { %v1892_v20 = vadd.f32 %v1891_v19, %v12007_v29  ;;  %v2085_v21 = vadd.f32 %v2084_v18, %v12010_v30  ;;  %3403 = vmatpush1.bf16.msra.mxu0 %v10487_v42  ;;  %3789 = vmatpush1.bf16.msra.mxu1 %v10514_v4  ;;  %v2236_v33 = vmax.f32 %v1888_v12, 0.0  ;;  %v2238_v36 = vmax.f32 %v2081_v13, 0.0  ;;  %v10496_v42 = vld [vmem:[#allocation11 + $0x260] ss:$16 sps:$4 sm:$0xff]   ;;  %v10501_v4 = vld [vmem:[#allocation11 + $0x284] ss:$16 sps:$4 sm:$0xff]  }
 0x3d6   : > { %v2239_v27 = vmax.f32 %v1890_v16, 0.0  ;;  %v2241_v0 = vmax.f32 %v2083_v17, 0.0  ;;  %3404 = vmatprep.subr.bf16.mxu0 %v10492_v10  ;;  %3790 = vmatprep.subr.bf16.mxu1 %v10519_v11  ;;  %v10534_v11 = vld [vmem:[#allocation11 + $0x28c] ss:$16 sps:$4 sm:$0xff]  }
 0x3d7   : > { %v2240_v37 = vmax.f32 %v1892_v20, 0.0  ;;  %v2242_v38 = vmax.f32 %v2085_v21, 0.0  ;;  %v10499_v21 = vld [vmem:[#allocation11 + $0x280] ss:$16 sps:$4 sm:$0xff]  }
 0x3d8   : > { %v2359_v31 = vpack.c.bf16 %v2239_v27, %v2235_v25  ;;  %v12032_v39 = vpack.c.bf16 %v2241_v0, %v2237_v26  ;;  %v10504_v0 = vld [vmem:[#allocation11 + $0x2a4] ss:$16 sps:$4 sm:$0xff]  }
 0x3d9   : > { %v1895_v43 = vpop.f32.mrb[40].mxu0  ;;  %v2088_v44 = vpop.f32.mrb[72].mxu1  ;;  %v2360_v45 = vpack.c.bf16 %v2240_v37, %v2236_v33  ;;  %3405 = vmatpush1.bf16.msra.mxu0 %v10490_v23  ;;  %3791 = vmatpush1.bf16.msra.mxu1 %v10517_v41  ;;  %v12034_v48 = vpack.c.bf16 %v2242_v38, %v2238_v36  ;;  %v10532_v23 = vld [vmem:[#allocation11 + $0x288] ss:$16 sps:$4 sm:$0xff]  }
 0x3da   : > { %v1896_v49 = vadd.f32 %v1895_v43, %v12001_v22  ;;  %v2089_v50 = vadd.f32 %v2088_v44, %v12004_v28  ;;  %v1897_v51 = vpop.f32.mrb[41].mxu0  ;;  %v2090_v52 = vpop.f32.mrb[73].mxu1  ;;  %3406 = vmatprep.subr.bf16.mxu0 %v10495_v2  ;;  %3792 = vmatprep.subr.bf16.mxu1 %v10525_v35  ;;  %v10537_v35 = vld [vmem:[#allocation11 + $0x2ac] ss:$16 sps:$4 sm:$0xff]  }
 0x3db   : > { %v1898_v55 = vadd.f32 %v1897_v51, %v12007_v29  ;;  %v2091_v56 = vadd.f32 %v2090_v52, %v12010_v30  ;;  %v1899_v57 = vpop.f32.mrb[42].mxu0  ;;  %v2092_v58 = vpop.f32.mrb[74].mxu1  ;;  %3251 = vmatprep.mubr.bf16.mxu0 %v2360_v45  ;;  %3637 = vmatprep.mubr.bf16.mxu1 %v2360_v45  ;;  %v10535_v51 = vld [vmem:[#allocation11 + $0x2a8] ss:$16 sps:$4 sm:$0xff]  }
 0x3dc   : > { %v1900_v59 = vadd.f32 %v1899_v57, %v12001_v22  ;;  %v2093_v60 = vadd.f32 %v2092_v58, %v12004_v28  ;;  %v1901_v61 = vpop.f32.mrb[43].mxu0  ;;  %v2094_v63 = vpop.f32.mrb[75].mxu1  ;;  %3252 = vmatmul.mubr.bf16.gmra.mrb[100].mxu0 %v2359_v31  ;;  %3638 = vmatmul.mubr.bf16.gmra.mrb[132].mxu1 %v2359_v31  ;;  %v2243_v7 = vmax.f32 %v1896_v49, 0.0  ;;  %v2245_v8 = vmax.f32 %v2089_v50, 0.0  ;;  %v10502_v49 = vld [vmem:[#allocation11 + $0x2a0] ss:$16 sps:$4 sm:$0xff]  }
 0x3dd   : > { %v1902_v1 = vadd.f32 %v1901_v61, %v12007_v29  ;;  %v2095_v3 = vadd.f32 %v2094_v63, %v12010_v30  ;;  %3407 = vmatpush1.bf16.msra.mxu0 %v10493_v46  ;;  %3793 = vmatpush1.bf16.msra.mxu1 %v10523_v47  ;;  %v2244_v12 = vmax.f32 %v1898_v55, 0.0  ;;  %v2246_v13 = vmax.f32 %v2091_v56, 0.0  ;;  %v10507_v50 = vld [vmem:[#allocation11 + $0x2c4] ss:$16 sps:$4 sm:$0xff]   ;;  %v10543_v56 = vld [vmem:[#allocation11 + $0x2cc] ss:$16 sps:$4 sm:$0xff]  }
 0x3de   : > { %v2247_v9 = vmax.f32 %v1900_v59, 0.0  ;;  %v2249_v10 = vmax.f32 %v2093_v60, 0.0  ;;  %3408 = vmatprep.subr.bf16.mxu0 %v10498_v53  ;;  %3794 = vmatprep.subr.bf16.mxu1 %v10528_v54 }
 0x3df   : > { %v2248_v14 = vmax.f32 %v1902_v1, 0.0  ;;  %v2250_v15 = vmax.f32 %v2095_v3, 0.0 }
 0x3e0   : > { %v2363_v16 = vpack.c.bf16 %v2247_v9, %v2243_v7  ;;  %v12044_v17 = vpack.c.bf16 %v2249_v10, %v2245_v8 }
 0x3e1   : > { %v1905_v19 = vpop.f32.mrb[44].mxu0  ;;  %v2098_v18 = vpop.f32.mrb[76].mxu1  ;;  %v2364_v20 = vpack.c.bf16 %v2248_v14, %v2244_v12  ;;  %3409 = vmatpush1.bf16.msra.mxu0 %v10496_v42  ;;  %3795 = vmatpush1.bf16.msra.mxu1 %v10526_v6  ;;  %v12046_v2 = vpack.c.bf16 %v2250_v15, %v2246_v13  ;;  %v10541_v6 = vld [vmem:[#allocation11 + $0x2c8] ss:$16 sps:$4 sm:$0xff]   ;;  %v10510_v12 = vld [vmem:[#allocation11 + $0x2e4] ss:$16 sps:$4 sm:$0xff]  }
 0x3e2   : > { %v1906_v41 = vadd.f32 %v1905_v19, %v12001_v22  ;;  %v2099_v25 = vadd.f32 %v2098_v18, %v12004_v28  ;;  %v1907_v26 = vpop.f32.mrb[45].mxu0  ;;  %v2100_v27 = vpop.f32.mrb[77].mxu1  ;;  %3410 = vmatprep.subr.bf16.mxu0 %v10501_v4  ;;  %3796 = vmatprep.subr.bf16.mxu1 %v10534_v11  ;;  %v10505_v4 = vld [vmem:[#allocation11 + $0x2c0] ss:$16 sps:$4 sm:$0xff]   ;;  %v10546_v13 = vld [vmem:[#allocation11 + $0x2ec] ss:$16 sps:$4 sm:$0xff]  }
 0x3e3   : > { %v1908_v33 = vadd.f32 %v1907_v26, %v12007_v29  ;;  %v2101_v36 = vadd.f32 %v2100_v27, %v12010_v30  ;;  %v1909_v37 = vpop.f32.mrb[46].mxu0  ;;  %v2102_v38 = vpop.f32.mrb[78].mxu1  ;;  %3261 = vmatprep.mubr.bf16.mxu0 %v2364_v20  ;;  %3647 = vmatprep.mubr.bf16.mxu1 %v2364_v20  ;;  %v10508_v26 = vld [vmem:[#allocation11 + $0x2e0] ss:$16 sps:$4 sm:$0xff]   ;;  %v10513_v27 = vld [vmem:[#allocation11 + $0x304] ss:$16 sps:$4 sm:$0xff]  }
 0x3e4   : > { %v1910_v31 = vadd.f32 %v1909_v37, %v12001_v22  ;;  %v2103_v43 = vadd.f32 %v2102_v38, %v12004_v28  ;;  %v1911_v44 = vpop.f32.mrb[47].mxu0  ;;  %v2104_v45 = vpop.f32.mrb[79].mxu1  ;;  %3262 = vmatmul.mubr.bf16.gmra.mrb[104].mxu0 %v2363_v16  ;;  %3648 = vmatmul.mubr.bf16.gmra.mrb[136].mxu1 %v2363_v16  ;;  %v2251_v52 = vmax.f32 %v1906_v41, 0.0  ;;  %v2253_v53 = vmax.f32 %v2099_v25, 0.0  ;;  %v10552_v38 = vld [vmem:[#allocation11 + $0x30c] ss:$16 sps:$4 sm:$0xff]  }
 0x3e5   : > { %v1912_v46 = vadd.f32 %v1911_v44, %v12007_v29  ;;  %v2105_v47 = vadd.f32 %v2104_v45, %v12010_v30  ;;  %3411 = vmatpush1.bf16.msra.mxu0 %v10499_v21  ;;  %3797 = vmatpush1.bf16.msra.mxu1 %v10532_v23  ;;  %v2252_v57 = vmax.f32 %v1908_v33, 0.0  ;;  %v2254_v58 = vmax.f32 %v2101_v36, 0.0 }
 0x3e6   : > { %v2255_v54 = vmax.f32 %v1910_v31, 0.0  ;;  %v2257_v55 = vmax.f32 %v2103_v43, 0.0  ;;  %3412 = vmatprep.subr.bf16.mxu0 %v10504_v0  ;;  %3798 = vmatprep.subr.bf16.mxu1 %v10537_v35  ;;  %v10544_v0 = vld [vmem:[#allocation11 + $0x2e8] ss:$16 sps:$4 sm:$0xff]  }
 0x3e7   : > { %v2256_v59 = vmax.f32 %v1912_v46, 0.0  ;;  %v2258_v60 = vmax.f32 %v2105_v47, 0.0 }
 0x3e8   : > { %v2367_v61 = vpack.c.bf16 %v2255_v54, %v2251_v52  ;;  %v12056_v63 = vpack.c.bf16 %v2257_v55, %v2253_v53  ;;  %v10511_v52 = vld [vmem:[#allocation11 + $0x300] ss:$16 sps:$4 sm:$0xff]   ;;  %v10550_v53 = vld [vmem:[#allocation11 + $0x308] ss:$16 sps:$4 sm:$0xff]  }
 0x3e9   : > { %v1915_v1 = vpop.f32.mrb[48].mxu0  ;;  %v2108_v3 = vpop.f32.mrb[80].mxu1  ;;  %v2368_v42 = vpack.c.bf16 %v2256_v59, %v2252_v57  ;;  %3413 = vmatpush1.bf16.msra.mxu0 %v10502_v49  ;;  %3799 = vmatpush1.bf16.msra.mxu1 %v10535_v51  ;;  %v12058_v7 = vpack.c.bf16 %v2258_v60, %v2254_v58  ;;  %v10522_v59 = vld [vmem:[#allocation11 + $0x324] ss:$16 sps:$4 sm:$0xff]   ;;  %v10555_v60 = vld [vmem:[#allocation11 + $0x32c] ss:$16 sps:$4 sm:$0xff]  }
 0x3ea   : > { %v1916_v8 = vadd.f32 %v1915_v1, %v12001_v22  ;;  %v2109_v9 = vadd.f32 %v2108_v3, %v12004_v28  ;;  %v1917_v10 = vpop.f32.mrb[49].mxu0  ;;  %v2110_v11 = vpop.f32.mrb[81].mxu1  ;;  %3414 = vmatprep.subr.bf16.mxu0 %v10507_v50  ;;  %3800 = vmatprep.subr.bf16.mxu1 %v10543_v56 }
 0x3eb   : > { %v1918_v14 = vadd.f32 %v1917_v10, %v12007_v29  ;;  %v2111_v15 = vadd.f32 %v2110_v11, %v12010_v30  ;;  %v1919_v16 = vpop.f32.mrb[50].mxu0  ;;  %v2112_v19 = vpop.f32.mrb[82].mxu1  ;;  %3271 = vmatprep.mubr.bf16.mxu0 %v2368_v42  ;;  %3657 = vmatprep.mubr.bf16.mxu1 %v2368_v42 }
 0x3ec   : > { %v1920_v18 = vadd.f32 %v1919_v16, %v12001_v22  ;;  %v2113_v20 = vadd.f32 %v2112_v19, %v12004_v28  ;;  %v1921_v21 = vpop.f32.mrb[51].mxu0  ;;  %v2114_v23 = vpop.f32.mrb[83].mxu1  ;;  %3272 = vmatmul.mubr.bf16.gmra.mrb[108].mxu0 %v2367_v61  ;;  %3658 = vmatmul.mubr.bf16.gmra.mrb[140].mxu1 %v2367_v61  ;;  %v2259_v35 = vmax.f32 %v1916_v8, 0.0  ;;  %v2261_v33 = vmax.f32 %v2109_v9, 0.0 }
 0x3ed   : > { %v1922_v41 = vadd.f32 %v1921_v21, %v12007_v29  ;;  %v2115_v25 = vadd.f32 %v2114_v23, %v12010_v30  ;;  %3415 = vmatpush1.bf16.msra.mxu0 %v10505_v4  ;;  %3801 = vmatpush1.bf16.msra.mxu1 %v10541_v6  ;;  %v2260_v31 = vmax.f32 %v1918_v14, 0.0  ;;  %v2262_v43 = vmax.f32 %v2111_v15, 0.0  ;;  %v10553_v14 = vld [vmem:[#allocation11 + $0x328] ss:$16 sps:$4 sm:$0xff]  }
 0x3ee   : > { %v2263_v36 = vmax.f32 %v1920_v18, 0.0  ;;  %v2265_v37 = vmax.f32 %v2113_v20, 0.0  ;;  %3416 = vmatprep.subr.bf16.mxu0 %v10510_v12  ;;  %3802 = vmatprep.subr.bf16.mxu1 %v10546_v13  ;;  %v10520_v12 = vld [vmem:[#allocation11 + $0x320] ss:$16 sps:$4 sm:$0xff]   ;;  %v10531_v13 = vld [vmem:[#allocation11 + $0x344] ss:$16 sps:$4 sm:$0xff]  }
 0x3ef   : > { %v2264_v44 = vmax.f32 %v1922_v41, 0.0  ;;  %v2266_v45 = vmax.f32 %v2115_v25, 0.0  ;;  %v10561_v20 = vld [vmem:[#allocation11 + $0x34c] ss:$16 sps:$4 sm:$0xff]  }
 0x3f0   : > { %v2371_v46 = vpack.c.bf16 %v2263_v36, %v2259_v35  ;;  %v12068_v47 = vpack.c.bf16 %v2265_v37, %v2261_v33  ;;  %v10529_v36 = vld [vmem:[#allocation11 + $0x340] ss:$16 sps:$4 sm:$0xff]   ;;  %v10559_v37 = vld [vmem:[#allocation11 + $0x348] ss:$16 sps:$4 sm:$0xff]  }
 0x3f1   : > { %v1925_v49 = vpop.f32.mrb[52].mxu0  ;;  %v2118_v50 = vpop.f32.mrb[84].mxu1  ;;  %v2372_v51 = vpack.c.bf16 %v2264_v44, %v2260_v31  ;;  %3417 = vmatpush1.bf16.msra.mxu0 %v10508_v26  ;;  %3803 = vmatpush1.bf16.msra.mxu1 %v10544_v0  ;;  %v12070_v54 = vpack.c.bf16 %v2266_v45, %v2262_v43 }
 0x3f2   : > { %v1926_v55 = vadd.f32 %v1925_v49, %v12001_v22  ;;  %v2119_v56 = vadd.f32 %v2118_v50, %v12004_v28  ;;  %v1927_v57 = vpop.f32.mrb[53].mxu0  ;;  %v2120_v58 = vpop.f32.mrb[85].mxu1  ;;  %3418 = vmatprep.subr.bf16.mxu0 %v10513_v27  ;;  %3804 = vmatprep.subr.bf16.mxu1 %v10552_v38  ;;  %v10564_v49 = vld [vmem:[#allocation11 + $0x36c] ss:$16 sps:$4 sm:$0xff]  }
 0x3f3   : > { %v1928_v61 = vadd.f32 %v1927_v57, %v12007_v29  ;;  %v2121_v1 = vadd.f32 %v2120_v58, %v12010_v30  ;;  %v1929_v3 = vpop.f32.mrb[54].mxu0  ;;  %v2122_v42 = vpop.f32.mrb[86].mxu1  ;;  %3281 = vmatprep.mubr.bf16.mxu0 %v2372_v51  ;;  %3667 = vmatprep.mubr.bf16.mxu1 %v2372_v51 }
 0x3f4   : > { %v1930_v4 = vadd.f32 %v1929_v3, %v12001_v22  ;;  %v2123_v6 = vadd.f32 %v2122_v42, %v12004_v28  ;;  %v1931_v8 = vpop.f32.mrb[55].mxu0  ;;  %v2124_v9 = vpop.f32.mrb[87].mxu1  ;;  %3282 = vmatmul.mubr.bf16.gmra.mrb[112].mxu0 %v2371_v46  ;;  %3668 = vmatmul.mubr.bf16.gmra.mrb[144].mxu1 %v2371_v46  ;;  %v2267_v15 = vmax.f32 %v1926_v55, 0.0  ;;  %v2269_v16 = vmax.f32 %v2119_v56, 0.0  ;;  %v10540_v46 = vld [vmem:[#allocation11 + $0x364] ss:$16 sps:$4 sm:$0xff]  }
 0x3f5   : > { %v1932_v10 = vadd.f32 %v1931_v8, %v12007_v29  ;;  %v2125_v11 = vadd.f32 %v2124_v9, %v12010_v30  ;;  %3419 = vmatpush1.bf16.msra.mxu0 %v10511_v52  ;;  %3805 = vmatpush1.bf16.msra.mxu1 %v10550_v53  ;;  %v2268_v21 = vmax.f32 %v1928_v61, 0.0  ;;  %v2270_v23 = vmax.f32 %v2121_v1, 0.0  ;;  %v10538_v61 = vld [vmem:[#allocation11 + $0x360] ss:$16 sps:$4 sm:$0xff]   ;;  %v10549_v1 = vld [vmem:[#allocation11 + $0x384] ss:$16 sps:$4 sm:$0xff]  }
 0x3f6   : > { %v2271_v19 = vmax.f32 %v1930_v4, 0.0  ;;  %v2273_v18 = vmax.f32 %v2123_v6, 0.0  ;;  %3420 = vmatprep.subr.bf16.mxu0 %v10522_v59  ;;  %3806 = vmatprep.subr.bf16.mxu1 %v10555_v60  ;;  %v10562_v3 = vld [vmem:[#allocation11 + $0x368] ss:$16 sps:$4 sm:$0xff]   ;;  %v10570_v9 = vld [vmem:[#allocation11 + $0x38c] ss:$16 sps:$4 sm:$0xff]  }
 0x3f7   : > { %v2272_v41 = vmax.f32 %v1932_v10, 0.0  ;;  %v2274_v25 = vmax.f32 %v2125_v11, 0.0 }
 0x3f8   : > { %v2375_v26 = vpack.c.bf16 %v2271_v19, %v2267_v15  ;;  %v12080_v27 = vpack.c.bf16 %v2273_v18, %v2269_v16 }
 0x3f9   : > { %v1935_v0 = vpop.f32.mrb[56].mxu0  ;;  %v2128_v35 = vpop.f32.mrb[88].mxu1  ;;  %v2376_v33 = vpack.c.bf16 %v2272_v41, %v2268_v21  ;;  %3421 = vmatpush1.bf16.msra.mxu0 %v10520_v12  ;;  %3807 = vmatpush1.bf16.msra.mxu1 %v10553_v14  ;;  %v12082_v38 = vpack.c.bf16 %v2274_v25, %v2270_v23  ;;  %v10568_v21 = vld [vmem:[#allocation11 + $0x388] ss:$16 sps:$4 sm:$0xff]  }
 0x3fa   : > { %v1936_v31 = vadd.f32 %v1935_v0, %v12001_v22  ;;  %v2129_v43 = vadd.f32 %v2128_v35, %v12004_v28  ;;  %v1937_v44 = vpop.f32.mrb[57].mxu0  ;;  %v2130_v45 = vpop.f32.mrb[89].mxu1  ;;  %3422 = vmatprep.subr.bf16.mxu0 %v10531_v13  ;;  %3808 = vmatprep.subr.bf16.mxu1 %v10561_v20  ;;  %v10547_v20 = vld [vmem:[#allocation11 + $0x380] ss:$16 sps:$4 sm:$0xff]   ;;  %v10558_v35 = vld [vmem:[#allocation11 + $0x3a4] ss:$16 sps:$4 sm:$0xff]  }
 0x3fb   : > { %v1938_v50 = vadd.f32 %v1937_v44, %v12007_v29  ;;  %v2131_v51 = vadd.f32 %v2130_v45, %v12010_v30  ;;  %v1939_v52 = vpop.f32.mrb[58].mxu0  ;;  %v2132_v53 = vpop.f32.mrb[90].mxu1  ;;  %3291 = vmatprep.mubr.bf16.mxu0 %v2376_v33  ;;  %3677 = vmatprep.mubr.bf16.mxu1 %v2376_v33  ;;  %v10573_v33 = vld [vmem:[#allocation11 + $0x3ac] ss:$16 sps:$4 sm:$0xff]  }
 0x3fc   : > { %v1940_v55 = vadd.f32 %v1939_v52, %v12001_v22  ;;  %v2133_v56 = vadd.f32 %v2132_v53, %v12004_v28  ;;  %v1941_v57 = vpop.f32.mrb[59].mxu0  ;;  %v2134_v58 = vpop.f32.mrb[91].mxu1  ;;  %3292 = vmatmul.mubr.bf16.gmra.mrb[116].mxu0 %v2375_v26  ;;  %3678 = vmatmul.mubr.bf16.gmra.mrb[148].mxu1 %v2375_v26  ;;  %v2275_v42 = vmax.f32 %v1936_v31, 0.0  ;;  %v2277_v4 = vmax.f32 %v2129_v43, 0.0  ;;  %v10556_v52 = vld [vmem:[#allocation11 + $0x3a0] ss:$16 sps:$4 sm:$0xff]  }
 0x3fd   : > { %v1942_v59 = vadd.f32 %v1941_v57, %v12007_v29  ;;  %v2135_v60 = vadd.f32 %v2134_v58, %v12010_v30  ;;  %3423 = vmatpush1.bf16.msra.mxu0 %v10529_v36  ;;  %3809 = vmatpush1.bf16.msra.mxu1 %v10559_v37  ;;  %v2276_v10 = vmax.f32 %v1938_v50, 0.0  ;;  %v2278_v11 = vmax.f32 %v2131_v51, 0.0  ;;  %v10567_v53 = vld [vmem:[#allocation11 + $0x3c4] ss:$16 sps:$4 sm:$0xff]  }
 0x3fe   : > { %v2279_v6 = vmax.f32 %v1940_v55, 0.0  ;;  %v2281_v8 = vmax.f32 %v2133_v56, 0.0  ;;  %3424 = vmatprep.subr.bf16.mxu0 %v10540_v46  ;;  %3810 = vmatprep.subr.bf16.mxu1 %v10564_v49  ;;  %v10571_v55 = vld [vmem:[#allocation11 + $0x3a8] ss:$16 sps:$4 sm:$0xff]  }
 0x3ff   : > { %v2280_v12 = vmax.f32 %v1942_v59, 0.0  ;;  %v2282_v13 = vmax.f32 %v2135_v60, 0.0  ;;  %v10579_v60 = vld [vmem:[#allocation11 + $0x3cc] ss:$16 sps:$4 sm:$0xff]  }
 0x400   : > { %v2379_v14 = vpack.c.bf16 %v2279_v6, %v2275_v42  ;;  %v12092_v15 = vpack.c.bf16 %v2281_v8, %v2277_v4 }
 0x401   : > { %v1945_v16 = vpop.f32.mrb[60].mxu0  ;;  %v2138_v19 = vpop.f32.mrb[92].mxu1  ;;  %v2380_v18 = vpack.c.bf16 %v2280_v12, %v2276_v10  ;;  %3425 = vmatpush1.bf16.msra.mxu0 %v10538_v61  ;;  %3811 = vmatpush1.bf16.msra.mxu1 %v10562_v3  ;;  %v12094_v23 = vpack.c.bf16 %v2282_v13, %v2278_v11  ;;  %v10565_v11 = vld [vmem:[#allocation11 + $0x3c0] ss:$16 sps:$4 sm:$0xff]   ;;  %v10577_v12 = vld [vmem:[#allocation11 + $0x3c8] ss:$16 sps:$4 sm:$0xff]  }
 0x402   : > { %v1946_v41 = vadd.f32 %v1945_v16, %v12001_v22  ;;  %v2139_v25 = vadd.f32 %v2138_v19, %v12004_v28  ;;  %v1947_v26 = vpop.f32.mrb[61].mxu0  ;;  %v2140_v0 = vpop.f32.mrb[93].mxu1  ;;  %3426 = vmatprep.subr.bf16.mxu0 %v10549_v1  ;;  %3812 = vmatprep.subr.bf16.mxu1 %v10570_v9 }
 0x403   : > { %v1948_v36 = vadd.f32 %v1947_v26, %v12007_v29  ;;  %v2141_v37 = vadd.f32 %v2140_v0, %v12010_v30  ;;  %v1949_v31 = vpop.f32.mrb[62].mxu0  ;;  %v2142_v43 = vpop.f32.mrb[94].mxu1  ;;  %3301 = vmatprep.mubr.bf16.mxu0 %v2380_v18  ;;  %3687 = vmatprep.mubr.bf16.mxu1 %v2380_v18 }
 0x404   : > { %v1950_v44 = vadd.f32 %v1949_v31, %v12001_v22  ;;  %v2143_v45 = vadd.f32 %v2142_v43, %v12004_v28  ;;  %v1951_v46 = vpop.f32.mrb[63].mxu0  ;;  %v2144_v49 = vpop.f32.mrb[95].mxu1  ;;  %3302 = vmatmul.mubr.bf16.gmra.mrb[120].mxu0 %v2379_v14  ;;  %3688 = vmatmul.mubr.bf16.gmra.mrb[152].mxu1 %v2379_v14  ;;  %v2283_v56 = vmax.f32 %v1946_v41, 0.0  ;;  %v2285_v57 = vmax.f32 %v2139_v25, 0.0 }
 0x405   : > { %v1952_v50 = vadd.f32 %v1951_v46, %v12007_v29  ;;  %v2145_v51 = vadd.f32 %v2144_v49, %v12010_v30  ;;  %3427 = vmatpush1.bf16.msra.mxu0 %v10547_v20  ;;  %3813 = vmatpush1.bf16.msra.mxu1 %v10568_v21  ;;  %v2284_v61 = vmax.f32 %v1948_v36, 0.0  ;;  %v2286_v1 = vmax.f32 %v2141_v37, 0.0  ;;  %v10576_v20 = vld [vmem:[#allocation11 + $0x3e4] ss:$16 sps:$4 sm:$0xff]   ;;  %v10582_v21 = vld [vmem:[#allocation11 + $0x3ec] ss:$16 sps:$4 sm:$0xff]  }
 0x406   : > { %v2287_v58 = vmax.f32 %v1950_v44, 0.0  ;;  %v2289_v59 = vmax.f32 %v2143_v45, 0.0  ;;  %3428 = vmatprep.subr.bf16.mxu0 %v10558_v35  ;;  %3814 = vmatprep.subr.bf16.mxu1 %v10573_v33  ;;  %v10574_v44 = vld [vmem:[#allocation11 + $0x3e0] ss:$16 sps:$4 sm:$0xff]   ;;  %v10580_v45 = vld [vmem:[#allocation11 + $0x3e8] ss:$16 sps:$4 sm:$0xff]  }
 0x407   : > { %v2288_v3 = vmax.f32 %v1952_v50, 0.0  ;;  %v2290_v42 = vmax.f32 %v2145_v51, 0.0 }
 0x408   : > { %v2383_v4 = vpack.c.bf16 %v2287_v58, %v2283_v56  ;;  %v12104_v6 = vpack.c.bf16 %v2289_v59, %v2285_v57 }
 0x409   : > { %v1955_v8 = vpop.f32.mrb[64].mxu0  ;;  %v2148_v9 = vpop.f32.mrb[96].mxu1  ;;  %v2384_v10 = vpack.c.bf16 %v2288_v3, %v2284_v61  ;;  %3429 = vmatpush1.bf16.msra.mxu0 %v10556_v52  ;;  %3815 = vmatpush1.bf16.msra.mxu1 %v10571_v55  ;;  %v12106_v13 = vpack.c.bf16 %v2290_v42, %v2286_v1 }
 0x40a   : > { %v1956_v14 = vadd.f32 %v1955_v8, %v12001_v22  ;;  %v2149_v16 = vadd.f32 %v2148_v9, %v12004_v28  ;;  %v1957_v19 = vpop.f32.mrb[65].mxu0  ;;  %v2150_v18 = vpop.f32.mrb[97].mxu1  ;;  %3430 = vmatprep.subr.bf16.mxu0 %v10567_v53  ;;  %3816 = vmatprep.subr.bf16.mxu1 %v10579_v60 }
 0x40b   : > { %v1958_v41 = vadd.f32 %v1957_v19, %v12007_v29  ;;  %v2151_v25 = vadd.f32 %v2150_v18, %v12010_v30  ;;  %v1959_v26 = vpop.f32.mrb[66].mxu0  ;;  %v2152_v0 = vpop.f32.mrb[98].mxu1  ;;  %3311 = vmatprep.mubr.bf16.mxu0 %v2384_v10  ;;  %3697 = vmatprep.mubr.bf16.mxu1 %v2384_v10 }
 0x40c   : > { %v1960_v35 = vadd.f32 %v1959_v26, %v12001_v22  ;;  %v2153_v33 = vadd.f32 %v2152_v0, %v12004_v28  ;;  %v1961_v36 = vpop.f32.mrb[67].mxu0  ;;  %v2154_v37 = vpop.f32.mrb[99].mxu1  ;;  %3312 = vmatmul.mubr.bf16.gmra.mrb[124].mxu0 %v2383_v4  ;;  %3698 = vmatmul.mubr.bf16.gmra.mrb[156].mxu1 %v2383_v4  ;;  %v2291_v46 = vmax.f32 %v1956_v14, 0.0  ;;  %v2293_v49 = vmax.f32 %v2149_v16, 0.0 }
 0x40d   : > { %v1962_v31 = vadd.f32 %v1961_v36, %v12007_v29  ;;  %v2155_v43 = vadd.f32 %v2154_v37, %v12010_v30  ;;  %3431 = vmatpush1.bf16.msra.mxu0 %v10565_v11  ;;  %3817 = vmatpush1.bf16.msra.mxu1 %v10577_v12  ;;  %v2292_v52 = vmax.f32 %v1958_v41, 0.0  ;;  %v2294_v53 = vmax.f32 %v2151_v25, 0.0 }
 0x40e   : > { %v2295_v50 = vmax.f32 %v1960_v35, 0.0  ;;  %v2297_v51 = vmax.f32 %v2153_v33, 0.0  ;;  %3432 = vmatprep.subr.bf16.mxu0 %v10576_v20  ;;  %3818 = vmatprep.subr.bf16.mxu1 %v10582_v21 }
 0x40f   : > { %v2296_v55 = vmax.f32 %v1962_v31, 0.0  ;;  %v2298_v56 = vmax.f32 %v2155_v43, 0.0 }
 0x410   : > { %v2387_v57 = vpack.c.bf16 %v2295_v50, %v2291_v46  ;;  %v12116_v58 = vpack.c.bf16 %v2297_v51, %v2293_v49 }
 0x411   : > { %v1965_v59 = vpop.f32.mrb[68].mxu0  ;;  %v2158_v60 = vpop.f32.mrb[100].mxu1  ;;  %v2388_v61 = vpack.c.bf16 %v2296_v55, %v2292_v52  ;;  %3433 = vmatpush1.bf16.msra.mxu0 %v10574_v44  ;;  %3819 = vmatpush1.bf16.msra.mxu1 %v10580_v45  ;;  %v12118_v1 = vpack.c.bf16 %v2298_v56, %v2294_v53 }
 0x412   : > { %v1966_v3 = vadd.f32 %v1965_v59, %v12001_v22  ;;  %v2159_v42 = vadd.f32 %v2158_v60, %v12004_v28  ;;  %v1967_v4 = vpop.f32.mrb[69].mxu0  ;;  %v2160_v8 = vpop.f32.mrb[101].mxu1 }
 0x413   : > { %v1968_v9 = vadd.f32 %v1967_v4, %v12007_v29  ;;  %v2161_v10 = vadd.f32 %v2160_v8, %v12010_v30  ;;  %v1969_v11 = vpop.f32.mrb[70].mxu0  ;;  %v2162_v12 = vpop.f32.mrb[102].mxu1  ;;  %3321 = vmatprep.mubr.bf16.mxu0 %v2388_v61  ;;  %3707 = vmatprep.mubr.bf16.mxu1 %v2388_v61 }
 0x414   : > { %v1970_v14 = vadd.f32 %v1969_v11, %v12001_v22  ;;  %v2163_v16 = vadd.f32 %v2162_v12, %v12004_v28  ;;  %v1971_v19 = vpop.f32.mrb[71].mxu0  ;;  %v2164_v18 = vpop.f32.mrb[103].mxu1  ;;  %3322 = vmatmul.mubr.bf16.gmra.mrb[128].mxu0 %v2387_v57  ;;  %3708 = vmatmul.mubr.bf16.gmra.mrb[160].mxu1 %v2387_v57  ;;  %v2299_v41 = vmax.f32 %v1966_v3, 0.0  ;;  %v2301_v25 = vmax.f32 %v2159_v42, 0.0 }
 0x415   : > { %v1972_v20 = vadd.f32 %v1971_v19, %v12007_v29  ;;  %v2165_v21 = vadd.f32 %v2164_v18, %v12010_v30  ;;  %v2300_v35 = vmax.f32 %v1968_v9, 0.0  ;;  %v2302_v33 = vmax.f32 %v2161_v10, 0.0 }
 0x416   : > { %v2303_v26 = vmax.f32 %v1970_v14, 0.0  ;;  %v2305_v0 = vmax.f32 %v2163_v16, 0.0 }
 0x417   : > { %v2304_v36 = vmax.f32 %v1972_v20, 0.0  ;;  %v2306_v37 = vmax.f32 %v2165_v21, 0.0 }
 0x418   : > { %v2391_v31 = vpack.c.bf16 %v2303_v26, %v2299_v41  ;;  %v12128_v43 = vpack.c.bf16 %v2305_v0, %v2301_v25 }
 0x419   : > { %v1975_v44 = vpop.f32.mrb[72].mxu0  ;;  %v2168_v45 = vpop.f32.mrb[104].mxu1  ;;  %v2392_v46 = vpack.c.bf16 %v2304_v36, %v2300_v35  ;;  %v12130_v49 = vpack.c.bf16 %v2306_v37, %v2302_v33 }
 0x41a   : > { %v1976_v50 = vadd.f32 %v1975_v44, %v12001_v22  ;;  %v2169_v51 = vadd.f32 %v2168_v45, %v12004_v28  ;;  %v1977_v52 = vpop.f32.mrb[73].mxu0  ;;  %v2170_v53 = vpop.f32.mrb[105].mxu1 }
 0x41b   : > { %v1978_v55 = vadd.f32 %v1977_v52, %v12007_v29  ;;  %v2171_v56 = vadd.f32 %v2170_v53, %v12010_v30  ;;  %v1979_v57 = vpop.f32.mrb[74].mxu0  ;;  %v2172_v59 = vpop.f32.mrb[106].mxu1  ;;  %3331 = vmatprep.mubr.bf16.mxu0 %v2392_v46  ;;  %3717 = vmatprep.mubr.bf16.mxu1 %v2392_v46 }
 0x41c   : > { %v1980_v60 = vadd.f32 %v1979_v57, %v12001_v22  ;;  %v2173_v61 = vadd.f32 %v2172_v59, %v12004_v28  ;;  %v1981_v3 = vpop.f32.mrb[75].mxu0  ;;  %v2174_v42 = vpop.f32.mrb[107].mxu1  ;;  %3332 = vmatmul.mubr.bf16.gmra.mrb[132].mxu0 %v2391_v31  ;;  %3718 = vmatmul.mubr.bf16.gmra.mrb[164].mxu1 %v2391_v31  ;;  %v2307_v9 = vmax.f32 %v1976_v50, 0.0  ;;  %v2309_v10 = vmax.f32 %v2169_v51, 0.0 }
 0x41d   : > { %v1982_v4 = vadd.f32 %v1981_v3, %v12007_v29  ;;  %v2175_v8 = vadd.f32 %v2174_v42, %v12010_v30  ;;  %v2308_v14 = vmax.f32 %v1978_v55, 0.0  ;;  %v2310_v16 = vmax.f32 %v2171_v56, 0.0 }
 0x41e   : > { %v2311_v11 = vmax.f32 %v1980_v60, 0.0  ;;  %v2313_v12 = vmax.f32 %v2173_v61, 0.0 }
 0x41f   : > { %v2312_v19 = vmax.f32 %v1982_v4, 0.0  ;;  %v2314_v18 = vmax.f32 %v2175_v8, 0.0 }
 0x420   : > { %v2395_v20 = vpack.c.bf16 %v2311_v11, %v2307_v9  ;;  %v12140_v21 = vpack.c.bf16 %v2313_v12, %v2309_v10 }
 0x421   : > { %v1985_v41 = vpop.f32.mrb[76].mxu0  ;;  %v2178_v25 = vpop.f32.mrb[108].mxu1  ;;  %v2396_v26 = vpack.c.bf16 %v2312_v19, %v2308_v14  ;;  %v12142_v0 = vpack.c.bf16 %v2314_v18, %v2310_v16 }
 0x422   : > { %v1986_v35 = vadd.f32 %v1985_v41, %v12001_v22  ;;  %v2179_v33 = vadd.f32 %v2178_v25, %v12004_v28  ;;  %v1987_v36 = vpop.f32.mrb[77].mxu0  ;;  %v2180_v37 = vpop.f32.mrb[109].mxu1 }
 0x423   : > { %v1988_v31 = vadd.f32 %v1987_v36, %v12007_v29  ;;  %v2181_v44 = vadd.f32 %v2180_v37, %v12010_v30  ;;  %v1989_v45 = vpop.f32.mrb[78].mxu0  ;;  %v2182_v46 = vpop.f32.mrb[110].mxu1  ;;  %3341 = vmatprep.mubr.bf16.mxu0 %v2396_v26  ;;  %3727 = vmatprep.mubr.bf16.mxu1 %v2396_v26 }
 0x424   : > { %v1990_v50 = vadd.f32 %v1989_v45, %v12001_v22  ;;  %v2183_v51 = vadd.f32 %v2182_v46, %v12004_v28  ;;  %v1991_v52 = vpop.f32.mrb[79].mxu0  ;;  %v2184_v53 = vpop.f32.mrb[111].mxu1  ;;  %3342 = vmatmul.mubr.bf16.gmra.mrb[136].mxu0 %v2395_v20  ;;  %3728 = vmatmul.mubr.bf16.gmra.mrb[168].mxu1 %v2395_v20  ;;  %v2315_v57 = vmax.f32 %v1986_v35, 0.0  ;;  %v2317_v59 = vmax.f32 %v2179_v33, 0.0 }
 0x425   : > { %v1992_v55 = vadd.f32 %v1991_v52, %v12007_v29  ;;  %v2185_v56 = vadd.f32 %v2184_v53, %v12010_v30  ;;  %v2316_v3 = vmax.f32 %v1988_v31, 0.0  ;;  %v2318_v42 = vmax.f32 %v2181_v44, 0.0 }
 0x426   : > { %v2319_v60 = vmax.f32 %v1990_v50, 0.0  ;;  %v2321_v61 = vmax.f32 %v2183_v51, 0.0  ;;  %v10585_v50 = vld [vmem:[#allocation13 + $0x4] ss:$16 sps:$4 sm:$0xff]  }
 0x427   : > { %v2320_v4 = vmax.f32 %v1992_v55, 0.0  ;;  %v2322_v8 = vmax.f32 %v2185_v56, 0.0  ;;  %4963 = vmatprep.subr.bf16.mxu0 %v10585_v50 }
 0x428   : > { %v2399_v9 = vpack.c.bf16 %v2319_v60, %v2315_v57  ;;  %v12152_v10 = vpack.c.bf16 %v2321_v61, %v2317_v59 }
 0x429   : > { %v1995_v11 = vpop.f32.mrb[80].mxu0  ;;  %v2188_v12 = vpop.f32.mrb[112].mxu1  ;;  %v2400_v14 = vpack.c.bf16 %v2320_v4, %v2316_v3  ;;  %v12154_v16 = vpack.c.bf16 %v2322_v8, %v2318_v42 }
 0x42a   : > { %v1996_v19 = vadd.f32 %v1995_v11, %v12001_v22  ;;  %v2189_v18 = vadd.f32 %v2188_v12, %v12004_v28  ;;  %v1997_v20 = vpop.f32.mrb[81].mxu0  ;;  %v2190_v41 = vpop.f32.mrb[113].mxu1 }
 0x42b   : > { %v1998_v25 = vadd.f32 %v1997_v20, %v12007_v29  ;;  %v2191_v26 = vadd.f32 %v2190_v41, %v12010_v30  ;;  %v1999_v35 = vpop.f32.mrb[82].mxu0  ;;  %v2192_v33 = vpop.f32.mrb[114].mxu1  ;;  %3351 = vmatprep.mubr.bf16.mxu0 %v2400_v14  ;;  %3737 = vmatprep.mubr.bf16.mxu1 %v2400_v14 }
 0x42c   : > { %v2000_v36 = vadd.f32 %v1999_v35, %v12001_v22  ;;  %v2193_v37 = vadd.f32 %v2192_v33, %v12004_v28  ;;  %v2001_v31 = vpop.f32.mrb[83].mxu0  ;;  %v2194_v44 = vpop.f32.mrb[115].mxu1  ;;  %3352 = vmatmul.mubr.bf16.gmra.mrb[140].mxu0 %v2399_v9  ;;  %3738 = vmatmul.mubr.bf16.gmra.mrb[172].mxu1 %v2399_v9  ;;  %v2323_v51 = vmax.f32 %v1996_v19, 0.0  ;;  %v2325_v52 = vmax.f32 %v2189_v18, 0.0 }
 0x42d   : > { %v2002_v45 = vadd.f32 %v2001_v31, %v12007_v29  ;;  %v2195_v46 = vadd.f32 %v2194_v44, %v12010_v30  ;;  %v2324_v56 = vmax.f32 %v1998_v25, 0.0  ;;  %v2326_v57 = vmax.f32 %v2191_v26, 0.0 }
 0x42e   : > { %v2327_v53 = vmax.f32 %v2000_v36, 0.0  ;;  %v2329_v55 = vmax.f32 %v2193_v37, 0.0 }
 0x42f   : > { %v2328_v59 = vmax.f32 %v2002_v45, 0.0  ;;  %v2330_v60 = vmax.f32 %v2195_v46, 0.0 }
 0x430   : > { %v2403_v61 = vpack.c.bf16 %v2327_v53, %v2323_v51  ;;  %v12164_v3 = vpack.c.bf16 %v2329_v55, %v2325_v52 }
 0x431   : > { %v2005_v42 = vpop.f32.mrb[84].mxu0  ;;  %v2198_v4 = vpop.f32.mrb[116].mxu1  ;;  %v2404_v8 = vpack.c.bf16 %v2328_v59, %v2324_v56  ;;  %v12166_v9 = vpack.c.bf16 %v2330_v60, %v2326_v57 }
 0x432   : > { %v2006_v11 = vadd.f32 %v2005_v42, %v12001_v22  ;;  %v2199_v12 = vadd.f32 %v2198_v4, %v12004_v28  ;;  %v2007_v14 = vpop.f32.mrb[85].mxu0  ;;  %v2200_v19 = vpop.f32.mrb[117].mxu1 }
 0x433   : > { %v2008_v18 = vadd.f32 %v2007_v14, %v12007_v29  ;;  %v2201_v20 = vadd.f32 %v2200_v19, %v12010_v30  ;;  %v2009_v41 = vpop.f32.mrb[86].mxu0  ;;  %v2202_v25 = vpop.f32.mrb[118].mxu1  ;;  %3361 = vmatprep.mubr.bf16.mxu0 %v2404_v8  ;;  %3747 = vmatprep.mubr.bf16.mxu1 %v2404_v8 }
 0x434   : > { %v2010_v26 = vadd.f32 %v2009_v41, %v12001_v22  ;;  %v2203_v35 = vadd.f32 %v2202_v25, %v12004_v28  ;;  %v2011_v33 = vpop.f32.mrb[87].mxu0  ;;  %v2204_v36 = vpop.f32.mrb[119].mxu1  ;;  %3362 = vmatmul.mubr.bf16.gmra.mrb[144].mxu0 %v2403_v61  ;;  %3748 = vmatmul.mubr.bf16.gmra.mrb[176].mxu1 %v2403_v61  ;;  %v2331_v44 = vmax.f32 %v2006_v11, 0.0  ;;  %v2333_v45 = vmax.f32 %v2199_v12, 0.0 }
 0x435   : > { %v2012_v37 = vadd.f32 %v2011_v33, %v12007_v29  ;;  %v2205_v31 = vadd.f32 %v2204_v36, %v12010_v30  ;;  %v2332_v51 = vmax.f32 %v2008_v18, 0.0  ;;  %v2334_v52 = vmax.f32 %v2201_v20, 0.0 }
 0x436   : > { %v2335_v46 = vmax.f32 %v2010_v26, 0.0  ;;  %v2337_v50 = vmax.f32 %v2203_v35, 0.0 }
 0x437   : > { %v2336_v53 = vmax.f32 %v2012_v37, 0.0  ;;  %v2338_v55 = vmax.f32 %v2205_v31, 0.0 }
 0x438   : > { %v2407_v56 = vpack.c.bf16 %v2335_v46, %v2331_v44  ;;  %v12176_v57 = vpack.c.bf16 %v2337_v50, %v2333_v45 }
 0x439   : > { %v2015_v59 = vpop.f32.mrb[88].mxu0  ;;  %v2208_v60 = vpop.f32.mrb[120].mxu1  ;;  %v2408_v42 = vpack.c.bf16 %v2336_v53, %v2332_v51  ;;  %v12178_v4 = vpack.c.bf16 %v2338_v55, %v2334_v52 }
 0x43a   : > { %v2016_v61 = vadd.f32 %v2015_v59, %v12001_v22  ;;  %v2209_v8 = vadd.f32 %v2208_v60, %v12004_v28  ;;  %v2017_v11 = vpop.f32.mrb[89].mxu0  ;;  %v2210_v12 = vpop.f32.mrb[121].mxu1 }
 0x43b   : > { %v2018_v14 = vadd.f32 %v2017_v11, %v12007_v29  ;;  %v2211_v19 = vadd.f32 %v2210_v12, %v12010_v30  ;;  %v2019_v18 = vpop.f32.mrb[90].mxu0  ;;  %v2212_v20 = vpop.f32.mrb[122].mxu1  ;;  %3371 = vmatprep.mubr.bf16.mxu0 %v2408_v42  ;;  %3757 = vmatprep.mubr.bf16.mxu1 %v2408_v42 }
 0x43c   : > { %v2020_v41 = vadd.f32 %v2019_v18, %v12001_v22  ;;  %v2213_v25 = vadd.f32 %v2212_v20, %v12004_v28  ;;  %v2021_v26 = vpop.f32.mrb[91].mxu0  ;;  %v2214_v35 = vpop.f32.mrb[123].mxu1  ;;  %3372 = vmatmul.mubr.bf16.gmra.mrb[148].mxu0 %v2407_v56  ;;  %3758 = vmatmul.mubr.bf16.gmra.mrb[180].mxu1 %v2407_v56  ;;  %v2339_v37 = vmax.f32 %v2016_v61, 0.0  ;;  %v2341_v31 = vmax.f32 %v2209_v8, 0.0 }
 0x43d   : > { %v2022_v33 = vadd.f32 %v2021_v26, %v12007_v29  ;;  %v2215_v36 = vadd.f32 %v2214_v35, %v12010_v30  ;;  %v2340_v46 = vmax.f32 %v2018_v14, 0.0  ;;  %v2342_v50 = vmax.f32 %v2211_v19, 0.0 }
 0x43e   : > { %v2343_v44 = vmax.f32 %v2020_v41, 0.0  ;;  %v2345_v45 = vmax.f32 %v2213_v25, 0.0 }
 0x43f   : > { %v2344_v51 = vmax.f32 %v2022_v33, 0.0  ;;  %v2346_v52 = vmax.f32 %v2215_v36, 0.0 }
 0x440   : > { %v2411_v53 = vpack.c.bf16 %v2343_v44, %v2339_v37  ;;  %v12188_v55 = vpack.c.bf16 %v2345_v45, %v2341_v31 }
 0x441   : > { %v2025_v59 = vpop.f32.mrb[92].mxu0  ;;  %v2218_v60 = vpop.f32.mrb[124].mxu1  ;;  %v2412_v42 = vpack.c.bf16 %v2344_v51, %v2340_v46  ;;  %v12190_v11 = vpack.c.bf16 %v2346_v52, %v2342_v50 }
 0x442   : > { %v2026_v56 = vadd.f32 %v2025_v59, %v12001_v22  ;;  %v2219_v12 = vadd.f32 %v2218_v60, %v12004_v28  ;;  %v2027_v61 = vpop.f32.mrb[93].mxu0  ;;  %v2220_v8 = vpop.f32.mrb[125].mxu1 }
 0x443   : > { %v2028_v18 = vadd.f32 %v2027_v61, %v12007_v29  ;;  %v2221_v14 = vadd.f32 %v2220_v8, %v12010_v30  ;;  %v2029_v19 = vpop.f32.mrb[94].mxu0  ;;  %v2222_v20 = vpop.f32.mrb[126].mxu1  ;;  %3381 = vmatprep.mubr.bf16.mxu0 %v2412_v42  ;;  %3767 = vmatprep.mubr.bf16.mxu1 %v2412_v42  ;;  %v10588_v42 = vld [vmem:[#allocation13 + $0x24] ss:$16 sps:$4 sm:$0xff]   ;;  %v10613_v61 = vld [vmem:[#allocation13 + $0x28] ss:$16 sps:$4 sm:$0xff]  }
 0x444   : > { %v2030_v41 = vadd.f32 %v2029_v19, %v12001_v22  ;;  %v2223_v25 = vadd.f32 %v2222_v20, %v12004_v28  ;;  %v2031_v26 = vpop.f32.mrb[95].mxu0  ;;  %v2224_v35 = vpop.f32.mrb[127].mxu1  ;;  %3382 = vmatmul.mubr.bf16.gmra.mrb[152].mxu0 %v2411_v53  ;;  %3768 = vmatmul.mubr.bf16.gmra.mrb[184].mxu1 %v2411_v53  ;;  %v2347_v37 = vmax.f32 %v2026_v56, 0.0  ;;  %v2349_v31 = vmax.f32 %v2219_v12, 0.0  ;;  %v10610_v53 = vld [vmem:[#allocation13 + $0x8] ss:$16 sps:$4 sm:$0xff]  }
 0x445   : > { %v2032_v33 = vadd.f32 %v2031_v26, %v12007_v29  ;;  %v2225_v36 = vadd.f32 %v2224_v35, %v12010_v30  ;;  %v2348_v46 = vmax.f32 %v2028_v18, 0.0  ;;  %v2350_v50 = vmax.f32 %v2221_v14, 0.0  ;;  %v10612_v29 = vld [vmem:[#allocation13 + $0xc] ss:$16 sps:$4 sm:$0xff]   ;;  %v10583_v30 = vld [vmem:[#allocation13] ss:$16 sps:$4 sm:$0xff]  }
 0x446   : > { %v2351_v44 = vmax.f32 %v2030_v41, 0.0  ;;  %v2353_v45 = vmax.f32 %v2223_v25, 0.0  ;;  %5349 = vmatprep.subr.bf16.mxu1 %v10612_v29  ;;  %v10615_v56 = vld [vmem:[#allocation13 + $0x2c] ss:$16 sps:$4 sm:$0xff]   ;;  %v10586_v12 = vld [vmem:[#allocation13 + $0x20] ss:$16 sps:$4 sm:$0xff]  }
 0x447   : > { %v2352_v51 = vmax.f32 %v2032_v33, 0.0  ;;  %v2354_v52 = vmax.f32 %v2225_v36, 0.0  ;;  %v10621_v8 = vld [vmem:[#allocation13 + $0x4c] ss:$16 sps:$4 sm:$0xff]   ;;  %v10589_v18 = vld [vmem:[#allocation13 + $0x40] ss:$16 sps:$4 sm:$0xff]  }
 0x448   : > { %v2415_v59 = vpack.c.bf16 %v2351_v44, %v2347_v37  ;;  %v12200_v22 = vpack.c.bf16 %v2353_v45, %v2349_v31  ;;  %v10619_v14 = vld [vmem:[#allocation13 + $0x48] ss:$16 sps:$4 sm:$0xff]   ;;  %v10594_v19 = vld [vmem:[#allocation13 + $0x64] ss:$16 sps:$4 sm:$0xff]   ;;  %v10630_v25 = vld [vmem:[#allocation13 + $0x8c] ss:$16 sps:$4 sm:$0xff]  }
 0x449   : > { %v2416_v28 = vpack.c.bf16 %v2352_v51, %v2348_v46  ;;  %v12202_v60 = vpack.c.bf16 %v2354_v52, %v2350_v50  ;;  %v10622_v20 = vld [vmem:[#allocation13 + $0x68] ss:$16 sps:$4 sm:$0xff]   ;;  %v10597_v41 = vld [vmem:[#allocation13 + $0x84] ss:$16 sps:$4 sm:$0xff]   ;;  %v10595_v26 = vld [vmem:[#allocation13 + $0x80] ss:$16 sps:$4 sm:$0xff]  }
 0x44a   : > { %v10628_v35 = vld [vmem:[#allocation13 + $0x88] ss:$16 sps:$4 sm:$0xff]   ;;  %v10600_v33 = vld [vmem:[#allocation13 + $0xa4] ss:$16 sps:$4 sm:$0xff]   ;;  %v10639_v31 = vld [vmem:[#allocation13 + $0xcc] ss:$16 sps:$4 sm:$0xff]  }
 0x44b   : > { %3391 = vmatprep.mubr.bf16.mxu0 %v2416_v28  ;;  %3777 = vmatprep.mubr.bf16.mxu1 %v2416_v28  ;;  %v10631_v36 = vld [vmem:[#allocation13 + $0xa8] ss:$16 sps:$4 sm:$0xff]   ;;  %v10603_v37 = vld [vmem:[#allocation13 + $0xc4] ss:$16 sps:$4 sm:$0xff]   ;;  %v10601_v44 = vld [vmem:[#allocation13 + $0xc0] ss:$16 sps:$4 sm:$0xff]  }
 0x44c   : > { %3392 = vmatmul.mubr.bf16.gmra.mrb[156].mxu0 %v2415_v59  ;;  %3778 = vmatmul.mubr.bf16.gmra.mrb[188].mxu1 %v2415_v59  ;;  %v10637_v45 = vld [vmem:[#allocation13 + $0xc8] ss:$16 sps:$4 sm:$0xff]   ;;  %v10606_v46 = vld [vmem:[#allocation13 + $0xe4] ss:$16 sps:$4 sm:$0xff]   ;;  %v10648_v52 = vld [vmem:[#allocation13 + $0x10c] ss:$16 sps:$4 sm:$0xff]  }
 0x44d   : > { %3434 = vmatprep.mubr.bf16.mxu0 %v12022_v5  ;;  %3820 = vmatprep.mubr.bf16.mxu1 %v12022_v5  ;;  %v10591_v5 = vld [vmem:[#allocation13 + $0x44] ss:$16 sps:$4 sm:$0xff]   ;;  %v10640_v50 = vld [vmem:[#allocation13 + $0xe8] ss:$16 sps:$4 sm:$0xff]   ;;  %v10607_v59 = vld [vmem:[#allocation13 + $0x100] ss:$16 sps:$4 sm:$0xff]  }
 0x44e   : > { %v10609_v51 = vld [vmem:[#allocation13 + $0x104] ss:$16 sps:$4 sm:$0xff]   ;;  %v10646_v28 = vld [vmem:[#allocation13 + $0x108] ss:$16 sps:$4 sm:$0xff]  }
 0x44f   : > { %v10618_v29 = vld [vmem:[#allocation13 + $0x124] ss:$16 sps:$4 sm:$0xff]  }
 0x454   : > { %3435 = vmatmul.mubr.bf16.vlgmr.msra.gmra.mrb[96].mxu0 %v12020_v62  ;;  %3821 = vmatmul.mubr.bf16.vlgmr.msra.gmra.mrb[128].mxu1 %v12020_v62  ;;  %v10624_v62 = vld [vmem:[#allocation13 + $0x6c] ss:$16 sps:$4 sm:$0xff]  }
 0x455   : > { %3444 = vmatprep.mubr.bf16.mxu0 %v12034_v48  ;;  %3830 = vmatprep.mubr.bf16.mxu1 %v12034_v48  ;;  %v10592_v48 = vld [vmem:[#allocation13 + $0x60] ss:$16 sps:$4 sm:$0xff]  }
 0x456   : > { %4964 = vmatpush1.bf16.msra.mxu0 %v10583_v30  ;;  %5350 = vmatpush1.bf16.msra.mxu1 %v10610_v53  ;;  %v10649_v30 = vld [vmem:[#allocation13 + $0x128] ss:$16 sps:$4 sm:$0xff]   ;;  %v10627_v53 = vld [vmem:[#allocation13 + $0x144] ss:$16 sps:$4 sm:$0xff]  }
 0x457   : > { %4965 = vmatprep.subr.bf16.mxu0 %v10588_v42  ;;  %5351 = vmatprep.subr.bf16.mxu1 %v10615_v56  ;;  %v10657_v42 = vld [vmem:[#allocation13 + $0x14c] ss:$16 sps:$4 sm:$0xff]   ;;  %v10625_v56 = vld [vmem:[#allocation13 + $0x140] ss:$16 sps:$4 sm:$0xff]  }
 0x45a   : > { %4966 = vmatpush1.bf16.msra.mxu0 %v10586_v12  ;;  %5352 = vmatpush1.bf16.msra.mxu1 %v10613_v61  ;;  %v10655_v12 = vld [vmem:[#allocation13 + $0x148] ss:$16 sps:$4 sm:$0xff]   ;;  %v10636_v61 = vld [vmem:[#allocation13 + $0x164] ss:$16 sps:$4 sm:$0xff]  }
 0x45b   : > { %4967 = vmatprep.subr.bf16.mxu0 %v10591_v5  ;;  %5353 = vmatprep.subr.bf16.mxu1 %v10621_v8  ;;  %v10658_v5 = vld [vmem:[#allocation13 + $0x168] ss:$16 sps:$4 sm:$0xff]   ;;  %v10645_v8 = vld [vmem:[#allocation13 + $0x184] ss:$16 sps:$4 sm:$0xff]  }
 0x45c   : > { %3445 = vmatmul.mubr.bf16.gmra.mrb[100].mxu0 %v12032_v39  ;;  %3831 = vmatmul.mubr.bf16.gmra.mrb[132].mxu1 %v12032_v39  ;;  %v10633_v39 = vld [vmem:[#allocation13 + $0xac] ss:$16 sps:$4 sm:$0xff]  }
 0x45d   : > { %3454 = vmatprep.mubr.bf16.mxu0 %v12046_v2  ;;  %3840 = vmatprep.mubr.bf16.mxu1 %v12046_v2  ;;  %v10598_v2 = vld [vmem:[#allocation13 + $0xa0] ss:$16 sps:$4 sm:$0xff]  }
 0x45e   : > { %4968 = vmatpush1.bf16.msra.mxu0 %v10589_v18  ;;  %5354 = vmatpush1.bf16.msra.mxu1 %v10619_v14  ;;  %v10666_v18 = vld [vmem:[#allocation13 + $0x18c] ss:$16 sps:$4 sm:$0xff]   ;;  %v10643_v14 = vld [vmem:[#allocation13 + $0x180] ss:$16 sps:$4 sm:$0xff]  }
 0x45f   : > { %4969 = vmatprep.subr.bf16.mxu0 %v10594_v19  ;;  %5355 = vmatprep.subr.bf16.mxu1 %v10624_v62  ;;  %v10664_v19 = vld [vmem:[#allocation13 + $0x188] ss:$16 sps:$4 sm:$0xff]   ;;  %v10654_v62 = vld [vmem:[#allocation13 + $0x1a4] ss:$16 sps:$4 sm:$0xff]  }
 0x462   : > { %4970 = vmatpush1.bf16.msra.mxu0 %v10592_v48  ;;  %5356 = vmatpush1.bf16.msra.mxu1 %v10622_v20  ;;  %v10667_v48 = vld [vmem:[#allocation13 + $0x1a8] ss:$16 sps:$4 sm:$0xff]   ;;  %v10663_v20 = vld [vmem:[#allocation13 + $0x1c4] ss:$16 sps:$4 sm:$0xff]  }
 0x463   : > { %4971 = vmatprep.subr.bf16.mxu0 %v10597_v41  ;;  %5357 = vmatprep.subr.bf16.mxu1 %v10630_v25  ;;  %v10661_v41 = vld [vmem:[#allocation13 + $0x1c0] ss:$16 sps:$4 sm:$0xff]  }
 0x464   : > { %3455 = vmatmul.mubr.bf16.gmra.mrb[104].mxu0 %v12044_v17  ;;  %3841 = vmatmul.mubr.bf16.gmra.mrb[136].mxu1 %v12044_v17  ;;  %v10642_v17 = vld [vmem:[#allocation13 + $0xec] ss:$16 sps:$4 sm:$0xff]  }
 0x465   : > { %3464 = vmatprep.mubr.bf16.mxu0 %v12058_v7  ;;  %3850 = vmatprep.mubr.bf16.mxu1 %v12058_v7  ;;  %v10604_v7 = vld [vmem:[#allocation13 + $0xe0] ss:$16 sps:$4 sm:$0xff]  }
 0x466   : > { %4972 = vmatpush1.bf16.msra.mxu0 %v10595_v26  ;;  %5358 = vmatpush1.bf16.msra.mxu1 %v10628_v35 }
 0x467   : > { %4973 = vmatprep.subr.bf16.mxu0 %v10600_v33  ;;  %5359 = vmatprep.subr.bf16.mxu1 %v10633_v39 }
 0x46a   : > { %4974 = vmatpush1.bf16.msra.mxu0 %v10598_v2  ;;  %5360 = vmatpush1.bf16.msra.mxu1 %v10631_v36 }
 0x46b   : > { %4975 = vmatprep.subr.bf16.mxu0 %v10603_v37  ;;  %5361 = vmatprep.subr.bf16.mxu1 %v10639_v31 }
 0x46c   : > { %3465 = vmatmul.mubr.bf16.gmra.mrb[108].mxu0 %v12056_v63  ;;  %3851 = vmatmul.mubr.bf16.gmra.mrb[140].mxu1 %v12056_v63  ;;  %v10651_v63 = vld [vmem:[#allocation13 + $0x12c] ss:$16 sps:$4 sm:$0xff]  }
 0x46d   : > { %3474 = vmatprep.mubr.bf16.mxu0 %v12070_v54  ;;  %3860 = vmatprep.mubr.bf16.mxu1 %v12070_v54  ;;  %v10616_v54 = vld [vmem:[#allocation13 + $0x120] ss:$16 sps:$4 sm:$0xff]  }
 0x46e   : > { %4976 = vmatpush1.bf16.msra.mxu0 %v10601_v44  ;;  %5362 = vmatpush1.bf16.msra.mxu1 %v10637_v45 }
 0x46f   : > { %4977 = vmatprep.subr.bf16.mxu0 %v10606_v46  ;;  %5363 = vmatprep.subr.bf16.mxu1 %v10642_v17 }
 0x472   : > { %4978 = vmatpush1.bf16.msra.mxu0 %v10604_v7  ;;  %5364 = vmatpush1.bf16.msra.mxu1 %v10640_v50 }
 0x473   : > { %4979 = vmatprep.subr.bf16.mxu0 %v10609_v51  ;;  %5365 = vmatprep.subr.bf16.mxu1 %v10648_v52 }
 0x474   : > { %3475 = vmatmul.mubr.bf16.gmra.mrb[112].mxu0 %v12068_v47  ;;  %3861 = vmatmul.mubr.bf16.gmra.mrb[144].mxu1 %v12068_v47  ;;  %v10660_v47 = vld [vmem:[#allocation13 + $0x16c] ss:$16 sps:$4 sm:$0xff]  }
 0x475   : > { %3484 = vmatprep.mubr.bf16.mxu0 %v12082_v38  ;;  %3870 = vmatprep.mubr.bf16.mxu1 %v12082_v38  ;;  %v10634_v38 = vld [vmem:[#allocation13 + $0x160] ss:$16 sps:$4 sm:$0xff]  }
 0x476   : > { %4980 = vmatpush1.bf16.msra.mxu0 %v10607_v59  ;;  %5366 = vmatpush1.bf16.msra.mxu1 %v10646_v28 }
 0x477   : > { %4981 = vmatprep.subr.bf16.mxu0 %v10618_v29  ;;  %5367 = vmatprep.subr.bf16.mxu1 %v10651_v63 }
 0x47a   : > { %4982 = vmatpush1.bf16.msra.mxu0 %v10616_v54  ;;  %5368 = vmatpush1.bf16.msra.mxu1 %v10649_v30 }
 0x47b   : > { %4983 = vmatprep.subr.bf16.mxu0 %v10627_v53  ;;  %5369 = vmatprep.subr.bf16.mxu1 %v10657_v42  ;;  %v10679_v42 = vld [vmem:[#allocation13 + $0x200] ss:$16 sps:$4 sm:$0xff]  }
 0x47c   : > { %3485 = vmatmul.mubr.bf16.gmra.mrb[116].mxu0 %v12080_v27  ;;  %3871 = vmatmul.mubr.bf16.gmra.mrb[148].mxu1 %v12080_v27  ;;  %v10669_v27 = vld [vmem:[#allocation13 + $0x1ac] ss:$16 sps:$4 sm:$0xff]  }
 0x47d   : > { %3494 = vmatprep.mubr.bf16.mxu0 %v12094_v23  ;;  %3880 = vmatprep.mubr.bf16.mxu1 %v12094_v23  ;;  %v10652_v23 = vld [vmem:[#allocation13 + $0x1a0] ss:$16 sps:$4 sm:$0xff]  }
 0x47e   : > { %4984 = vmatpush1.bf16.msra.mxu0 %v10625_v56  ;;  %5370 = vmatpush1.bf16.msra.mxu1 %v10655_v12  ;;  %v10706_v56 = vld [vmem:[#allocation13 + $0x208] ss:$16 sps:$4 sm:$0xff]  }
 0x47f   : > { %4985 = vmatprep.subr.bf16.mxu0 %v10636_v61  ;;  %5371 = vmatprep.subr.bf16.mxu1 %v10660_v47 }
 0x482   : > { %4986 = vmatpush1.bf16.msra.mxu0 %v10634_v38  ;;  %5372 = vmatpush1.bf16.msra.mxu1 %v10658_v5  ;;  %v10684_v5 = vld [vmem:[#allocation13 + $0x224] ss:$16 sps:$4 sm:$0xff]  }
 0x483   : > { %4987 = vmatprep.subr.bf16.mxu0 %v10645_v8  ;;  %5373 = vmatprep.subr.bf16.mxu1 %v10666_v18  ;;  %v10711_v8 = vld [vmem:[#allocation13 + $0x22c] ss:$16 sps:$4 sm:$0xff]  }
 0x484   : > { %3495 = vmatmul.mubr.bf16.gmra.mrb[120].mxu0 %v12092_v15  ;;  %3881 = vmatmul.mubr.bf16.gmra.mrb[152].mxu1 %v12092_v15  ;;  %v10675_v15 = vld [vmem:[#allocation13 + $0x1cc] ss:$16 sps:$4 sm:$0xff]  }
 0x485   : > { %3504 = vmatprep.mubr.bf16.mxu0 %v12106_v13  ;;  %3890 = vmatprep.mubr.bf16.mxu1 %v12106_v13  ;;  %v10672_v13 = vld [vmem:[#allocation13 + $0x1e4] ss:$16 sps:$4 sm:$0xff]  }
 0x486   : > { %4988 = vmatpush1.bf16.msra.mxu0 %v10643_v14  ;;  %5374 = vmatpush1.bf16.msra.mxu1 %v10664_v19 }
 0x487   : > { %4989 = vmatprep.subr.bf16.mxu0 %v10654_v62  ;;  %5375 = vmatprep.subr.bf16.mxu1 %v10669_v27 }
 0x48a   : > { %4990 = vmatpush1.bf16.msra.mxu0 %v10652_v23  ;;  %5376 = vmatpush1.bf16.msra.mxu1 %v10667_v48 }
 0x48b   : > { %4991 = vmatprep.subr.bf16.mxu0 %v10663_v20  ;;  %5377 = vmatprep.subr.bf16.mxu1 %v10675_v15 }
 0x48c   : > { %3505 = vmatmul.mubr.bf16.gmra.mrb[124].mxu0 %v12104_v6  ;;  %3891 = vmatmul.mubr.bf16.gmra.mrb[156].mxu1 %v12104_v6  ;;  %v10673_v6 = vld [vmem:[#allocation13 + $0x1c8] ss:$16 sps:$4 sm:$0xff]  }
 0x48d   : > { %3514 = vmatprep.mubr.bf16.mxu0 %v12118_v1  ;;  %3900 = vmatprep.mubr.bf16.mxu1 %v12118_v1  ;;  %v10670_v1 = vld [vmem:[#allocation13 + $0x1e0] ss:$16 sps:$4 sm:$0xff]  }
 0x48e   : > { %4992 = vmatpush1.bf16.msra.mxu0 %v10661_v41  ;;  %5378 = vmatpush1.bf16.msra.mxu1 %v10673_v6  ;;  %v10682_v6 = vld [vmem:[#allocation13 + $0x220] ss:$16 sps:$4 sm:$0xff]  }
 0x48f   : > { %4993 = vmatprep.subr.bf16.mxu0 %v10672_v13  ;;  %v10687_v13 = vld [vmem:[#allocation13 + $0x244] ss:$16 sps:$4 sm:$0xff]  }
 0x492   : > { %4994 = vmatpush1.bf16.msra.mxu0 %v10670_v1 }
 0x494   : > { %3515 = vmatmul.mubr.bf16.gmra.mrb[128].mxu0 %v12116_v58  ;;  %3901 = vmatmul.mubr.bf16.gmra.mrb[160].mxu1 %v12116_v58  ;;  %v10678_v58 = vld [vmem:[#allocation13 + $0x1ec] ss:$16 sps:$4 sm:$0xff]  }
 0x495   : > { %3524 = vmatprep.mubr.bf16.mxu0 %v12130_v49  ;;  %3910 = vmatprep.mubr.bf16.mxu1 %v12130_v49  ;;  %v10681_v49 = vld [vmem:[#allocation13 + $0x204] ss:$16 sps:$4 sm:$0xff]  }
 0x496   : > { %5379 = vmatprep.subr.bf16.mxu1 %v10678_v58  ;;  %5156 = vmatprep.subr.bf16.mxu0 %v10681_v49  ;;  %v10709_v58 = vld [vmem:[#allocation13 + $0x228] ss:$16 sps:$4 sm:$0xff]  }
 0x49c   : > { %3525 = vmatmul.mubr.bf16.gmra.mrb[132].mxu0 %v12128_v43  ;;  %3911 = vmatmul.mubr.bf16.gmra.mrb[164].mxu1 %v12128_v43  ;;  %v10676_v43 = vld [vmem:[#allocation13 + $0x1e8] ss:$16 sps:$4 sm:$0xff]  }
 0x49d   : > { %3534 = vmatprep.mubr.bf16.mxu0 %v12142_v0  ;;  %3920 = vmatprep.mubr.bf16.mxu1 %v12142_v0  ;;  %v2547_v0 = vld [vmem:[%s13395_s17] sm:$0xf] }
 0x49e   : > { %5380 = vmatpush1.bf16.msra.mxu1 %v10676_v43 }
 0x4a4   : > { %3535 = vmatmul.mubr.bf16.gmra.mrb[136].mxu0 %v12140_v21  ;;  %3921 = vmatmul.mubr.bf16.gmra.mrb[168].mxu1 %v12140_v21  ;;  %v10708_v21 = vld [vmem:[#allocation13 + $0x20c] ss:$16 sps:$4 sm:$0xff]  }
 0x4a5   : > { %3544 = vmatprep.mubr.bf16.mxu0 %v12154_v16  ;;  %3930 = vmatprep.mubr.bf16.mxu1 %v12154_v16  ;;  %v12275_v16 = vrot.slane %v2547_v0, %v11992_v24 }
 0x4a6   : > { %5542 = vmatprep.subr.bf16.mxu1 %v10708_v21 }
 0x4ac   : > { %3545 = vmatmul.mubr.bf16.gmra.mrb[140].mxu0 %v12152_v10  ;;  %3931 = vmatmul.mubr.bf16.gmra.mrb[172].mxu1 %v12152_v10  ;;  %v12272_v10 = vrot.slane %v2547_v0, %v11913_v32 }
 0x4ad   : > { %3554 = vmatprep.mubr.bf16.mxu0 %v12166_v9  ;;  %3940 = vmatprep.mubr.bf16.mxu1 %v12166_v9  ;;  %v12281_v9 = vrot.slane %v2547_v0, %v11998_v40 }
 0x4b4   : > { %3555 = vmatmul.mubr.bf16.gmra.mrb[144].mxu0 %v12164_v3  ;;  %3941 = vmatmul.mubr.bf16.gmra.mrb[176].mxu1 %v12164_v3  ;;  %v12278_v3 = vrot.slane %v2547_v0, %v11919_v34  ;;  %v10717_v0 = vld [vmem:[#allocation13 + $0x24c] ss:$16 sps:$4 sm:$0xff]  }
 0x4b5   : > { %3564 = vmatprep.mubr.bf16.mxu0 %v12178_v4  ;;  %3950 = vmatprep.mubr.bf16.mxu1 %v12178_v4 }
 0x4bc   : > { %3565 = vmatmul.mubr.bf16.gmra.mrb[148].mxu0 %v12176_v57  ;;  %3951 = vmatmul.mubr.bf16.gmra.mrb[180].mxu1 %v12176_v57 }
 0x4bd   : > { %3574 = vmatprep.mubr.bf16.mxu0 %v12190_v11  ;;  %3960 = vmatprep.mubr.bf16.mxu1 %v12190_v11 }
 0x4c4   : > { %3575 = vmatmul.mubr.bf16.gmra.mrb[152].mxu0 %v12188_v55  ;;  %3961 = vmatmul.mubr.bf16.gmra.mrb[184].mxu1 %v12188_v55 }
 0x4c5   : > { %3584 = vmatprep.mubr.bf16.mxu0 %v12202_v60  ;;  %3970 = vmatprep.mubr.bf16.mxu1 %v12202_v60 }
 0x4cc   : > { %3585 = vmatmul.mubr.bf16.gmra.mrb[156].mxu0 %v12200_v22  ;;  %3971 = vmatmul.mubr.bf16.gmra.mrb[188].mxu1 %v12200_v22 }
 0x527   : > { %v3436_v57 = vpop.f32.mrb[96].mxu0  ;;  %v3822_v4 = vpop.f32.mrb[128].mxu1 }
 0x528   : > { %v9343_v55 = vadd.f32 %v3436_v57, %v12272_v10  ;;  %v9407_v11 = vadd.f32 %v3822_v4, %v12275_v16  ;;  %v3438_v22 = vpop.f32.mrb[97].mxu0  ;;  %v3824_v60 = vpop.f32.mrb[129].mxu1 }
 0x529   : > { %v9344_v25 = vadd.f32 %v3438_v22, %v12278_v3  ;;  %v9408_v26 = vadd.f32 %v3824_v60, %v12281_v9  ;;  %v3440_v35 = vpop.f32.mrb[98].mxu0  ;;  %v3826_v33 = vpop.f32.mrb[130].mxu1 }
 0x52a   : > { %v9345_v39 = vadd.f32 %v3440_v35, %v12272_v10  ;;  %v9409_v2 = vadd.f32 %v3826_v33, %v12275_v16  ;;  %v3442_v36 = vpop.f32.mrb[99].mxu0  ;;  %v3828_v37 = vpop.f32.mrb[131].mxu1  ;;  %v3981_v45 = vmax.f32 %v9343_v55, 0.0  ;;  %v3983_v46 = vmax.f32 %v9407_v11, 0.0 }
 0x52b   : > { %v9346_v31 = vadd.f32 %v3442_v36, %v12278_v3  ;;  %v9410_v44 = vadd.f32 %v3828_v37, %v12281_v9  ;;  %v3982_v50 = vmax.f32 %v9344_v25, 0.0  ;;  %v3984_v51 = vmax.f32 %v9408_v26, 0.0 }
 0x52c   : > { %v3985_v17 = vmax.f32 %v9345_v39, 0.0  ;;  %v3987_v7 = vmax.f32 %v9409_v2, 0.0  ;;  %v10685_v39 = vld [vmem:[#allocation13 + $0x240] ss:$16 sps:$4 sm:$0xff]   ;;  %v10715_v2 = vld [vmem:[#allocation13 + $0x248] ss:$16 sps:$4 sm:$0xff]  }
 0x52d   : > { %v3986_v52 = vmax.f32 %v9346_v31, 0.0  ;;  %v3988_v59 = vmax.f32 %v9410_v44, 0.0 }
 0x52e   : > { %v4109_v28 = vpack.c.bf16 %v3985_v17, %v3981_v45  ;;  %v12291_v29 = vpack.c.bf16 %v3987_v7, %v3983_v46  ;;  %v10690_v45 = vld [vmem:[#allocation13 + $0x264] ss:$16 sps:$4 sm:$0xff]   ;;  %v10720_v46 = vld [vmem:[#allocation13 + $0x26c] ss:$16 sps:$4 sm:$0xff]  }
 0x52f   : > { %v12293_v63 = vpack.c.bf16 %v3988_v59, %v3984_v51  ;;  %v3446_v54 = vpop.f32.mrb[100].mxu0  ;;  %v3832_v30 = vpop.f32.mrb[132].mxu1  ;;  %v4110_v53 = vpack.c.bf16 %v3986_v52, %v3982_v50 }
 0x530   : > { %v9347_v12 = vadd.f32 %v3446_v54, %v12272_v10  ;;  %v9411_v61 = vadd.f32 %v3832_v30, %v12275_v16  ;;  %v3448_v47 = vpop.f32.mrb[101].mxu0  ;;  %v3834_v38 = vpop.f32.mrb[133].mxu1 }
 0x531   : > { %v9348_v18 = vadd.f32 %v3448_v47, %v12278_v3  ;;  %v9412_v14 = vadd.f32 %v3834_v38, %v12281_v9  ;;  %v3450_v19 = vpop.f32.mrb[102].mxu0  ;;  %v3836_v62 = vpop.f32.mrb[134].mxu1  ;;  %4995 = vmatprep.mubr.bf16.mxu0 %v4110_v53  ;;  %5381 = vmatprep.mubr.bf16.mxu1 %v4110_v53 }
 0x532   : > { %v9349_v27 = vadd.f32 %v3450_v19, %v12272_v10  ;;  %v9413_v23 = vadd.f32 %v3836_v62, %v12275_v16  ;;  %v3452_v48 = vpop.f32.mrb[103].mxu0  ;;  %v3838_v20 = vpop.f32.mrb[135].mxu1  ;;  %4996 = vmatmul.mubr.bf16.vlgmr.msra.gmra.mrb[160].mxu0 %v4109_v28  ;;  %5382 = vmatmul.mubr.bf16.vlgmr.msra.gmra.mrb[192].mxu1 %v4109_v28  ;;  %v3989_v1 = vmax.f32 %v9347_v12, 0.0  ;;  %v3991_v43 = vmax.f32 %v9411_v61, 0.0  ;;  %v10718_v12 = vld [vmem:[#allocation13 + $0x268] ss:$16 sps:$4 sm:$0xff]  }
 0x533   : > { %v9350_v41 = vadd.f32 %v3452_v48, %v12278_v3  ;;  %v9414_v15 = vadd.f32 %v3838_v20, %v12281_v9  ;;  %5157 = vmatpush1.bf16.msra.mxu0 %v10679_v42  ;;  %5543 = vmatpush1.bf16.msra.mxu1 %v10706_v56  ;;  %v3990_v57 = vmax.f32 %v9348_v18, 0.0  ;;  %v3992_v4 = vmax.f32 %v9412_v14, 0.0  ;;  %v10688_v42 = vld [vmem:[#allocation13 + $0x260] ss:$16 sps:$4 sm:$0xff]   ;;  %v10693_v56 = vld [vmem:[#allocation13 + $0x284] ss:$16 sps:$4 sm:$0xff]  }
 0x534   : > { %v3993_v49 = vmax.f32 %v9349_v27, 0.0  ;;  %v3995_v21 = vmax.f32 %v9413_v23, 0.0  ;;  %5158 = vmatprep.subr.bf16.mxu0 %v10684_v5  ;;  %5544 = vmatprep.subr.bf16.mxu1 %v10711_v8  ;;  %v10726_v8 = vld [vmem:[#allocation13 + $0x28c] ss:$16 sps:$4 sm:$0xff]  }
 0x535   : > { %v3994_v55 = vmax.f32 %v9350_v41, 0.0  ;;  %v3996_v11 = vmax.f32 %v9414_v15, 0.0 }
 0x536   : > { %v12303_v22 = vpack.c.bf16 %v3995_v21, %v3991_v43  ;;  %v4113_v60 = vpack.c.bf16 %v3993_v49, %v3989_v1  ;;  %v10696_v21 = vld [vmem:[#allocation13 + $0x2a4] ss:$16 sps:$4 sm:$0xff]  }
 0x537   : > { %v12305_v25 = vpack.c.bf16 %v3996_v11, %v3992_v4  ;;  %v3456_v26 = vpop.f32.mrb[104].mxu0  ;;  %v3842_v35 = vpop.f32.mrb[136].mxu1  ;;  %v4114_v33 = vpack.c.bf16 %v3994_v55, %v3990_v57  ;;  %5159 = vmatpush1.bf16.msra.mxu0 %v10682_v6  ;;  %5545 = vmatpush1.bf16.msra.mxu1 %v10709_v58  ;;  %v10691_v6 = vld [vmem:[#allocation13 + $0x280] ss:$16 sps:$4 sm:$0xff]  }
 0x538   : > { %v9351_v36 = vadd.f32 %v3456_v26, %v12272_v10  ;;  %v9415_v37 = vadd.f32 %v3842_v35, %v12275_v16  ;;  %v3458_v31 = vpop.f32.mrb[105].mxu0  ;;  %v3844_v44 = vpop.f32.mrb[137].mxu1  ;;  %5160 = vmatprep.subr.bf16.mxu0 %v10687_v13  ;;  %5546 = vmatprep.subr.bf16.mxu1 %v10717_v0  ;;  %v10724_v13 = vld [vmem:[#allocation13 + $0x288] ss:$16 sps:$4 sm:$0xff]   ;;  %v10729_v0 = vld [vmem:[#allocation13 + $0x2ac] ss:$16 sps:$4 sm:$0xff]  }
 0x539   : > { %v9352_v17 = vadd.f32 %v3458_v31, %v12278_v3  ;;  %v9416_v7 = vadd.f32 %v3844_v44, %v12281_v9  ;;  %v3460_v50 = vpop.f32.mrb[106].mxu0  ;;  %v3846_v51 = vpop.f32.mrb[138].mxu1  ;;  %5005 = vmatprep.mubr.bf16.mxu0 %v4114_v33  ;;  %5391 = vmatprep.mubr.bf16.mxu1 %v4114_v33  ;;  %v10727_v31 = vld [vmem:[#allocation13 + $0x2a8] ss:$16 sps:$4 sm:$0xff]  }
 0x53a   : > { %v9353_v52 = vadd.f32 %v3460_v50, %v12272_v10  ;;  %v9417_v59 = vadd.f32 %v3846_v51, %v12275_v16  ;;  %v3462_v28 = vpop.f32.mrb[107].mxu0  ;;  %v3848_v54 = vpop.f32.mrb[139].mxu1  ;;  %5006 = vmatmul.mubr.bf16.gmra.mrb[164].mxu0 %v4113_v60  ;;  %5392 = vmatmul.mubr.bf16.gmra.mrb[196].mxu1 %v4113_v60  ;;  %v3997_v61 = vmax.f32 %v9351_v36, 0.0  ;;  %v3999_v47 = vmax.f32 %v9415_v37, 0.0  ;;  %v10694_v36 = vld [vmem:[#allocation13 + $0x2a0] ss:$16 sps:$4 sm:$0xff]  }
 0x53b   : > { %v9354_v30 = vadd.f32 %v3462_v28, %v12278_v3  ;;  %v9418_v53 = vadd.f32 %v3848_v54, %v12281_v9  ;;  %5161 = vmatpush1.bf16.msra.mxu0 %v10685_v39  ;;  %5547 = vmatpush1.bf16.msra.mxu1 %v10715_v2  ;;  %v3998_v18 = vmax.f32 %v9352_v17, 0.0  ;;  %v4000_v14 = vmax.f32 %v9416_v7, 0.0  ;;  %v10699_v37 = vld [vmem:[#allocation13 + $0x2c4] ss:$16 sps:$4 sm:$0xff]   ;;  %v10735_v7 = vld [vmem:[#allocation13 + $0x2cc] ss:$16 sps:$4 sm:$0xff]  }
 0x53c   : > { %v4001_v38 = vmax.f32 %v9353_v52, 0.0  ;;  %v4003_v5 = vmax.f32 %v9417_v59, 0.0  ;;  %5162 = vmatprep.subr.bf16.mxu0 %v10690_v45  ;;  %5548 = vmatprep.subr.bf16.mxu1 %v10720_v46 }
 0x53d   : > { %v4002_v19 = vmax.f32 %v9354_v30, 0.0  ;;  %v4004_v62 = vmax.f32 %v9418_v53, 0.0 }
 0x53e   : > { %v12315_v27 = vpack.c.bf16 %v4003_v5, %v3999_v47  ;;  %v4117_v23 = vpack.c.bf16 %v4001_v38, %v3997_v61  ;;  %v10733_v61 = vld [vmem:[#allocation13 + $0x2c8] ss:$16 sps:$4 sm:$0xff]  }
 0x53f   : > { %v12317_v48 = vpack.c.bf16 %v4004_v62, %v4000_v14  ;;  %v3466_v20 = vpop.f32.mrb[108].mxu0  ;;  %v3852_v41 = vpop.f32.mrb[140].mxu1  ;;  %v4118_v15 = vpack.c.bf16 %v4002_v19, %v3998_v18  ;;  %5163 = vmatpush1.bf16.msra.mxu0 %v10688_v42  ;;  %5549 = vmatpush1.bf16.msra.mxu1 %v10718_v12  ;;  %v10697_v12 = vld [vmem:[#allocation13 + $0x2c0] ss:$16 sps:$4 sm:$0xff]   ;;  %v10702_v18 = vld [vmem:[#allocation13 + $0x2e4] ss:$16 sps:$4 sm:$0xff]  }
 0x540   : > { %v9355_v58 = vadd.f32 %v3466_v20, %v12272_v10  ;;  %v9419_v1 = vadd.f32 %v3852_v41, %v12275_v16  ;;  %v3468_v43 = vpop.f32.mrb[109].mxu0  ;;  %v3854_v49 = vpop.f32.mrb[141].mxu1  ;;  %5164 = vmatprep.subr.bf16.mxu0 %v10693_v56  ;;  %5550 = vmatprep.subr.bf16.mxu1 %v10726_v8  ;;  %v10738_v14 = vld [vmem:[#allocation13 + $0x2ec] ss:$16 sps:$4 sm:$0xff]  }
 0x541   : > { %v9356_v57 = vadd.f32 %v3468_v43, %v12278_v3  ;;  %v9420_v4 = vadd.f32 %v3854_v49, %v12281_v9  ;;  %v3470_v55 = vpop.f32.mrb[110].mxu0  ;;  %v3856_v11 = vpop.f32.mrb[142].mxu1  ;;  %5015 = vmatprep.mubr.bf16.mxu0 %v4118_v15  ;;  %5401 = vmatprep.mubr.bf16.mxu1 %v4118_v15  ;;  %v10700_v43 = vld [vmem:[#allocation13 + $0x2e0] ss:$16 sps:$4 sm:$0xff]   ;;  %v10705_v49 = vld [vmem:[#allocation13 + $0x304] ss:$16 sps:$4 sm:$0xff]  }
 0x542   : > { %v9357_v60 = vadd.f32 %v3470_v55, %v12272_v10  ;;  %v9421_v26 = vadd.f32 %v3856_v11, %v12275_v16  ;;  %v3472_v35 = vpop.f32.mrb[111].mxu0  ;;  %v3858_v33 = vpop.f32.mrb[143].mxu1  ;;  %5016 = vmatmul.mubr.bf16.gmra.mrb[168].mxu0 %v4117_v23  ;;  %5402 = vmatmul.mubr.bf16.gmra.mrb[200].mxu1 %v4117_v23  ;;  %v4005_v44 = vmax.f32 %v9355_v58, 0.0  ;;  %v4007_v45 = vmax.f32 %v9419_v1, 0.0  ;;  %v10744_v11 = vld [vmem:[#allocation13 + $0x30c] ss:$16 sps:$4 sm:$0xff]  }
 0x543   : > { %v9358_v39 = vadd.f32 %v3472_v35, %v12278_v3  ;;  %v9422_v2 = vadd.f32 %v3858_v33, %v12281_v9  ;;  %5165 = vmatpush1.bf16.msra.mxu0 %v10691_v6  ;;  %5551 = vmatpush1.bf16.msra.mxu1 %v10724_v13  ;;  %v4006_v50 = vmax.f32 %v9356_v57, 0.0  ;;  %v4008_v51 = vmax.f32 %v9420_v4, 0.0 }
 0x544   : > { %v4009_v46 = vmax.f32 %v9357_v60, 0.0  ;;  %v4011_v17 = vmax.f32 %v9421_v26, 0.0  ;;  %5166 = vmatprep.subr.bf16.mxu0 %v10696_v21  ;;  %5552 = vmatprep.subr.bf16.mxu1 %v10729_v0  ;;  %v10736_v21 = vld [vmem:[#allocation13 + $0x2e8] ss:$16 sps:$4 sm:$0xff]  }
 0x545   : > { %v4010_v52 = vmax.f32 %v9358_v39, 0.0  ;;  %v4012_v59 = vmax.f32 %v9422_v2, 0.0 }
 0x546   : > { %v12327_v28 = vpack.c.bf16 %v4011_v17, %v4007_v45  ;;  %v4121_v54 = vpack.c.bf16 %v4009_v46, %v4005_v44  ;;  %v10703_v45 = vld [vmem:[#allocation13 + $0x300] ss:$16 sps:$4 sm:$0xff]   ;;  %v10742_v46 = vld [vmem:[#allocation13 + $0x308] ss:$16 sps:$4 sm:$0xff]  }
 0x547   : > { %v12329_v30 = vpack.c.bf16 %v4012_v59, %v4008_v51  ;;  %v3476_v53 = vpop.f32.mrb[112].mxu0  ;;  %v3862_v42 = vpop.f32.mrb[144].mxu1  ;;  %v4122_v56 = vpack.c.bf16 %v4010_v52, %v4006_v50  ;;  %5167 = vmatpush1.bf16.msra.mxu0 %v10694_v36  ;;  %5553 = vmatpush1.bf16.msra.mxu1 %v10727_v31  ;;  %v10714_v52 = vld [vmem:[#allocation13 + $0x324] ss:$16 sps:$4 sm:$0xff]   ;;  %v10747_v59 = vld [vmem:[#allocation13 + $0x32c] ss:$16 sps:$4 sm:$0xff]  }
 0x548   : > { %v9359_v47 = vadd.f32 %v3476_v53, %v12272_v10  ;;  %v9423_v38 = vadd.f32 %v3862_v42, %v12275_v16  ;;  %v3478_v5 = vpop.f32.mrb[113].mxu0  ;;  %v3864_v8 = vpop.f32.mrb[145].mxu1  ;;  %5168 = vmatprep.subr.bf16.mxu0 %v10699_v37  ;;  %5554 = vmatprep.subr.bf16.mxu1 %v10735_v7 }
 0x549   : > { %v9360_v19 = vadd.f32 %v3478_v5, %v12278_v3  ;;  %v9424_v62 = vadd.f32 %v3864_v8, %v12281_v9  ;;  %v3480_v23 = vpop.f32.mrb[114].mxu0  ;;  %v3866_v20 = vpop.f32.mrb[146].mxu1  ;;  %5025 = vmatprep.mubr.bf16.mxu0 %v4122_v56  ;;  %5411 = vmatprep.mubr.bf16.mxu1 %v4122_v56 }
 0x54a   : > { %v9361_v41 = vadd.f32 %v3480_v23, %v12272_v10  ;;  %v9425_v15 = vadd.f32 %v3866_v20, %v12275_v16  ;;  %v3482_v6 = vpop.f32.mrb[115].mxu0  ;;  %v3868_v13 = vpop.f32.mrb[147].mxu1  ;;  %5026 = vmatmul.mubr.bf16.gmra.mrb[172].mxu0 %v4121_v54  ;;  %5412 = vmatmul.mubr.bf16.gmra.mrb[204].mxu1 %v4121_v54  ;;  %v4013_v0 = vmax.f32 %v9359_v47, 0.0  ;;  %v4015_v57 = vmax.f32 %v9423_v38, 0.0 }
 0x54b   : > { %v9362_v58 = vadd.f32 %v3482_v6, %v12278_v3  ;;  %v9426_v1 = vadd.f32 %v3868_v13, %v12281_v9  ;;  %5169 = vmatpush1.bf16.msra.mxu0 %v10697_v12  ;;  %5555 = vmatpush1.bf16.msra.mxu1 %v10733_v61  ;;  %v4014_v60 = vmax.f32 %v9360_v19, 0.0  ;;  %v4016_v26 = vmax.f32 %v9424_v62, 0.0  ;;  %v10745_v19 = vld [vmem:[#allocation13 + $0x328] ss:$16 sps:$4 sm:$0xff]  }
 0x54c   : > { %v4017_v4 = vmax.f32 %v9361_v41, 0.0  ;;  %v4019_v55 = vmax.f32 %v9425_v15, 0.0  ;;  %5170 = vmatprep.subr.bf16.mxu0 %v10702_v18  ;;  %5556 = vmatprep.subr.bf16.mxu1 %v10738_v14  ;;  %v10712_v18 = vld [vmem:[#allocation13 + $0x320] ss:$16 sps:$4 sm:$0xff]   ;;  %v10723_v14 = vld [vmem:[#allocation13 + $0x344] ss:$16 sps:$4 sm:$0xff]  }
 0x54d   : > { %v4018_v35 = vmax.f32 %v9362_v58, 0.0  ;;  %v4020_v33 = vmax.f32 %v9426_v1, 0.0  ;;  %v10753_v15 = vld [vmem:[#allocation13 + $0x34c] ss:$16 sps:$4 sm:$0xff]  }
 0x54e   : > { %v4125_v39 = vpack.c.bf16 %v4017_v4, %v4013_v0  ;;  %v12339_v2 = vpack.c.bf16 %v4019_v55, %v4015_v57  ;;  %v10721_v55 = vld [vmem:[#allocation13 + $0x340] ss:$16 sps:$4 sm:$0xff]  }
 0x54f   : > { %v4126_v36 = vpack.c.bf16 %v4018_v35, %v4014_v60  ;;  %v12341_v37 = vpack.c.bf16 %v4020_v33, %v4016_v26  ;;  %v3486_v31 = vpop.f32.mrb[116].mxu0  ;;  %v3872_v44 = vpop.f32.mrb[148].mxu1  ;;  %5171 = vmatpush1.bf16.msra.mxu0 %v10700_v43  ;;  %5557 = vmatpush1.bf16.msra.mxu1 %v10736_v21 }
 0x550   : > { %v9363_v17 = vadd.f32 %v3486_v31, %v12272_v10  ;;  %v9427_v7 = vadd.f32 %v3872_v44, %v12275_v16  ;;  %v3488_v50 = vpop.f32.mrb[117].mxu0  ;;  %v3874_v51 = vpop.f32.mrb[149].mxu1  ;;  %5172 = vmatprep.subr.bf16.mxu0 %v10705_v49  ;;  %5558 = vmatprep.subr.bf16.mxu1 %v10744_v11  ;;  %v10751_v11 = vld [vmem:[#allocation13 + $0x348] ss:$16 sps:$4 sm:$0xff]  }
 0x551   : > { %v9364_v54 = vadd.f32 %v3488_v50, %v12278_v3  ;;  %v9428_v53 = vadd.f32 %v3874_v51, %v12281_v9  ;;  %v3490_v42 = vpop.f32.mrb[118].mxu0  ;;  %v3876_v56 = vpop.f32.mrb[150].mxu1  ;;  %5035 = vmatprep.mubr.bf16.mxu0 %v4126_v36  ;;  %5421 = vmatprep.mubr.bf16.mxu1 %v4126_v36  ;;  %v10756_v36 = vld [vmem:[#allocation13 + $0x36c] ss:$16 sps:$4 sm:$0xff]  }
 0x552   : > { %v9365_v12 = vadd.f32 %v3490_v42, %v12272_v10  ;;  %v9429_v61 = vadd.f32 %v3876_v56, %v12275_v16  ;;  %v3492_v47 = vpop.f32.mrb[119].mxu0  ;;  %v3878_v38 = vpop.f32.mrb[151].mxu1  ;;  %5036 = vmatmul.mubr.bf16.gmra.mrb[176].mxu0 %v4125_v39  ;;  %5422 = vmatmul.mubr.bf16.gmra.mrb[208].mxu1 %v4125_v39  ;;  %v4021_v62 = vmax.f32 %v9363_v17, 0.0  ;;  %v4023_v23 = vmax.f32 %v9427_v7, 0.0  ;;  %v10732_v39 = vld [vmem:[#allocation13 + $0x364] ss:$16 sps:$4 sm:$0xff]  }
 0x553   : > { %v9366_v5 = vadd.f32 %v3492_v47, %v12278_v3  ;;  %v9430_v8 = vadd.f32 %v3878_v38, %v12281_v9  ;;  %5173 = vmatpush1.bf16.msra.mxu0 %v10703_v45  ;;  %5559 = vmatpush1.bf16.msra.mxu1 %v10742_v46  ;;  %v4022_v6 = vmax.f32 %v9364_v54, 0.0  ;;  %v4024_v13 = vmax.f32 %v9428_v53, 0.0  ;;  %v10730_v54 = vld [vmem:[#allocation13 + $0x360] ss:$16 sps:$4 sm:$0xff]   ;;  %v10741_v53 = vld [vmem:[#allocation13 + $0x384] ss:$16 sps:$4 sm:$0xff]  }
 0x554   : > { %v4025_v20 = vmax.f32 %v9365_v12, 0.0  ;;  %v4027_v41 = vmax.f32 %v9429_v61, 0.0  ;;  %5174 = vmatprep.subr.bf16.mxu0 %v10714_v52  ;;  %5560 = vmatprep.subr.bf16.mxu1 %v10747_v59  ;;  %v10754_v42 = vld [vmem:[#allocation13 + $0x368] ss:$16 sps:$4 sm:$0xff]   ;;  %v10762_v38 = vld [vmem:[#allocation13 + $0x38c] ss:$16 sps:$4 sm:$0xff]  }
 0x555   : > { %v4026_v58 = vmax.f32 %v9366_v5, 0.0  ;;  %v4028_v1 = vmax.f32 %v9430_v8, 0.0 }
 0x556   : > { %v4129_v43 = vpack.c.bf16 %v4025_v20, %v4021_v62  ;;  %v12351_v49 = vpack.c.bf16 %v4027_v41, %v4023_v23 }
 0x557   : > { %v4130_v21 = vpack.c.bf16 %v4026_v58, %v4022_v6  ;;  %v12353_v0 = vpack.c.bf16 %v4028_v1, %v4024_v13  ;;  %v3496_v57 = vpop.f32.mrb[120].mxu0  ;;  %v3882_v4 = vpop.f32.mrb[152].mxu1  ;;  %5175 = vmatpush1.bf16.msra.mxu0 %v10712_v18  ;;  %5561 = vmatpush1.bf16.msra.mxu1 %v10745_v19  ;;  %v10739_v6 = vld [vmem:[#allocation13 + $0x380] ss:$16 sps:$4 sm:$0xff]   ;;  %v10760_v13 = vld [vmem:[#allocation13 + $0x388] ss:$16 sps:$4 sm:$0xff]  }
 0x558   : > { %v9367_v60 = vadd.f32 %v3496_v57, %v12272_v10  ;;  %v9431_v26 = vadd.f32 %v3882_v4, %v12275_v16  ;;  %v3498_v35 = vpop.f32.mrb[121].mxu0  ;;  %v3884_v33 = vpop.f32.mrb[153].mxu1  ;;  %5176 = vmatprep.subr.bf16.mxu0 %v10723_v14  ;;  %5562 = vmatprep.subr.bf16.mxu1 %v10753_v15  ;;  %v10750_v57 = vld [vmem:[#allocation13 + $0x3a4] ss:$16 sps:$4 sm:$0xff]   ;;  %v10765_v4 = vld [vmem:[#allocation13 + $0x3ac] ss:$16 sps:$4 sm:$0xff]  }
 0x559   : > { %v9368_v31 = vadd.f32 %v3498_v35, %v12278_v3  ;;  %v9432_v44 = vadd.f32 %v3884_v33, %v12281_v9  ;;  %v3500_v45 = vpop.f32.mrb[122].mxu0  ;;  %v3886_v46 = vpop.f32.mrb[154].mxu1  ;;  %5045 = vmatprep.mubr.bf16.mxu0 %v4130_v21  ;;  %5431 = vmatprep.mubr.bf16.mxu1 %v4130_v21 }
 0x55a   : > { %v9369_v17 = vadd.f32 %v3500_v45, %v12272_v10  ;;  %v9433_v7 = vadd.f32 %v3886_v46, %v12275_v16  ;;  %v3502_v50 = vpop.f32.mrb[123].mxu0  ;;  %v3888_v51 = vpop.f32.mrb[155].mxu1  ;;  %5046 = vmatmul.mubr.bf16.gmra.mrb[180].mxu0 %v4129_v43  ;;  %5432 = vmatmul.mubr.bf16.gmra.mrb[212].mxu1 %v4129_v43  ;;  %v4029_v56 = vmax.f32 %v9367_v60, 0.0  ;;  %v4031_v12 = vmax.f32 %v9431_v26, 0.0  ;;  %v10748_v45 = vld [vmem:[#allocation13 + $0x3a0] ss:$16 sps:$4 sm:$0xff]  }
 0x55b   : > { %v9370_v52 = vadd.f32 %v3502_v50, %v12278_v3  ;;  %v9434_v59 = vadd.f32 %v3888_v51, %v12281_v9  ;;  %5177 = vmatpush1.bf16.msra.mxu0 %v10721_v55  ;;  %5563 = vmatpush1.bf16.msra.mxu1 %v10751_v11  ;;  %v4030_v5 = vmax.f32 %v9368_v31, 0.0  ;;  %v4032_v8 = vmax.f32 %v9432_v44, 0.0  ;;  %v10759_v46 = vld [vmem:[#allocation13 + $0x3c4] ss:$16 sps:$4 sm:$0xff]  }
 0x55c   : > { %v4033_v61 = vmax.f32 %v9369_v17, 0.0  ;;  %v4035_v47 = vmax.f32 %v9433_v7, 0.0  ;;  %5178 = vmatprep.subr.bf16.mxu0 %v10732_v39  ;;  %5564 = vmatprep.subr.bf16.mxu1 %v10756_v36  ;;  %v10763_v17 = vld [vmem:[#allocation13 + $0x3a8] ss:$16 sps:$4 sm:$0xff]  }
 0x55d   : > { %v4034_v18 = vmax.f32 %v9370_v52, 0.0  ;;  %v4036_v14 = vmax.f32 %v9434_v59, 0.0  ;;  %v10771_v59 = vld [vmem:[#allocation13 + $0x3cc] ss:$16 sps:$4 sm:$0xff]  }
 0x55e   : > { %v4133_v19 = vpack.c.bf16 %v4033_v61, %v4029_v56  ;;  %v12363_v62 = vpack.c.bf16 %v4035_v47, %v4031_v12 }
 0x55f   : > { %v4134_v23 = vpack.c.bf16 %v4034_v18, %v4030_v5  ;;  %v12365_v20 = vpack.c.bf16 %v4036_v14, %v4032_v8  ;;  %v3506_v41 = vpop.f32.mrb[124].mxu0  ;;  %v3892_v15 = vpop.f32.mrb[156].mxu1  ;;  %5179 = vmatpush1.bf16.msra.mxu0 %v10730_v54  ;;  %5565 = vmatpush1.bf16.msra.mxu1 %v10754_v42  ;;  %v10757_v18 = vld [vmem:[#allocation13 + $0x3c0] ss:$16 sps:$4 sm:$0xff]   ;;  %v10769_v14 = vld [vmem:[#allocation13 + $0x3c8] ss:$16 sps:$4 sm:$0xff]  }
 0x560   : > { %v9371_v58 = vadd.f32 %v3506_v41, %v12272_v10  ;;  %v9435_v1 = vadd.f32 %v3892_v15, %v12275_v16  ;;  %v3508_v43 = vpop.f32.mrb[125].mxu0  ;;  %v3894_v21 = vpop.f32.mrb[157].mxu1  ;;  %5180 = vmatprep.subr.bf16.mxu0 %v10741_v53  ;;  %5566 = vmatprep.subr.bf16.mxu1 %v10762_v38 }
 0x561   : > { %v9372_v55 = vadd.f32 %v3508_v43, %v12278_v3  ;;  %v9436_v11 = vadd.f32 %v3894_v21, %v12281_v9  ;;  %v3510_v60 = vpop.f32.mrb[126].mxu0  ;;  %v3896_v26 = vpop.f32.mrb[158].mxu1  ;;  %5055 = vmatprep.mubr.bf16.mxu0 %v4134_v23  ;;  %5441 = vmatprep.mubr.bf16.mxu1 %v4134_v23 }
 0x562   : > { %v9373_v35 = vadd.f32 %v3510_v60, %v12272_v10  ;;  %v9437_v33 = vadd.f32 %v3896_v26, %v12275_v16  ;;  %v3512_v39 = vpop.f32.mrb[127].mxu0  ;;  %v3898_v36 = vpop.f32.mrb[159].mxu1  ;;  %5056 = vmatmul.mubr.bf16.gmra.mrb[184].mxu0 %v4133_v19  ;;  %5442 = vmatmul.mubr.bf16.gmra.mrb[216].mxu1 %v4133_v19  ;;  %v4037_v7 = vmax.f32 %v9371_v58, 0.0  ;;  %v4039_v50 = vmax.f32 %v9435_v1, 0.0 }
 0x563   : > { %v9374_v31 = vadd.f32 %v3512_v39, %v12278_v3  ;;  %v9438_v44 = vadd.f32 %v3898_v36, %v12281_v9  ;;  %5181 = vmatpush1.bf16.msra.mxu0 %v10739_v6  ;;  %5567 = vmatpush1.bf16.msra.mxu1 %v10760_v13  ;;  %v4038_v54 = vmax.f32 %v9372_v55, 0.0  ;;  %v4040_v53 = vmax.f32 %v9436_v11, 0.0  ;;  %v10768_v6 = vld [vmem:[#allocation13 + $0x3e4] ss:$16 sps:$4 sm:$0xff]   ;;  %v10774_v13 = vld [vmem:[#allocation13 + $0x3ec] ss:$16 sps:$4 sm:$0xff]  }
 0x564   : > { %v4041_v51 = vmax.f32 %v9373_v35, 0.0  ;;  %v4043_v52 = vmax.f32 %v9437_v33, 0.0  ;;  %5182 = vmatprep.subr.bf16.mxu0 %v10750_v57  ;;  %5568 = vmatprep.subr.bf16.mxu1 %v10765_v4  ;;  %v10766_v35 = vld [vmem:[#allocation13 + $0x3e0] ss:$16 sps:$4 sm:$0xff]   ;;  %v10772_v33 = vld [vmem:[#allocation13 + $0x3e8] ss:$16 sps:$4 sm:$0xff]  }
 0x565   : > { %v4042_v42 = vmax.f32 %v9374_v31, 0.0  ;;  %v4044_v56 = vmax.f32 %v9438_v44, 0.0 }
 0x566   : > { %v4137_v12 = vpack.c.bf16 %v4041_v51, %v4037_v7  ;;  %v12375_v61 = vpack.c.bf16 %v4043_v52, %v4039_v50 }
 0x567   : > { %v4138_v47 = vpack.c.bf16 %v4042_v42, %v4038_v54  ;;  %v12377_v38 = vpack.c.bf16 %v4044_v56, %v4040_v53  ;;  %v3516_v5 = vpop.f32.mrb[128].mxu0  ;;  %v3902_v8 = vpop.f32.mrb[160].mxu1  ;;  %5183 = vmatpush1.bf16.msra.mxu0 %v10748_v45  ;;  %5569 = vmatpush1.bf16.msra.mxu1 %v10763_v17 }
 0x568   : > { %v9375_v19 = vadd.f32 %v3516_v5, %v12272_v10  ;;  %v9439_v23 = vadd.f32 %v3902_v8, %v12275_v16  ;;  %v3518_v41 = vpop.f32.mrb[129].mxu0  ;;  %v3904_v15 = vpop.f32.mrb[161].mxu1  ;;  %5184 = vmatprep.subr.bf16.mxu0 %v10759_v46  ;;  %5570 = vmatprep.subr.bf16.mxu1 %v10771_v59 }
 0x569   : > { %v9376_v58 = vadd.f32 %v3518_v41, %v12278_v3  ;;  %v9440_v1 = vadd.f32 %v3904_v15, %v12281_v9  ;;  %v3520_v43 = vpop.f32.mrb[130].mxu0  ;;  %v3906_v21 = vpop.f32.mrb[162].mxu1  ;;  %5065 = vmatprep.mubr.bf16.mxu0 %v4138_v47  ;;  %5451 = vmatprep.mubr.bf16.mxu1 %v4138_v47 }
 0x56a   : > { %v9377_v57 = vadd.f32 %v3520_v43, %v12272_v10  ;;  %v9441_v4 = vadd.f32 %v3906_v21, %v12275_v16  ;;  %v3522_v55 = vpop.f32.mrb[131].mxu0  ;;  %v3908_v11 = vpop.f32.mrb[163].mxu1  ;;  %5066 = vmatmul.mubr.bf16.gmra.mrb[188].mxu0 %v4137_v12  ;;  %5452 = vmatmul.mubr.bf16.gmra.mrb[220].mxu1 %v4137_v12  ;;  %v4045_v39 = vmax.f32 %v9375_v19, 0.0  ;;  %v4047_v36 = vmax.f32 %v9439_v23, 0.0 }
 0x56b   : > { %v9378_v60 = vadd.f32 %v3522_v55, %v12278_v3  ;;  %v9442_v26 = vadd.f32 %v3908_v11, %v12281_v9  ;;  %5185 = vmatpush1.bf16.msra.mxu0 %v10757_v18  ;;  %5571 = vmatpush1.bf16.msra.mxu1 %v10769_v14  ;;  %v4046_v45 = vmax.f32 %v9376_v58, 0.0  ;;  %v4048_v46 = vmax.f32 %v9440_v1, 0.0 }
 0x56c   : > { %v4049_v31 = vmax.f32 %v9377_v57, 0.0  ;;  %v4051_v44 = vmax.f32 %v9441_v4, 0.0  ;;  %5186 = vmatprep.subr.bf16.mxu0 %v10768_v6  ;;  %5572 = vmatprep.subr.bf16.mxu1 %v10774_v13 }
 0x56d   : > { %v4050_v17 = vmax.f32 %v9378_v60, 0.0  ;;  %v4052_v7 = vmax.f32 %v9442_v26, 0.0 }
 0x56e   : > { %v4141_v50 = vpack.c.bf16 %v4049_v31, %v4045_v39  ;;  %v12387_v51 = vpack.c.bf16 %v4051_v44, %v4047_v36 }
 0x56f   : > { %v4142_v52 = vpack.c.bf16 %v4050_v17, %v4046_v45  ;;  %v12389_v59 = vpack.c.bf16 %v4052_v7, %v4048_v46  ;;  %v3526_v54 = vpop.f32.mrb[132].mxu0  ;;  %v3912_v53 = vpop.f32.mrb[164].mxu1  ;;  %5187 = vmatpush1.bf16.msra.mxu0 %v10766_v35  ;;  %5573 = vmatpush1.bf16.msra.mxu1 %v10772_v33 }
 0x570   : > { %v9379_v42 = vadd.f32 %v3526_v54, %v12272_v10  ;;  %v9443_v56 = vadd.f32 %v3912_v53, %v12275_v16  ;;  %v3528_v12 = vpop.f32.mrb[133].mxu0  ;;  %v3914_v47 = vpop.f32.mrb[165].mxu1 }
 0x571   : > { %v9380_v5 = vadd.f32 %v3528_v12, %v12278_v3  ;;  %v9444_v8 = vadd.f32 %v3914_v47, %v12281_v9  ;;  %v3530_v18 = vpop.f32.mrb[134].mxu0  ;;  %v3916_v14 = vpop.f32.mrb[166].mxu1  ;;  %5075 = vmatprep.mubr.bf16.mxu0 %v4142_v52  ;;  %5461 = vmatprep.mubr.bf16.mxu1 %v4142_v52 }
 0x572   : > { %v9381_v19 = vadd.f32 %v3530_v18, %v12272_v10  ;;  %v9445_v23 = vadd.f32 %v3916_v14, %v12275_v16  ;;  %v3532_v41 = vpop.f32.mrb[135].mxu0  ;;  %v3918_v15 = vpop.f32.mrb[167].mxu1  ;;  %5076 = vmatmul.mubr.bf16.gmra.mrb[192].mxu0 %v4141_v50  ;;  %5462 = vmatmul.mubr.bf16.gmra.mrb[224].mxu1 %v4141_v50  ;;  %v4053_v58 = vmax.f32 %v9379_v42, 0.0  ;;  %v4055_v1 = vmax.f32 %v9443_v56, 0.0 }
 0x573   : > { %v9382_v6 = vadd.f32 %v3532_v41, %v12278_v3  ;;  %v9446_v13 = vadd.f32 %v3918_v15, %v12281_v9  ;;  %v4054_v57 = vmax.f32 %v9380_v5, 0.0  ;;  %v4056_v4 = vmax.f32 %v9444_v8, 0.0 }
 0x574   : > { %v4057_v43 = vmax.f32 %v9381_v19, 0.0  ;;  %v4059_v21 = vmax.f32 %v9445_v23, 0.0 }
 0x575   : > { %v4058_v55 = vmax.f32 %v9382_v6, 0.0  ;;  %v4060_v11 = vmax.f32 %v9446_v13, 0.0 }
 0x576   : > { %v4145_v60 = vpack.c.bf16 %v4057_v43, %v4053_v58  ;;  %v12399_v26 = vpack.c.bf16 %v4059_v21, %v4055_v1 }
 0x577   : > { %v4146_v35 = vpack.c.bf16 %v4058_v55, %v4054_v57  ;;  %v12401_v33 = vpack.c.bf16 %v4060_v11, %v4056_v4  ;;  %v3536_v39 = vpop.f32.mrb[136].mxu0  ;;  %v3922_v36 = vpop.f32.mrb[168].mxu1 }
 0x578   : > { %v9383_v31 = vadd.f32 %v3536_v39, %v12272_v10  ;;  %v9447_v44 = vadd.f32 %v3922_v36, %v12275_v16  ;;  %v3538_v45 = vpop.f32.mrb[137].mxu0  ;;  %v3924_v46 = vpop.f32.mrb[169].mxu1 }
 0x579   : > { %v9384_v17 = vadd.f32 %v3538_v45, %v12278_v3  ;;  %v9448_v7 = vadd.f32 %v3924_v46, %v12281_v9  ;;  %v3540_v50 = vpop.f32.mrb[138].mxu0  ;;  %v3926_v52 = vpop.f32.mrb[170].mxu1  ;;  %5085 = vmatprep.mubr.bf16.mxu0 %v4146_v35  ;;  %5471 = vmatprep.mubr.bf16.mxu1 %v4146_v35 }
 0x57a   : > { %v9385_v54 = vadd.f32 %v3540_v50, %v12272_v10  ;;  %v9449_v53 = vadd.f32 %v3926_v52, %v12275_v16  ;;  %v3542_v42 = vpop.f32.mrb[139].mxu0  ;;  %v3928_v56 = vpop.f32.mrb[171].mxu1  ;;  %5086 = vmatmul.mubr.bf16.gmra.mrb[196].mxu0 %v4145_v60  ;;  %5472 = vmatmul.mubr.bf16.gmra.mrb[228].mxu1 %v4145_v60  ;;  %v4061_v5 = vmax.f32 %v9383_v31, 0.0  ;;  %v4063_v8 = vmax.f32 %v9447_v44, 0.0 }
 0x57b   : > { %v9386_v12 = vadd.f32 %v3542_v42, %v12278_v3  ;;  %v9450_v47 = vadd.f32 %v3928_v56, %v12281_v9  ;;  %v4062_v19 = vmax.f32 %v9384_v17, 0.0  ;;  %v4064_v23 = vmax.f32 %v9448_v7, 0.0 }
 0x57c   : > { %v4065_v18 = vmax.f32 %v9385_v54, 0.0  ;;  %v4067_v14 = vmax.f32 %v9449_v53, 0.0 }
 0x57d   : > { %v4066_v41 = vmax.f32 %v9386_v12, 0.0  ;;  %v4068_v15 = vmax.f32 %v9450_v47, 0.0 }
 0x57e   : > { %v4149_v6 = vpack.c.bf16 %v4065_v18, %v4061_v5  ;;  %v12411_v13 = vpack.c.bf16 %v4067_v14, %v4063_v8 }
 0x57f   : > { %v4150_v58 = vpack.c.bf16 %v4066_v41, %v4062_v19  ;;  %v12413_v1 = vpack.c.bf16 %v4068_v15, %v4064_v23  ;;  %v3546_v43 = vpop.f32.mrb[140].mxu0  ;;  %v3932_v21 = vpop.f32.mrb[172].mxu1 }
 0x580   : > { %v9387_v57 = vadd.f32 %v3546_v43, %v12272_v10  ;;  %v9451_v4 = vadd.f32 %v3932_v21, %v12275_v16  ;;  %v3548_v55 = vpop.f32.mrb[141].mxu0  ;;  %v3934_v11 = vpop.f32.mrb[173].mxu1 }
 0x581   : > { %v9388_v60 = vadd.f32 %v3548_v55, %v12278_v3  ;;  %v9452_v35 = vadd.f32 %v3934_v11, %v12281_v9  ;;  %v3550_v39 = vpop.f32.mrb[142].mxu0  ;;  %v3936_v36 = vpop.f32.mrb[174].mxu1  ;;  %5095 = vmatprep.mubr.bf16.mxu0 %v4150_v58  ;;  %5481 = vmatprep.mubr.bf16.mxu1 %v4150_v58 }
 0x582   : > { %v9389_v31 = vadd.f32 %v3550_v39, %v12272_v10  ;;  %v9453_v44 = vadd.f32 %v3936_v36, %v12275_v16  ;;  %v3552_v45 = vpop.f32.mrb[143].mxu0  ;;  %v3938_v46 = vpop.f32.mrb[175].mxu1  ;;  %5096 = vmatmul.mubr.bf16.gmra.mrb[200].mxu0 %v4149_v6  ;;  %5482 = vmatmul.mubr.bf16.gmra.mrb[232].mxu1 %v4149_v6  ;;  %v4069_v50 = vmax.f32 %v9387_v57, 0.0  ;;  %v4071_v52 = vmax.f32 %v9451_v4, 0.0 }
 0x583   : > { %v9390_v17 = vadd.f32 %v3552_v45, %v12278_v3  ;;  %v9454_v7 = vadd.f32 %v3938_v46, %v12281_v9  ;;  %v4070_v42 = vmax.f32 %v9388_v60, 0.0  ;;  %v4072_v56 = vmax.f32 %v9452_v35, 0.0 }
 0x584   : > { %v4073_v54 = vmax.f32 %v9389_v31, 0.0  ;;  %v4075_v53 = vmax.f32 %v9453_v44, 0.0  ;;  %v10777_v31 = vld [vmem:[#allocation14 + $0x4] ss:$16 sps:$4 sm:$0xff]  }
 0x585   : > { %v4074_v12 = vmax.f32 %v9390_v17, 0.0  ;;  %v4076_v47 = vmax.f32 %v9454_v7, 0.0  ;;  %6717 = vmatprep.subr.bf16.mxu0 %v10777_v31 }
 0x586   : > { %v4153_v5 = vpack.c.bf16 %v4073_v54, %v4069_v50  ;;  %v12423_v8 = vpack.c.bf16 %v4075_v53, %v4071_v52 }
 0x587   : > { %v4154_v18 = vpack.c.bf16 %v4074_v12, %v4070_v42  ;;  %v12425_v14 = vpack.c.bf16 %v4076_v47, %v4072_v56  ;;  %v3556_v19 = vpop.f32.mrb[144].mxu0  ;;  %v3942_v23 = vpop.f32.mrb[176].mxu1 }
 0x588   : > { %v9391_v41 = vadd.f32 %v3556_v19, %v12272_v10  ;;  %v9455_v15 = vadd.f32 %v3942_v23, %v12275_v16  ;;  %v3558_v6 = vpop.f32.mrb[145].mxu0  ;;  %v3944_v58 = vpop.f32.mrb[177].mxu1 }
 0x589   : > { %v9392_v43 = vadd.f32 %v3558_v6, %v12278_v3  ;;  %v9456_v21 = vadd.f32 %v3944_v58, %v12281_v9  ;;  %v3560_v57 = vpop.f32.mrb[146].mxu0  ;;  %v3946_v4 = vpop.f32.mrb[178].mxu1  ;;  %5105 = vmatprep.mubr.bf16.mxu0 %v4154_v18  ;;  %5491 = vmatprep.mubr.bf16.mxu1 %v4154_v18 }
 0x58a   : > { %v9393_v55 = vadd.f32 %v3560_v57, %v12272_v10  ;;  %v9457_v11 = vadd.f32 %v3946_v4, %v12275_v16  ;;  %v3562_v60 = vpop.f32.mrb[147].mxu0  ;;  %v3948_v35 = vpop.f32.mrb[179].mxu1  ;;  %5106 = vmatmul.mubr.bf16.gmra.mrb[204].mxu0 %v4153_v5  ;;  %5492 = vmatmul.mubr.bf16.gmra.mrb[236].mxu1 %v4153_v5  ;;  %v4077_v44 = vmax.f32 %v9391_v41, 0.0  ;;  %v4079_v45 = vmax.f32 %v9455_v15, 0.0 }
 0x58b   : > { %v9394_v39 = vadd.f32 %v3562_v60, %v12278_v3  ;;  %v9458_v36 = vadd.f32 %v3948_v35, %v12281_v9  ;;  %v4078_v7 = vmax.f32 %v9392_v43, 0.0  ;;  %v4080_v50 = vmax.f32 %v9456_v21, 0.0 }
 0x58c   : > { %v4081_v46 = vmax.f32 %v9393_v55, 0.0  ;;  %v4083_v17 = vmax.f32 %v9457_v11, 0.0 }
 0x58d   : > { %v4082_v52 = vmax.f32 %v9394_v39, 0.0  ;;  %v4084_v54 = vmax.f32 %v9458_v36, 0.0 }
 0x58e   : > { %v4157_v53 = vpack.c.bf16 %v4081_v46, %v4077_v44  ;;  %v12435_v42 = vpack.c.bf16 %v4083_v17, %v4079_v45 }
 0x58f   : > { %v4158_v56 = vpack.c.bf16 %v4082_v52, %v4078_v7  ;;  %v12437_v12 = vpack.c.bf16 %v4084_v54, %v4080_v50  ;;  %v3566_v47 = vpop.f32.mrb[148].mxu0  ;;  %v3952_v5 = vpop.f32.mrb[180].mxu1 }
 0x590   : > { %v9395_v18 = vadd.f32 %v3566_v47, %v12272_v10  ;;  %v9459_v19 = vadd.f32 %v3952_v5, %v12275_v16  ;;  %v3568_v23 = vpop.f32.mrb[149].mxu0  ;;  %v3954_v41 = vpop.f32.mrb[181].mxu1 }
 0x591   : > { %v9396_v15 = vadd.f32 %v3568_v23, %v12278_v3  ;;  %v9460_v6 = vadd.f32 %v3954_v41, %v12281_v9  ;;  %v3570_v58 = vpop.f32.mrb[150].mxu0  ;;  %v3956_v43 = vpop.f32.mrb[182].mxu1  ;;  %5115 = vmatprep.mubr.bf16.mxu0 %v4158_v56  ;;  %5501 = vmatprep.mubr.bf16.mxu1 %v4158_v56 }
 0x592   : > { %v9397_v21 = vadd.f32 %v3570_v58, %v12272_v10  ;;  %v9461_v57 = vadd.f32 %v3956_v43, %v12275_v16  ;;  %v3572_v4 = vpop.f32.mrb[151].mxu0  ;;  %v3958_v55 = vpop.f32.mrb[183].mxu1  ;;  %5116 = vmatmul.mubr.bf16.gmra.mrb[208].mxu0 %v4157_v53  ;;  %5502 = vmatmul.mubr.bf16.gmra.mrb[240].mxu1 %v4157_v53  ;;  %v4085_v35 = vmax.f32 %v9395_v18, 0.0  ;;  %v4087_v39 = vmax.f32 %v9459_v19, 0.0 }
 0x593   : > { %v9398_v11 = vadd.f32 %v3572_v4, %v12278_v3  ;;  %v9462_v60 = vadd.f32 %v3958_v55, %v12281_v9  ;;  %v4086_v44 = vmax.f32 %v9396_v15, 0.0  ;;  %v4088_v45 = vmax.f32 %v9460_v6, 0.0 }
 0x594   : > { %v4089_v36 = vmax.f32 %v9397_v21, 0.0  ;;  %v4091_v31 = vmax.f32 %v9461_v57, 0.0 }
 0x595   : > { %v4090_v46 = vmax.f32 %v9398_v11, 0.0  ;;  %v4092_v17 = vmax.f32 %v9462_v60, 0.0 }
 0x596   : > { %v4161_v7 = vpack.c.bf16 %v4089_v36, %v4085_v35  ;;  %v12447_v50 = vpack.c.bf16 %v4091_v31, %v4087_v39 }
 0x597   : > { %v4162_v52 = vpack.c.bf16 %v4090_v46, %v4086_v44  ;;  %v12449_v54 = vpack.c.bf16 %v4092_v17, %v4088_v45  ;;  %v3576_v56 = vpop.f32.mrb[152].mxu0  ;;  %v3962_v53 = vpop.f32.mrb[184].mxu1 }
 0x598   : > { %v9399_v47 = vadd.f32 %v3576_v56, %v12272_v10  ;;  %v9463_v5 = vadd.f32 %v3962_v53, %v12275_v16  ;;  %v3578_v18 = vpop.f32.mrb[153].mxu0  ;;  %v3964_v19 = vpop.f32.mrb[185].mxu1 }
 0x599   : > { %v9400_v23 = vadd.f32 %v3578_v18, %v12278_v3  ;;  %v9464_v41 = vadd.f32 %v3964_v19, %v12281_v9  ;;  %v3580_v15 = vpop.f32.mrb[154].mxu0  ;;  %v3966_v6 = vpop.f32.mrb[186].mxu1  ;;  %5125 = vmatprep.mubr.bf16.mxu0 %v4162_v52  ;;  %5511 = vmatprep.mubr.bf16.mxu1 %v4162_v52 }
 0x59a   : > { %v9401_v58 = vadd.f32 %v3580_v15, %v12272_v10  ;;  %v9465_v43 = vadd.f32 %v3966_v6, %v12275_v16  ;;  %v3582_v21 = vpop.f32.mrb[155].mxu0  ;;  %v3968_v57 = vpop.f32.mrb[187].mxu1  ;;  %5126 = vmatmul.mubr.bf16.gmra.mrb[212].mxu0 %v4161_v7  ;;  %5512 = vmatmul.mubr.bf16.gmra.mrb[244].mxu1 %v4161_v7  ;;  %v4093_v11 = vmax.f32 %v9399_v47, 0.0  ;;  %v4095_v60 = vmax.f32 %v9463_v5, 0.0 }
 0x59b   : > { %v9402_v4 = vadd.f32 %v3582_v21, %v12278_v3  ;;  %v9466_v55 = vadd.f32 %v3968_v57, %v12281_v9  ;;  %v4094_v36 = vmax.f32 %v9400_v23, 0.0  ;;  %v4096_v31 = vmax.f32 %v9464_v41, 0.0 }
 0x59c   : > { %v4097_v35 = vmax.f32 %v9401_v58, 0.0  ;;  %v4099_v39 = vmax.f32 %v9465_v43, 0.0 }
 0x59d   : > { %v4098_v44 = vmax.f32 %v9402_v4, 0.0  ;;  %v4100_v45 = vmax.f32 %v9466_v55, 0.0 }
 0x59e   : > { %v4165_v46 = vpack.c.bf16 %v4097_v35, %v4093_v11  ;;  %v12459_v17 = vpack.c.bf16 %v4099_v39, %v4095_v60 }
 0x59f   : > { %v4166_v52 = vpack.c.bf16 %v4098_v44, %v4094_v36  ;;  %v12461_v56 = vpack.c.bf16 %v4100_v45, %v4096_v31  ;;  %v3586_v53 = vpop.f32.mrb[156].mxu0  ;;  %v3972_v7 = vpop.f32.mrb[188].mxu1 }
 0x5a0   : > { %v9403_v18 = vadd.f32 %v3586_v53, %v12272_v10  ;;  %v9467_v19 = vadd.f32 %v3972_v7, %v12275_v16  ;;  %v3588_v47 = vpop.f32.mrb[157].mxu0  ;;  %v3974_v5 = vpop.f32.mrb[189].mxu1  ;;  %v10814_v7 = vld [vmem:[#allocation14 + $0x8] ss:$16 sps:$4 sm:$0xff]  }
 0x5a1   : > { %v9404_v15 = vadd.f32 %v3588_v47, %v12278_v3  ;;  %v9468_v23 = vadd.f32 %v3974_v5, %v12281_v9  ;;  %v3590_v41 = vpop.f32.mrb[158].mxu0  ;;  %v3976_v6 = vpop.f32.mrb[190].mxu1  ;;  %5135 = vmatprep.mubr.bf16.mxu0 %v4166_v52  ;;  %5521 = vmatprep.mubr.bf16.mxu1 %v4166_v52  ;;  %v10783_v47 = vld [vmem:[#allocation14 + $0x44] ss:$16 sps:$4 sm:$0xff]   ;;  %v10781_v5 = vld [vmem:[#allocation14 + $0x40] ss:$16 sps:$4 sm:$0xff]  }
 0x5a2   : > { %v9405_v58 = vadd.f32 %v3590_v41, %v12272_v10  ;;  %v9469_v43 = vadd.f32 %v3976_v6, %v12275_v16  ;;  %v3592_v21 = vpop.f32.mrb[159].mxu0  ;;  %v3978_v57 = vpop.f32.mrb[191].mxu1  ;;  %5136 = vmatmul.mubr.bf16.gmra.mrb[216].mxu0 %v4165_v46  ;;  %5522 = vmatmul.mubr.bf16.gmra.mrb[248].mxu1 %v4165_v46  ;;  %v4101_v11 = vmax.f32 %v9403_v18, 0.0  ;;  %v4103_v60 = vmax.f32 %v9467_v19, 0.0  ;;  %v10780_v46 = vld [vmem:[#allocation14 + $0x24] ss:$16 sps:$4 sm:$0xff]  }
 0x5a3   : > { %v9406_v4 = vadd.f32 %v3592_v21, %v12278_v3  ;;  %v9470_v55 = vadd.f32 %v3978_v57, %v12281_v9  ;;  %v4102_v36 = vmax.f32 %v9404_v15, 0.0  ;;  %v4104_v31 = vmax.f32 %v9468_v23, 0.0  ;;  %v10775_v3 = vld [vmem:[#allocation14] ss:$16 sps:$4 sm:$0xff]   ;;  %v10816_v9 = vld [vmem:[#allocation14 + $0xc] ss:$16 sps:$4 sm:$0xff]  }
 0x5a4   : > { %v4105_v35 = vmax.f32 %v9405_v58, 0.0  ;;  %v4107_v39 = vmax.f32 %v9469_v43, 0.0  ;;  %v10819_v18 = vld [vmem:[#allocation14 + $0x2c] ss:$16 sps:$4 sm:$0xff]   ;;  %v10778_v19 = vld [vmem:[#allocation14 + $0x20] ss:$16 sps:$4 sm:$0xff]   ;;  %9311 = vmatprep.subr.bf16.mxu1 %v10816_v9 }
 0x5a5   : > { %v4106_v44 = vmax.f32 %v9406_v4, 0.0  ;;  %v4108_v45 = vmax.f32 %v9470_v55, 0.0  ;;  %v10825_v15 = vld [vmem:[#allocation14 + $0x4c] ss:$16 sps:$4 sm:$0xff]   ;;  %v10786_v23 = vld [vmem:[#allocation14 + $0x64] ss:$16 sps:$4 sm:$0xff]  }
 0x5a6   : > { %v4169_v52 = vpack.c.bf16 %v4105_v35, %v4101_v11  ;;  %v12471_v10 = vpack.c.bf16 %v4107_v39, %v4103_v60  ;;  %v10784_v41 = vld [vmem:[#allocation14 + $0x60] ss:$16 sps:$4 sm:$0xff]   ;;  %v10789_v6 = vld [vmem:[#allocation14 + $0x84] ss:$16 sps:$4 sm:$0xff]   ;;  %v10826_v58 = vld [vmem:[#allocation14 + $0x68] ss:$16 sps:$4 sm:$0xff]  }
 0x5a7   : > { %v4170_v16 = vpack.c.bf16 %v4106_v44, %v4102_v36  ;;  %v12473_v53 = vpack.c.bf16 %v4108_v45, %v4104_v31  ;;  %v10787_v43 = vld [vmem:[#allocation14 + $0x80] ss:$16 sps:$4 sm:$0xff]   ;;  %v10834_v21 = vld [vmem:[#allocation14 + $0x8c] ss:$16 sps:$4 sm:$0xff]   ;;  %v10792_v57 = vld [vmem:[#allocation14 + $0xa4] ss:$16 sps:$4 sm:$0xff]  }
 0x5a8   : > { %v10790_v4 = vld [vmem:[#allocation14 + $0xa0] ss:$16 sps:$4 sm:$0xff]   ;;  %v10795_v55 = vld [vmem:[#allocation14 + $0xc4] ss:$16 sps:$4 sm:$0xff]   ;;  %v10835_v11 = vld [vmem:[#allocation14 + $0xa8] ss:$16 sps:$4 sm:$0xff]  }
 0x5a9   : > { %5145 = vmatprep.mubr.bf16.mxu0 %v4170_v16  ;;  %5531 = vmatprep.mubr.bf16.mxu1 %v4170_v16  ;;  %v10793_v60 = vld [vmem:[#allocation14 + $0xc0] ss:$16 sps:$4 sm:$0xff]   ;;  %v10798_v35 = vld [vmem:[#allocation14 + $0xe4] ss:$16 sps:$4 sm:$0xff]   ;;  %v10864_v9 = vld [vmem:[#allocation14 + $0x16c] ss:$16 sps:$4 sm:$0xff]  }
 0x5aa   : > { %5146 = vmatmul.mubr.bf16.gmra.mrb[220].mxu0 %v4169_v52  ;;  %5532 = vmatmul.mubr.bf16.gmra.mrb[252].mxu1 %v4169_v52  ;;  %v10799_v39 = vld [vmem:[#allocation14 + $0x100] ss:$16 sps:$4 sm:$0xff]   ;;  %v10804_v36 = vld [vmem:[#allocation14 + $0x124] ss:$16 sps:$4 sm:$0xff]  }
 0x5ab   : > { %5188 = vmatprep.mubr.bf16.mxu0 %v12293_v63  ;;  %5574 = vmatprep.mubr.bf16.mxu1 %v12293_v63  ;;  %v10817_v63 = vld [vmem:[#allocation14 + $0x28] ss:$16 sps:$4 sm:$0xff]   ;;  %v10805_v31 = vld [vmem:[#allocation14 + $0x140] ss:$16 sps:$4 sm:$0xff]   ;;  %v10810_v44 = vld [vmem:[#allocation14 + $0x164] ss:$16 sps:$4 sm:$0xff]  }
 0x5ac   : > { %v10811_v45 = vld [vmem:[#allocation14 + $0x180] ss:$16 sps:$4 sm:$0xff]   ;;  %v10822_v52 = vld [vmem:[#allocation14 + $0x1a4] ss:$16 sps:$4 sm:$0xff]  }
 0x5ad   : > { %v10829_v16 = vld [vmem:[#allocation14 + $0x1c0] ss:$16 sps:$4 sm:$0xff]  }
 0x5b2   : > { %5189 = vmatmul.mubr.bf16.vlgmr.msra.gmra.mrb[160].mxu0 %v12291_v29  ;;  %5575 = vmatmul.mubr.bf16.vlgmr.msra.gmra.mrb[192].mxu1 %v12291_v29  ;;  %v10823_v29 = vld [vmem:[#allocation14 + $0x48] ss:$16 sps:$4 sm:$0xff]  }
 0x5b3   : > { %5198 = vmatprep.mubr.bf16.mxu0 %v12305_v25  ;;  %5584 = vmatprep.mubr.bf16.mxu1 %v12305_v25  ;;  %v10828_v25 = vld [vmem:[#allocation14 + $0x6c] ss:$16 sps:$4 sm:$0xff]  }
 0x5b4   : > { %6718 = vmatpush1.bf16.msra.mxu0 %v10775_v3  ;;  %9327 = vmatpush1.bf16.msra.mxu1 %v10814_v7  ;;  %v10859_v3 = vld [vmem:[#allocation14 + $0x148] ss:$16 sps:$4 sm:$0xff]   ;;  %v10873_v7 = vld [vmem:[#allocation14 + $0x1ac] ss:$16 sps:$4 sm:$0xff]  }
 0x5b5   : > { %6719 = vmatprep.subr.bf16.mxu0 %v10780_v46  ;;  %9312 = vmatprep.subr.bf16.mxu1 %v10819_v18  ;;  %v10868_v46 = vld [vmem:[#allocation14 + $0x188] ss:$16 sps:$4 sm:$0xff]  }
 0x5b6   : > { %v10877_v18 = vld [vmem:[#allocation14 + $0x1c8] ss:$16 sps:$4 sm:$0xff]  }
 0x5b8   : > { %6720 = vmatpush1.bf16.msra.mxu0 %v10778_v19  ;;  %9328 = vmatpush1.bf16.msra.mxu1 %v10817_v63  ;;  %v10882_v19 = vld [vmem:[#allocation14 + $0x1ec] ss:$16 sps:$4 sm:$0xff]  }
 0x5b9   : > { %6721 = vmatprep.subr.bf16.mxu0 %v10783_v47  ;;  %9313 = vmatprep.subr.bf16.mxu1 %v10825_v15  ;;  %v10880_v47 = vld [vmem:[#allocation14 + $0x1e8] ss:$16 sps:$4 sm:$0xff]  }
 0x5ba   : > { %5199 = vmatmul.mubr.bf16.gmra.mrb[164].mxu0 %v12303_v22  ;;  %5585 = vmatmul.mubr.bf16.gmra.mrb[196].mxu1 %v12303_v22  ;;  %v10832_v22 = vld [vmem:[#allocation14 + $0x88] ss:$16 sps:$4 sm:$0xff]  }
 0x5bb   : > { %5208 = vmatprep.mubr.bf16.mxu0 %v12317_v48  ;;  %5594 = vmatprep.mubr.bf16.mxu1 %v12317_v48  ;;  %v10837_v48 = vld [vmem:[#allocation14 + $0xac] ss:$16 sps:$4 sm:$0xff]  }
 0x5bc   : > { %6722 = vmatpush1.bf16.msra.mxu0 %v10781_v5  ;;  %9329 = vmatpush1.bf16.msra.mxu1 %v10823_v29 }
 0x5bd   : > { %6723 = vmatprep.subr.bf16.mxu0 %v10786_v23  ;;  %9314 = vmatprep.subr.bf16.mxu1 %v10828_v25 }
 0x5c0   : > { %6724 = vmatpush1.bf16.msra.mxu0 %v10784_v41  ;;  %9330 = vmatpush1.bf16.msra.mxu1 %v10826_v58 }
 0x5c1   : > { %6725 = vmatprep.subr.bf16.mxu0 %v10789_v6  ;;  %9315 = vmatprep.subr.bf16.mxu1 %v10834_v21 }
 0x5c2   : > { %5209 = vmatmul.mubr.bf16.gmra.mrb[168].mxu0 %v12315_v27  ;;  %5595 = vmatmul.mubr.bf16.gmra.mrb[200].mxu1 %v12315_v27  ;;  %v10796_v27 = vld [vmem:[#allocation14 + $0xe0] ss:$16 sps:$4 sm:$0xff]  }
 0x5c3   : > { %5218 = vmatprep.mubr.bf16.mxu0 %v12329_v30  ;;  %5604 = vmatprep.mubr.bf16.mxu1 %v12329_v30  ;;  %v10801_v30 = vld [vmem:[#allocation14 + $0x104] ss:$16 sps:$4 sm:$0xff]  }
 0x5c4   : > { %6726 = vmatpush1.bf16.msra.mxu0 %v10787_v43  ;;  %9331 = vmatpush1.bf16.msra.mxu1 %v10832_v22 }
 0x5c5   : > { %6727 = vmatprep.subr.bf16.mxu0 %v10792_v57  ;;  %9316 = vmatprep.subr.bf16.mxu1 %v10837_v48 }
 0x5c8   : > { %6728 = vmatpush1.bf16.msra.mxu0 %v10790_v4  ;;  %9332 = vmatpush1.bf16.msra.mxu1 %v10835_v11 }
 0x5c9   : > { %6729 = vmatprep.subr.bf16.mxu0 %v10795_v55 }
 0x5ca   : > { %5219 = vmatmul.mubr.bf16.gmra.mrb[172].mxu0 %v12327_v28  ;;  %5605 = vmatmul.mubr.bf16.gmra.mrb[204].mxu1 %v12327_v28  ;;  %v10802_v28 = vld [vmem:[#allocation14 + $0x120] ss:$16 sps:$4 sm:$0xff]  }
 0x5cb   : > { %5228 = vmatprep.mubr.bf16.mxu0 %v12341_v37  ;;  %5614 = vmatprep.mubr.bf16.mxu1 %v12341_v37  ;;  %v10807_v37 = vld [vmem:[#allocation14 + $0x144] ss:$16 sps:$4 sm:$0xff]  }
 0x5cc   : > { %6730 = vmatpush1.bf16.msra.mxu0 %v10793_v60 }
 0x5cd   : > { %6731 = vmatprep.subr.bf16.mxu0 %v10798_v35 }
 0x5d0   : > { %6732 = vmatpush1.bf16.msra.mxu0 %v10796_v27 }
 0x5d1   : > { %6733 = vmatprep.subr.bf16.mxu0 %v10801_v30 }
 0x5d2   : > { %5229 = vmatmul.mubr.bf16.gmra.mrb[176].mxu0 %v12339_v2  ;;  %5615 = vmatmul.mubr.bf16.gmra.mrb[208].mxu1 %v12339_v2  ;;  %v10808_v2 = vld [vmem:[#allocation14 + $0x160] ss:$16 sps:$4 sm:$0xff]  }
 0x5d3   : > { %5238 = vmatprep.mubr.bf16.mxu0 %v12353_v0  ;;  %5624 = vmatprep.mubr.bf16.mxu1 %v12353_v0  ;;  %v10813_v0 = vld [vmem:[#allocation14 + $0x184] ss:$16 sps:$4 sm:$0xff]  }
 0x5d4   : > { %6734 = vmatpush1.bf16.msra.mxu0 %v10799_v39 }
 0x5d5   : > { %6735 = vmatprep.subr.bf16.mxu0 %v10804_v36 }
 0x5d8   : > { %6736 = vmatpush1.bf16.msra.mxu0 %v10802_v28 }
 0x5d9   : > { %6737 = vmatprep.subr.bf16.mxu0 %v10807_v37 }
 0x5da   : > { %5239 = vmatmul.mubr.bf16.gmra.mrb[180].mxu0 %v12351_v49  ;;  %5625 = vmatmul.mubr.bf16.gmra.mrb[212].mxu1 %v12351_v49  ;;  %v10820_v49 = vld [vmem:[#allocation14 + $0x1a0] ss:$16 sps:$4 sm:$0xff]  }
 0x5db   : > { %5248 = vmatprep.mubr.bf16.mxu0 %v12365_v20  ;;  %5634 = vmatprep.mubr.bf16.mxu1 %v12365_v20  ;;  %v10831_v20 = vld [vmem:[#allocation14 + $0x1c4] ss:$16 sps:$4 sm:$0xff]  }
 0x5dc   : > { %6738 = vmatpush1.bf16.msra.mxu0 %v10805_v31 }
 0x5dd   : > { %6739 = vmatprep.subr.bf16.mxu0 %v10810_v44 }
 0x5e0   : > { %6740 = vmatpush1.bf16.msra.mxu0 %v10808_v2 }
 0x5e1   : > { %6741 = vmatprep.subr.bf16.mxu0 %v10813_v0 }
 0x5e2   : > { %5249 = vmatmul.mubr.bf16.gmra.mrb[184].mxu0 %v12363_v62  ;;  %5635 = vmatmul.mubr.bf16.gmra.mrb[216].mxu1 %v12363_v62  ;;  %v10843_v62 = vld [vmem:[#allocation14 + $0xcc] ss:$16 sps:$4 sm:$0xff]  }
 0x5e3   : > { %5258 = vmatprep.mubr.bf16.mxu0 %v12377_v38  ;;  %5644 = vmatprep.mubr.bf16.mxu1 %v12377_v38  ;;  %v10840_v38 = vld [vmem:[#allocation14 + $0x1e4] ss:$16 sps:$4 sm:$0xff]  }
 0x5e4   : > { %6742 = vmatpush1.bf16.msra.mxu0 %v10811_v45  ;;  %9317 = vmatprep.subr.bf16.mxu1 %v10843_v62 }
 0x5e5   : > { %6743 = vmatprep.subr.bf16.mxu0 %v10822_v52 }
 0x5e8   : > { %6744 = vmatpush1.bf16.msra.mxu0 %v10820_v49 }
 0x5e9   : > { %6745 = vmatprep.subr.bf16.mxu0 %v10831_v20 }
 0x5ea   : > { %5259 = vmatmul.mubr.bf16.gmra.mrb[188].mxu0 %v12375_v61  ;;  %5645 = vmatmul.mubr.bf16.gmra.mrb[220].mxu1 %v12375_v61  ;;  %v10841_v61 = vld [vmem:[#allocation14 + $0xc8] ss:$16 sps:$4 sm:$0xff]  }
 0x5eb   : > { %5268 = vmatprep.mubr.bf16.mxu0 %v12389_v59  ;;  %5654 = vmatprep.mubr.bf16.mxu1 %v12389_v59  ;;  %v10838_v59 = vld [vmem:[#allocation14 + $0x1e0] ss:$16 sps:$4 sm:$0xff]  }
 0x5ec   : > { %6746 = vmatpush1.bf16.msra.mxu0 %v10829_v16  ;;  %9333 = vmatpush1.bf16.msra.mxu1 %v10841_v61  ;;  %v10847_v16 = vld [vmem:[#allocation14 + $0x200] ss:$16 sps:$4 sm:$0xff]  }
 0x5ed   : > { %6747 = vmatprep.subr.bf16.mxu0 %v10840_v38 }
 0x5f0   : > { %6748 = vmatpush1.bf16.msra.mxu0 %v10838_v59  ;;  %v10858_v59 = vld [vmem:[#allocation14 + $0x224] ss:$16 sps:$4 sm:$0xff]  }
 0x5f2   : > { %5269 = vmatmul.mubr.bf16.gmra.mrb[192].mxu0 %v12387_v51  ;;  %5655 = vmatmul.mubr.bf16.gmra.mrb[224].mxu1 %v12387_v51  ;;  %v10846_v51 = vld [vmem:[#allocation14 + $0xec] ss:$16 sps:$4 sm:$0xff]  }
 0x5f3   : > { %5278 = vmatprep.mubr.bf16.mxu0 %v12401_v33  ;;  %5664 = vmatprep.mubr.bf16.mxu1 %v12401_v33  ;;  %v10852_v33 = vld [vmem:[#allocation14 + $0x10c] ss:$16 sps:$4 sm:$0xff]  }
 0x5f4   : > { %9318 = vmatprep.subr.bf16.mxu1 %v10846_v51 }
 0x5fa   : > { %5279 = vmatmul.mubr.bf16.gmra.mrb[196].mxu0 %v12399_v26  ;;  %5665 = vmatmul.mubr.bf16.gmra.mrb[228].mxu1 %v12399_v26  ;;  %v10844_v26 = vld [vmem:[#allocation14 + $0xe8] ss:$16 sps:$4 sm:$0xff]  }
 0x5fb   : > { %5288 = vmatprep.mubr.bf16.mxu0 %v12413_v1  ;;  %5674 = vmatprep.mubr.bf16.mxu1 %v12413_v1  ;;  %v10855_v1 = vld [vmem:[#allocation14 + $0x12c] ss:$16 sps:$4 sm:$0xff]  }
 0x5fc   : > { %9334 = vmatpush1.bf16.msra.mxu1 %v10844_v26 }
 0x5fd   : > { %9319 = vmatprep.subr.bf16.mxu1 %v10852_v33 }
 0x602   : > { %5289 = vmatmul.mubr.bf16.gmra.mrb[200].mxu0 %v12411_v13  ;;  %5675 = vmatmul.mubr.bf16.gmra.mrb[232].mxu1 %v12411_v13  ;;  %v10850_v13 = vld [vmem:[#allocation14 + $0x108] ss:$16 sps:$4 sm:$0xff]  }
 0x603   : > { %5298 = vmatprep.mubr.bf16.mxu0 %v12425_v14  ;;  %5684 = vmatprep.mubr.bf16.mxu1 %v12425_v14  ;;  %v10849_v14 = vld [vmem:[#allocation14 + $0x204] ss:$16 sps:$4 sm:$0xff]  }
 0x604   : > { %9335 = vmatpush1.bf16.msra.mxu1 %v10850_v13  ;;  %6910 = vmatprep.subr.bf16.mxu0 %v10849_v14 }
 0x605   : > { %9320 = vmatprep.subr.bf16.mxu1 %v10855_v1 }
 0x60a   : > { %5299 = vmatmul.mubr.bf16.gmra.mrb[204].mxu0 %v12423_v8  ;;  %5685 = vmatmul.mubr.bf16.gmra.mrb[236].mxu1 %v12423_v8  ;;  %v10853_v8 = vld [vmem:[#allocation14 + $0x128] ss:$16 sps:$4 sm:$0xff]  }
 0x60b   : > { %5308 = vmatprep.mubr.bf16.mxu0 %v12437_v12  ;;  %5694 = vmatprep.mubr.bf16.mxu1 %v12437_v12  ;;  %v10861_v12 = vld [vmem:[#allocation14 + $0x14c] ss:$16 sps:$4 sm:$0xff]  }
 0x60c   : > { %9336 = vmatpush1.bf16.msra.mxu1 %v10853_v8 }
 0x60d   : > { %9321 = vmatprep.subr.bf16.mxu1 %v10861_v12 }
 0x610   : > { %9337 = vmatpush1.bf16.msra.mxu1 %v10859_v3 }
 0x611   : > { %9322 = vmatprep.subr.bf16.mxu1 %v10864_v9 }
 0x612   : > { %5309 = vmatmul.mubr.bf16.gmra.mrb[208].mxu0 %v12435_v42  ;;  %5695 = vmatmul.mubr.bf16.gmra.mrb[240].mxu1 %v12435_v42  ;;  %v10862_v42 = vld [vmem:[#allocation14 + $0x168] ss:$16 sps:$4 sm:$0xff]  }
 0x613   : > { %5318 = vmatprep.mubr.bf16.mxu0 %v12449_v54  ;;  %5704 = vmatprep.mubr.bf16.mxu1 %v12449_v54  ;;  %v10870_v54 = vld [vmem:[#allocation14 + $0x18c] ss:$16 sps:$4 sm:$0xff]  }
 0x614   : > { %9338 = vmatpush1.bf16.msra.mxu1 %v10862_v42 }
 0x615   : > { %9323 = vmatprep.subr.bf16.mxu1 %v10870_v54  ;;  %v10856_v54 = vld [vmem:[#allocation14 + $0x220] ss:$16 sps:$4 sm:$0xff]  }
 0x618   : > { %9339 = vmatpush1.bf16.msra.mxu1 %v10868_v46 }
 0x619   : > { %9324 = vmatprep.subr.bf16.mxu1 %v10873_v7 }
 0x61a   : > { %5319 = vmatmul.mubr.bf16.gmra.mrb[212].mxu0 %v12447_v50  ;;  %5705 = vmatmul.mubr.bf16.gmra.mrb[244].mxu1 %v12447_v50  ;;  %v10871_v50 = vld [vmem:[#allocation14 + $0x1a8] ss:$16 sps:$4 sm:$0xff]  }
 0x61b   : > { %5328 = vmatprep.mubr.bf16.mxu0 %v12461_v56  ;;  %5714 = vmatprep.mubr.bf16.mxu1 %v12461_v56  ;;  %v10879_v56 = vld [vmem:[#allocation14 + $0x1cc] ss:$16 sps:$4 sm:$0xff]  }
 0x61c   : > { %9340 = vmatpush1.bf16.msra.mxu1 %v10871_v50 }
 0x61d   : > { %9325 = vmatprep.subr.bf16.mxu1 %v10879_v56 }
 0x620   : > { %9341 = vmatpush1.bf16.msra.mxu1 %v10877_v18  ;;  %v10867_v18 = vld [vmem:[#allocation14 + $0x244] ss:$16 sps:$4 sm:$0xff]  }
 0x621   : > { %9326 = vmatprep.subr.bf16.mxu1 %v10882_v19 }
 0x622   : > { %5329 = vmatmul.mubr.bf16.gmra.mrb[216].mxu0 %v12459_v17  ;;  %5715 = vmatmul.mubr.bf16.gmra.mrb[248].mxu1 %v12459_v17  ;;  %v10900_v17 = vld [vmem:[#allocation14 + $0x20c] ss:$16 sps:$4 sm:$0xff]  }
 0x623   : > { %5338 = vmatprep.mubr.bf16.mxu0 %v12473_v53  ;;  %5724 = vmatprep.mubr.bf16.mxu1 %v12473_v53  ;;  %v4301_v53 = vld [vmem:[%s13396_s29] sm:$0xf]  ;;  %s13282_s29 = scalar_lea.hbm %s13405_s1, %s9014_s27 }
 0x624   : > { %9342 = vmatpush1.bf16.msra.mxu1 %v10880_v47  ;;  %v12543_v63 = vrot.slane %v4301_v53, %v11913_v32  ;;  %v12546_v5 = vrot.slane %v4301_v53, %v11992_v24  ;;  %v12549_v15 = vrot.slane %v4301_v53, %v11919_v34 }
 0x625   : > { %7296 = vmatprep.subr.bf16.mxu1 %v10900_v17 }
 0x62a   : > { %5339 = vmatmul.mubr.bf16.gmra.mrb[220].mxu0 %v12471_v10  ;;  %5725 = vmatmul.mubr.bf16.gmra.mrb[252].mxu1 %v12471_v10  ;;  %v12552_v10 = vrot.slane %v4301_v53, %v11998_v40 }
 0x685   : > { %v5190_v23 = vpop.f32.mrb[160].mxu0  ;;  %v5576_v29 = vpop.f32.mrb[192].mxu1 }
 0x686   : > { %v9471_v25 = vadd.f32 %v5190_v23, %v12543_v63  ;;  %v9535_v41 = vadd.f32 %v5576_v29, %v12546_v5  ;;  %v5192_v6 = vpop.f32.mrb[161].mxu0  ;;  %v5578_v58 = vpop.f32.mrb[193].mxu1 }
 0x687   : > { %v9472_v43 = vadd.f32 %v5192_v6, %v12549_v15  ;;  %v9536_v21 = vadd.f32 %v5578_v58, %v12552_v10  ;;  %v5194_v57 = vpop.f32.mrb[162].mxu0  ;;  %v5580_v22 = vpop.f32.mrb[194].mxu1 }
 0x688   : > { %v9473_v48 = vadd.f32 %v5194_v57, %v12543_v63  ;;  %v9537_v4 = vadd.f32 %v5580_v22, %v12546_v5  ;;  %v5196_v55 = vpop.f32.mrb[163].mxu0  ;;  %v5582_v11 = vpop.f32.mrb[195].mxu1  ;;  %v5735_v27 = vmax.f32 %v9471_v25, 0.0  ;;  %v5737_v30 = vmax.f32 %v9535_v41, 0.0 }
 0x689   : > { %v9474_v60 = vadd.f32 %v5196_v55, %v12549_v15  ;;  %v9538_v35 = vadd.f32 %v5582_v11, %v12552_v10  ;;  %v5736_v28 = vmax.f32 %v9472_v43, 0.0  ;;  %v5738_v37 = vmax.f32 %v9536_v21, 0.0  ;;  %v10865_v43 = vld [vmem:[#allocation14 + $0x240] ss:$16 sps:$4 sm:$0xff]  }
 0x68a   : > { %v5739_v39 = vmax.f32 %v9473_v48, 0.0  ;;  %v5741_v36 = vmax.f32 %v9537_v4, 0.0  ;;  %v10876_v4 = vld [vmem:[#allocation14 + $0x264] ss:$16 sps:$4 sm:$0xff]  }
 0x68b   : > { %v5740_v31 = vmax.f32 %v9474_v60, 0.0  ;;  %v5742_v44 = vmax.f32 %v9538_v35, 0.0 }
 0x68c   : > { %v12562_v2 = vpack.c.bf16 %v5739_v39, %v5735_v27  ;;  %v12564_v0 = vpack.c.bf16 %v5741_v36, %v5737_v30 }
 0x68d   : > { %v12566_v45 = vpack.c.bf16 %v5740_v31, %v5736_v28  ;;  %v12568_v52 = vpack.c.bf16 %v5742_v44, %v5738_v37  ;;  %v5200_v49 = vpop.f32.mrb[164].mxu0  ;;  %v5586_v20 = vpop.f32.mrb[196].mxu1  ;;  %v10874_v31 = vld [vmem:[#allocation14 + $0x260] ss:$16 sps:$4 sm:$0xff]  }
 0x68e   : > { %v9475_v62 = vadd.f32 %v5200_v49, %v12543_v63  ;;  %v9539_v61 = vadd.f32 %v5586_v20, %v12546_v5  ;;  %v5202_v38 = vpop.f32.mrb[165].mxu0  ;;  %v5588_v51 = vpop.f32.mrb[197].mxu1 }
 0x68f   : > { %v9476_v26 = vadd.f32 %v5202_v38, %v12549_v15  ;;  %v9540_v33 = vadd.f32 %v5588_v51, %v12552_v10  ;;  %v5204_v13 = vpop.f32.mrb[166].mxu0  ;;  %v5590_v1 = vpop.f32.mrb[198].mxu1  ;;  %6749 = vmatprep.mubr.bf16.mxu0 %v12566_v45 }
 0x690   : > { %v9477_v8 = vadd.f32 %v5204_v13, %v12543_v63  ;;  %v9541_v14 = vadd.f32 %v5590_v1, %v12546_v5  ;;  %v5206_v12 = vpop.f32.mrb[167].mxu0  ;;  %v5592_v3 = vpop.f32.mrb[199].mxu1  ;;  %6750 = vmatmul.mubr.bf16.vlgmr.msra.gmra.mrb[224].mxu0 %v12562_v2  ;;  %v5743_v46 = vmax.f32 %v9475_v62, 0.0  ;;  %v5745_v7 = vmax.f32 %v9539_v61, 0.0  ;;  %v10885_v62 = vld [vmem:[#allocation14 + $0x284] ss:$16 sps:$4 sm:$0xff]  }
 0x691   : > { %v9478_v9 = vadd.f32 %v5206_v12, %v12549_v15  ;;  %v9542_v42 = vadd.f32 %v5592_v3, %v12552_v10  ;;  %6911 = vmatpush1.bf16.msra.mxu0 %v10847_v16  ;;  %v5744_v19 = vmax.f32 %v9476_v26, 0.0  ;;  %v5746_v47 = vmax.f32 %v9540_v33, 0.0  ;;  %v10883_v12 = vld [vmem:[#allocation14 + $0x280] ss:$16 sps:$4 sm:$0xff]  }
 0x692   : > { %v5747_v50 = vmax.f32 %v9477_v8, 0.0  ;;  %v5749_v56 = vmax.f32 %v9541_v14, 0.0  ;;  %6912 = vmatprep.subr.bf16.mxu0 %v10858_v59 }
 0x693   : > { %v5748_v17 = vmax.f32 %v9478_v9, 0.0  ;;  %v5750_v53 = vmax.f32 %v9542_v42, 0.0 }
 0x694   : > { %v12580_v23 = vpack.c.bf16 %v5747_v50, %v5743_v46  ;;  %v12582_v29 = vpack.c.bf16 %v5749_v56, %v5745_v7  ;;  %v10888_v46 = vld [vmem:[#allocation14 + $0x2a4] ss:$16 sps:$4 sm:$0xff]  }
 0x695   : > { %v12584_v25 = vpack.c.bf16 %v5748_v17, %v5744_v19  ;;  %v12586_v41 = vpack.c.bf16 %v5750_v53, %v5746_v47  ;;  %v5210_v6 = vpop.f32.mrb[168].mxu0  ;;  %v5596_v58 = vpop.f32.mrb[200].mxu1  ;;  %6913 = vmatpush1.bf16.msra.mxu0 %v10856_v54 }
 0x696   : > { %v9479_v21 = vadd.f32 %v5210_v6, %v12543_v63  ;;  %v9543_v57 = vadd.f32 %v5596_v58, %v12546_v5  ;;  %v5212_v22 = vpop.f32.mrb[169].mxu0  ;;  %v5598_v48 = vpop.f32.mrb[201].mxu1  ;;  %6914 = vmatprep.subr.bf16.mxu0 %v10867_v18 }
 0x697   : > { %v9480_v55 = vadd.f32 %v5212_v22, %v12549_v15  ;;  %v9544_v11 = vadd.f32 %v5598_v48, %v12552_v10  ;;  %v5214_v60 = vpop.f32.mrb[170].mxu0  ;;  %v5600_v35 = vpop.f32.mrb[202].mxu1  ;;  %6759 = vmatprep.mubr.bf16.mxu0 %v12584_v25 }
 0x698   : > { %v9481_v27 = vadd.f32 %v5214_v60, %v12543_v63  ;;  %v9545_v30 = vadd.f32 %v5600_v35, %v12546_v5  ;;  %v5216_v39 = vpop.f32.mrb[171].mxu0  ;;  %v5602_v36 = vpop.f32.mrb[203].mxu1  ;;  %6760 = vmatmul.mubr.bf16.gmra.mrb[228].mxu0 %v12580_v23  ;;  %v5751_v44 = vmax.f32 %v9479_v21, 0.0  ;;  %v5753_v49 = vmax.f32 %v9543_v57, 0.0 }
 0x699   : > { %v9482_v28 = vadd.f32 %v5216_v39, %v12549_v15  ;;  %v9546_v37 = vadd.f32 %v5602_v36, %v12552_v10  ;;  %6915 = vmatpush1.bf16.msra.mxu0 %v10865_v43  ;;  %v5752_v61 = vmax.f32 %v9480_v55, 0.0  ;;  %v5754_v38 = vmax.f32 %v9544_v11, 0.0  ;;  %v10886_v43 = vld [vmem:[#allocation14 + $0x2a0] ss:$16 sps:$4 sm:$0xff]  }
 0x69a   : > { %v5755_v20 = vmax.f32 %v9481_v27, 0.0  ;;  %v5757_v16 = vmax.f32 %v9545_v30, 0.0  ;;  %6916 = vmatprep.subr.bf16.mxu0 %v10876_v4  ;;  %v10891_v4 = vld [vmem:[#allocation14 + $0x2c4] ss:$16 sps:$4 sm:$0xff]  }
 0x69b   : > { %v5756_v51 = vmax.f32 %v9482_v28, 0.0  ;;  %v5758_v59 = vmax.f32 %v9546_v37, 0.0 }
 0x69c   : > { %v12598_v26 = vpack.c.bf16 %v5755_v20, %v5751_v44  ;;  %v12600_v33 = vpack.c.bf16 %v5757_v16, %v5753_v49 }
 0x69d   : > { %v12602_v13 = vpack.c.bf16 %v5756_v51, %v5752_v61  ;;  %v12604_v1 = vpack.c.bf16 %v5758_v59, %v5754_v38  ;;  %v5220_v8 = vpop.f32.mrb[172].mxu0  ;;  %v5606_v14 = vpop.f32.mrb[204].mxu1  ;;  %6917 = vmatpush1.bf16.msra.mxu0 %v10874_v31  ;;  %v10889_v31 = vld [vmem:[#allocation14 + $0x2c0] ss:$16 sps:$4 sm:$0xff]  }
 0x69e   : > { %v9483_v3 = vadd.f32 %v5220_v8, %v12543_v63  ;;  %v9547_v9 = vadd.f32 %v5606_v14, %v12546_v5  ;;  %v5222_v42 = vpop.f32.mrb[173].mxu0  ;;  %v5608_v54 = vpop.f32.mrb[205].mxu1  ;;  %6918 = vmatprep.subr.bf16.mxu0 %v10885_v62  ;;  %v10894_v62 = vld [vmem:[#allocation14 + $0x2e4] ss:$16 sps:$4 sm:$0xff]  }
 0x69f   : > { %v9484_v7 = vadd.f32 %v5222_v42, %v12549_v15  ;;  %v9548_v50 = vadd.f32 %v5608_v54, %v12552_v10  ;;  %v5224_v56 = vpop.f32.mrb[174].mxu0  ;;  %v5610_v18 = vpop.f32.mrb[206].mxu1  ;;  %6769 = vmatprep.mubr.bf16.mxu0 %v12602_v13  ;;  %v10892_v54 = vld [vmem:[#allocation14 + $0x2e0] ss:$16 sps:$4 sm:$0xff]  }
 0x6a0   : > { %v9485_v19 = vadd.f32 %v5224_v56, %v12543_v63  ;;  %v9549_v47 = vadd.f32 %v5610_v18, %v12546_v5  ;;  %v5226_v17 = vpop.f32.mrb[175].mxu0  ;;  %v5612_v53 = vpop.f32.mrb[207].mxu1  ;;  %6770 = vmatmul.mubr.bf16.gmra.mrb[232].mxu0 %v12598_v26  ;;  %v5759_v21 = vmax.f32 %v9483_v3, 0.0  ;;  %v5761_v57 = vmax.f32 %v9547_v9, 0.0  ;;  %v10897_v18 = vld [vmem:[#allocation14 + $0x304] ss:$16 sps:$4 sm:$0xff]  }
 0x6a1   : > { %v9486_v6 = vadd.f32 %v5226_v17, %v12549_v15  ;;  %v9550_v58 = vadd.f32 %v5612_v53, %v12552_v10  ;;  %6919 = vmatpush1.bf16.msra.mxu0 %v10883_v12  ;;  %v5760_v55 = vmax.f32 %v9484_v7, 0.0  ;;  %v5762_v11 = vmax.f32 %v9548_v50, 0.0 }
 0x6a2   : > { %v5763_v22 = vmax.f32 %v9485_v19, 0.0  ;;  %v5765_v48 = vmax.f32 %v9549_v47, 0.0  ;;  %6920 = vmatprep.subr.bf16.mxu0 %v10888_v46 }
 0x6a3   : > { %v5764_v60 = vmax.f32 %v9486_v6, 0.0  ;;  %v5766_v35 = vmax.f32 %v9550_v58, 0.0 }
 0x6a4   : > { %v12616_v27 = vpack.c.bf16 %v5763_v22, %v5759_v21  ;;  %v12618_v30 = vpack.c.bf16 %v5765_v48, %v5761_v57  ;;  %v10895_v48 = vld [vmem:[#allocation14 + $0x300] ss:$16 sps:$4 sm:$0xff]  }
 0x6a5   : > { %v12620_v39 = vpack.c.bf16 %v5764_v60, %v5760_v55  ;;  %v12622_v36 = vpack.c.bf16 %v5766_v35, %v5762_v11  ;;  %v5230_v28 = vpop.f32.mrb[176].mxu0  ;;  %v5616_v37 = vpop.f32.mrb[208].mxu1  ;;  %6921 = vmatpush1.bf16.msra.mxu0 %v10886_v43 }
 0x6a6   : > { %v9487_v44 = vadd.f32 %v5230_v28, %v12543_v63  ;;  %v9551_v49 = vadd.f32 %v5616_v37, %v12546_v5  ;;  %v5232_v20 = vpop.f32.mrb[177].mxu0  ;;  %v5618_v16 = vpop.f32.mrb[209].mxu1  ;;  %6922 = vmatprep.subr.bf16.mxu0 %v10891_v4  ;;  %v10898_v4 = vld [vmem:[#allocation14 + $0x208] ss:$16 sps:$4 sm:$0xff]   ;;  %v10903_v28 = vld [vmem:[#allocation14 + $0x22c] ss:$16 sps:$4 sm:$0xff]  }
 0x6a7   : > { %v9488_v61 = vadd.f32 %v5232_v20, %v12549_v15  ;;  %v9552_v38 = vadd.f32 %v5618_v16, %v12552_v10  ;;  %v5234_v51 = vpop.f32.mrb[178].mxu0  ;;  %v5620_v59 = vpop.f32.mrb[210].mxu1  ;;  %6779 = vmatprep.mubr.bf16.mxu0 %v12620_v39  ;;  %v10906_v37 = vld [vmem:[#allocation14 + $0x324] ss:$16 sps:$4 sm:$0xff]  }
 0x6a8   : > { %v9489_v8 = vadd.f32 %v5234_v51, %v12543_v63  ;;  %v9553_v14 = vadd.f32 %v5620_v59, %v12546_v5  ;;  %v5236_v12 = vpop.f32.mrb[179].mxu0  ;;  %v5622_v3 = vpop.f32.mrb[211].mxu1  ;;  %6780 = vmatmul.mubr.bf16.gmra.mrb[236].mxu0 %v12616_v27  ;;  %v5767_v46 = vmax.f32 %v9487_v44, 0.0  ;;  %v5769_v7 = vmax.f32 %v9551_v49, 0.0 }
 0x6a9   : > { %v9490_v9 = vadd.f32 %v5236_v12, %v12549_v15  ;;  %v9554_v42 = vadd.f32 %v5622_v3, %v12552_v10  ;;  %6923 = vmatpush1.bf16.msra.mxu0 %v10889_v31  ;;  %v5768_v19 = vmax.f32 %v9488_v61, 0.0  ;;  %v5770_v47 = vmax.f32 %v9552_v38, 0.0  ;;  %v10909_v12 = vld [vmem:[#allocation14 + $0x24c] ss:$16 sps:$4 sm:$0xff]  }
 0x6aa   : > { %v5771_v50 = vmax.f32 %v9489_v8, 0.0  ;;  %v5773_v56 = vmax.f32 %v9553_v14, 0.0  ;;  %6924 = vmatprep.subr.bf16.mxu0 %v10894_v62  ;;  %v10901_v8 = vld [vmem:[#allocation14 + $0x228] ss:$16 sps:$4 sm:$0xff]   ;;  %v10904_v14 = vld [vmem:[#allocation14 + $0x320] ss:$16 sps:$4 sm:$0xff]  }
 0x6ab   : > { %v5772_v17 = vmax.f32 %v9490_v9, 0.0  ;;  %v5774_v53 = vmax.f32 %v9554_v42, 0.0 }
 0x6ac   : > { %v5879_v6 = vpack.c.bf16 %v5771_v50, %v5767_v46  ;;  %v12634_v58 = vpack.c.bf16 %v5773_v56, %v5769_v7  ;;  %v10915_v46 = vld [vmem:[#allocation14 + $0x344] ss:$16 sps:$4 sm:$0xff]  }
 0x6ad   : > { %v5880_v43 = vpack.c.bf16 %v5772_v17, %v5768_v19  ;;  %v12636_v21 = vpack.c.bf16 %v5774_v53, %v5770_v47  ;;  %v5240_v57 = vpop.f32.mrb[180].mxu0  ;;  %v5626_v22 = vpop.f32.mrb[212].mxu1  ;;  %6925 = vmatpush1.bf16.msra.mxu0 %v10892_v54 }
 0x6ae   : > { %v9491_v55 = vadd.f32 %v5240_v57, %v12543_v63  ;;  %v9555_v11 = vadd.f32 %v5626_v22, %v12546_v5  ;;  %v5242_v60 = vpop.f32.mrb[181].mxu0  ;;  %v5628_v35 = vpop.f32.mrb[213].mxu1  ;;  %6926 = vmatprep.subr.bf16.mxu0 %v10897_v18  ;;  %v10907_v57 = vld [vmem:[#allocation14 + $0x248] ss:$16 sps:$4 sm:$0xff]   ;;  %v10913_v22 = vld [vmem:[#allocation14 + $0x340] ss:$16 sps:$4 sm:$0xff]  }
 0x6af   : > { %v9492_v31 = vadd.f32 %v5242_v60, %v12549_v15  ;;  %v9556_v44 = vadd.f32 %v5628_v35, %v12552_v10  ;;  %v5244_v49 = vpop.f32.mrb[182].mxu0  ;;  %v5630_v20 = vpop.f32.mrb[214].mxu1  ;;  %6789 = vmatprep.mubr.bf16.mxu0 %v5880_v43  ;;  %7175 = vmatprep.mubr.bf16.mxu1 %v5880_v43  ;;  %v10912_v60 = vld [vmem:[#allocation14 + $0x26c] ss:$16 sps:$4 sm:$0xff]   ;;  %v10924_v35 = vld [vmem:[#allocation14 + $0x364] ss:$16 sps:$4 sm:$0xff]  }
 0x6b0   : > { %v9493_v16 = vadd.f32 %v5244_v49, %v12543_v63  ;;  %v9557_v62 = vadd.f32 %v5630_v20, %v12546_v5  ;;  %v5246_v61 = vpop.f32.mrb[183].mxu0  ;;  %v5632_v38 = vpop.f32.mrb[215].mxu1  ;;  %6790 = vmatmul.mubr.bf16.gmra.mrb[240].mxu0 %v5879_v6  ;;  %7176 = vmatmul.mubr.bf16.vlgmr.msra.gmra.mrb[0].mxu1 %v5879_v6  ;;  %v5775_v3 = vmax.f32 %v9491_v55, 0.0  ;;  %v5777_v9 = vmax.f32 %v9555_v11, 0.0 }
 0x6b1   : > { %v9494_v51 = vadd.f32 %v5246_v61, %v12549_v15  ;;  %v9558_v59 = vadd.f32 %v5632_v38, %v12552_v10  ;;  %6927 = vmatpush1.bf16.msra.mxu0 %v10895_v48  ;;  %7297 = vmatpush1.bf16.msra.mxu1 %v10898_v4  ;;  %v5776_v7 = vmax.f32 %v9492_v31, 0.0  ;;  %v5778_v50 = vmax.f32 %v9556_v44, 0.0 }
 0x6b2   : > { %v5779_v42 = vmax.f32 %v9493_v16, 0.0  ;;  %v5781_v54 = vmax.f32 %v9557_v62, 0.0  ;;  %7298 = vmatprep.subr.bf16.mxu1 %v10903_v28  ;;  %6928 = vmatprep.subr.bf16.mxu0 %v10906_v37 }
 0x6b3   : > { %v5780_v56 = vmax.f32 %v9494_v51, 0.0  ;;  %v5782_v18 = vmax.f32 %v9558_v59, 0.0  ;;  %v10910_v51 = vld [vmem:[#allocation14 + $0x268] ss:$16 sps:$4 sm:$0xff]   ;;  %v10918_v59 = vld [vmem:[#allocation14 + $0x28c] ss:$16 sps:$4 sm:$0xff]  }
 0x6b4   : > { %v5883_v19 = vpack.c.bf16 %v5779_v42, %v5775_v3  ;;  %v12646_v47 = vpack.c.bf16 %v5781_v54, %v5777_v9  ;;  %v10933_v42 = vld [vmem:[#allocation14 + $0x384] ss:$16 sps:$4 sm:$0xff]  }
 0x6b5   : > { %v5884_v17 = vpack.c.bf16 %v5780_v56, %v5776_v7  ;;  %v12648_v53 = vpack.c.bf16 %v5782_v18, %v5778_v50  ;;  %v5250_v6 = vpop.f32.mrb[184].mxu0  ;;  %v5636_v43 = vpop.f32.mrb[216].mxu1  ;;  %7299 = vmatpush1.bf16.msra.mxu1 %v10901_v8  ;;  %6929 = vmatpush1.bf16.msra.mxu0 %v10904_v14  ;;  %v10922_v8 = vld [vmem:[#allocation14 + $0x360] ss:$16 sps:$4 sm:$0xff]  }
 0x6b6   : > { %v9495_v48 = vadd.f32 %v5250_v6, %v12543_v63  ;;  %v9559_v4 = vadd.f32 %v5636_v43, %v12546_v5  ;;  %v5252_v55 = vpop.f32.mrb[185].mxu0  ;;  %v5638_v11 = vpop.f32.mrb[217].mxu1  ;;  %7300 = vmatprep.subr.bf16.mxu1 %v10909_v12  ;;  %6930 = vmatprep.subr.bf16.mxu0 %v10915_v46 }
 0x6b7   : > { %v9496_v28 = vadd.f32 %v5252_v55, %v12549_v15  ;;  %v9560_v37 = vadd.f32 %v5638_v11, %v12552_v10  ;;  %v5254_v31 = vpop.f32.mrb[186].mxu0  ;;  %v5640_v44 = vpop.f32.mrb[218].mxu1  ;;  %6799 = vmatprep.mubr.bf16.mxu0 %v5884_v17  ;;  %7185 = vmatprep.mubr.bf16.mxu1 %v5884_v17 }
 0x6b8   : > { %v9497_v49 = vadd.f32 %v5254_v31, %v12543_v63  ;;  %v9561_v20 = vadd.f32 %v5640_v44, %v12546_v5  ;;  %v5256_v16 = vpop.f32.mrb[187].mxu0  ;;  %v5642_v62 = vpop.f32.mrb[219].mxu1  ;;  %6800 = vmatmul.mubr.bf16.gmra.mrb[244].mxu0 %v5883_v19  ;;  %7186 = vmatmul.mubr.bf16.gmra.mrb[4].mxu1 %v5883_v19  ;;  %v5783_v14 = vmax.f32 %v9495_v48, 0.0  ;;  %v5785_v12 = vmax.f32 %v9559_v4, 0.0 }
 0x6b9   : > { %v9498_v61 = vadd.f32 %v5256_v16, %v12549_v15  ;;  %v9562_v38 = vadd.f32 %v5642_v62, %v12552_v10  ;;  %7301 = vmatpush1.bf16.msra.mxu1 %v10907_v57  ;;  %6931 = vmatpush1.bf16.msra.mxu0 %v10913_v22  ;;  %v5784_v54 = vmax.f32 %v9496_v28, 0.0  ;;  %v5786_v46 = vmax.f32 %v9560_v37, 0.0  ;;  %v10916_v57 = vld [vmem:[#allocation14 + $0x288] ss:$16 sps:$4 sm:$0xff]   ;;  %v10931_v22 = vld [vmem:[#allocation14 + $0x380] ss:$16 sps:$4 sm:$0xff]  }
 0x6ba   : > { %v5787_v3 = vmax.f32 %v9497_v49, 0.0  ;;  %v5789_v9 = vmax.f32 %v9561_v20, 0.0  ;;  %7302 = vmatprep.subr.bf16.mxu1 %v10912_v60  ;;  %6932 = vmatprep.subr.bf16.mxu0 %v10924_v35  ;;  %v10921_v60 = vld [vmem:[#allocation14 + $0x2ac] ss:$16 sps:$4 sm:$0xff]   ;;  %v10942_v35 = vld [vmem:[#allocation14 + $0x3a4] ss:$16 sps:$4 sm:$0xff]  }
 0x6bb   : > { %v5788_v7 = vmax.f32 %v9498_v61, 0.0  ;;  %v5790_v50 = vmax.f32 %v9562_v38, 0.0 }
 0x6bc   : > { %v5887_v56 = vpack.c.bf16 %v5787_v3, %v5783_v14  ;;  %v12658_v18 = vpack.c.bf16 %v5789_v9, %v5785_v12 }
 0x6bd   : > { %v5888_v19 = vpack.c.bf16 %v5788_v7, %v5784_v54  ;;  %v12660_v17 = vpack.c.bf16 %v5790_v50, %v5786_v46  ;;  %v5260_v6 = vpop.f32.mrb[188].mxu0  ;;  %v5646_v43 = vpop.f32.mrb[220].mxu1  ;;  %7303 = vmatpush1.bf16.msra.mxu1 %v10910_v51  ;;  %6933 = vmatpush1.bf16.msra.mxu0 %v10922_v8  ;;  %v10919_v51 = vld [vmem:[#allocation14 + $0x2a8] ss:$16 sps:$4 sm:$0xff]   ;;  %v10940_v8 = vld [vmem:[#allocation14 + $0x3a0] ss:$16 sps:$4 sm:$0xff]  }
 0x6be   : > { %v9499_v48 = vadd.f32 %v5260_v6, %v12543_v63  ;;  %v9563_v4 = vadd.f32 %v5646_v43, %v12546_v5  ;;  %v5262_v55 = vpop.f32.mrb[189].mxu0  ;;  %v5648_v11 = vpop.f32.mrb[221].mxu1  ;;  %7304 = vmatprep.subr.bf16.mxu1 %v10918_v59  ;;  %6934 = vmatprep.subr.bf16.mxu0 %v10933_v42  ;;  %v10927_v59 = vld [vmem:[#allocation14 + $0x2cc] ss:$16 sps:$4 sm:$0xff]   ;;  %v10951_v42 = vld [vmem:[#allocation14 + $0x3c4] ss:$16 sps:$4 sm:$0xff]  }
 0x6bf   : > { %v9500_v28 = vadd.f32 %v5262_v55, %v12549_v15  ;;  %v9564_v37 = vadd.f32 %v5648_v11, %v12552_v10  ;;  %v5264_v31 = vpop.f32.mrb[190].mxu0  ;;  %v5650_v44 = vpop.f32.mrb[222].mxu1  ;;  %6809 = vmatprep.mubr.bf16.mxu0 %v5888_v19  ;;  %7195 = vmatprep.mubr.bf16.mxu1 %v5888_v19 }
 0x6c0   : > { %v9501_v49 = vadd.f32 %v5264_v31, %v12543_v63  ;;  %v9565_v20 = vadd.f32 %v5650_v44, %v12546_v5  ;;  %v5266_v16 = vpop.f32.mrb[191].mxu0  ;;  %v5652_v62 = vpop.f32.mrb[223].mxu1  ;;  %6810 = vmatmul.mubr.bf16.gmra.mrb[248].mxu0 %v5887_v56  ;;  %7196 = vmatmul.mubr.bf16.gmra.mrb[8].mxu1 %v5887_v56  ;;  %v5791_v14 = vmax.f32 %v9499_v48, 0.0  ;;  %v5793_v12 = vmax.f32 %v9563_v4, 0.0  ;;  %v10925_v48 = vld [vmem:[#allocation14 + $0x2c8] ss:$16 sps:$4 sm:$0xff]  }
 0x6c1   : > { %v9502_v61 = vadd.f32 %v5266_v16, %v12549_v15  ;;  %v9566_v38 = vadd.f32 %v5652_v62, %v12552_v10  ;;  %7305 = vmatpush1.bf16.msra.mxu1 %v10916_v57  ;;  %6935 = vmatpush1.bf16.msra.mxu0 %v10931_v22  ;;  %v5792_v54 = vmax.f32 %v9500_v28, 0.0  ;;  %v5794_v46 = vmax.f32 %v9564_v37, 0.0  ;;  %v10949_v4 = vld [vmem:[#allocation14 + $0x3c0] ss:$16 sps:$4 sm:$0xff]   ;;  %v10930_v28 = vld [vmem:[#allocation14 + $0x2ec] ss:$16 sps:$4 sm:$0xff]  }
 0x6c2   : > { %v5795_v3 = vmax.f32 %v9501_v49, 0.0  ;;  %v5797_v9 = vmax.f32 %v9565_v20, 0.0  ;;  %7306 = vmatprep.subr.bf16.mxu1 %v10921_v60  ;;  %6936 = vmatprep.subr.bf16.mxu0 %v10942_v35  ;;  %v10960_v37 = vld [vmem:[#allocation14 + $0x3e4] ss:$16 sps:$4 sm:$0xff]  }
 0x6c3   : > { %v5796_v7 = vmax.f32 %v9502_v61, 0.0  ;;  %v5798_v50 = vmax.f32 %v9566_v38, 0.0 }
 0x6c4   : > { %v5891_v56 = vpack.c.bf16 %v5795_v3, %v5791_v14  ;;  %v12670_v19 = vpack.c.bf16 %v5797_v9, %v5793_v12  ;;  %v10958_v14 = vld [vmem:[#allocation14 + $0x3e0] ss:$16 sps:$4 sm:$0xff]  }
 0x6c5   : > { %v5892_v6 = vpack.c.bf16 %v5796_v7, %v5792_v54  ;;  %v12672_v43 = vpack.c.bf16 %v5798_v50, %v5794_v46  ;;  %v5270_v57 = vpop.f32.mrb[192].mxu0  ;;  %v5656_v22 = vpop.f32.mrb[224].mxu1  ;;  %7307 = vmatpush1.bf16.msra.mxu1 %v10919_v51  ;;  %6937 = vmatpush1.bf16.msra.mxu0 %v10940_v8  ;;  %v10928_v8 = vld [vmem:[#allocation14 + $0x2e8] ss:$16 sps:$4 sm:$0xff]   ;;  %v10936_v54 = vld [vmem:[#allocation14 + $0x30c] ss:$16 sps:$4 sm:$0xff]  }
 0x6c6   : > { %v9503_v55 = vadd.f32 %v5270_v57, %v12543_v63  ;;  %v9567_v11 = vadd.f32 %v5656_v22, %v12546_v5  ;;  %v5272_v60 = vpop.f32.mrb[193].mxu0  ;;  %v5658_v35 = vpop.f32.mrb[225].mxu1  ;;  %7308 = vmatprep.subr.bf16.mxu1 %v10927_v59  ;;  %6938 = vmatprep.subr.bf16.mxu0 %v10951_v42 }
 0x6c7   : > { %v9504_v31 = vadd.f32 %v5272_v60, %v12549_v15  ;;  %v9568_v44 = vadd.f32 %v5658_v35, %v12552_v10  ;;  %v5274_v49 = vpop.f32.mrb[194].mxu0  ;;  %v5660_v20 = vpop.f32.mrb[226].mxu1  ;;  %6819 = vmatprep.mubr.bf16.mxu0 %v5892_v6  ;;  %7205 = vmatprep.mubr.bf16.mxu1 %v5892_v6 }
 0x6c8   : > { %v9505_v16 = vadd.f32 %v5274_v49, %v12543_v63  ;;  %v9569_v62 = vadd.f32 %v5660_v20, %v12546_v5  ;;  %v5276_v61 = vpop.f32.mrb[195].mxu0  ;;  %v5662_v38 = vpop.f32.mrb[227].mxu1  ;;  %6820 = vmatmul.mubr.bf16.gmra.mrb[252].mxu0 %v5891_v56  ;;  %7206 = vmatmul.mubr.bf16.gmra.mrb[12].mxu1 %v5891_v56  ;;  %v5799_v12 = vmax.f32 %v9503_v55, 0.0  ;;  %v5801_v3 = vmax.f32 %v9567_v11, 0.0  ;;  %v10934_v55 = vld [vmem:[#allocation14 + $0x308] ss:$16 sps:$4 sm:$0xff]  }
 0x6c9   : > { %v9506_v51 = vadd.f32 %v5276_v61, %v12549_v15  ;;  %v9570_v59 = vadd.f32 %v5662_v38, %v12552_v10  ;;  %7309 = vmatpush1.bf16.msra.mxu1 %v10925_v48  ;;  %6939 = vmatpush1.bf16.msra.mxu0 %v10949_v4  ;;  %v5800_v46 = vmax.f32 %v9504_v31, 0.0  ;;  %v5802_v7 = vmax.f32 %v9568_v44, 0.0  ;;  %v10939_v31 = vld [vmem:[#allocation14 + $0x32c] ss:$16 sps:$4 sm:$0xff]  }
 0x6ca   : > { %v5803_v9 = vmax.f32 %v9505_v16, 0.0  ;;  %v5805_v42 = vmax.f32 %v9569_v62, 0.0  ;;  %7310 = vmatprep.subr.bf16.mxu1 %v10930_v28  ;;  %6940 = vmatprep.subr.bf16.mxu0 %v10960_v37  ;;  %v10999_v44 = vld [vmem:[#allocation14 + $0xc] ss:$16 sps:$4 sm:$0xff]  }
 0x6cb   : > { %v5804_v50 = vmax.f32 %v9506_v51, 0.0  ;;  %v5806_v6 = vmax.f32 %v9570_v59, 0.0 }
 0x6cc   : > { %v5895_v56 = vpack.c.bf16 %v5803_v9, %v5799_v12  ;;  %v12682_v57 = vpack.c.bf16 %v5805_v42, %v5801_v3  ;;  %v10937_v12 = vld [vmem:[#allocation14 + $0x328] ss:$16 sps:$4 sm:$0xff]  }
 0x6cd   : > { %v5896_v22 = vpack.c.bf16 %v5804_v50, %v5800_v46  ;;  %v12684_v60 = vpack.c.bf16 %v5806_v6, %v5802_v7  ;;  %v5280_v48 = vpop.f32.mrb[196].mxu0  ;;  %v5666_v4 = vpop.f32.mrb[228].mxu1  ;;  %7311 = vmatpush1.bf16.msra.mxu1 %v10928_v8  ;;  %6941 = vmatpush1.bf16.msra.mxu0 %v10958_v14  ;;  %v10945_v46 = vld [vmem:[#allocation14 + $0x34c] ss:$16 sps:$4 sm:$0xff]  }
 0x6ce   : > { %v9507_v11 = vadd.f32 %v5280_v48, %v12543_v63  ;;  %v9571_v35 = vadd.f32 %v5666_v4, %v12546_v5  ;;  %v5282_v28 = vpop.f32.mrb[197].mxu0  ;;  %v5668_v37 = vpop.f32.mrb[229].mxu1  ;;  %7312 = vmatprep.subr.bf16.mxu1 %v10936_v54  ;;  %7103 = vmatprep.subr.bf16.mxu0 %v10999_v44 }
 0x6cf   : > { %v9508_v49 = vadd.f32 %v5282_v28, %v12549_v15  ;;  %v9572_v20 = vadd.f32 %v5668_v37, %v12552_v10  ;;  %v5284_v16 = vpop.f32.mrb[198].mxu0  ;;  %v5670_v62 = vpop.f32.mrb[230].mxu1  ;;  %6829 = vmatprep.mubr.bf16.mxu0 %v5896_v22  ;;  %7215 = vmatprep.mubr.bf16.mxu1 %v5896_v22 }
 0x6d0   : > { %v9509_v61 = vadd.f32 %v5284_v16, %v12543_v63  ;;  %v9573_v38 = vadd.f32 %v5670_v62, %v12546_v5  ;;  %v5286_v51 = vpop.f32.mrb[199].mxu0  ;;  %v5672_v59 = vpop.f32.mrb[231].mxu1  ;;  %6830 = vmatmul.mubr.bf16.gmra.mrb[0].mxu0 %v5895_v56  ;;  %7216 = vmatmul.mubr.bf16.gmra.mrb[16].mxu1 %v5895_v56  ;;  %v5807_v3 = vmax.f32 %v9507_v11, 0.0  ;;  %v5809_v9 = vmax.f32 %v9571_v35, 0.0 }
 0x6d1   : > { %v9510_v8 = vadd.f32 %v5286_v51, %v12549_v15  ;;  %v9574_v14 = vadd.f32 %v5672_v59, %v12552_v10  ;;  %7313 = vmatpush1.bf16.msra.mxu1 %v10934_v55  ;;  %v5808_v7 = vmax.f32 %v9508_v49, 0.0  ;;  %v5810_v50 = vmax.f32 %v9572_v20, 0.0  ;;  %v10943_v55 = vld [vmem:[#allocation14 + $0x348] ss:$16 sps:$4 sm:$0xff]   ;;  %v10948_v49 = vld [vmem:[#allocation14 + $0x36c] ss:$16 sps:$4 sm:$0xff]  }
 0x6d2   : > { %v5811_v42 = vmax.f32 %v9509_v61, 0.0  ;;  %v5813_v54 = vmax.f32 %v9573_v38, 0.0  ;;  %7314 = vmatprep.subr.bf16.mxu1 %v10939_v31 }
 0x6d3   : > { %v5812_v6 = vmax.f32 %v9510_v8, 0.0  ;;  %v5814_v22 = vmax.f32 %v9574_v14, 0.0 }
 0x6d4   : > { %v5899_v48 = vpack.c.bf16 %v5811_v42, %v5807_v3  ;;  %v12694_v4 = vpack.c.bf16 %v5813_v54, %v5809_v9  ;;  %v10946_v9 = vld [vmem:[#allocation14 + $0x368] ss:$16 sps:$4 sm:$0xff]  }
 0x6d5   : > { %v5900_v56 = vpack.c.bf16 %v5812_v6, %v5808_v7  ;;  %v12696_v28 = vpack.c.bf16 %v5814_v22, %v5810_v50  ;;  %v5290_v37 = vpop.f32.mrb[200].mxu0  ;;  %v5676_v44 = vpop.f32.mrb[232].mxu1  ;;  %7315 = vmatpush1.bf16.msra.mxu1 %v10937_v12  ;;  %v10954_v50 = vld [vmem:[#allocation14 + $0x38c] ss:$16 sps:$4 sm:$0xff]  }
 0x6d6   : > { %v9511_v11 = vadd.f32 %v5290_v37, %v12543_v63  ;;  %v9575_v35 = vadd.f32 %v5676_v44, %v12546_v5  ;;  %v5292_v31 = vpop.f32.mrb[201].mxu0  ;;  %v5678_v16 = vpop.f32.mrb[233].mxu1  ;;  %7316 = vmatprep.subr.bf16.mxu1 %v10945_v46 }
 0x6d7   : > { %v9512_v20 = vadd.f32 %v5292_v31, %v12549_v15  ;;  %v9576_v62 = vadd.f32 %v5678_v16, %v12552_v10  ;;  %v5294_v61 = vpop.f32.mrb[202].mxu0  ;;  %v5680_v38 = vpop.f32.mrb[234].mxu1  ;;  %6839 = vmatprep.mubr.bf16.mxu0 %v5900_v56  ;;  %7225 = vmatprep.mubr.bf16.mxu1 %v5900_v56 }
 0x6d8   : > { %v9513_v51 = vadd.f32 %v5294_v61, %v12543_v63  ;;  %v9577_v59 = vadd.f32 %v5680_v38, %v12546_v5  ;;  %v5296_v8 = vpop.f32.mrb[203].mxu0  ;;  %v5682_v14 = vpop.f32.mrb[235].mxu1  ;;  %6840 = vmatmul.mubr.bf16.gmra.mrb[4].mxu0 %v5899_v48  ;;  %7226 = vmatmul.mubr.bf16.gmra.mrb[20].mxu1 %v5899_v48  ;;  %v5815_v42 = vmax.f32 %v9511_v11, 0.0  ;;  %v5817_v54 = vmax.f32 %v9575_v35, 0.0 }
 0x6d9   : > { %v9514_v12 = vadd.f32 %v5296_v8, %v12549_v15  ;;  %v9578_v3 = vadd.f32 %v5682_v14, %v12552_v10  ;;  %7317 = vmatpush1.bf16.msra.mxu1 %v10943_v55  ;;  %v5816_v6 = vmax.f32 %v9512_v20, 0.0  ;;  %v5818_v22 = vmax.f32 %v9576_v62, 0.0  ;;  %v10952_v55 = vld [vmem:[#allocation14 + $0x388] ss:$16 sps:$4 sm:$0xff]   ;;  %v10957_v20 = vld [vmem:[#allocation14 + $0x3ac] ss:$16 sps:$4 sm:$0xff]  }
 0x6da   : > { %v5819_v46 = vmax.f32 %v9513_v51, 0.0  ;;  %v5821_v7 = vmax.f32 %v9577_v59, 0.0  ;;  %7318 = vmatprep.subr.bf16.mxu1 %v10948_v49 }
 0x6db   : > { %v5820_v56 = vmax.f32 %v9514_v12, 0.0  ;;  %v5822_v37 = vmax.f32 %v9578_v3, 0.0 }
 0x6dc   : > { %v5903_v44 = vpack.c.bf16 %v5819_v46, %v5815_v42  ;;  %v12706_v31 = vpack.c.bf16 %v5821_v7, %v5817_v54  ;;  %v10955_v7 = vld [vmem:[#allocation14 + $0x3a8] ss:$16 sps:$4 sm:$0xff]  }
 0x6dd   : > { %v5904_v48 = vpack.c.bf16 %v5820_v56, %v5816_v6  ;;  %v12708_v16 = vpack.c.bf16 %v5822_v37, %v5818_v22  ;;  %v5300_v61 = vpop.f32.mrb[204].mxu0  ;;  %v5686_v38 = vpop.f32.mrb[236].mxu1  ;;  %7319 = vmatpush1.bf16.msra.mxu1 %v10946_v9  ;;  %v10963_v37 = vld [vmem:[#allocation14 + $0x3cc] ss:$16 sps:$4 sm:$0xff]  }
 0x6de   : > { %v9515_v11 = vadd.f32 %v5300_v61, %v12543_v63  ;;  %v9579_v35 = vadd.f32 %v5686_v38, %v12546_v5  ;;  %v5302_v49 = vpop.f32.mrb[205].mxu0  ;;  %v5688_v51 = vpop.f32.mrb[237].mxu1  ;;  %7320 = vmatprep.subr.bf16.mxu1 %v10954_v50 }
 0x6df   : > { %v9516_v62 = vadd.f32 %v5302_v49, %v12549_v15  ;;  %v9580_v59 = vadd.f32 %v5688_v51, %v12552_v10  ;;  %v5304_v8 = vpop.f32.mrb[206].mxu0  ;;  %v5690_v14 = vpop.f32.mrb[238].mxu1  ;;  %6849 = vmatprep.mubr.bf16.mxu0 %v5904_v48  ;;  %7235 = vmatprep.mubr.bf16.mxu1 %v5904_v48 }
 0x6e0   : > { %v9517_v12 = vadd.f32 %v5304_v8, %v12543_v63  ;;  %v9581_v3 = vadd.f32 %v5690_v14, %v12546_v5  ;;  %v5306_v9 = vpop.f32.mrb[207].mxu0  ;;  %v5692_v42 = vpop.f32.mrb[239].mxu1  ;;  %6850 = vmatmul.mubr.bf16.gmra.mrb[8].mxu0 %v5903_v44  ;;  %7236 = vmatmul.mubr.bf16.gmra.mrb[24].mxu1 %v5903_v44  ;;  %v5823_v50 = vmax.f32 %v9515_v11, 0.0  ;;  %v5825_v6 = vmax.f32 %v9579_v35, 0.0 }
 0x6e1   : > { %v9518_v54 = vadd.f32 %v5306_v9, %v12549_v15  ;;  %v9582_v46 = vadd.f32 %v5692_v42, %v12552_v10  ;;  %7321 = vmatpush1.bf16.msra.mxu1 %v10952_v55  ;;  %v5824_v48 = vmax.f32 %v9516_v62, 0.0  ;;  %v5826_v61 = vmax.f32 %v9580_v59, 0.0  ;;  %v10961_v55 = vld [vmem:[#allocation14 + $0x3c8] ss:$16 sps:$4 sm:$0xff]   ;;  %v10966_v62 = vld [vmem:[#allocation14 + $0x3ec] ss:$16 sps:$4 sm:$0xff]  }
 0x6e2   : > { %v5827_v22 = vmax.f32 %v9517_v12, 0.0  ;;  %v5829_v56 = vmax.f32 %v9581_v3, 0.0  ;;  %7322 = vmatprep.subr.bf16.mxu1 %v10957_v20 }
 0x6e3   : > { %v5828_v38 = vmax.f32 %v9518_v54, 0.0  ;;  %v5830_v49 = vmax.f32 %v9582_v46, 0.0 }
 0x6e4   : > { %v5907_v51 = vpack.c.bf16 %v5827_v22, %v5823_v50  ;;  %v12718_v8 = vpack.c.bf16 %v5829_v56, %v5825_v6 }
 0x6e5   : > { %v5908_v44 = vpack.c.bf16 %v5828_v38, %v5824_v48  ;;  %v12720_v14 = vpack.c.bf16 %v5830_v49, %v5826_v61  ;;  %v5310_v9 = vpop.f32.mrb[208].mxu0  ;;  %v5696_v42 = vpop.f32.mrb[240].mxu1  ;;  %7323 = vmatpush1.bf16.msra.mxu1 %v10955_v7  ;;  %v10964_v48 = vld [vmem:[#allocation14 + $0x3e8] ss:$16 sps:$4 sm:$0xff]  }
 0x6e6   : > { %v9519_v11 = vadd.f32 %v5310_v9, %v12543_v63  ;;  %v9583_v35 = vadd.f32 %v5696_v42, %v12546_v5  ;;  %v5312_v20 = vpop.f32.mrb[209].mxu0  ;;  %v5698_v12 = vpop.f32.mrb[241].mxu1  ;;  %7324 = vmatprep.subr.bf16.mxu1 %v10963_v37 }
 0x6e7   : > { %v9520_v59 = vadd.f32 %v5312_v20, %v12549_v15  ;;  %v9584_v3 = vadd.f32 %v5698_v12, %v12552_v10  ;;  %v5314_v54 = vpop.f32.mrb[210].mxu0  ;;  %v5700_v46 = vpop.f32.mrb[242].mxu1  ;;  %6859 = vmatprep.mubr.bf16.mxu0 %v5908_v44  ;;  %7245 = vmatprep.mubr.bf16.mxu1 %v5908_v44 }
 0x6e8   : > { %v9521_v50 = vadd.f32 %v5314_v54, %v12543_v63  ;;  %v9585_v7 = vadd.f32 %v5700_v46, %v12546_v5  ;;  %v5316_v6 = vpop.f32.mrb[211].mxu0  ;;  %v5702_v22 = vpop.f32.mrb[243].mxu1  ;;  %6860 = vmatmul.mubr.bf16.gmra.mrb[12].mxu0 %v5907_v51  ;;  %7246 = vmatmul.mubr.bf16.gmra.mrb[28].mxu1 %v5907_v51  ;;  %v5831_v61 = vmax.f32 %v9519_v11, 0.0  ;;  %v5833_v38 = vmax.f32 %v9583_v35, 0.0 }
 0x6e9   : > { %v9522_v56 = vadd.f32 %v5316_v6, %v12549_v15  ;;  %v9586_v37 = vadd.f32 %v5702_v22, %v12552_v10  ;;  %7325 = vmatpush1.bf16.msra.mxu1 %v10961_v55  ;;  %v5832_v44 = vmax.f32 %v9520_v59, 0.0  ;;  %v5834_v42 = vmax.f32 %v9584_v3, 0.0 }
 0x6ea   : > { %v5835_v49 = vmax.f32 %v9521_v50, 0.0  ;;  %v5837_v9 = vmax.f32 %v9585_v7, 0.0  ;;  %7326 = vmatprep.subr.bf16.mxu1 %v10966_v62 }
 0x6eb   : > { %v5836_v20 = vmax.f32 %v9522_v56, 0.0  ;;  %v5838_v12 = vmax.f32 %v9586_v37, 0.0 }
 0x6ec   : > { %v5911_v54 = vpack.c.bf16 %v5835_v49, %v5831_v61  ;;  %v12730_v46 = vpack.c.bf16 %v5837_v9, %v5833_v38 }
 0x6ed   : > { %v5912_v40 = vpack.c.bf16 %v5836_v20, %v5832_v44  ;;  %v12732_v51 = vpack.c.bf16 %v5838_v12, %v5834_v42  ;;  %v5320_v6 = vpop.f32.mrb[212].mxu0  ;;  %v5706_v24 = vpop.f32.mrb[244].mxu1  ;;  %7327 = vmatpush1.bf16.msra.mxu1 %v10964_v48 }
 0x6ee   : > { %v9523_v55 = vadd.f32 %v5320_v6, %v12543_v63  ;;  %v9587_v11 = vadd.f32 %v5706_v24, %v12546_v5  ;;  %v5322_v35 = vpop.f32.mrb[213].mxu0  ;;  %v5708_v50 = vpop.f32.mrb[245].mxu1 }
 0x6ef   : > { %v9524_v62 = vadd.f32 %v5322_v35, %v12549_v15  ;;  %v9588_v59 = vadd.f32 %v5708_v50, %v12552_v10  ;;  %v5324_v3 = vpop.f32.mrb[214].mxu0  ;;  %v5710_v7 = vpop.f32.mrb[246].mxu1  ;;  %6869 = vmatprep.mubr.bf16.mxu0 %v5912_v40  ;;  %7255 = vmatprep.mubr.bf16.mxu1 %v5912_v40 }
 0x6f0   : > { %v9525_v22 = vadd.f32 %v5324_v3, %v12543_v63  ;;  %v9589_v56 = vadd.f32 %v5710_v7, %v12546_v5  ;;  %v5326_v37 = vpop.f32.mrb[215].mxu0  ;;  %v5712_v48 = vpop.f32.mrb[247].mxu1  ;;  %6870 = vmatmul.mubr.bf16.gmra.mrb[16].mxu0 %v5911_v54  ;;  %7256 = vmatmul.mubr.bf16.gmra.mrb[32].mxu1 %v5911_v54  ;;  %v5839_v38 = vmax.f32 %v9523_v55, 0.0  ;;  %v5841_v49 = vmax.f32 %v9587_v11, 0.0 }
 0x6f1   : > { %v9526_v24 = vadd.f32 %v5326_v37, %v12549_v15  ;;  %v9590_v61 = vadd.f32 %v5712_v48, %v12552_v10  ;;  %v5840_v42 = vmax.f32 %v9524_v62, 0.0  ;;  %v5842_v20 = vmax.f32 %v9588_v59, 0.0 }
 0x6f2   : > { %v5843_v9 = vmax.f32 %v9525_v22, 0.0  ;;  %v5845_v44 = vmax.f32 %v9589_v56, 0.0 }
 0x6f3   : > { %v5844_v12 = vmax.f32 %v9526_v24, 0.0  ;;  %v5846_v40 = vmax.f32 %v9590_v61, 0.0 }
 0x6f4   : > { %v5915_v6 = vpack.c.bf16 %v5843_v9, %v5839_v38  ;;  %v12742_v35 = vpack.c.bf16 %v5845_v44, %v5841_v49 }
 0x6f5   : > { %v5916_v50 = vpack.c.bf16 %v5844_v12, %v5840_v42  ;;  %v12744_v3 = vpack.c.bf16 %v5846_v40, %v5842_v20  ;;  %v5330_v7 = vpop.f32.mrb[216].mxu0  ;;  %v5716_v54 = vpop.f32.mrb[248].mxu1 }
 0x6f6   : > { %v9527_v37 = vadd.f32 %v5330_v7, %v12543_v63  ;;  %v9591_v48 = vadd.f32 %v5716_v54, %v12546_v5  ;;  %v5332_v55 = vpop.f32.mrb[217].mxu0  ;;  %v5718_v11 = vpop.f32.mrb[249].mxu1 }
 0x6f7   : > { %v9528_v22 = vadd.f32 %v5332_v55, %v12549_v15  ;;  %v9592_v62 = vadd.f32 %v5718_v11, %v12552_v10  ;;  %v5334_v59 = vpop.f32.mrb[218].mxu0  ;;  %v5720_v56 = vpop.f32.mrb[250].mxu1  ;;  %6879 = vmatprep.mubr.bf16.mxu0 %v5916_v50  ;;  %7265 = vmatprep.mubr.bf16.mxu1 %v5916_v50 }
 0x6f8   : > { %v9529_v24 = vadd.f32 %v5334_v59, %v12543_v63  ;;  %v9593_v61 = vadd.f32 %v5720_v56, %v12546_v5  ;;  %v5336_v38 = vpop.f32.mrb[219].mxu0  ;;  %v5722_v49 = vpop.f32.mrb[251].mxu1  ;;  %6880 = vmatmul.mubr.bf16.gmra.mrb[20].mxu0 %v5915_v6  ;;  %7266 = vmatmul.mubr.bf16.gmra.mrb[36].mxu1 %v5915_v6  ;;  %v5847_v42 = vmax.f32 %v9527_v37, 0.0  ;;  %v5849_v20 = vmax.f32 %v9591_v48, 0.0 }
 0x6f9   : > { %v9530_v9 = vadd.f32 %v5336_v38, %v12549_v15  ;;  %v9594_v44 = vadd.f32 %v5722_v49, %v12552_v10  ;;  %v5848_v7 = vmax.f32 %v9528_v22, 0.0  ;;  %v5850_v54 = vmax.f32 %v9592_v62, 0.0 }
 0x6fa   : > { %v5851_v12 = vmax.f32 %v9529_v24, 0.0  ;;  %v5853_v40 = vmax.f32 %v9593_v61, 0.0 }
 0x6fb   : > { %v5852_v55 = vmax.f32 %v9530_v9, 0.0  ;;  %v5854_v50 = vmax.f32 %v9594_v44, 0.0 }
 0x6fc   : > { %v5919_v11 = vpack.c.bf16 %v5851_v12, %v5847_v42  ;;  %v12754_v59 = vpack.c.bf16 %v5853_v40, %v5849_v20 }
 0x6fd   : > { %v5920_v56 = vpack.c.bf16 %v5852_v55, %v5848_v7  ;;  %v12756_v34 = vpack.c.bf16 %v5854_v50, %v5850_v54  ;;  %v5340_v32 = vpop.f32.mrb[220].mxu0  ;;  %v5726_v6 = vpop.f32.mrb[252].mxu1 }
 0x6fe   : > { %v9531_v38 = vadd.f32 %v5340_v32, %v12543_v63  ;;  %v9595_v49 = vadd.f32 %v5726_v6, %v12546_v5  ;;  %v5342_v37 = vpop.f32.mrb[221].mxu0  ;;  %v5728_v48 = vpop.f32.mrb[253].mxu1 }
 0x6ff   : > { %v9532_v24 = vadd.f32 %v5342_v37, %v12549_v15  ;;  %v9596_v22 = vadd.f32 %v5728_v48, %v12552_v10  ;;  %v5344_v62 = vpop.f32.mrb[222].mxu0  ;;  %v5730_v61 = vpop.f32.mrb[254].mxu1  ;;  %6889 = vmatprep.mubr.bf16.mxu0 %v5920_v56  ;;  %7275 = vmatprep.mubr.bf16.mxu1 %v5920_v56 }
 0x700   : > { %v9533_v9 = vadd.f32 %v5344_v62, %v12543_v63  ;;  %v9597_v44 = vadd.f32 %v5730_v61, %v12546_v5  ;;  %v5346_v42 = vpop.f32.mrb[223].mxu0  ;;  %v5732_v20 = vpop.f32.mrb[255].mxu1  ;;  %6890 = vmatmul.mubr.bf16.gmra.mrb[24].mxu0 %v5919_v11  ;;  %7276 = vmatmul.mubr.bf16.gmra.mrb[40].mxu1 %v5919_v11  ;;  %v5855_v40 = vmax.f32 %v9531_v38, 0.0  ;;  %v5857_v7 = vmax.f32 %v9595_v49, 0.0  ;;  %v11002_v11 = vld [vmem:[#allocation14 + $0x28] ss:$16 sps:$4 sm:$0xff]  }
 0x701   : > { %v9534_v32 = vadd.f32 %v5346_v42, %v12549_v15  ;;  %v9598_v12 = vadd.f32 %v5732_v20, %v12552_v10  ;;  %v5856_v50 = vmax.f32 %v9532_v24, 0.0  ;;  %v5858_v6 = vmax.f32 %v9596_v22, 0.0  ;;  %v11000_v15 = vld [vmem:[#allocation14 + $0x8] ss:$16 sps:$4 sm:$0xff]   ;;  %v11001_v10 = vld [vmem:[#allocation14 + $0x2c] ss:$16 sps:$4 sm:$0xff]  }
 0x702   : > { %v5859_v54 = vmax.f32 %v9533_v9, 0.0  ;;  %v5861_v55 = vmax.f32 %v9597_v44, 0.0  ;;  %v11003_v38 = vld [vmem:[#allocation14 + $0x4c] ss:$16 sps:$4 sm:$0xff]   ;;  %v11006_v49 = vld [vmem:[#allocation14 + $0x68] ss:$16 sps:$4 sm:$0xff]  }
 0x703   : > { %v5860_v37 = vmax.f32 %v9534_v32, 0.0  ;;  %v5862_v56 = vmax.f32 %v9598_v12, 0.0  ;;  %v11009_v24 = vld [vmem:[#allocation14 + $0xac] ss:$16 sps:$4 sm:$0xff]  }
 0x704   : > { %v5923_v48 = vpack.c.bf16 %v5859_v54, %v5855_v40  ;;  %v12766_v63 = vpack.c.bf16 %v5861_v55, %v5857_v7  ;;  %v11011_v22 = vld [vmem:[#allocation14 + $0xcc] ss:$16 sps:$4 sm:$0xff]   ;;  %v11030_v54 = vld [vmem:[#allocation14 + $0x1e8] ss:$16 sps:$4 sm:$0xff]  }
 0x705   : > { %v5924_v5 = vpack.c.bf16 %v5860_v37, %v5856_v50  ;;  %v12768_v62 = vpack.c.bf16 %v5862_v56, %v5858_v6  ;;  %v11013_v61 = vld [vmem:[#allocation14 + $0xec] ss:$16 sps:$4 sm:$0xff]  }
 0x706   : > { %v11015_v9 = vld [vmem:[#allocation14 + $0x10c] ss:$16 sps:$4 sm:$0xff]  }
 0x707   : > { %6899 = vmatprep.mubr.bf16.mxu0 %v5924_v5  ;;  %7285 = vmatprep.mubr.bf16.mxu1 %v5924_v5  ;;  %v11017_v44 = vld [vmem:[#allocation14 + $0x12c] ss:$16 sps:$4 sm:$0xff]   ;;  %v13398_v5 = vld [vmem:[#allocation24_spill] sm:$0xff] }
 0x708   : > { %6900 = vmatmul.mubr.bf16.gmra.mrb[28].mxu0 %v5923_v48  ;;  %7286 = vmatmul.mubr.bf16.gmra.mrb[44].mxu1 %v5923_v48  ;;  %v11019_v42 = vld [vmem:[#allocation14 + $0x14c] ss:$16 sps:$4 sm:$0xff]   ;;  %v10995_v48 = vld [vmem:[#allocation16 + $0xf0] sm:$0xff]  }
 0x709   : > { %6942 = vmatprep.mubr.bf16.mxu0 %v12568_v52  ;;  %7328 = vmatprep.mubr.bf16.mxu1 %v12568_v52  ;;  %v11005_v52 = vld [vmem:[#allocation14 + $0x6c] ss:$16 sps:$4 sm:$0xff]  }
 0x70a   : > { %v11021_v20 = vld [vmem:[#allocation14 + $0x16c] ss:$16 sps:$4 sm:$0xff]  }
 0x70b   : > { %v11023_v32 = vld [vmem:[#allocation14 + $0x18c] ss:$16 sps:$4 sm:$0xff]  }
 0x70c   : > { %v11025_v12 = vld [vmem:[#allocation14 + $0x1ac] ss:$16 sps:$4 sm:$0xff]  }
 0x70d   : > { %v11027_v40 = vld [vmem:[#allocation14 + $0x1cc] ss:$16 sps:$4 sm:$0xff]  }
 0x70e   : > { %v11029_v7 = vld [vmem:[#allocation14 + $0x1ec] ss:$16 sps:$4 sm:$0xff]  }
 0x70f   : > { %v10989_v55 = vld [vmem:[#allocation16 + $0xd8] sm:$0xff]   ;;  %v10993_v37 = vld [vmem:[#allocation16 + $0xe8] sm:$0xff]  }
 0x710   : > { %6943 = vmatmul.mubr.bf16.vlgmr.msra.gmra.mrb[224].mxu0 %v12564_v0  ;;  %7329 = vmatmul.mubr.bf16.vlgmr.msra.gmra.mrb[48].mxu1 %v12564_v0  ;;  %v11004_v0 = vld [vmem:[#allocation14 + $0x48] ss:$16 sps:$4 sm:$0xff]  }
 0x711   : > { %7104 = vmatpush1.bf16.msra.mxu0 %v11000_v15  ;;  %6952 = vmatprep.mubr.bf16.mxu0 %v12586_v41  ;;  %v10981_v50 = vld [vmem:[#allocation16 + $0x78] sm:$0xff]   ;;  %v10994_v56 = vld [vmem:[#allocation16 + $0xa8] sm:$0xff]  }
 0x712   : > { %7338 = vmatprep.mubr.bf16.mxu1 %v12586_v41  ;;  %7105 = vmatprep.subr.bf16.mxu0 %v11001_v10  ;;  %v11007_v41 = vld [vmem:[#allocation14 + $0x8c] ss:$16 sps:$4 sm:$0xff]  }
 0x713   : > { %v10982_v6 = vld [vmem:[#allocation16 + $0x38] sm:$0xff]   ;;  %v13399_v15 = vld [vmem:[#allocation25_spill] sm:$0xff] }
 0x715   : > { %7106 = vmatpush1.bf16.msra.mxu0 %v11002_v11 }
 0x716   : > { %7107 = vmatprep.subr.bf16.mxu0 %v11003_v38 }
 0x718   : > { %6953 = vmatmul.mubr.bf16.gmra.mrb[228].mxu0 %v12582_v29  ;;  %7339 = vmatmul.mubr.bf16.gmra.mrb[52].mxu1 %v12582_v29  ;;  %v11008_v29 = vld [vmem:[#allocation14 + $0x88] ss:$16 sps:$4 sm:$0xff]  }
 0x719   : > { %6962 = vmatprep.mubr.bf16.mxu0 %v12604_v1  ;;  %7348 = vmatprep.mubr.bf16.mxu1 %v12604_v1  ;;  %v11010_v1 = vld [vmem:[#allocation14 + $0xa8] ss:$16 sps:$4 sm:$0xff]  }
 0x71a   : > { %7108 = vmatpush1.bf16.msra.mxu0 %v11004_v0  ;;  %v10997_v0 = vld [vmem:[#allocation16 + $0xf8] sm:$0xff]  }
 0x71b   : > { %7109 = vmatprep.subr.bf16.mxu0 %v11005_v52  ;;  %v10998_v52 = vld [vmem:[#allocation16 + $0xb8] sm:$0xff]  }
 0x71e   : > { %7110 = vmatpush1.bf16.msra.mxu0 %v11006_v49 }
 0x71f   : > { %7111 = vmatprep.subr.bf16.mxu0 %v11007_v41 }
 0x720   : > { %6963 = vmatmul.mubr.bf16.gmra.mrb[232].mxu0 %v12600_v33  ;;  %7349 = vmatmul.mubr.bf16.gmra.mrb[56].mxu1 %v12600_v33  ;;  %v11012_v33 = vld [vmem:[#allocation14 + $0xc8] ss:$16 sps:$4 sm:$0xff]  }
 0x721   : > { %6972 = vmatprep.mubr.bf16.mxu0 %v12622_v36  ;;  %7358 = vmatprep.mubr.bf16.mxu1 %v12622_v36  ;;  %v11014_v36 = vld [vmem:[#allocation14 + $0xe8] ss:$16 sps:$4 sm:$0xff]  }
 0x722   : > { %7112 = vmatpush1.bf16.msra.mxu0 %v11008_v29 }
 0x723   : > { %7113 = vmatprep.subr.bf16.mxu0 %v11009_v24 }
 0x726   : > { %7114 = vmatpush1.bf16.msra.mxu0 %v11010_v1 }
 0x727   : > { %7115 = vmatprep.subr.bf16.mxu0 %v11011_v22 }
 0x728   : > { %6973 = vmatmul.mubr.bf16.gmra.mrb[236].mxu0 %v12618_v30  ;;  %7359 = vmatmul.mubr.bf16.gmra.mrb[60].mxu1 %v12618_v30  ;;  %v11016_v30 = vld [vmem:[#allocation14 + $0x108] ss:$16 sps:$4 sm:$0xff]  }
 0x729   : > { %6982 = vmatprep.mubr.bf16.mxu0 %v12636_v21  ;;  %7368 = vmatprep.mubr.bf16.mxu1 %v12636_v21  ;;  %v11018_v21 = vld [vmem:[#allocation14 + $0x128] ss:$16 sps:$4 sm:$0xff]  }
 0x72a   : > { %7116 = vmatpush1.bf16.msra.mxu0 %v11012_v33 }
 0x72b   : > { %7117 = vmatprep.subr.bf16.mxu0 %v11013_v61 }
 0x72e   : > { %7118 = vmatpush1.bf16.msra.mxu0 %v11014_v36 }
 0x72f   : > { %7119 = vmatprep.subr.bf16.mxu0 %v11015_v9 }
 0x730   : > { %6983 = vmatmul.mubr.bf16.gmra.mrb[240].mxu0 %v12634_v58  ;;  %7369 = vmatmul.mubr.bf16.gmra.mrb[0].mxu1 %v12634_v58  ;;  %v11020_v58 = vld [vmem:[#allocation14 + $0x148] ss:$16 sps:$4 sm:$0xff]  }
 0x731   : > { %6992 = vmatprep.mubr.bf16.mxu0 %v12648_v53  ;;  %7378 = vmatprep.mubr.bf16.mxu1 %v12648_v53  ;;  %v11022_v53 = vld [vmem:[#allocation14 + $0x168] ss:$16 sps:$4 sm:$0xff]  }
 0x732   : > { %7120 = vmatpush1.bf16.msra.mxu0 %v11016_v30 }
 0x733   : > { %7121 = vmatprep.subr.bf16.mxu0 %v11017_v44 }
 0x736   : > { %7122 = vmatpush1.bf16.msra.mxu0 %v11018_v21 }
 0x737   : > { %7123 = vmatprep.subr.bf16.mxu0 %v11019_v42 }
 0x738   : > { %6993 = vmatmul.mubr.bf16.gmra.mrb[244].mxu0 %v12646_v47  ;;  %7379 = vmatmul.mubr.bf16.gmra.mrb[4].mxu1 %v12646_v47  ;;  %v11024_v47 = vld [vmem:[#allocation14 + $0x188] ss:$16 sps:$4 sm:$0xff]  }
 0x739   : > { %7002 = vmatprep.mubr.bf16.mxu0 %v12660_v17  ;;  %7388 = vmatprep.mubr.bf16.mxu1 %v12660_v17  ;;  %v11026_v17 = vld [vmem:[#allocation14 + $0x1a8] ss:$16 sps:$4 sm:$0xff]  }
 0x73a   : > { %7124 = vmatpush1.bf16.msra.mxu0 %v11020_v58 }
 0x73b   : > { %7125 = vmatprep.subr.bf16.mxu0 %v11021_v20 }
 0x73e   : > { %7126 = vmatpush1.bf16.msra.mxu0 %v11022_v53 }
 0x73f   : > { %7127 = vmatprep.subr.bf16.mxu0 %v11023_v32 }
 0x740   : > { %7003 = vmatmul.mubr.bf16.gmra.mrb[248].mxu0 %v12658_v18  ;;  %7389 = vmatmul.mubr.bf16.gmra.mrb[8].mxu1 %v12658_v18  ;;  %v11028_v18 = vld [vmem:[#allocation14 + $0x1c8] ss:$16 sps:$4 sm:$0xff]  }
 0x741   : > { %7012 = vmatprep.mubr.bf16.mxu0 %v12672_v43  ;;  %7398 = vmatprep.mubr.bf16.mxu1 %v12672_v43  ;;  %v10967_v43 = vld [vmem:[#allocation16 + $0x40] sm:$0xff]  }
 0x742   : > { %7128 = vmatpush1.bf16.msra.mxu0 %v11024_v47 }
 0x743   : > { %7129 = vmatprep.subr.bf16.mxu0 %v11025_v12 }
 0x746   : > { %7130 = vmatpush1.bf16.msra.mxu0 %v11026_v17 }
 0x747   : > { %7131 = vmatprep.subr.bf16.mxu0 %v11027_v40 }
 0x748   : > { %7013 = vmatmul.mubr.bf16.gmra.mrb[252].mxu0 %v12670_v19  ;;  %7399 = vmatmul.mubr.bf16.gmra.mrb[12].mxu1 %v12670_v19  ;;  %v10983_v19 = vld [vmem:[#allocation16 + $0xc0] sm:$0xff]  }
 0x749   : > { %7022 = vmatprep.mubr.bf16.mxu0 %v12684_v60  ;;  %7408 = vmatprep.mubr.bf16.mxu1 %v12684_v60  ;;  %v10985_v60 = vld [vmem:[#allocation16 + $0xc8] sm:$0xff]  }
 0x74a   : > { %7132 = vmatpush1.bf16.msra.mxu0 %v11028_v18  ;;  %9151 = vmatprep.subr.bf16.mxu1 %v10983_v19 }
 0x74b   : > { %7133 = vmatprep.subr.bf16.mxu0 %v11029_v7 }
 0x74e   : > { %7134 = vmatpush1.bf16.msra.mxu0 %v11030_v54 }
 0x74f   : > { %9039 = vmatprep.subr.bf16.mxu0 %v10967_v43 }
 0x750   : > { %7023 = vmatmul.mubr.bf16.gmra.mrb[0].mxu0 %v12682_v57  ;;  %7409 = vmatmul.mubr.bf16.gmra.mrb[16].mxu1 %v12682_v57  ;;  %v10984_v57 = vld [vmem:[#allocation16 + $0x80] sm:$0xff]  }
 0x751   : > { %7032 = vmatprep.mubr.bf16.mxu0 %v12696_v28  ;;  %7418 = vmatprep.mubr.bf16.mxu1 %v12696_v28  ;;  %v10968_v28 = vld [vmem:[#allocation16] sm:$0xff]  }
 0x752   : > { %9152 = vmatpush3.bf16.msra.mxu1 %v10984_v57 }
 0x753   : > { %9153 = vmatprep.subr.bf16.mxu1 %v10985_v60 }
 0x758   : > { %7033 = vmatmul.mubr.bf16.gmra.mrb[4].mxu0 %v12694_v4  ;;  %7419 = vmatmul.mubr.bf16.gmra.mrb[20].mxu1 %v12694_v4  ;;  %v10986_v4 = vld [vmem:[#allocation16 + $0x88] sm:$0xff]  }
 0x759   : > { %7042 = vmatprep.mubr.bf16.mxu0 %v12708_v16  ;;  %7428 = vmatprep.mubr.bf16.mxu1 %v12708_v16  ;;  %v10971_v16 = vld [vmem:[#allocation16 + $0x50] sm:$0xff]  }
 0x75a   : > { %9154 = vmatpush3.bf16.msra.mxu1 %v10986_v4 }
 0x760   : > { %7043 = vmatmul.mubr.bf16.gmra.mrb[8].mxu0 %v12706_v31  ;;  %7429 = vmatmul.mubr.bf16.gmra.mrb[24].mxu1 %v12706_v31  ;;  %v10970_v31 = vld [vmem:[#allocation16 + $0x8] sm:$0xff]  }
 0x761   : > { %7052 = vmatprep.mubr.bf16.mxu0 %v12720_v14  ;;  %7438 = vmatprep.mubr.bf16.mxu1 %v12720_v14  ;;  %v10988_v14 = vld [vmem:[#allocation16 + $0x90] sm:$0xff]  }
 0x768   : > { %7053 = vmatmul.mubr.bf16.gmra.mrb[12].mxu0 %v12718_v8  ;;  %7439 = vmatmul.mubr.bf16.gmra.mrb[28].mxu1 %v12718_v8  ;;  %v10987_v8 = vld [vmem:[#allocation16 + $0xd0] sm:$0xff]  }
 0x769   : > { %7062 = vmatprep.mubr.bf16.mxu0 %v12732_v51  ;;  %7448 = vmatprep.mubr.bf16.mxu1 %v12732_v51  ;;  %v10973_v51 = vld [vmem:[#allocation16 + $0x58] sm:$0xff]  }
 0x76a   : > { %9155 = vmatprep.subr.bf16.mxu1 %v10987_v8 }
 0x76b   : > { %9156 = vmatpush3.bf16.msra.mxu1 %v10988_v14 }
 0x76c   : > { %9157 = vmatprep.subr.bf16.mxu1 %v10989_v55 }
 0x770   : > { %7063 = vmatmul.mubr.bf16.gmra.mrb[16].mxu0 %v12730_v46  ;;  %7449 = vmatmul.mubr.bf16.gmra.mrb[32].mxu1 %v12730_v46  ;;  %v10972_v46 = vld [vmem:[#allocation16 + $0x10] sm:$0xff]  }
 0x771   : > { %7072 = vmatprep.mubr.bf16.mxu0 %v12744_v3  ;;  %7458 = vmatprep.mubr.bf16.mxu1 %v12744_v3  ;;  %v10978_v3 = vld [vmem:[#allocation16 + $0x28] sm:$0xff]  }
 0x778   : > { %7073 = vmatmul.mubr.bf16.gmra.mrb[20].mxu0 %v12742_v35  ;;  %7459 = vmatmul.mubr.bf16.gmra.mrb[36].mxu1 %v12742_v35  ;;  %v10977_v35 = vld [vmem:[#allocation16 + $0x68] sm:$0xff]  }
 0x779   : > { %7082 = vmatprep.mubr.bf16.mxu0 %v12756_v34  ;;  %7468 = vmatprep.mubr.bf16.mxu1 %v12756_v34  ;;  %v10969_v34 = vld [vmem:[#allocation16 + $0x48] sm:$0xff]  }
 0x780   : > { %7083 = vmatmul.mubr.bf16.gmra.mrb[24].mxu0 %v12754_v59  ;;  %7469 = vmatmul.mubr.bf16.gmra.mrb[40].mxu1 %v12754_v59  ;;  %v10979_v59 = vld [vmem:[#allocation16 + $0x70] sm:$0xff]  }
 0x781   : > { %7092 = vmatprep.mubr.bf16.mxu0 %v12768_v62  ;;  %7478 = vmatprep.mubr.bf16.mxu1 %v12768_v62 }
 0x788   : > { %7093 = vmatmul.mubr.bf16.gmra.mrb[28].mxu0 %v12766_v63  ;;  %7479 = vmatmul.mubr.bf16.gmra.mrb[44].mxu1 %v12766_v63  ;;  %v10996_v63 = vld [vmem:[#allocation16 + $0xb0] sm:$0xff]  }
 0x789   : > { %7135 = vmatprep.mubr.bf16.mxu0 %v12566_v45  ;;  %v10975_v45 = vld [vmem:[#allocation16 + $0x60] sm:$0xff]  }
 0x790   : > { %7136 = vmatmul.mubr.bf16.vlgmr.msra.gmra.mrb[32].mxu0 %v12562_v2  ;;  %v10974_v2 = vld [vmem:[#allocation16 + $0x18] sm:$0xff]  }
 0x791   : > { %7145 = vmatprep.mubr.bf16.mxu0 %v12584_v25  ;;  %9040 = vmatpush3.bf16.msra.mxu0 %v10968_v28  ;;  %v10976_v25 = vld [vmem:[#allocation16 + $0x20] sm:$0xff]  }
 0x792   : > { %9041 = vmatprep.subr.bf16.mxu0 %v10969_v34 }
 0x795   : > { %9042 = vmatpush3.bf16.msra.mxu0 %v10970_v31 }
 0x796   : > { %9043 = vmatprep.subr.bf16.mxu0 %v10971_v16 }
 0x798   : > { %7146 = vmatmul.mubr.bf16.gmra.mrb[36].mxu0 %v12580_v23  ;;  %v10990_v23 = vld [vmem:[#allocation16 + $0x98] sm:$0xff]  }
 0x799   : > { %7155 = vmatprep.mubr.bf16.mxu0 %v12602_v13  ;;  %9044 = vmatpush3.bf16.msra.mxu0 %v10972_v46  ;;  %v10980_v13 = vld [vmem:[#allocation16 + $0x30] sm:$0xff]  }
 0x79a   : > { %9045 = vmatprep.subr.bf16.mxu0 %v10973_v51  ;;  %9158 = vmatpush3.bf16.msra.mxu1 %v10990_v23 }
 0x79d   : > { %9046 = vmatpush3.bf16.msra.mxu0 %v10974_v2 }
 0x79e   : > { %9047 = vmatprep.subr.bf16.mxu0 %v10975_v45 }
 0x7a0   : > { %7156 = vmatmul.mubr.bf16.gmra.mrb[40].mxu0 %v12598_v26  ;;  %v10991_v26 = vld [vmem:[#allocation16 + $0xe0] sm:$0xff]  }
 0x7a1   : > { %7165 = vmatprep.mubr.bf16.mxu0 %v12620_v39  ;;  %9048 = vmatpush3.bf16.msra.mxu0 %v10976_v25  ;;  %v10992_v39 = vld [vmem:[#allocation16 + $0xa0] sm:$0xff]  }
 0x7a2   : > { %9049 = vmatprep.subr.bf16.mxu0 %v10977_v35  ;;  %9159 = vmatprep.subr.bf16.mxu1 %v10991_v26 }
 0x7a3   : > { %9160 = vmatpush3.bf16.msra.mxu1 %v10992_v39 }
 0x7a4   : > { %9161 = vmatprep.subr.bf16.mxu1 %v10993_v37 }
 0x7a5   : > { %9050 = vmatpush3.bf16.msra.mxu0 %v10978_v3 }
 0x7a6   : > { %9051 = vmatprep.subr.bf16.mxu0 %v10979_v59 }
 0x7a7   : > { %9162 = vmatpush3.bf16.msra.mxu1 %v10994_v56 }
 0x7a8   : > { %7166 = vmatmul.mubr.bf16.gmra.mrb[44].mxu0 %v12616_v27  ;;  %9163 = vmatprep.subr.bf16.mxu1 %v10995_v48  ;;  %v12845_v27 = vld [vmem:[%s13397_s30] sm:$0xf]  ;;  %s11289_s30 = sshll.u32 %s11385_s15, 4  ;;  %s11290_s30 = int_to_ptr.vmem [resolvable:$false] %s11289_s30 }
 0x7a9   : > { %9052 = vmatpush3.bf16.msra.mxu0 %v10980_v13  ;;  %v12849_v62 = vrot.slane %v12845_v27, %v13398_v5  ;;  %v12853_v10 = vrot.slane %v12845_v27, %v13399_v15  ;;  %s11291_s2 = scalar_lea.vmem %s11290_s30, 8192  ;;  %p11292_p13 = scmp.lt.s32.totalorder %s13284_s8, %s11290_s30 }
 0x7aa   : > { %9053 = vmatprep.subr.bf16.mxu0 %v10981_v50  ;;  %p11293_p8 = scmp.lt.s32.totalorder %s11291_s2, %s11285_s26 }
 0x7ab   : > { %9164 = vmatpush3.bf16.msra.mxu1 %v10996_v63 }
 0x7ac   : > { %9165 = vmatprep.subr.bf16.mxu1 %v10997_v0  ;;  %p11294_p7 = por %p11293_p8, %p11292_p13 }
 0x7ad   : > { %9054 = vmatpush3.bf16.msra.mxu0 %v10982_v6 }
 0x7ae   : > { %p11295_p9 = pnand %p11294_p7, %p11288_p12 }
 0x7af   : > { %9166 = vmatpush3.bf16.msra.mxu1 %v10998_v52 }
 0x7e3   : > { %v6944_v11 = vpop.f32.mrb[224].mxu0  ;;  %v12855_v38 = vpop.f32.mrb[48].mxu1 }
 0x7e4   : > { %v9599_v49 = vadd.f32 %v6944_v11, %v12849_v62  ;;  %v6946_v41 = vpop.f32.mrb[225].mxu0  ;;  %v12858_v29 = vpop.f32.mrb[49].mxu1 }
 0x7e5   : > { %v9600_v24 = vadd.f32 %v6946_v41, %v12853_v10  ;;  %v6948_v1 = vpop.f32.mrb[226].mxu0  ;;  %v12861_v22 = vpop.f32.mrb[50].mxu1 }
 0x7e6   : > { %v9601_v33 = vadd.f32 %v6948_v1, %v12849_v62  ;;  %v6950_v61 = vpop.f32.mrb[227].mxu0  ;;  %v12864_v36 = vpop.f32.mrb[51].mxu1  ;;  %v7489_v30 = vmax.f32 %v9599_v49, 0.0 }
 0x7e7   : > { %v9602_v9 = vadd.f32 %v6950_v61, %v12853_v10  ;;  %v7490_v21 = vmax.f32 %v9600_v24, 0.0 }
 0x7e8   : > { %v7493_v44 = vmax.f32 %v9601_v33, 0.0 }
 0x7e9   : > { %v7494_v42 = vmax.f32 %v9602_v9, 0.0  ;;  %v13400_v9 = vld [vmem:[#allocation26_spill] sm:$0xff] }
 0x7ea   : > { %v7617_v58 = vpack.c.bf16 %v7493_v44, %v7489_v30  ;;  %v12905_v30 = vrot.slane %v12845_v27, %v13400_v9 }
 0x7eb   : > { %v7618_v20 = vpack.c.bf16 %v7494_v42, %v7490_v21  ;;  %v6954_v53 = vpop.f32.mrb[228].mxu0  ;;  %v12867_v32 = vpop.f32.mrb[52].mxu1  ;;  %v13401_v42 = vld [vmem:[#allocation27_spill] sm:$0xff] }
 0x7ec   : > { %v9603_v47 = vadd.f32 %v6954_v53, %v12849_v62  ;;  %v6956_v12 = vpop.f32.mrb[229].mxu0  ;;  %v12870_v17 = vpop.f32.mrb[53].mxu1 }
 0x7ed   : > { %v9604_v40 = vadd.f32 %v6956_v12, %v12853_v10  ;;  %v6958_v18 = vpop.f32.mrb[230].mxu0  ;;  %v12873_v7 = vpop.f32.mrb[54].mxu1  ;;  %7976 = vmatprep.mubr.bf16.mxu0 %v7618_v20 }
 0x7ee   : > { %v9605_v43 = vadd.f32 %v6958_v18, %v12849_v62  ;;  %v6960_v54 = vpop.f32.mrb[231].mxu0  ;;  %v12876_v19 = vpop.f32.mrb[55].mxu1  ;;  %7977 = vmatmul.mubr.bf16.vlgmr.msra.gmra.mrb[48].mxu0 %v7617_v58  ;;  %v7497_v60 = vmax.f32 %v9603_v47, 0.0  ;;  %v12909_v58 = vrot.slane %v12845_v27, %v13401_v42 }
 0x7ef   : > { %v9606_v57 = vadd.f32 %v6960_v54, %v12853_v10  ;;  %v7498_v28 = vmax.f32 %v9604_v40, 0.0 }
 0x7f0   : > { %v7501_v4 = vmax.f32 %v9605_v43, 0.0 }
 0x7f1   : > { %v7502_v34 = vmax.f32 %v9606_v57, 0.0 }
 0x7f2   : > { %v7621_v31 = vpack.c.bf16 %v7501_v4, %v7497_v60 }
 0x7f3   : > { %v7622_v16 = vpack.c.bf16 %v7502_v34, %v7498_v28  ;;  %v6964_v8 = vpop.f32.mrb[232].mxu0  ;;  %v12879_v14 = vpop.f32.mrb[56].mxu1 }
 0x7f4   : > { %v9607_v46 = vadd.f32 %v6964_v8, %v12849_v62  ;;  %v6966_v51 = vpop.f32.mrb[233].mxu0  ;;  %v12882_v2 = vpop.f32.mrb[57].mxu1 }
 0x7f5   : > { %v9608_v45 = vadd.f32 %v6966_v51, %v12853_v10  ;;  %v6968_v25 = vpop.f32.mrb[234].mxu0  ;;  %v12885_v35 = vpop.f32.mrb[58].mxu1  ;;  %7984 = vmatprep.mubr.bf16.mxu0 %v7622_v16 }
 0x7f6   : > { %v9609_v3 = vadd.f32 %v6968_v25, %v12849_v62  ;;  %v6970_v59 = vpop.f32.mrb[235].mxu0  ;;  %v12888_v55 = vpop.f32.mrb[59].mxu1  ;;  %7985 = vmatmul.mubr.bf16.gmra.mrb[52].mxu0 %v7621_v31  ;;  %v7505_v13 = vmax.f32 %v9607_v46, 0.0 }
 0x7f7   : > { %v9610_v23 = vadd.f32 %v6970_v59, %v12853_v10  ;;  %v7506_v6 = vmax.f32 %v9608_v45, 0.0 }
 0x7f8   : > { %v7509_v50 = vmax.f32 %v9609_v3, 0.0 }
 0x7f9   : > { %v7510_v26 = vmax.f32 %v9610_v23, 0.0 }
 0x7fa   : > { %v7625_v39 = vpack.c.bf16 %v7509_v50, %v7505_v13 }
 0x7fb   : > { %v7626_v37 = vpack.c.bf16 %v7510_v26, %v7506_v6  ;;  %v6974_v56 = vpop.f32.mrb[236].mxu0  ;;  %v12891_v48 = vpop.f32.mrb[60].mxu1 }
 0x7fc   : > { %v9611_v63 = vadd.f32 %v6974_v56, %v12849_v62  ;;  %v6976_v5 = vpop.f32.mrb[237].mxu0  ;;  %v12894_v15 = vpop.f32.mrb[61].mxu1 }
 0x7fd   : > { %v9612_v11 = vadd.f32 %v6976_v5, %v12853_v10  ;;  %v6978_v0 = vpop.f32.mrb[238].mxu0  ;;  %v12897_v52 = vpop.f32.mrb[62].mxu1  ;;  %7992 = vmatprep.mubr.bf16.mxu0 %v7626_v37 }
 0x7fe   : > { %v9613_v49 = vadd.f32 %v6978_v0, %v12849_v62  ;;  %v6980_v41 = vpop.f32.mrb[239].mxu0  ;;  %v12900_v24 = vpop.f32.mrb[63].mxu1  ;;  %7993 = vmatmul.mubr.bf16.gmra.mrb[56].mxu0 %v7625_v39  ;;  %v7513_v33 = vmax.f32 %v9611_v63, 0.0 }
 0x7ff   : > { %v9614_v1 = vadd.f32 %v6980_v41, %v12853_v10  ;;  %v7514_v44 = vmax.f32 %v9612_v11, 0.0 }
 0x800   : > { %v7517_v61 = vmax.f32 %v9613_v49, 0.0 }
 0x801   : > { %v7518_v21 = vmax.f32 %v9614_v1, 0.0 }
 0x802   : > { %v7629_v20 = vpack.c.bf16 %v7517_v61, %v7513_v33 }
 0x803   : > { %v7630_v53 = vpack.c.bf16 %v7518_v21, %v7514_v44  ;;  %v6984_v47 = vpop.f32.mrb[240].mxu0  ;;  %v7370_v12 = vpop.f32.mrb[0].mxu1 }
 0x804   : > { %v9615_v40 = vadd.f32 %v6984_v47, %v12849_v62  ;;  %v9695_v18 = vadd.f32 %v7370_v12, %v12905_v30  ;;  %v6986_v43 = vpop.f32.mrb[241].mxu0  ;;  %v7372_v54 = vpop.f32.mrb[1].mxu1 }
 0x805   : > { %v9616_v57 = vadd.f32 %v6986_v43, %v12853_v10  ;;  %v9696_v60 = vadd.f32 %v7372_v54, %v12909_v58  ;;  %v6988_v4 = vpop.f32.mrb[242].mxu0  ;;  %v7374_v28 = vpop.f32.mrb[2].mxu1  ;;  %8000 = vmatprep.mubr.bf16.mxu0 %v7630_v53 }
 0x806   : > { %v9617_v27 = vadd.f32 %v6988_v4, %v12849_v62  ;;  %v9697_v34 = vadd.f32 %v7374_v28, %v12905_v30  ;;  %v6990_v31 = vpop.f32.mrb[243].mxu0  ;;  %v7376_v16 = vpop.f32.mrb[3].mxu1  ;;  %8001 = vmatmul.mubr.bf16.gmra.mrb[60].mxu0 %v7629_v20  ;;  %v7521_v51 = vmax.f32 %v9615_v40, 0.0  ;;  %v7523_v45 = vmax.f32 %v9695_v18, 0.0 }
 0x807   : > { %v9618_v8 = vadd.f32 %v6990_v31, %v12853_v10  ;;  %v9698_v46 = vadd.f32 %v7376_v16, %v12909_v58  ;;  %v7522_v59 = vmax.f32 %v9616_v57, 0.0  ;;  %v7524_v23 = vmax.f32 %v9696_v60, 0.0 }
 0x808   : > { %v7525_v25 = vmax.f32 %v9617_v27, 0.0  ;;  %v7527_v3 = vmax.f32 %v9697_v34, 0.0 }
 0x809   : > { %v7526_v13 = vmax.f32 %v9618_v8, 0.0  ;;  %v7528_v50 = vmax.f32 %v9698_v46, 0.0 }
 0x80a   : > { %v7633_v6 = vpack.c.bf16 %v7525_v25, %v7521_v51  ;;  %v12919_v26 = vpack.c.bf16 %v7527_v3, %v7523_v45 }
 0x80b   : > { %v7634_v39 = vpack.c.bf16 %v7526_v13, %v7522_v59  ;;  %v12921_v37 = vpack.c.bf16 %v7528_v50, %v7524_v23  ;;  %v6994_v56 = vpop.f32.mrb[244].mxu0  ;;  %v7380_v63 = vpop.f32.mrb[4].mxu1 }
 0x80c   : > { %v9619_v5 = vadd.f32 %v6994_v56, %v12849_v62  ;;  %v9699_v11 = vadd.f32 %v7380_v63, %v12905_v30  ;;  %v6996_v0 = vpop.f32.mrb[245].mxu0  ;;  %v7382_v49 = vpop.f32.mrb[5].mxu1 }
 0x80d   : > { %v9620_v41 = vadd.f32 %v6996_v0, %v12853_v10  ;;  %v9700_v1 = vadd.f32 %v7382_v49, %v12909_v58  ;;  %v6998_v33 = vpop.f32.mrb[246].mxu0  ;;  %v7384_v61 = vpop.f32.mrb[6].mxu1  ;;  %8008 = vmatprep.mubr.bf16.mxu0 %v7634_v39 }
 0x80e   : > { %v9621_v9 = vadd.f32 %v6998_v33, %v12849_v62  ;;  %v9701_v44 = vadd.f32 %v7384_v61, %v12905_v30  ;;  %v7000_v21 = vpop.f32.mrb[247].mxu0  ;;  %v7386_v42 = vpop.f32.mrb[7].mxu1  ;;  %8009 = vmatmul.mubr.bf16.gmra.mrb[64].mxu0 %v7633_v6  ;;  %v7529_v47 = vmax.f32 %v9619_v5, 0.0  ;;  %v7531_v12 = vmax.f32 %v9699_v11, 0.0 }
 0x80f   : > { %v9622_v20 = vadd.f32 %v7000_v21, %v12853_v10  ;;  %v9702_v53 = vadd.f32 %v7386_v42, %v12909_v58  ;;  %v7530_v43 = vmax.f32 %v9620_v41, 0.0  ;;  %v7532_v54 = vmax.f32 %v9700_v1, 0.0 }
 0x810   : > { %v7533_v40 = vmax.f32 %v9621_v9, 0.0  ;;  %v7535_v18 = vmax.f32 %v9701_v44, 0.0 }
 0x811   : > { %v7534_v57 = vmax.f32 %v9622_v20, 0.0  ;;  %v7536_v60 = vmax.f32 %v9702_v53, 0.0 }
 0x812   : > { %v7637_v4 = vpack.c.bf16 %v7533_v40, %v7529_v47  ;;  %v12931_v28 = vpack.c.bf16 %v7535_v18, %v7531_v12 }
 0x813   : > { %v7638_v27 = vpack.c.bf16 %v7534_v57, %v7530_v43  ;;  %v12933_v34 = vpack.c.bf16 %v7536_v60, %v7532_v54  ;;  %v7004_v31 = vpop.f32.mrb[248].mxu0  ;;  %v7390_v16 = vpop.f32.mrb[8].mxu1 }
 0x814   : > { %v9623_v8 = vadd.f32 %v7004_v31, %v12849_v62  ;;  %v9703_v46 = vadd.f32 %v7390_v16, %v12905_v30  ;;  %v7006_v51 = vpop.f32.mrb[249].mxu0  ;;  %v7392_v45 = vpop.f32.mrb[9].mxu1 }
 0x815   : > { %v9624_v25 = vadd.f32 %v7006_v51, %v12853_v10  ;;  %v9704_v3 = vadd.f32 %v7392_v45, %v12909_v58  ;;  %v7008_v59 = vpop.f32.mrb[250].mxu0  ;;  %v7394_v23 = vpop.f32.mrb[10].mxu1  ;;  %8016 = vmatprep.mubr.bf16.mxu0 %v7638_v27 }
 0x816   : > { %v9625_v13 = vadd.f32 %v7008_v59, %v12849_v62  ;;  %v9705_v50 = vadd.f32 %v7394_v23, %v12905_v30  ;;  %v7010_v6 = vpop.f32.mrb[251].mxu0  ;;  %v7396_v39 = vpop.f32.mrb[11].mxu1  ;;  %8017 = vmatmul.mubr.bf16.gmra.mrb[68].mxu0 %v7637_v4  ;;  %v7537_v5 = vmax.f32 %v9623_v8, 0.0  ;;  %v7539_v11 = vmax.f32 %v9703_v46, 0.0 }
 0x817   : > { %v9626_v56 = vadd.f32 %v7010_v6, %v12853_v10  ;;  %v9706_v63 = vadd.f32 %v7396_v39, %v12909_v58  ;;  %v7538_v41 = vmax.f32 %v9624_v25, 0.0  ;;  %v7540_v1 = vmax.f32 %v9704_v3, 0.0 }
 0x818   : > { %v7541_v0 = vmax.f32 %v9625_v13, 0.0  ;;  %v7543_v49 = vmax.f32 %v9705_v50, 0.0 }
 0x819   : > { %v7542_v33 = vmax.f32 %v9626_v56, 0.0  ;;  %v7544_v61 = vmax.f32 %v9706_v63, 0.0 }
 0x81a   : > { %v7641_v9 = vpack.c.bf16 %v7541_v0, %v7537_v5  ;;  %v12943_v44 = vpack.c.bf16 %v7543_v49, %v7539_v11 }
 0x81b   : > { %v7642_v21 = vpack.c.bf16 %v7542_v33, %v7538_v41  ;;  %v12945_v42 = vpack.c.bf16 %v7544_v61, %v7540_v1  ;;  %v7014_v20 = vpop.f32.mrb[252].mxu0  ;;  %v7400_v53 = vpop.f32.mrb[12].mxu1 }
 0x81c   : > { %v9627_v47 = vadd.f32 %v7014_v20, %v12849_v62  ;;  %v9707_v12 = vadd.f32 %v7400_v53, %v12905_v30  ;;  %v7016_v40 = vpop.f32.mrb[253].mxu0  ;;  %v7402_v18 = vpop.f32.mrb[13].mxu1 }
 0x81d   : > { %v9628_v43 = vadd.f32 %v7016_v40, %v12853_v10  ;;  %v9708_v54 = vadd.f32 %v7402_v18, %v12909_v58  ;;  %v7018_v57 = vpop.f32.mrb[254].mxu0  ;;  %v7404_v60 = vpop.f32.mrb[14].mxu1  ;;  %8024 = vmatprep.mubr.bf16.mxu0 %v7642_v21 }
 0x81e   : > { %v9629_v4 = vadd.f32 %v7018_v57, %v12849_v62  ;;  %v9709_v27 = vadd.f32 %v7404_v60, %v12905_v30  ;;  %v7020_v31 = vpop.f32.mrb[255].mxu0  ;;  %v7406_v16 = vpop.f32.mrb[15].mxu1  ;;  %8025 = vmatmul.mubr.bf16.gmra.mrb[72].mxu0 %v7641_v9  ;;  %v7545_v51 = vmax.f32 %v9627_v47, 0.0  ;;  %v7547_v45 = vmax.f32 %v9707_v12, 0.0 }
 0x81f   : > { %v9630_v8 = vadd.f32 %v7020_v31, %v12853_v10  ;;  %v9710_v46 = vadd.f32 %v7406_v16, %v12909_v58  ;;  %v7546_v59 = vmax.f32 %v9628_v43, 0.0  ;;  %v7548_v23 = vmax.f32 %v9708_v54, 0.0 }
 0x820   : > { %v7549_v25 = vmax.f32 %v9629_v4, 0.0  ;;  %v7551_v3 = vmax.f32 %v9709_v27, 0.0 }
 0x821   : > { %v7550_v13 = vmax.f32 %v9630_v8, 0.0  ;;  %v7552_v50 = vmax.f32 %v9710_v46, 0.0 }
 0x822   : > { %v7645_v6 = vpack.c.bf16 %v7549_v25, %v7545_v51  ;;  %v12955_v39 = vpack.c.bf16 %v7551_v3, %v7547_v45 }
 0x823   : > { %v7646_v56 = vpack.c.bf16 %v7550_v13, %v7546_v59  ;;  %v12957_v63 = vpack.c.bf16 %v7552_v50, %v7548_v23  ;;  %v7024_v5 = vpop.f32.mrb[0].mxu0  ;;  %v7410_v11 = vpop.f32.mrb[16].mxu1 }
 0x824   : > { %v9631_v0 = vadd.f32 %v7024_v5, %v12849_v62  ;;  %v9711_v49 = vadd.f32 %v7410_v11, %v12905_v30  ;;  %v7026_v41 = vpop.f32.mrb[1].mxu0  ;;  %v7412_v1 = vpop.f32.mrb[17].mxu1 }
 0x825   : > { %v9632_v33 = vadd.f32 %v7026_v41, %v12853_v10  ;;  %v9712_v61 = vadd.f32 %v7412_v1, %v12909_v58  ;;  %v7028_v9 = vpop.f32.mrb[2].mxu0  ;;  %v7414_v21 = vpop.f32.mrb[18].mxu1  ;;  %8032 = vmatprep.mubr.bf16.mxu0 %v7646_v56 }
 0x826   : > { %v9633_v20 = vadd.f32 %v7028_v9, %v12849_v62  ;;  %v9713_v53 = vadd.f32 %v7414_v21, %v12905_v30  ;;  %v7030_v47 = vpop.f32.mrb[3].mxu0  ;;  %v7416_v12 = vpop.f32.mrb[19].mxu1  ;;  %8033 = vmatmul.mubr.bf16.gmra.mrb[76].mxu0 %v7645_v6  ;;  %v7553_v43 = vmax.f32 %v9631_v0, 0.0  ;;  %v7555_v54 = vmax.f32 %v9711_v49, 0.0 }
 0x827   : > { %v9634_v40 = vadd.f32 %v7030_v47, %v12853_v10  ;;  %v9714_v18 = vadd.f32 %v7416_v12, %v12909_v58  ;;  %v7554_v4 = vmax.f32 %v9632_v33, 0.0  ;;  %v7556_v27 = vmax.f32 %v9712_v61, 0.0 }
 0x828   : > { %v7557_v57 = vmax.f32 %v9633_v20, 0.0  ;;  %v7559_v60 = vmax.f32 %v9713_v53, 0.0 }
 0x829   : > { %v7558_v31 = vmax.f32 %v9634_v40, 0.0  ;;  %v7560_v16 = vmax.f32 %v9714_v18, 0.0 }
 0x82a   : > { %v7649_v8 = vpack.c.bf16 %v7557_v57, %v7553_v43  ;;  %v12967_v46 = vpack.c.bf16 %v7559_v60, %v7555_v54 }
 0x82b   : > { %v7650_v51 = vpack.c.bf16 %v7558_v31, %v7554_v4  ;;  %v12969_v45 = vpack.c.bf16 %v7560_v16, %v7556_v27  ;;  %v7034_v25 = vpop.f32.mrb[4].mxu0  ;;  %v7420_v3 = vpop.f32.mrb[20].mxu1 }
 0x82c   : > { %v9635_v59 = vadd.f32 %v7034_v25, %v12849_v62  ;;  %v9715_v23 = vadd.f32 %v7420_v3, %v12905_v30  ;;  %v7036_v13 = vpop.f32.mrb[5].mxu0  ;;  %v7422_v50 = vpop.f32.mrb[21].mxu1 }
 0x82d   : > { %v9636_v6 = vadd.f32 %v7036_v13, %v12853_v10  ;;  %v9716_v56 = vadd.f32 %v7422_v50, %v12909_v58  ;;  %v7038_v5 = vpop.f32.mrb[6].mxu0  ;;  %v7424_v11 = vpop.f32.mrb[22].mxu1  ;;  %8040 = vmatprep.mubr.bf16.mxu0 %v7650_v51 }
 0x82e   : > { %v9637_v0 = vadd.f32 %v7038_v5, %v12849_v62  ;;  %v9717_v49 = vadd.f32 %v7424_v11, %v12905_v30  ;;  %v7040_v41 = vpop.f32.mrb[7].mxu0  ;;  %v7426_v1 = vpop.f32.mrb[23].mxu1  ;;  %8041 = vmatmul.mubr.bf16.gmra.mrb[80].mxu0 %v7649_v8  ;;  %v7561_v9 = vmax.f32 %v9635_v59, 0.0  ;;  %v7563_v21 = vmax.f32 %v9715_v23, 0.0 }
 0x82f   : > { %v9638_v33 = vadd.f32 %v7040_v41, %v12853_v10  ;;  %v9718_v61 = vadd.f32 %v7426_v1, %v12909_v58  ;;  %v7562_v47 = vmax.f32 %v9636_v6, 0.0  ;;  %v7564_v12 = vmax.f32 %v9716_v56, 0.0 }
 0x830   : > { %v7565_v20 = vmax.f32 %v9637_v0, 0.0  ;;  %v7567_v53 = vmax.f32 %v9717_v49, 0.0 }
 0x831   : > { %v7566_v40 = vmax.f32 %v9638_v33, 0.0  ;;  %v7568_v18 = vmax.f32 %v9718_v61, 0.0 }
 0x832   : > { %v7653_v43 = vpack.c.bf16 %v7565_v20, %v7561_v9  ;;  %v12979_v54 = vpack.c.bf16 %v7567_v53, %v7563_v21 }
 0x833   : > { %v7654_v57 = vpack.c.bf16 %v7566_v40, %v7562_v47  ;;  %v12981_v60 = vpack.c.bf16 %v7568_v18, %v7564_v12  ;;  %v7044_v4 = vpop.f32.mrb[8].mxu0  ;;  %v7430_v27 = vpop.f32.mrb[24].mxu1 }
 0x834   : > { %v9639_v31 = vadd.f32 %v7044_v4, %v12849_v62  ;;  %v9719_v16 = vadd.f32 %v7430_v27, %v12905_v30  ;;  %v7046_v8 = vpop.f32.mrb[9].mxu0  ;;  %v7432_v51 = vpop.f32.mrb[25].mxu1 }
 0x835   : > { %v9640_v25 = vadd.f32 %v7046_v8, %v12853_v10  ;;  %v9720_v3 = vadd.f32 %v7432_v51, %v12909_v58  ;;  %v7048_v59 = vpop.f32.mrb[10].mxu0  ;;  %v7434_v23 = vpop.f32.mrb[26].mxu1  ;;  %8048 = vmatprep.mubr.bf16.mxu0 %v7654_v57 }
 0x836   : > { %v9641_v13 = vadd.f32 %v7048_v59, %v12849_v62  ;;  %v9721_v50 = vadd.f32 %v7434_v23, %v12905_v30  ;;  %v7050_v6 = vpop.f32.mrb[11].mxu0  ;;  %v7436_v56 = vpop.f32.mrb[27].mxu1  ;;  %8049 = vmatmul.mubr.bf16.gmra.mrb[84].mxu0 %v7653_v43  ;;  %v7569_v0 = vmax.f32 %v9639_v31, 0.0  ;;  %v7571_v49 = vmax.f32 %v9719_v16, 0.0 }
 0x837   : > { %v9642_v5 = vadd.f32 %v7050_v6, %v12853_v10  ;;  %v9722_v11 = vadd.f32 %v7436_v56, %v12909_v58  ;;  %v7570_v33 = vmax.f32 %v9640_v25, 0.0  ;;  %v7572_v61 = vmax.f32 %v9720_v3, 0.0 }
 0x838   : > { %v7573_v41 = vmax.f32 %v9641_v13, 0.0  ;;  %v7575_v1 = vmax.f32 %v9721_v50, 0.0 }
 0x839   : > { %v7574_v9 = vmax.f32 %v9642_v5, 0.0  ;;  %v7576_v21 = vmax.f32 %v9722_v11, 0.0 }
 0x83a   : > { %v7657_v20 = vpack.c.bf16 %v7573_v41, %v7569_v0  ;;  %v12991_v53 = vpack.c.bf16 %v7575_v1, %v7571_v49 }
 0x83b   : > { %v7658_v47 = vpack.c.bf16 %v7574_v9, %v7570_v33  ;;  %v12993_v12 = vpack.c.bf16 %v7576_v21, %v7572_v61  ;;  %v7054_v40 = vpop.f32.mrb[12].mxu0  ;;  %v7440_v18 = vpop.f32.mrb[28].mxu1 }
 0x83c   : > { %v9643_v43 = vadd.f32 %v7054_v40, %v12849_v62  ;;  %v9723_v57 = vadd.f32 %v7440_v18, %v12905_v30  ;;  %v7056_v4 = vpop.f32.mrb[13].mxu0  ;;  %v7442_v27 = vpop.f32.mrb[29].mxu1 }
 0x83d   : > { %v9644_v31 = vadd.f32 %v7056_v4, %v12853_v10  ;;  %v9724_v16 = vadd.f32 %v7442_v27, %v12909_v58  ;;  %v7058_v8 = vpop.f32.mrb[14].mxu0  ;;  %v7444_v51 = vpop.f32.mrb[30].mxu1  ;;  %8056 = vmatprep.mubr.bf16.mxu0 %v7658_v47 }
 0x83e   : > { %v9645_v25 = vadd.f32 %v7058_v8, %v12849_v62  ;;  %v9725_v3 = vadd.f32 %v7444_v51, %v12905_v30  ;;  %v7060_v59 = vpop.f32.mrb[15].mxu0  ;;  %v7446_v23 = vpop.f32.mrb[31].mxu1  ;;  %8057 = vmatmul.mubr.bf16.gmra.mrb[88].mxu0 %v7657_v20  ;;  %v7577_v6 = vmax.f32 %v9643_v43, 0.0  ;;  %v7579_v56 = vmax.f32 %v9723_v57, 0.0 }
 0x83f   : > { %v9646_v13 = vadd.f32 %v7060_v59, %v12853_v10  ;;  %v9726_v50 = vadd.f32 %v7446_v23, %v12909_v58  ;;  %v7578_v0 = vmax.f32 %v9644_v31, 0.0  ;;  %v7580_v49 = vmax.f32 %v9724_v16, 0.0 }
 0x840   : > { %v7581_v5 = vmax.f32 %v9645_v25, 0.0  ;;  %v7583_v11 = vmax.f32 %v9725_v3, 0.0 }
 0x841   : > { %v7582_v41 = vmax.f32 %v9646_v13, 0.0  ;;  %v7584_v1 = vmax.f32 %v9726_v50, 0.0 }
 0x842   : > { %v7661_v33 = vpack.c.bf16 %v7581_v5, %v7577_v6  ;;  %v13003_v61 = vpack.c.bf16 %v7583_v11, %v7579_v56 }
 0x843   : > { %v7662_v9 = vpack.c.bf16 %v7582_v41, %v7578_v0  ;;  %v13005_v21 = vpack.c.bf16 %v7584_v1, %v7580_v49  ;;  %v7064_v47 = vpop.f32.mrb[16].mxu0  ;;  %v7450_v20 = vpop.f32.mrb[32].mxu1 }
 0x844   : > { %v9647_v40 = vadd.f32 %v7064_v47, %v12849_v62  ;;  %v9727_v18 = vadd.f32 %v7450_v20, %v12905_v30  ;;  %v7066_v43 = vpop.f32.mrb[17].mxu0  ;;  %v7452_v57 = vpop.f32.mrb[33].mxu1 }
 0x845   : > { %v9648_v4 = vadd.f32 %v7066_v43, %v12853_v10  ;;  %v9728_v27 = vadd.f32 %v7452_v57, %v12909_v58  ;;  %v7068_v31 = vpop.f32.mrb[18].mxu0  ;;  %v7454_v16 = vpop.f32.mrb[34].mxu1  ;;  %8064 = vmatprep.mubr.bf16.mxu0 %v7662_v9 }
 0x846   : > { %v9649_v8 = vadd.f32 %v7068_v31, %v12849_v62  ;;  %v9729_v51 = vadd.f32 %v7454_v16, %v12905_v30  ;;  %v7070_v25 = vpop.f32.mrb[19].mxu0  ;;  %v7456_v3 = vpop.f32.mrb[35].mxu1  ;;  %8065 = vmatmul.mubr.bf16.gmra.mrb[92].mxu0 %v7661_v33  ;;  %v7585_v13 = vmax.f32 %v9647_v40, 0.0  ;;  %v7587_v50 = vmax.f32 %v9727_v18, 0.0 }
 0x847   : > { %v9650_v59 = vadd.f32 %v7070_v25, %v12853_v10  ;;  %v9730_v23 = vadd.f32 %v7456_v3, %v12909_v58  ;;  %v7586_v5 = vmax.f32 %v9648_v4, 0.0  ;;  %v7588_v11 = vmax.f32 %v9728_v27, 0.0 }
 0x848   : > { %v7589_v6 = vmax.f32 %v9649_v8, 0.0  ;;  %v7591_v56 = vmax.f32 %v9729_v51, 0.0 }
 0x849   : > { %v7590_v0 = vmax.f32 %v9650_v59, 0.0  ;;  %v7592_v49 = vmax.f32 %v9730_v23, 0.0 }
 0x84a   : > { %v7665_v41 = vpack.c.bf16 %v7589_v6, %v7585_v13  ;;  %v13015_v1 = vpack.c.bf16 %v7591_v56, %v7587_v50 }
 0x84b   : > { %v7666_v9 = vpack.c.bf16 %v7590_v0, %v7586_v5  ;;  %v13017_v47 = vpack.c.bf16 %v7592_v49, %v7588_v11  ;;  %v7074_v20 = vpop.f32.mrb[20].mxu0  ;;  %v7460_v33 = vpop.f32.mrb[36].mxu1 }
 0x84c   : > { %v9651_v43 = vadd.f32 %v7074_v20, %v12849_v62  ;;  %v9731_v57 = vadd.f32 %v7460_v33, %v12905_v30  ;;  %v7076_v40 = vpop.f32.mrb[21].mxu0  ;;  %v7462_v18 = vpop.f32.mrb[37].mxu1 }
 0x84d   : > { %v9652_v31 = vadd.f32 %v7076_v40, %v12853_v10  ;;  %v9732_v4 = vadd.f32 %v7462_v18, %v12909_v58  ;;  %v7078_v27 = vpop.f32.mrb[22].mxu0  ;;  %v7464_v16 = vpop.f32.mrb[38].mxu1  ;;  %8072 = vmatprep.mubr.bf16.mxu0 %v7666_v9 }
 0x84e   : > { %v9653_v8 = vadd.f32 %v7078_v27, %v12849_v62  ;;  %v9733_v51 = vadd.f32 %v7464_v16, %v12905_v30  ;;  %v7080_v25 = vpop.f32.mrb[23].mxu0  ;;  %v7466_v3 = vpop.f32.mrb[39].mxu1  ;;  %8073 = vmatmul.mubr.bf16.gmra.mrb[96].mxu0 %v7665_v41  ;;  %v7593_v13 = vmax.f32 %v9651_v43, 0.0  ;;  %v7595_v50 = vmax.f32 %v9731_v57, 0.0 }
 0x84f   : > { %v9654_v59 = vadd.f32 %v7080_v25, %v12853_v10  ;;  %v9734_v23 = vadd.f32 %v7466_v3, %v12909_v58  ;;  %v7594_v5 = vmax.f32 %v9652_v31, 0.0  ;;  %v7596_v11 = vmax.f32 %v9732_v4, 0.0 }
 0x850   : > { %v7597_v6 = vmax.f32 %v9653_v8, 0.0  ;;  %v7599_v56 = vmax.f32 %v9733_v51, 0.0 }
 0x851   : > { %v7598_v0 = vmax.f32 %v9654_v59, 0.0  ;;  %v7600_v49 = vmax.f32 %v9734_v23, 0.0 }
 0x852   : > { %v7669_v9 = vpack.c.bf16 %v7597_v6, %v7593_v13  ;;  %v13027_v20 = vpack.c.bf16 %v7599_v56, %v7595_v50 }
 0x853   : > { %v7670_v33 = vpack.c.bf16 %v7598_v0, %v7594_v5  ;;  %v13029_v40 = vpack.c.bf16 %v7600_v49, %v7596_v11  ;;  %v7084_v18 = vpop.f32.mrb[24].mxu0  ;;  %v7470_v41 = vpop.f32.mrb[40].mxu1 }
 0x854   : > { %v9655_v27 = vadd.f32 %v7084_v18, %v12849_v62  ;;  %v9735_v16 = vadd.f32 %v7470_v41, %v12905_v30  ;;  %v7086_v43 = vpop.f32.mrb[25].mxu0  ;;  %v7472_v57 = vpop.f32.mrb[41].mxu1 }
 0x855   : > { %v9656_v8 = vadd.f32 %v7086_v43, %v12853_v10  ;;  %v9736_v31 = vadd.f32 %v7472_v57, %v12909_v58  ;;  %v7088_v4 = vpop.f32.mrb[26].mxu0  ;;  %v7474_v51 = vpop.f32.mrb[42].mxu1  ;;  %8080 = vmatprep.mubr.bf16.mxu0 %v7670_v33 }
 0x856   : > { %v9657_v25 = vadd.f32 %v7088_v4, %v12849_v62  ;;  %v9737_v3 = vadd.f32 %v7474_v51, %v12905_v30  ;;  %v7090_v59 = vpop.f32.mrb[27].mxu0  ;;  %v7476_v23 = vpop.f32.mrb[43].mxu1  ;;  %8081 = vmatmul.mubr.bf16.gmra.mrb[100].mxu0 %v7669_v9  ;;  %v7601_v6 = vmax.f32 %v9655_v27, 0.0  ;;  %v7603_v56 = vmax.f32 %v9735_v16, 0.0 }
 0x857   : > { %v9658_v13 = vadd.f32 %v7090_v59, %v12853_v10  ;;  %v9738_v50 = vadd.f32 %v7476_v23, %v12909_v58  ;;  %v7602_v0 = vmax.f32 %v9656_v8, 0.0  ;;  %v7604_v49 = vmax.f32 %v9736_v31, 0.0 }
 0x858   : > { %v7605_v5 = vmax.f32 %v9657_v25, 0.0  ;;  %v7607_v11 = vmax.f32 %v9737_v3, 0.0 }
 0x859   : > { %v7606_v18 = vmax.f32 %v9658_v13, 0.0  ;;  %v7608_v41 = vmax.f32 %v9738_v50, 0.0 }
 0x85a   : > { %v7673_v33 = vpack.c.bf16 %v7605_v5, %v7601_v6  ;;  %v13039_v43 = vpack.c.bf16 %v7607_v11, %v7603_v56 }
 0x85b   : > { %v7674_v57 = vpack.c.bf16 %v7606_v18, %v7602_v0  ;;  %v13041_v4 = vpack.c.bf16 %v7608_v41, %v7604_v49  ;;  %v7094_v51 = vpop.f32.mrb[28].mxu0  ;;  %v7480_v9 = vpop.f32.mrb[44].mxu1 }
 0x85c   : > { %13402 = vst [vmem:[#allocation24_spill] sm:$0xff] %v13039_v43  ;;  %v9659_v59 = vadd.f32 %v7094_v51, %v12849_v62  ;;  %v9739_v23 = vadd.f32 %v7480_v9, %v12905_v30  ;;  %v7096_v27 = vpop.f32.mrb[29].mxu0  ;;  %v7482_v16 = vpop.f32.mrb[45].mxu1 }
 0x85d   : > { %v9660_v25 = vadd.f32 %v7096_v27, %v12853_v10  ;;  %v9740_v8 = vadd.f32 %v7482_v16, %v12909_v58  ;;  %v7098_v31 = vpop.f32.mrb[30].mxu0  ;;  %v7484_v3 = vpop.f32.mrb[46].mxu1  ;;  %8088 = vmatprep.mubr.bf16.mxu0 %v7674_v57 }
 0x85e   : > { %v9661_v13 = vadd.f32 %v7098_v31, %v12849_v62  ;;  %v9741_v50 = vadd.f32 %v7484_v3, %v12905_v30  ;;  %v7100_v6 = vpop.f32.mrb[31].mxu0  ;;  %v7486_v56 = vpop.f32.mrb[47].mxu1  ;;  %8089 = vmatmul.mubr.bf16.gmra.mrb[104].mxu0 %v7673_v33  ;;  %v7609_v0 = vmax.f32 %v9659_v59, 0.0  ;;  %v7611_v49 = vmax.f32 %v9739_v23, 0.0 }
 0x85f   : > { %v9662_v5 = vadd.f32 %v7100_v6, %v12853_v10  ;;  %v9742_v11 = vadd.f32 %v7486_v56, %v12909_v58  ;;  %v7610_v51 = vmax.f32 %v9660_v25, 0.0  ;;  %v7612_v9 = vmax.f32 %v9740_v8, 0.0 }
 0x860   : > { %v7613_v18 = vmax.f32 %v9661_v13, 0.0  ;;  %v7615_v41 = vmax.f32 %v9741_v50, 0.0 }
 0x861   : > { %v7614_v27 = vmax.f32 %v9662_v5, 0.0  ;;  %v7616_v16 = vmax.f32 %v9742_v11, 0.0 }
 0x862   : > { %v7677_v57 = vpack.c.bf16 %v7613_v18, %v7609_v0  ;;  %v13051_v43 = vpack.c.bf16 %v7615_v41, %v7611_v49 }
 0x863   : > { %v7678_v62 = vpack.c.bf16 %v7614_v27, %v7610_v51  ;;  %v13053_v31 = vpack.c.bf16 %v7616_v16, %v7612_v9  ;;  %v7137_v3 = vpop.f32.mrb[32].mxu0 }
 0x864   : > { %v7138_v33 = vadd.f32 %v7137_v3, %v12905_v30  ;;  %v7139_v10 = vpop.f32.mrb[33].mxu0 }
 0x865   : > { %v7140_v6 = vadd.f32 %v7139_v10, %v12909_v58  ;;  %v7141_v59 = vpop.f32.mrb[34].mxu0  ;;  %8096 = vmatprep.mubr.bf16.mxu0 %v7678_v62 }
 0x866   : > { %v7331_v23 = vadd.f32 %v12855_v38, %v7138_v33  ;;  %v7142_v25 = vadd.f32 %v7141_v59, %v12905_v30  ;;  %v7143_v8 = vpop.f32.mrb[35].mxu0  ;;  %8097 = vmatmul.mubr.bf16.gmra.mrb[108].mxu0 %v7677_v57 }
 0x867   : > { %v7333_v13 = vadd.f32 %v12858_v29, %v7140_v6  ;;  %v7144_v50 = vadd.f32 %v7143_v8, %v12909_v58 }
 0x868   : > { %v7335_v56 = vadd.f32 %v12861_v22, %v7142_v25  ;;  %v7491_v11 = vmax.f32 %v7331_v23, 0.0 }
 0x869   : > { %v7337_v5 = vadd.f32 %v12864_v36, %v7144_v50  ;;  %v7492_v49 = vmax.f32 %v7333_v13, 0.0 }
 0x86a   : > { %v7495_v0 = vmax.f32 %v7335_v56, 0.0 }
 0x86b   : > { %v7496_v18 = vmax.f32 %v7337_v5, 0.0  ;;  %v7147_v41 = vpop.f32.mrb[36].mxu0 }
 0x86c   : > { %v7619_v51 = vpack.c.bf16 %v7495_v0, %v7491_v11  ;;  %v7148_v38 = vadd.f32 %v7147_v41, %v12905_v30  ;;  %v7149_v9 = vpop.f32.mrb[37].mxu0 }
 0x86d   : > { %v7150_v27 = vadd.f32 %v7149_v9, %v12909_v58  ;;  %v7151_v16 = vpop.f32.mrb[38].mxu0  ;;  %v7620_v57 = vpack.c.bf16 %v7496_v18, %v7492_v49 }
 0x86e   : > { %v7341_v29 = vadd.f32 %v12867_v32, %v7148_v38  ;;  %v7152_v62 = vadd.f32 %v7151_v16, %v12905_v30  ;;  %v7153_v22 = vpop.f32.mrb[39].mxu0 }
 0x86f   : > { %v7343_v36 = vadd.f32 %v12870_v17, %v7150_v27  ;;  %v7154_v3 = vadd.f32 %v7153_v22, %v12909_v58  ;;  %8137 = vmatprep.mubr.bf16.mxu1 %v7620_v57 }
 0x870   : > { %v7345_v33 = vadd.f32 %v12873_v7, %v7152_v62  ;;  %8138 = vmatmul.mubr.bf16.vlgmr.msra.gmra.mrb[64].mxu1 %v7619_v51  ;;  %v7499_v6 = vmax.f32 %v7341_v29, 0.0 }
 0x871   : > { %v7347_v10 = vadd.f32 %v12876_v19, %v7154_v3  ;;  %v7500_v23 = vmax.f32 %v7343_v36, 0.0 }
 0x872   : > { %v7503_v59 = vmax.f32 %v7345_v33, 0.0 }
 0x873   : > { %v7504_v25 = vmax.f32 %v7347_v10, 0.0  ;;  %v7157_v8 = vpop.f32.mrb[40].mxu0 }
 0x874   : > { %v7623_v13 = vpack.c.bf16 %v7503_v59, %v7499_v6  ;;  %v7158_v32 = vadd.f32 %v7157_v8, %v12905_v30  ;;  %v7159_v50 = vpop.f32.mrb[41].mxu0 }
 0x875   : > { %v7160_v56 = vadd.f32 %v7159_v50, %v12909_v58  ;;  %v7161_v17 = vpop.f32.mrb[42].mxu0  ;;  %v7624_v5 = vpack.c.bf16 %v7504_v25, %v7500_v23 }
 0x876   : > { %v7351_v11 = vadd.f32 %v12879_v14, %v7158_v32  ;;  %v7162_v7 = vadd.f32 %v7161_v17, %v12905_v30  ;;  %v7163_v0 = vpop.f32.mrb[43].mxu0 }
 0x877   : > { %v7353_v19 = vadd.f32 %v12882_v2, %v7160_v56  ;;  %v7164_v49 = vadd.f32 %v7163_v0, %v12909_v58  ;;  %8145 = vmatprep.mubr.bf16.mxu1 %v7624_v5 }
 0x878   : > { %v7355_v18 = vadd.f32 %v12885_v35, %v7162_v7  ;;  %8146 = vmatmul.mubr.bf16.gmra.mrb[68].mxu1 %v7623_v13  ;;  %v7507_v51 = vmax.f32 %v7351_v11, 0.0 }
 0x879   : > { %v7357_v41 = vadd.f32 %v12888_v55, %v7164_v49  ;;  %v7508_v9 = vmax.f32 %v7353_v19, 0.0 }
 0x87a   : > { %v7511_v38 = vmax.f32 %v7355_v18, 0.0 }
 0x87b   : > { %v7512_v27 = vmax.f32 %v7357_v41, 0.0  ;;  %v7167_v16 = vpop.f32.mrb[44].mxu0 }
 0x87c   : > { %v7627_v57 = vpack.c.bf16 %v7511_v38, %v7507_v51  ;;  %v7168_v14 = vadd.f32 %v7167_v16, %v12905_v30  ;;  %v7169_v29 = vpop.f32.mrb[45].mxu0 }
 0x87d   : > { %v7170_v62 = vadd.f32 %v7169_v29, %v12909_v58  ;;  %v7171_v2 = vpop.f32.mrb[46].mxu0  ;;  %v7628_v22 = vpack.c.bf16 %v7512_v27, %v7508_v9 }
 0x87e   : > { %v7361_v36 = vadd.f32 %v12891_v48, %v7168_v14  ;;  %v7172_v35 = vadd.f32 %v7171_v2, %v12905_v30  ;;  %v7173_v3 = vpop.f32.mrb[47].mxu0 }
 0x87f   : > { %v7363_v55 = vadd.f32 %v12894_v15, %v7170_v62  ;;  %v7174_v33 = vadd.f32 %v7173_v3, %v12909_v58  ;;  %8153 = vmatprep.mubr.bf16.mxu1 %v7628_v22 }
 0x880   : > { %v7365_v10 = vadd.f32 %v12897_v52, %v7172_v35  ;;  %8154 = vmatmul.mubr.bf16.gmra.mrb[72].mxu1 %v7627_v57  ;;  %v7515_v59 = vmax.f32 %v7361_v36, 0.0 }
 0x881   : > { %v7367_v6 = vadd.f32 %v12900_v24, %v7174_v33  ;;  %v7516_v25 = vmax.f32 %v7363_v55, 0.0 }
 0x882   : > { %v7519_v23 = vmax.f32 %v7365_v10, 0.0 }
 0x883   : > { %v7520_v8 = vmax.f32 %v7367_v6, 0.0 }
 0x884   : > { %v7631_v13 = vpack.c.bf16 %v7519_v23, %v7515_v59 }
 0x885   : > { %v7632_v32 = vpack.c.bf16 %v7520_v8, %v7516_v25 }
 0x887   : > { %8161 = vmatprep.mubr.bf16.mxu1 %v7632_v32 }
 0x888   : > { %8162 = vmatmul.mubr.bf16.gmra.mrb[76].mxu1 %v7631_v13 }
 0x889   : > { %8169 = vmatprep.mubr.bf16.mxu1 %v12921_v37 }
 0x890   : > { %8170 = vmatmul.mubr.bf16.gmra.mrb[80].mxu1 %v12919_v26 }
 0x891   : > { %8177 = vmatprep.mubr.bf16.mxu1 %v12933_v34 }
 0x898   : > { %8178 = vmatmul.mubr.bf16.gmra.mrb[84].mxu1 %v12931_v28 }
 0x899   : > { %8185 = vmatprep.mubr.bf16.mxu1 %v12945_v42 }
 0x8a0   : > { %8186 = vmatmul.mubr.bf16.gmra.mrb[88].mxu1 %v12943_v44 }
 0x8a1   : > { %8193 = vmatprep.mubr.bf16.mxu1 %v12957_v63 }
 0x8a8   : > { %8194 = vmatmul.mubr.bf16.gmra.mrb[92].mxu1 %v12955_v39 }
 0x8a9   : > { %8201 = vmatprep.mubr.bf16.mxu1 %v12969_v45 }
 0x8b0   : > { %8202 = vmatmul.mubr.bf16.gmra.mrb[96].mxu1 %v12967_v46 }
 0x8b1   : > { %8209 = vmatprep.mubr.bf16.mxu1 %v12981_v60 }
 0x8b8   : > { %8210 = vmatmul.mubr.bf16.gmra.mrb[100].mxu1 %v12979_v54 }
 0x8b9   : > { %8217 = vmatprep.mubr.bf16.mxu1 %v12993_v12 }
 0x8c0   : > { %8218 = vmatmul.mubr.bf16.gmra.mrb[104].mxu1 %v12991_v53 }
 0x8c1   : > { %v9055_v48 = vpop.f32.mrb[48].mxu0  ;;  %8225 = vmatprep.mubr.bf16.mxu1 %v13005_v21 }
 0x8c2   : > { %v9056_v15 = vpop.f32.mrb[49].mxu0 }
 0x8c3   : > { %v13102_v52 = vadd.f32 %v9056_v15, %v9055_v48  ;;  %v9058_v24 = vpop.f32.mrb[50].mxu0 }
 0x8c4   : > { %v9059_v30 = vpop.f32.mrb[51].mxu0 }
 0x8c5   : > { %v13104_v58 = vadd.f32 %v9059_v30, %v9058_v24 }
 0x8c8   : > { %8226 = vmatmul.mubr.bf16.gmra.mrb[108].mxu1 %v13003_v61 }
 0x8c9   : > { %v9061_v26 = vpop.f32.mrb[52].mxu0  ;;  %8233 = vmatprep.mubr.bf16.mxu1 %v13017_v47 }
 0x8ca   : > { %v9062_v37 = vpop.f32.mrb[53].mxu0 }
 0x8cb   : > { %v13108_v28 = vadd.f32 %v9062_v37, %v9061_v26  ;;  %v9064_v34 = vpop.f32.mrb[54].mxu0 }
 0x8cc   : > { %v9065_v44 = vpop.f32.mrb[55].mxu0 }
 0x8cd   : > { %v13110_v42 = vadd.f32 %v9065_v44, %v9064_v34 }
 0x8d0   : > { %8234 = vmatmul.mubr.bf16.gmra.mrb[112].mxu1 %v13015_v1 }
 0x8d1   : > { %v9067_v39 = vpop.f32.mrb[56].mxu0  ;;  %8241 = vmatprep.mubr.bf16.mxu1 %v13029_v40  ;;  %v13403_v40 = vld [vmem:[#allocation24_spill] sm:$0xff] }
 0x8d2   : > { %v9068_v63 = vpop.f32.mrb[57].mxu0 }
 0x8d3   : > { %v13114_v46 = vadd.f32 %v9068_v63, %v9067_v39  ;;  %v9070_v45 = vpop.f32.mrb[58].mxu0 }
 0x8d4   : > { %v9071_v54 = vpop.f32.mrb[59].mxu0 }
 0x8d5   : > { %v13116_v60 = vadd.f32 %v9071_v54, %v9070_v45 }
 0x8d8   : > { %8242 = vmatmul.mubr.bf16.gmra.mrb[116].mxu1 %v13027_v20 }
 0x8d9   : > { %v9073_v53 = vpop.f32.mrb[60].mxu0  ;;  %8249 = vmatprep.mubr.bf16.mxu1 %v13041_v4 }
 0x8da   : > { %v9074_v12 = vpop.f32.mrb[61].mxu0 }
 0x8db   : > { %v13120_v61 = vadd.f32 %v9074_v12, %v9073_v53  ;;  %v9076_v21 = vpop.f32.mrb[62].mxu0 }
 0x8dc   : > { %v9077_v1 = vpop.f32.mrb[63].mxu0 }
 0x8dd   : > { %v13122_v47 = vadd.f32 %v9077_v1, %v9076_v21 }
 0x8e0   : > { %8250 = vmatmul.mubr.bf16.gmra.mrb[120].mxu1 %v13403_v40 }
 0x8e1   : > { %v9079_v50 = vpop.f32.mrb[64].mxu0  ;;  %8257 = vmatprep.mubr.bf16.mxu1 %v13053_v31 }
 0x8e2   : > { %v9080_v56 = vpop.f32.mrb[65].mxu0 }
 0x8e3   : > { %v13126_v17 = vadd.f32 %v9080_v56, %v9079_v50  ;;  %v9082_v5 = vpop.f32.mrb[66].mxu0 }
 0x8e4   : > { %v9083_v20 = vpop.f32.mrb[67].mxu0 }
 0x8e5   : > { %v13128_v11 = vadd.f32 %v9083_v20, %v9082_v5 }
 0x8e8   : > { %8258 = vmatmul.mubr.bf16.gmra.mrb[124].mxu1 %v13051_v43 }
 0x8e9   : > { %v9085_v4 = vpop.f32.mrb[68].mxu0 }
 0x8ea   : > { %v9086_v7 = vpop.f32.mrb[69].mxu0 }
 0x8eb   : > { %v13131_v0 = vadd.f32 %v9086_v7, %v9085_v4  ;;  %v9088_v19 = vpop.f32.mrb[70].mxu0 }
 0x8ec   : > { %v9089_v49 = vpop.f32.mrb[71].mxu0 }
 0x8ed   : > { %v13133_v18 = vadd.f32 %v9089_v49, %v9088_v19 }
 0x8f1   : > { %v9091_v41 = vpop.f32.mrb[72].mxu0 }
 0x8f2   : > { %v9092_v51 = vpop.f32.mrb[73].mxu0 }
 0x8f3   : > { %v13135_v31 = vadd.f32 %v9092_v51, %v9091_v41  ;;  %v9094_v38 = vpop.f32.mrb[74].mxu0 }
 0x8f4   : > { %v9095_v9 = vpop.f32.mrb[75].mxu0 }
 0x8f5   : > { %v13137_v27 = vadd.f32 %v9095_v9, %v9094_v38 }
 0x8f9   : > { %v9097_v16 = vpop.f32.mrb[76].mxu0 }
 0x8fa   : > { %v9098_v57 = vpop.f32.mrb[77].mxu0 }
 0x8fb   : > { %v13139_v14 = vadd.f32 %v9098_v57, %v9097_v16  ;;  %v9100_v43 = vpop.f32.mrb[78].mxu0 }
 0x8fc   : > { %v9101_v29 = vpop.f32.mrb[79].mxu0 }
 0x8fd   : > { %v13141_v62 = vadd.f32 %v9101_v29, %v9100_v43 }
 0x901   : > { %v9103_v2 = vpop.f32.mrb[80].mxu0 }
 0x902   : > { %v9104_v22 = vpop.f32.mrb[81].mxu0 }
 0x903   : > { %v13143_v36 = vadd.f32 %v9104_v22, %v9103_v2  ;;  %v9106_v35 = vpop.f32.mrb[82].mxu0  ;;  %v13178_v2 = vld [vmem:[%s13404_s25] ss:$0 sm:$0xff] }
 0x904   : > { %v9107_v3 = vpop.f32.mrb[83].mxu0 }
 0x905   : > { %v13145_v55 = vadd.f32 %v9107_v3, %v9106_v35  ;;  %v7979_v3 = vadd.f32 %v13102_v52, %v13178_v2  ;;  %v7987_v52 = vadd.f32 %v13108_v28, %v13178_v2 }
 0x909   : > { %v9109_v33 = vpop.f32.mrb[84].mxu0 }
 0x90a   : > { %v9110_v10 = vpop.f32.mrb[85].mxu0 }
 0x90b   : > { %v13147_v6 = vadd.f32 %v9110_v10, %v9109_v33  ;;  %v9112_v59 = vpop.f32.mrb[86].mxu0 }
 0x90c   : > { %v9113_v23 = vpop.f32.mrb[87].mxu0 }
 0x90d   : > { %v13149_v25 = vadd.f32 %v9113_v23, %v9112_v59  ;;  %v7982_v23 = vadd.f32 %v13104_v58, %v13178_v2  ;;  %v7990_v58 = vadd.f32 %v13110_v42, %v13178_v2 }
 0x911   : > { %v9115_v8 = vpop.f32.mrb[88].mxu0 }
 0x912   : > { %v9116_v13 = vpop.f32.mrb[89].mxu0 }
 0x913   : > { %v13151_v32 = vadd.f32 %v9116_v13, %v9115_v8  ;;  %v9118_v48 = vpop.f32.mrb[90].mxu0 }
 0x914   : > { %v9119_v15 = vpop.f32.mrb[91].mxu0 }
 0x915   : > { %v13153_v24 = vadd.f32 %v9119_v15, %v9118_v48 }
 0x919   : > { %v9121_v30 = vpop.f32.mrb[92].mxu0 }
 0x91a   : > { %v9122_v26 = vpop.f32.mrb[93].mxu0 }
 0x91b   : > { %v13155_v37 = vadd.f32 %v9122_v26, %v9121_v30  ;;  %v9124_v34 = vpop.f32.mrb[94].mxu0 }
 0x91c   : > { %v9125_v44 = vpop.f32.mrb[95].mxu0 }
 0x91d   : > { %v13157_v39 = vadd.f32 %v9125_v44, %v9124_v34 }
 0x921   : > { %v9127_v63 = vpop.f32.mrb[96].mxu0 }
 0x922   : > { %v9128_v45 = vpop.f32.mrb[97].mxu0 }
 0x923   : > { %v13159_v54 = vadd.f32 %v9128_v45, %v9127_v63  ;;  %v9130_v53 = vpop.f32.mrb[98].mxu0 }
 0x924   : > { %v9131_v12 = vpop.f32.mrb[99].mxu0 }
 0x925   : > { %v13161_v21 = vadd.f32 %v9131_v12, %v9130_v53 }
 0x929   : > { %v9133_v1 = vpop.f32.mrb[100].mxu0 }
 0x92a   : > { %v9134_v40 = vpop.f32.mrb[101].mxu0 }
 0x92b   : > { %v13163_v50 = vadd.f32 %v9134_v40, %v9133_v1  ;;  %v9136_v56 = vpop.f32.mrb[102].mxu0  ;;  %v7995_v40 = vadd.f32 %v13114_v46, %v13178_v2 }
 0x92c   : > { %v9137_v5 = vpop.f32.mrb[103].mxu0 }
 0x92d   : > { %v13165_v20 = vadd.f32 %v9137_v5, %v9136_v56 }
 0x931   : > { %v9139_v4 = vpop.f32.mrb[104].mxu0 }
 0x932   : > { %v9140_v7 = vpop.f32.mrb[105].mxu0 }
 0x933   : > { %v13167_v19 = vadd.f32 %v9140_v7, %v9139_v4  ;;  %v9142_v49 = vpop.f32.mrb[106].mxu0  ;;  %v7998_v4 = vadd.f32 %v13116_v60, %v13178_v2 }
 0x934   : > { %v9143_v41 = vpop.f32.mrb[107].mxu0 }
 0x935   : > { %v13169_v51 = vadd.f32 %v9143_v41, %v9142_v49 }
 0x939   : > { %v9145_v38 = vpop.f32.mrb[108].mxu0 }
 0x93a   : > { %v9146_v9 = vpop.f32.mrb[109].mxu0 }
 0x93b   : > { %v13171_v16 = vadd.f32 %v9146_v9, %v9145_v38  ;;  %v9148_v57 = vpop.f32.mrb[110].mxu0  ;;  %v8003_v9 = vadd.f32 %v13120_v61, %v13178_v2 }
 0x93c   : > { %v9149_v43 = vpop.f32.mrb[111].mxu0 }
 0x93d   : > { %v13173_v29 = vadd.f32 %v9149_v43, %v9148_v57 }
 0x943   : > { %v9167_v22 = vpop.f32.mrb[64].mxu1 }
 0x944   : > { %v9168_v35 = vpop.f32.mrb[65].mxu1 }
 0x945   : > { %v9169_v33 = vadd.f32 %v9168_v35, %v9167_v22  ;;  %v9170_v10 = vpop.f32.mrb[66].mxu1  ;;  %v8006_v22 = vadd.f32 %v13122_v47, %v13178_v2 }
 0x946   : > { %v9171_v59 = vpop.f32.mrb[67].mxu1 }
 0x947   : > { %v8140_v8 = vadd.f32 %v9169_v33, %v7979_v3  ;;  %v9172_v13 = vadd.f32 %v9171_v59, %v9170_v10  ;;  %v8011_v59 = vadd.f32 %v13126_v17, %v13178_v2 }
 0x949   : > { %8266 = vst [vmem:[%s13185_s23] sm:$0xff] %v8140_v8  ;;  %v8143_v48 = vadd.f32 %v9172_v13, %v7982_v23  ;;  %v8014_v13 = vadd.f32 %v13128_v11, %v13178_v2 }
 0x94b   : > { %8267 = vst [vmem:[%s13185_s23 + $0x8] sm:$0xff] %v8143_v48  ;;  %v9173_v15 = vpop.f32.mrb[68].mxu1 }
 0x94c   : > { %v9174_v30 = vpop.f32.mrb[69].mxu1 }
 0x94d   : > { %v9175_v26 = vadd.f32 %v9174_v30, %v9173_v15  ;;  %v9176_v34 = vpop.f32.mrb[70].mxu1 }
 0x94e   : > { %v9177_v44 = vpop.f32.mrb[71].mxu1 }
 0x94f   : > { %v8148_v63 = vadd.f32 %v9175_v26, %v7987_v52  ;;  %v9178_v45 = vadd.f32 %v9177_v44, %v9176_v34  ;;  %v8019_v26 = vadd.f32 %v13131_v0, %v13178_v2 }
 0x951   : > { %8268 = vst [vmem:[%s13185_s23 + $0x10] sm:$0xff] %v8148_v63  ;;  %v8151_v53 = vadd.f32 %v9178_v45, %v7990_v58  ;;  %v8022_v58 = vadd.f32 %v13133_v18, %v13178_v2 }
 0x953   : > { %8269 = vst [vmem:[%s13185_s23 + $0x18] sm:$0xff] %v8151_v53  ;;  %v9179_v12 = vpop.f32.mrb[72].mxu1 }
 0x954   : > { %v9180_v1 = vpop.f32.mrb[73].mxu1 }
 0x955   : > { %v9181_v56 = vadd.f32 %v9180_v1, %v9179_v12  ;;  %v9182_v28 = vpop.f32.mrb[74].mxu1  ;;  %v8027_v1 = vadd.f32 %v13135_v31, %v13178_v2 }
 0x956   : > { %v9183_v5 = vpop.f32.mrb[75].mxu1 }
 0x957   : > { %v8156_v7 = vadd.f32 %v9181_v56, %v7995_v40  ;;  %v9184_v42 = vadd.f32 %v9183_v5, %v9182_v28  ;;  %v8030_v28 = vadd.f32 %v13137_v27, %v13178_v2 }
 0x959   : > { %8270 = vst [vmem:[%s13185_s23 + $0x20] sm:$0xff] %v8156_v7  ;;  %v8159_v49 = vadd.f32 %v9184_v42, %v7998_v4 }
 0x95b   : > { %8271 = vst [vmem:[%s13185_s23 + $0x28] sm:$0xff] %v8159_v49  ;;  %v9185_v41 = vpop.f32.mrb[76].mxu1  ;;  %v8035_v49 = vadd.f32 %v13139_v14, %v13178_v2 }
 0x95c   : > { %v9186_v38 = vpop.f32.mrb[77].mxu1 }
 0x95d   : > { %v9187_v57 = vadd.f32 %v9186_v38, %v9185_v41  ;;  %v9188_v46 = vpop.f32.mrb[78].mxu1 }
 0x95e   : > { %v9189_v43 = vpop.f32.mrb[79].mxu1 }
 0x95f   : > { %v8164_v35 = vadd.f32 %v9187_v57, %v8003_v9  ;;  %v9190_v60 = vadd.f32 %v9189_v43, %v9188_v46  ;;  %v8038_v9 = vadd.f32 %v13141_v62, %v13178_v2 }
 0x961   : > { %8272 = vst [vmem:[%s13185_s23 + $0x30] sm:$0xff] %v8164_v35  ;;  %v8167_v3 = vadd.f32 %v9190_v60, %v8006_v22  ;;  %v8043_v35 = vadd.f32 %v13143_v36, %v13178_v2 }
 0x963   : > { %8273 = vst [vmem:[%s13185_s23 + $0x38] sm:$0xff] %v8167_v3  ;;  %v9191_v33 = vpop.f32.mrb[80].mxu1 }
 0x964   : > { %v9192_v10 = vpop.f32.mrb[81].mxu1 }
 0x965   : > { %v9193_v23 = vadd.f32 %v9192_v10, %v9191_v33  ;;  %v9194_v61 = vpop.f32.mrb[82].mxu1  ;;  %v8046_v33 = vadd.f32 %v13145_v55, %v13178_v2 }
 0x966   : > { %v9195_v8 = vpop.f32.mrb[83].mxu1 }
 0x967   : > { %v8172_v48 = vadd.f32 %v9193_v23, %v8011_v59  ;;  %v9196_v47 = vadd.f32 %v9195_v8, %v9194_v61  ;;  %v8051_v8 = vadd.f32 %v13147_v6, %v13178_v2 }
 0x969   : > { %8274 = vst [vmem:[%s13185_s23 + $0x40] sm:$0xff] %v8172_v48  ;;  %v8175_v15 = vadd.f32 %v9196_v47, %v8014_v13  ;;  %v8054_v47 = vadd.f32 %v13149_v25, %v13178_v2 }
 0x96b   : > { %8275 = vst [vmem:[%s13185_s23 + $0x48] sm:$0xff] %v8175_v15  ;;  %v9197_v30 = vpop.f32.mrb[84].mxu1 }
 0x96c   : > { %v9198_v52 = vpop.f32.mrb[85].mxu1 }
 0x96d   : > { %v9199_v34 = vadd.f32 %v9198_v52, %v9197_v30  ;;  %v9200_v17 = vpop.f32.mrb[86].mxu1 }
 0x96e   : > { %v9201_v44 = vpop.f32.mrb[87].mxu1 }
 0x96f   : > { %v8180_v63 = vadd.f32 %v9199_v34, %v8019_v26  ;;  %v9202_v11 = vadd.f32 %v9201_v44, %v9200_v17  ;;  %v8059_v34 = vadd.f32 %v13151_v32, %v13178_v2 }
 0x971   : > { %8276 = vst [vmem:[%s13185_s23 + $0x50] sm:$0xff] %v8180_v63  ;;  %v8183_v45 = vadd.f32 %v9202_v11, %v8022_v58  ;;  %v8062_v58 = vadd.f32 %v13153_v24, %v13178_v2 }
 0x973   : > { %8277 = vst [vmem:[%s13185_s23 + $0x58] sm:$0xff] %v8183_v45  ;;  %v9203_v53 = vpop.f32.mrb[88].mxu1 }
 0x974   : > { %v9204_v12 = vpop.f32.mrb[89].mxu1 }
 0x975   : > { %v9205_v40 = vadd.f32 %v9204_v12, %v9203_v53  ;;  %v9206_v0 = vpop.f32.mrb[90].mxu1  ;;  %v8067_v12 = vadd.f32 %v13155_v37, %v13178_v2 }
 0x976   : > { %v9207_v56 = vpop.f32.mrb[91].mxu1 }
 0x977   : > { %v8188_v5 = vadd.f32 %v9205_v40, %v8027_v1  ;;  %v9208_v18 = vadd.f32 %v9207_v56, %v9206_v0  ;;  %v8070_v0 = vadd.f32 %v13157_v39, %v13178_v2 }
 0x979   : > { %8278 = vst [vmem:[%s13185_s23 + $0x60] sm:$0xff] %v8188_v5  ;;  %v8191_v4 = vadd.f32 %v9208_v18, %v8030_v28 }
 0x97b   : > { %8279 = vst [vmem:[%s13185_s23 + $0x68] sm:$0xff] %v8191_v4  ;;  %v9209_v7 = vpop.f32.mrb[92].mxu1  ;;  %v8075_v4 = vadd.f32 %v13159_v54, %v13178_v2 }
 0x97c   : > { %v9210_v42 = vpop.f32.mrb[93].mxu1 }
 0x97d   : > { %v9211_v41 = vadd.f32 %v9210_v42, %v9209_v7  ;;  %v9212_v31 = vpop.f32.mrb[94].mxu1 }
 0x97e   : > { %v9213_v38 = vpop.f32.mrb[95].mxu1 }
 0x97f   : > { %v8196_v57 = vadd.f32 %v9211_v41, %v8035_v49  ;;  %v9214_v27 = vadd.f32 %v9213_v38, %v9212_v31  ;;  %v8078_v49 = vadd.f32 %v13161_v21, %v13178_v2 }
 0x981   : > { %8280 = vst [vmem:[%s13185_s23 + $0x70] sm:$0xff] %v8196_v57  ;;  %v8199_v46 = vadd.f32 %v9214_v27, %v8038_v9  ;;  %v8083_v57 = vadd.f32 %v13163_v50, %v13178_v2 }
 0x983   : > { %8281 = vst [vmem:[%s13185_s23 + $0x78] sm:$0xff] %v8199_v46  ;;  %v9215_v43 = vpop.f32.mrb[96].mxu1 }
 0x984   : > { %v9216_v22 = vpop.f32.mrb[97].mxu1 }
 0x985   : > { %v9217_v60 = vadd.f32 %v9216_v22, %v9215_v43  ;;  %v9218_v14 = vpop.f32.mrb[98].mxu1  ;;  %v8086_v43 = vadd.f32 %v13165_v20, %v13178_v2 }
 0x986   : > { %v9219_v3 = vpop.f32.mrb[99].mxu1 }
 0x987   : > { %v8204_v10 = vadd.f32 %v9217_v60, %v8043_v35  ;;  %v9220_v62 = vadd.f32 %v9219_v3, %v9218_v14  ;;  %v8091_v3 = vadd.f32 %v13167_v19, %v13178_v2  ;;  %v8099_v19 = vadd.f32 %v13171_v16, %v13178_v2 }
 0x989   : > { %8282 = vst [vmem:[%s13185_s23 + $0x80] sm:$0xff] %v8204_v10  ;;  %v8207_v59 = vadd.f32 %v9220_v62, %v8046_v33  ;;  %v8094_v62 = vadd.f32 %v13169_v51, %v13178_v2  ;;  %v8102_v51 = vadd.f32 %v13173_v29, %v13178_v2 }
 0x98b   : > { %8283 = vst [vmem:[%s13185_s23 + $0x88] sm:$0xff] %v8207_v59  ;;  %v9221_v23 = vpop.f32.mrb[100].mxu1 }
 0x98c   : > { %v9222_v61 = vpop.f32.mrb[101].mxu1 }
 0x98d   : > { %v9223_v13 = vadd.f32 %v9222_v61, %v9221_v23  ;;  %v9224_v36 = vpop.f32.mrb[102].mxu1 }
 0x98e   : > { %v9225_v48 = vpop.f32.mrb[103].mxu1 }
 0x98f   : > { %v8212_v15 = vadd.f32 %v9223_v13, %v8051_v8  ;;  %v9226_v55 = vadd.f32 %v9225_v48, %v9224_v36 }
 0x991   : > { %8284 = vst [vmem:[%s13185_s23 + $0x90] sm:$0xff] %v8212_v15  ;;  %v8215_v30 = vadd.f32 %v9226_v55, %v8054_v47 }
 0x993   : > { %8285 = vst [vmem:[%s13185_s23 + $0x98] sm:$0xff] %v8215_v30  ;;  %v9227_v52 = vpop.f32.mrb[104].mxu1 }
 0x994   : > { %v9228_v26 = vpop.f32.mrb[105].mxu1 }
 0x995   : > { %v9229_v17 = vadd.f32 %v9228_v26, %v9227_v52  ;;  %v9230_v6 = vpop.f32.mrb[106].mxu1 }
 0x996   : > { %v9231_v44 = vpop.f32.mrb[107].mxu1 }
 0x997   : > { %v8220_v63 = vadd.f32 %v9229_v17, %v8059_v34  ;;  %v9232_v25 = vadd.f32 %v9231_v44, %v9230_v6 }
 0x999   : > { %8286 = vst [vmem:[%s13185_s23 + $0xa0] sm:$0xff] %v8220_v63  ;;  %v8223_v11 = vadd.f32 %v9232_v25, %v8062_v58 }
 0x99b   : > { %8287 = vst [vmem:[%s13185_s23 + $0xa8] sm:$0xff] %v8223_v11  ;;  %v9233_v45 = vpop.f32.mrb[108].mxu1 }
 0x99c   : > { %v9234_v53 = vpop.f32.mrb[109].mxu1 }
 0x99d   : > { %v9235_v1 = vadd.f32 %v9234_v53, %v9233_v45  ;;  %v9236_v32 = vpop.f32.mrb[110].mxu1 }
 0x99e   : > { %v9237_v40 = vpop.f32.mrb[111].mxu1 }
 0x99f   : > { %v8228_v56 = vadd.f32 %v9235_v1, %v8067_v12  ;;  %v9238_v24 = vadd.f32 %v9237_v40, %v9236_v32 }
 0x9a1   : > { %8288 = vst [vmem:[%s13185_s23 + $0xb0] sm:$0xff] %v8228_v56  ;;  %v8231_v28 = vadd.f32 %v9238_v24, %v8070_v0 }
 0x9a3   : > { %8289 = vst [vmem:[%s13185_s23 + $0xb8] sm:$0xff] %v8231_v28  ;;  %v9239_v5 = vpop.f32.mrb[112].mxu1 }
 0x9a4   : > { %v9240_v18 = vpop.f32.mrb[113].mxu1 }
 0x9a5   : > { %v9241_v7 = vadd.f32 %v9240_v18, %v9239_v5  ;;  %v9242_v37 = vpop.f32.mrb[114].mxu1 }
 0x9a6   : > { %v9243_v42 = vpop.f32.mrb[115].mxu1 }
 0x9a7   : > { %v8236_v41 = vadd.f32 %v9241_v7, %v8075_v4  ;;  %v9244_v39 = vadd.f32 %v9243_v42, %v9242_v37 }
 0x9a9   : > { %8290 = vst [vmem:[%s13185_s23 + $0xc0] sm:$0xff] %v8236_v41  ;;  %v8239_v31 = vadd.f32 %v9244_v39, %v8078_v49 }
 0x9ab   : > { %8291 = vst [vmem:[%s13185_s23 + $0xc8] sm:$0xff] %v8239_v31  ;;  %v9245_v38 = vpop.f32.mrb[116].mxu1 }
 0x9ac   : > { %v9246_v9 = vpop.f32.mrb[117].mxu1 }
 0x9ad   : > { %v9247_v27 = vadd.f32 %v9246_v9, %v9245_v38  ;;  %v9248_v54 = vpop.f32.mrb[118].mxu1 }
 0x9ae   : > { %v9249_v46 = vpop.f32.mrb[119].mxu1 }
 0x9af   : > { %v8244_v22 = vadd.f32 %v9247_v27, %v8083_v57  ;;  %v9250_v21 = vadd.f32 %v9249_v46, %v9248_v54 }
 0x9b1   : > { %8292 = vst [vmem:[%s13185_s23 + $0xd0] sm:$0xff] %v8244_v22  ;;  %v8247_v35 = vadd.f32 %v9250_v21, %v8086_v43 }
 0x9b3   : > { %8293 = vst [vmem:[%s13185_s23 + $0xd8] sm:$0xff] %v8247_v35  ;;  %v9251_v60 = vpop.f32.mrb[120].mxu1 }
 0x9b4   : > { %v9252_v14 = vpop.f32.mrb[121].mxu1 }
 0x9b5   : > { %v9253_v50 = vadd.f32 %v9252_v14, %v9251_v60  ;;  %v9254_v33 = vpop.f32.mrb[122].mxu1 }
 0x9b6   : > { %v9255_v10 = vpop.f32.mrb[123].mxu1 }
 0x9b7   : > { %v8252_v20 = vadd.f32 %v9253_v50, %v8091_v3  ;;  %v9256_v59 = vadd.f32 %v9255_v10, %v9254_v33 }
 0x9b9   : > { %8294 = vst [vmem:[%s13185_s23 + $0xe0] sm:$0xff] %v8252_v20  ;;  %v8255_v23 = vadd.f32 %v9256_v59, %v8094_v62 }
 0x9bb   : > { %8295 = vst [vmem:[%s13185_s23 + $0xe8] sm:$0xff] %v8255_v23  ;;  %v9257_v61 = vpop.f32.mrb[124].mxu1 }
 0x9bc   : > { %v9258_v8 = vpop.f32.mrb[125].mxu1 }
 0x9bd   : > { %v9259_v13 = vadd.f32 %v9258_v8, %v9257_v61  ;;  %v9260_v36 = vpop.f32.mrb[126].mxu1 }
 0x9be   : > { %v9261_v48 = vpop.f32.mrb[127].mxu1 }
 0x9bf   : > { %v8260_v47 = vadd.f32 %v9259_v13, %v8099_v19  ;;  %v9262_v15 = vadd.f32 %v9261_v48, %v9260_v36 }
 0x9c1   : > { %8296 = vst [vmem:[%s13185_s23 + $0xf0] sm:$0xff] %v8260_v47  ;;  %v8263_v16 = vadd.f32 %v9262_v15, %v8102_v51 }
 0x9c3   : > { %8297 = vst [vmem:[%s13185_s23 + $0xf8] sm:$0xff] %v8263_v16 }
 0x9c4   : > { %11298 = shalt.err (!%p11295_p9)
}
 0x9c5   : > { %s11299_s3 = scalar_lea.hbm %s13282_s29, 4096  ;;  %s11303_s23 = scalar_lea.hbm %s13405_s1, 8192 }
 0x9c6   : > { %p11300_p4 = scmp.ne.s32.totalorder %s13282_s29, %s11299_s3  ;;  %p11304_p2 = scmp.lt.u32.totalorder %s13282_s29, %s13405_s1 }
 0x9c7   : > { %p11305_p6 = scmp.lt.u32.totalorder %s11303_s23, %s11299_s3  ;;  %p11307_p10 = scmp.lt.u32.totalorder %s11299_s3, %s13282_s29 }
 0x9c8   : > { %p11301_p3 = pnand %p11300_p4, %p13406_p1 }
 0x9c9   : > { %p11306_p5 = por %p11305_p6, %p11304_p2 }
 0x9ca   : > { %p11302_p0 = pneg %p11301_p3 }
 0x9cb   : > { %p11308_p11 = por %p11307_p10, %p11306_p5 }
 0x9cd   : > { %p11309_p12 = pnand %p11308_p11, %p11302_p0 }
 0x9cf   : > { %11312 = shalt.err (!%p11309_p12)
}
 0x9d0   : > { %s11386_s22 = smov 128   ;;  %s11387_s26 = smov 8  }
 0x9d1   : > { %10145 = dma.vmem_to_hbm [thread:$0]  (%p13406_p1), %s13284_s8, 4096, %s13282_s29, %s8299_s24, %s11386_s22, %s11386_s22, %s11387_s26  }
 0x9d2 PF: > { %s8327_s15 = sand.u32 1, %s11355_s18   ;;  %p13407_p13 = scmp.ne.s32.totalorder %s13379_s6, 0 }
 0x9d3   : > { %p13408_p8 = scmp.ge.s32.totalorder %s11367_s21, 2  ;;  %s8328_s30 = scalar_lea.sflag [#allocation4], %s8327_s15 }
 0x9d5   : > { %p10177_p7 = pnand %p13408_p8, %p13407_p13 }
 0x9d7   : > { %11350 = dma.done.wait (!%p10177_p7), %s8328_s30, 4096  }
 0x9d8   : > { %11352 = vsyncadd (!%p10177_p7), %s8328_s30, 4294963200  ;;  %p32_p9 = scmp.ge.s32.totalorder %s11712_s28, 4   ;;  %s13409_s18 = smov %s11359_s19 }
 0x9d9   : > { %s13410_s19 = smov %s11363_s20  ;;  %s13411_s20 = smov %s11723_s10 }
 0x9da   : > { %s13412_s21 = smov %s11712_s28  ;;  %34 = sbr.rel (!%p32_p9) target bundleno = 19 (0x13), region = 157 }
 0x9e1   :  { %8333 = vsyncpa [#allocation3], 1 }
 0x9e2   :  { %8335 = vsyncpa [#allocation3 + $0x1], 1 }
 0x9e3   :  { %8336 = vsyncpa [#allocation6], 1 }
 0x9e4   :  { %8337 = vsyncpa [#allocation9], 1 }
 0x9e5   :  { %8338 = vsyncpa [#allocation12], 1 }
 0x9e6   :  { %8339 = vsyncpa [#allocation15], 1 }
 0x9e7   :  { %8340 = vsyncpa [#allocation4], 1 }
 0x9e8   :  { %8342 = vsyncpa [#allocation4 + $0x1], 1 }

</bundles_post_ra>
